<compile_context>
chip_gen: v7x
topology: tpu7x:2x2x1
jax: 0.10.0
libtpu: 0.0.40
codegen_flags: <defaults>
</compile_context>

<pallas_src>
import jax
import jax.numpy as jnp
from jax.experimental import pallas as pl
from jax.experimental.pallas import tpu as pltpu


def _leaky_relu(x, slope=0.01):
    # max(x, slope*x) == LeakyReLU for 0 < slope < 1; 2 VALU ops vs 3 for where().
    return jnp.maximum(x, slope * x)


def _num_tensorcores():
    """TensorCores per chip: 2 on megacore / dual-TC chips (v4, v5p, v7x), else 1."""
    try:
        kind = jax.devices()[0].device_kind.lower()
    except Exception:
        return 1
    if "v7" in kind or "v5p" in kind or "v4" in kind:
        return 2
    return 1


def _const_spec(shape):
    """BlockSpec for an operand resident across the whole grid (weights/biases).
    Single-buffered (constant index_map needs no double buffering); falls back
    if pipeline_mode/Buffered is unavailable in this JAX build."""
    idx = lambda i: (0, 0)
    try:
        return pl.BlockSpec(shape, idx, pipeline_mode=pl.Buffered(1))
    except (AttributeError, TypeError):
        return pl.BlockSpec(shape, idx)


def generator_kernel(z_ref, c_ref,
                     w1_ref, b1_ref,
                     w2_ref, b2_ref,
                     w3_ref, b3_ref,
                     w4_ref, b4_ref,
                     o_ref, xin_ref):
    zd = z_ref.shape[1]
    cd = c_ref.shape[1]
    cdt = w1_ref.dtype  # compute dtype for the MXU (f32 or bf16)

    # In-kernel concat (two VMEM stores) replaces torch's cat([z, c], 1):
    # one K=(z_dim+c_dim) MXU push instead of two tiny-K pushes, no HBM concat.
    xin_ref[:, :zd] = z_ref[...].astype(cdt)
    xin_ref[:, zd:zd + cd] = c_ref[...].astype(cdt)

    h = jnp.dot(xin_ref[...], w1_ref[...],
                preferred_element_type=jnp.float32) + b1_ref[...]
    h = _leaky_relu(h)

    h = jnp.dot(h.astype(cdt), w2_ref[...],
                preferred_element_type=jnp.float32) + b2_ref[...]
    h = _leaky_relu(h)

    h = jnp.dot(h.astype(cdt), w3_ref[...],
                preferred_element_type=jnp.float32) + b3_ref[...]
    h = _leaky_relu(h)

    # Output layer (w4/b4 lane-padded in the wrapper -> unmasked stores).
    h = jnp.dot(h.astype(cdt), w4_ref[...],
                preferred_element_type=jnp.float32) + b4_ref[...]
    o_ref[...] = jax.nn.sigmoid(h).astype(o_ref.dtype)  # exp on the EUP slot


def generator_forward(z, c, params, *, block_b=None,
                      compute_dtype=jnp.float32, return_padded=False):
    """params: w1 (z_dim+c_dim, h), w2/w3 (h, h), w4 (h, x_dim), b1..b3 (1, h),
    b4 (1, x_dim).  Returns (B, x_dim) float32 (or (B, x_pad) if return_padded)."""
    z = z.astype(jnp.float32)
    c = c.astype(jnp.float32)
    B, z_dim = z.shape
    c_dim = c.shape[1]
    in_dim = z_dim + c_dim
    h_dim = params["w1"].shape[1]
    x_dim = params["w4"].shape[1]
    assert params["w1"].shape[0] == in_dim

    # Lane-dense output: pad x_dim up to a multiple of 128 (zero weight cols).
    x_pad = pl.cdiv(x_dim, 128) * 128
    w4, b4 = params["w4"], params["b4"]
    if x_pad != x_dim:
        w4 = jnp.pad(w4, ((0, 0), (0, x_pad - x_dim)))
        b4 = jnp.pad(b4, ((0, 0), (0, x_pad - x_dim)))

    cdt = jnp.dtype(compute_dtype)
    w1 = params["w1"].astype(cdt)
    w2 = params["w2"].astype(cdt)
    w3 = params["w3"].astype(cdt)
    w4 = w4.astype(cdt)
    # Biases stay f32 (added to the f32 MXU accumulator).
    b1, b2, b3 = (params["b1"].astype(jnp.float32),
                  params["b2"].astype(jnp.float32),
                  params["b3"].astype(jnp.float32))
    b4 = b4.astype(jnp.float32)

    # Per-generation tile policy:
    #  - single-TC chips (v5e/v6e): one full-batch tile, grid=(1,) -- no serial
    #    loop overhead, full MXU M-fill.
    #  - multi-TC chips (v7x/v5p/v4): one tile per core so the "parallel" axis
    #    shards across TensorCores.  Explicit fallback to 1 tile if B doesn't split.
    if block_b is None:
        cores = _num_tensorcores()
        if cores > 1 and B % cores == 0 and (B // cores) % 8 == 0:
            block_b = B // cores
        else:
            block_b = B  # explicit: no cross-TC split (single core or indivisible B)
    block_b = min(block_b, B)
    assert B % block_b == 0, "batch must be divisible by the batch tile"
    grid = (B // block_b,)

    def batch_spec(feat):
        return pl.BlockSpec((block_b, feat), lambda i: (i, 0))

    in_specs = [
        batch_spec(z_dim), batch_spec(c_dim),
        _const_spec(w1.shape), _const_spec(b1.shape),
        _const_spec(w2.shape), _const_spec(b2.shape),
        _const_spec(w3.shape), _const_spec(b3.shape),
        _const_spec(w4.shape), _const_spec(b4.shape),
    ]
    out_specs = batch_spec(x_pad)

    # VMEM budget guard (worst case: weights double-buffered if Buffered(1)
    # is unavailable).  Raise the scoped limit instead of OOMing on v7x (64 MiB).
    wbytes = (in_dim * h_dim + 2 * h_dim * h_dim + h_dim * x_pad) * cdt.itemsize \
             + (3 * h_dim + x_pad) * 4
    iobytes = 2 * block_b * (z_dim + c_dim + x_pad) * 4
    actbytes = block_b * (in_dim * cdt.itemsize + 2 * h_dim * 4 + x_pad * 4)
    vmem_need = 2 * wbytes + iobytes + actbytes
    vmem_limit = None
    if vmem_need > (28 << 20):
        vmem_limit = min(int(vmem_need * 1.25), 100 << 20)

    flops = 2 * B * (in_dim * h_dim + 2 * h_dim * h_dim + h_dim * x_pad)
    bytes_accessed = (4 * B * (z_dim + c_dim)      # z, c in
                      + wbytes                      # weights + biases
                      + 4 * B * x_pad)              # output

    out = pl.pallas_call(
        generator_kernel,
        out_shape=jax.ShapeDtypeStruct((B, x_pad), jnp.float32),
        grid=grid,
        in_specs=in_specs,
        out_specs=out_specs,
        scratch_shapes=[pltpu.VMEM((block_b, in_dim), cdt)],
        compiler_params=pltpu.CompilerParams(
            dimension_semantics=("parallel",),
            vmem_limit_bytes=vmem_limit),
        cost_estimate=pl.CostEstimate(
            flops=flops,
            transcendentals=B * x_pad,              # sigmoid exp
            bytes_accessed=bytes_accessed),
    )(z, c, w1, b1, w2, b2, w3, b3, w4, b4)

    if return_padded or x_pad == x_dim:
        return out
    # NOTE: this slice is a separate XLA copy; pass return_padded=True to skip it
    # if the consumer accepts the lane-padded width.
    return out[:, :x_dim]


def init_params(key, z_dim, c_dim, h_dim, x_dim):
    """kaiming_normal_ (fan_in) weights like the torch weight_init hook,
    torch-default uniform biases.  w1 is the fused (z_dim+c_dim, h) weight."""
    def kaiming(k, fi, fo):
        return jax.random.normal(k, (fi, fo), jnp.float32) * jnp.sqrt(2.0 / fi)

    def bias(k, fi, fo):
        bound = 1.0 / jnp.sqrt(fi)
        return jax.random.uniform(k, (1, fo), jnp.float32, -bound, bound)

    in_dim = z_dim + c_dim
    ks = jax.random.split(key, 8)
    dims = [(in_dim, h_dim), (h_dim, h_dim), (h_dim, h_dim), (h_dim, x_dim)]
    params = {}
    for i, (fi, fo) in enumerate(dims, start=1):
        params[f"w{i}"] = kaiming(ks[2 * (i - 1)], fi, fo)
        params[f"b{i}"] = bias(ks[2 * (i - 1) + 1], fi, fo)
    return params


def reference_forward(z, c, params):
    x = jnp.concatenate([z.astype(jnp.float32), c.astype(jnp.float32)], axis=1)
    h = _leaky_relu(x @ params["w1"] + params["b1"])
    h = _leaky_relu(h @ params["w2"] + params["b2"])
    h = _leaky_relu(h @ params["w3"] + params["b3"])
    return jax.nn.sigmoid(h @ params["w4"] + params["b4"])


if __name__ == "__main__":
    # Shapes from the module: mb_size=256, z_dim=30, h_dim=512, c_dim = n_classes
    # (one-hot conditioning), X_dim = number of spectral bands.
    B, Z_DIM, C_DIM, H_DIM, X_DIM = 256, 30, 10, 512, 103

    key = jax.random.PRNGKey(0)
    kz, kc, kp = jax.random.split(key, 3)

    z = jax.random.normal(kz, (B, Z_DIM), jnp.float32)
    labels = jax.random.randint(kc, (B,), 0, C_DIM)
    c = jax.nn.one_hot(labels, C_DIM, dtype=jnp.float32)

    params = init_params(kp, Z_DIM, C_DIM, H_DIM, X_DIM)

    out = jax.block_until_ready(generator_forward(z, c, params))
    ref = reference_forward(z, c, params)

    assert out.shape == (B, X_DIM)
    assert jnp.allclose(out, ref, atol=2e-4, rtol=2e-4), "mismatch vs JAX reference"

    print("KERNEL_OK")
</pallas_src>

<mosaic_0001>
module attributes {stable_mosaic.version = 11 : i64} {
  func.func @generator_kernel(%arg0: i32, %arg1: memref<256x30xf32, #tpu.memory_space<vmem>>, %arg2: memref<256x10xf32, #tpu.memory_space<vmem>>, %arg3: memref<40x512xf32, #tpu.memory_space<vmem>>, %arg4: memref<1x512xf32, #tpu.memory_space<vmem>>, %arg5: memref<512x512xf32, #tpu.memory_space<vmem>>, %arg6: memref<1x512xf32, #tpu.memory_space<vmem>>, %arg7: memref<512x512xf32, #tpu.memory_space<vmem>>, %arg8: memref<1x512xf32, #tpu.memory_space<vmem>>, %arg9: memref<512x128xf32, #tpu.memory_space<vmem>>, %arg10: memref<1x128xf32, #tpu.memory_space<vmem>>, %arg11: memref<256x128xf32, #tpu.memory_space<vmem>>, %arg12: memref<256x40xf32, #tpu.memory_space<vmem>>) attributes {dimension_semantics = [#tpu.dimension_semantics<parallel>], iteration_bounds = array<i64: 1>, scalar_prefetch = 0 : i64, scratch_operands = 1 : i64, tpu.core_type = #tpu.core_type<tc>, window_params = [{transform_indices = @transform_0, window_bounds = array<i64: 256, 30>}, {transform_indices = @transform_1, window_bounds = array<i64: 256, 10>}, {pipeline_mode = #tpu.pipeline_mode<synchronous>, transform_indices = @transform_2, window_bounds = array<i64: 40, 512>}, {pipeline_mode = #tpu.pipeline_mode<synchronous>, transform_indices = @transform_3, window_bounds = array<i64: 1, 512>}, {pipeline_mode = #tpu.pipeline_mode<synchronous>, transform_indices = @transform_4, window_bounds = array<i64: 512, 512>}, {pipeline_mode = #tpu.pipeline_mode<synchronous>, transform_indices = @transform_5, window_bounds = array<i64: 1, 512>}, {pipeline_mode = #tpu.pipeline_mode<synchronous>, transform_indices = @transform_6, window_bounds = array<i64: 512, 512>}, {pipeline_mode = #tpu.pipeline_mode<synchronous>, transform_indices = @transform_7, window_bounds = array<i64: 1, 512>}, {pipeline_mode = #tpu.pipeline_mode<synchronous>, transform_indices = @transform_8, window_bounds = array<i64: 512, 128>}, {pipeline_mode = #tpu.pipeline_mode<synchronous>, transform_indices = @transform_9, window_bounds = array<i64: 1, 128>}, {transform_indices = @transform_10, window_bounds = array<i64: 256, 128>}]} {
    %c0 = arith.constant 0 : index
    %c0_0 = arith.constant 0 : index
    %0 = vector.load %arg1[%c0, %c0_0] : memref<256x30xf32, #tpu.memory_space<vmem>>, vector<256x30xf32>
    %c0_1 = arith.constant 0 : index
    %c0_2 = arith.constant 0 : index
    %1 = vector.load %arg12[%c0_1, %c0_2] : memref<256x40xf32, #tpu.memory_space<vmem>>, vector<256x30xf32>
    tpu.vector_store %arg12[%c0_1, %c0_2], %0 {strides = array<i32>} : memref<256x40xf32, #tpu.memory_space<vmem>>, vector<256x30xf32>,
    %c0_3 = arith.constant 0 : index
    %c0_4 = arith.constant 0 : index
    %2 = vector.load %arg2[%c0_3, %c0_4] : memref<256x10xf32, #tpu.memory_space<vmem>>, vector<256x10xf32>
    %c0_5 = arith.constant 0 : index
    %c30 = arith.constant 30 : index
    %3 = vector.load %arg12[%c0_5, %c30] : memref<256x40xf32, #tpu.memory_space<vmem>>, vector<256x10xf32>
    tpu.vector_store %arg12[%c0_5, %c30], %2 {strides = array<i32>} : memref<256x40xf32, #tpu.memory_space<vmem>>, vector<256x10xf32>,
    %c0_6 = arith.constant 0 : index
    %c0_7 = arith.constant 0 : index
    %4 = vector.load %arg12[%c0_6, %c0_7] : memref<256x40xf32, #tpu.memory_space<vmem>>, vector<256x40xf32>
    %c0_8 = arith.constant 0 : index
    %c0_9 = arith.constant 0 : index
    %5 = vector.load %arg3[%c0_8, %c0_9] : memref<40x512xf32, #tpu.memory_space<vmem>>, vector<40x512xf32>
    %cst = arith.constant dense<0.000000e+00> : vector<256x512xf32>
    %6 = tpu.matmul %4, %5, %cst {dimension_numbers = #tpu.dot_dimension_numbers<[1], [0], [0], [1], [0, 0, 1, 1], [], []>} : vector<256x40xf32>, vector<40x512xf32>, vector<256x512xf32> -> vector<256x512xf32>
    %c0_10 = arith.constant 0 : index
    %c0_11 = arith.constant 0 : index
    %7 = vector.load %arg4[%c0_10, %c0_11] : memref<1x512xf32, #tpu.memory_space<vmem>>, vector<1x512xf32>
    %8 = vector.broadcast %7 : vector<1x512xf32> to vector<256x512xf32>
    %9 = arith.addf %6, %8 : vector<256x512xf32>
    %cst_12 = arith.constant 0.00999999977 : f32
    %10 = vector.broadcast %cst_12 : f32 to vector<256x512xf32>
    %11 = arith.mulf %10, %9 : vector<256x512xf32>
    %12 = arith.maximumf %9, %11 : vector<256x512xf32>
    %c0_13 = arith.constant 0 : index
    %c0_14 = arith.constant 0 : index
    %13 = vector.load %arg5[%c0_13, %c0_14] : memref<512x512xf32, #tpu.memory_space<vmem>>, vector<512x512xf32>
    %cst_15 = arith.constant dense<0.000000e+00> : vector<256x512xf32>
    %14 = tpu.matmul %12, %13, %cst_15 {dimension_numbers = #tpu.dot_dimension_numbers<[1], [0], [0], [1], [0, 0, 1, 1], [], []>} : vector<256x512xf32>, vector<512x512xf32>, vector<256x512xf32> -> vector<256x512xf32>
    %c0_16 = arith.constant 0 : index
    %c0_17 = arith.constant 0 : index
    %15 = vector.load %arg6[%c0_16, %c0_17] : memref<1x512xf32, #tpu.memory_space<vmem>>, vector<1x512xf32>
    %16 = vector.broadcast %15 : vector<1x512xf32> to vector<256x512xf32>
    %17 = arith.addf %14, %16 : vector<256x512xf32>
    %cst_18 = arith.constant 0.00999999977 : f32
    %18 = vector.broadcast %cst_18 : f32 to vector<256x512xf32>
    %19 = arith.mulf %18, %17 : vector<256x512xf32>
    %20 = arith.maximumf %17, %19 : vector<256x512xf32>
    %c0_19 = arith.constant 0 : index
    %c0_20 = arith.constant 0 : index
    %21 = vector.load %arg7[%c0_19, %c0_20] : memref<512x512xf32, #tpu.memory_space<vmem>>, vector<512x512xf32>
    %cst_21 = arith.constant dense<0.000000e+00> : vector<256x512xf32>
    %22 = tpu.matmul %20, %21, %cst_21 {dimension_numbers = #tpu.dot_dimension_numbers<[1], [0], [0], [1], [0, 0, 1, 1], [], []>} : vector<256x512xf32>, vector<512x512xf32>, vector<256x512xf32> -> vector<256x512xf32>
    %c0_22 = arith.constant 0 : index
    %c0_23 = arith.constant 0 : index
    %23 = vector.load %arg8[%c0_22, %c0_23] : memref<1x512xf32, #tpu.memory_space<vmem>>, vector<1x512xf32>
    %24 = vector.broadcast %23 : vector<1x512xf32> to vector<256x512xf32>
    %25 = arith.addf %22, %24 : vector<256x512xf32>
    %cst_24 = arith.constant 0.00999999977 : f32
    %26 = vector.broadcast %cst_24 : f32 to vector<256x512xf32>
    %27 = arith.mulf %26, %25 : vector<256x512xf32>
    %28 = arith.maximumf %25, %27 : vector<256x512xf32>
    %c0_25 = arith.constant 0 : index
    %c0_26 = arith.constant 0 : index
    %29 = vector.load %arg9[%c0_25, %c0_26] : memref<512x128xf32, #tpu.memory_space<vmem>>, vector<512x128xf32>
    %cst_27 = arith.constant dense<0.000000e+00> : vector<256x128xf32>
    %30 = tpu.matmul %28, %29, %cst_27 {dimension_numbers = #tpu.dot_dimension_numbers<[1], [0], [0], [1], [0, 0, 1, 1], [], []>} : vector<256x512xf32>, vector<512x128xf32>, vector<256x128xf32> -> vector<256x128xf32>
    %c0_28 = arith.constant 0 : index
    %c0_29 = arith.constant 0 : index
    %31 = vector.load %arg10[%c0_28, %c0_29] : memref<1x128xf32, #tpu.memory_space<vmem>>, vector<1x128xf32>
    %32 = vector.broadcast %31 : vector<1x128xf32> to vector<256x128xf32>
    %33 = arith.addf %30, %32 : vector<256x128xf32>
    %34 = arith.negf %33 : vector<256x128xf32>
    %35 = math.exp %34 : vector<256x128xf32>
    %cst_30 = arith.constant 1.000000e+00 : f32
    %36 = vector.broadcast %cst_30 : f32 to vector<256x128xf32>
    %37 = arith.addf %36, %35 : vector<256x128xf32>
    %38 = arith.divf %36, %37 : vector<256x128xf32>
    %c0_31 = arith.constant 0 : index
    %c0_32 = arith.constant 0 : index
    %39 = vector.load %arg11[%c0_31, %c0_32] : memref<256x128xf32, #tpu.memory_space<vmem>>, vector<256x128xf32>
    tpu.vector_store %arg11[%c0_31, %c0_32], %38 {strides = array<i32>} : memref<256x128xf32, #tpu.memory_space<vmem>>, vector<256x128xf32>,
    return
  }
  func.func @transform_0(%arg0: i32) -> (i32, i32) {
    %c0_i32 = arith.constant 0 : i32
    %c0_i32_0 = arith.constant 0 : i32
    return %arg0, %c0_i32 : i32, i32
  }
  func.func @transform_1(%arg0: i32) -> (i32, i32) {
    %c0_i32 = arith.constant 0 : i32
    %c0_i32_0 = arith.constant 0 : i32
    return %arg0, %c0_i32 : i32, i32
  }
  func.func @transform_2(%arg0: i32) -> (i32, i32) {
    %c0_i32 = arith.constant 0 : i32
    %c0_i32_0 = arith.constant 0 : i32
    %c0_i32_1 = arith.constant 0 : i32
    return %c0_i32, %c0_i32_0 : i32, i32
  }
  func.func @transform_3(%arg0: i32) -> (i32, i32) {
    %c0_i32 = arith.constant 0 : i32
    %c0_i32_0 = arith.constant 0 : i32
    %c0_i32_1 = arith.constant 0 : i32
    return %c0_i32, %c0_i32_0 : i32, i32
  }
  func.func @transform_4(%arg0: i32) -> (i32, i32) {
    %c0_i32 = arith.constant 0 : i32
    %c0_i32_0 = arith.constant 0 : i32
    %c0_i32_1 = arith.constant 0 : i32
    return %c0_i32, %c0_i32_0 : i32, i32
  }
  func.func @transform_5(%arg0: i32) -> (i32, i32) {
    %c0_i32 = arith.constant 0 : i32
    %c0_i32_0 = arith.constant 0 : i32
    %c0_i32_1 = arith.constant 0 : i32
    return %c0_i32, %c0_i32_0 : i32, i32
  }
  func.func @transform_6(%arg0: i32) -> (i32, i32) {
    %c0_i32 = arith.constant 0 : i32
    %c0_i32_0 = arith.constant 0 : i32
    %c0_i32_1 = arith.constant 0 : i32
    return %c0_i32, %c0_i32_0 : i32, i32
  }
  func.func @transform_7(%arg0: i32) -> (i32, i32) {
    %c0_i32 = arith.constant 0 : i32
    %c0_i32_0 = arith.constant 0 : i32
    %c0_i32_1 = arith.constant 0 : i32
    return %c0_i32, %c0_i32_0 : i32, i32
  }
  func.func @transform_8(%arg0: i32) -> (i32, i32) {
    %c0_i32 = arith.constant 0 : i32
    %c0_i32_0 = arith.constant 0 : i32
    %c0_i32_1 = arith.constant 0 : i32
    return %c0_i32, %c0_i32_0 : i32, i32
  }
  func.func @transform_9(%arg0: i32) -> (i32, i32) {
    %c0_i32 = arith.constant 0 : i32
    %c0_i32_0 = arith.constant 0 : i32
    %c0_i32_1 = arith.constant 0 : i32
    return %c0_i32, %c0_i32_0 : i32, i32
  }
  func.func @transform_10(%arg0: i32) -> (i32, i32) {
    %c0_i32 = arith.constant 0 : i32
    %c0_i32_0 = arith.constant 0 : i32
    return %arg0, %c0_i32 : i32, i32
  }
}

</mosaic_0001>

<bundles_post_ra>
// kernel: tpu_custom_call.1
= control target key start
LH: loop header
LB: loop body
LE: loop exit
PB: predicated region body
PF: predicated region fallthrough
CT: control target
= control target key end

     0   :  { %15 = vsyncpa [#allocation4], 0  ;;  %s9167_s0 = inlined_call_operand.vmem [shape: f32[256,30], index: 0, kind: input, shape index: {}]   ;;  %s9168_s1 = inlined_call_operand.vmem [shape: f32[256,10], index: 1, kind: input, shape index: {}]   ;;  %s9169_s2 = inlined_call_operand.hbm [shape: f32[40,512], index: 2, kind: input, shape index: {}]   ;;  %s9170_s3 = inlined_call_operand.vmem [shape: f32[1,512], index: 3, kind: input, shape index: {}]   ;;  %s9171_s4 = inlined_call_operand.hbm [shape: f32[512,512], index: 4, kind: input, shape index: {}]   ;;  %s9172_s5 = inlined_call_operand.vmem [shape: f32[1,512], index: 5, kind: input, shape index: {}]   ;;  %s9173_s6 = inlined_call_operand.hbm [shape: f32[512,512], index: 6, kind: input, shape index: {}]   ;;  %s9174_s7 = inlined_call_operand.vmem [shape: f32[1,512], index: 7, kind: input, shape index: {}]   ;;  %s9175_s8 = inlined_call_operand.vmem [shape: f32[512,128], index: 8, kind: input, shape index: {}]   ;;  %s9176_s9 = inlined_call_operand.vmem [shape: f32[1,128], index: 9, kind: input, shape index: {}]   ;;  %s9177_s10 = inlined_call_operand.hbm [shape: f32[256,128], index: 10, kind: output, shape index: {}]  }
   0x1   :  { %16 = vsyncpa [#allocation7], 0 }
   0x2   :  { %17 = vsyncpa [#allocation5], 0  ;;  %s6726_s13 = smov [#allocation6]   ;;  %s6727_s15 = smov [#allocation3]  }
   0x3   :  { %s41_s14 = sshll.u32 %s6726_s13, 4  ;;  %s27_s16 = sshll.u32 %s6727_s15, 4  ;;  %s42_s14 = int_to_ptr.vmem [resolvable:$true] %s41_s14  ;;  %s6792_s16 = int_to_ptr.vmem [resolvable:$true] %s27_s16 }
   0x4   :  { %s6632_s19 = scalar_lea.hbm %s9171_s4, 32768 }
   0x5   :  { %p6633_p0 = scmp.ne.s32.totalorder %s9171_s4, %s6632_s19  ;;  %p6636_p1 = scmp.lt.u32.totalorder %s6632_s19, %s9171_s4 }
   0x7   :  { %p6638_p2 = pnand %p6636_p1, %p6633_p0 }
   0x9   :  { %6641 = shalt.err (!%p6638_p2)
}
   0xa   :  { %s6642_s24 = scalar_lea.vmem %s42_s14, 32768  ;;  %p6647_p4 = scmp.lt.s32.totalorder %s42_s14, %s42_s14 }
   0xb   :  { %p6643_p3 = scmp.ne.s32.totalorder %s42_s14, %s6642_s24  ;;  %p6648_p5 = scmp.lt.s32.totalorder %s6642_s24, %s6642_s24 }
   0xd   :  { %p6649_p6 = por %p6648_p5, %p6647_p4 }
   0xf   :  { %p6650_p7 = pnand %p6649_p6, %p6643_p3 }
  0x11   :  { %6653 = shalt.err (!%p6650_p7)
}
  0x12   :  { %s6728_s25 = smov 512   ;;  %s6729_s26 = smov 32  }
  0x13   :  { %47 = dma.hbm_to_vmem [thread:$0]  %s9171_s4, 32768, %s42_s14, [#allocation7], %s6728_s25, %s6728_s25, %s6729_s26  }
  0x14   :  { %s6654_s11 = scalar_lea.hbm %s9169_s2, 2560 }
  0x15   :  { %p6655_p8 = scmp.ne.s32.totalorder %s9169_s2, %s6654_s11  ;;  %p6658_p9 = scmp.lt.u32.totalorder %s6654_s11, %s9169_s2 }
  0x17   :  { %p6660_p10 = pnand %p6658_p9, %p6655_p8 }
  0x19   :  { %6663 = shalt.err (!%p6660_p10)
}
  0x1a   :  { %s6664_s18 = scalar_lea.vmem %s6792_s16, 2560  ;;  %p6669_p12 = scmp.lt.s32.totalorder %s6792_s16, %s6792_s16 }
  0x1b   :  { %p6665_p11 = scmp.ne.s32.totalorder %s6792_s16, %s6664_s18  ;;  %p6670_p13 = scmp.lt.s32.totalorder %s6664_s18, %s6664_s18 }
  0x1d   :  { %p6671_p0 = por %p6670_p13, %p6669_p12 }
  0x1f   :  { %p6672_p1 = pnand %p6671_p0, %p6665_p11 }
  0x21   :  { %6675 = shalt.err (!%p6672_p1)
}
  0x22   :  { %33 = dma.hbm_to_vmem [thread:$0]  %s9169_s2, 2560, %s6792_s16, [#allocation4], %s6728_s25, %s6728_s25, %s6729_s26  }
  0x23   :  { %s6730_s19 = smov [#allocation8]   ;;  %s6676_s23 = scalar_lea.hbm %s9173_s6, 32768 }
  0x24   :  { %s55_s20 = sshll.u32 %s6730_s19, 4  ;;  %p6677_p2 = scmp.ne.s32.totalorder %s9173_s6, %s6676_s23  ;;  %s56_s20 = int_to_ptr.vmem [resolvable:$true] %s55_s20 }
  0x25   :  { %p6680_p3 = scmp.lt.u32.totalorder %s6676_s23, %s9173_s6 }
  0x27   :  { %p6682_p4 = pnand %p6680_p3, %p6677_p2 }
  0x29   :  { %6685 = shalt.err (!%p6682_p4)
}
  0x2a   :  { %s6686_s30 = scalar_lea.vmem %s56_s20, 32768  ;;  %p6691_p6 = scmp.lt.s32.totalorder %s56_s20, %s56_s20 }
  0x2b   :  { %p6687_p5 = scmp.ne.s32.totalorder %s56_s20, %s6686_s30  ;;  %p6692_p7 = scmp.lt.s32.totalorder %s6686_s30, %s6686_s30 }
  0x2d   :  { %p6693_p8 = por %p6692_p7, %p6691_p6 }
  0x2f   :  { %p6694_p9 = pnand %p6693_p8, %p6687_p5 }
  0x31   :  { %6697 = shalt.err (!%p6694_p9)
}
  0x32   :  { %61 = dma.hbm_to_vmem [thread:$0]  %s9173_s6, 32768, %s56_s20, [#allocation7], %s6728_s25, %s6728_s25, %s6729_s26  }
  0x33   :  { %6720 = dma.done.wait [#allocation4], 2560  }
  0x34   :  { %6721 = vsyncadd [#allocation4], 4294964736 }
  0x35   :  { %6722 = dma.done.wait [#allocation7], 65536  }
  0x36   :  { %6723 = vsyncadd [#allocation7], 4294901760  ;;  %v6731_v0 = vmov 0.0   ;;  %v142_v1 = vld [vmem:[%s9168_s1] sm:$0xff]  ;;  %v144_v2 = vld [vmem:[%s9168_s1 + $0x10] sm:$0xff]  ;;  %s6732_s17 = smov 30  }
  0x37   :  { %570 = vmatprep.mubr.f32.mxu0 %v6731_v0  ;;  %827 = vmatprep.mubr.f32.mxu1 %v6731_v0  ;;  %v143_v3 = vld [vmem:[%s9168_s1 + $0x8] sm:$0xff]  ;;  %v145_v4 = vld [vmem:[%s9168_s1 + $0x18] sm:$0xff]  ;;  %v146_v7 = vld [vmem:[%s9168_s1 + $0x20] sm:$0xff]  ;;  %vm109_vm0 = vcmask 244736   ;;  %vm302_vm1 = vcmask 326896   ;;  %vm409_vm2 = vcmask 326656  }
  0x38   :  { %206 = vrot.lane.b32.xlu0 %v142_v1, %s6732_s17  ;;  %210 = vrot.lane.b32.xlu1 %v144_v2, %s6732_s17  ;;  %v368_v5 = vld [vmem:[#allocation3 + $0x8] sm:$0xff]  ;;  %v370_v10 = vld [vmem:[#allocation3 + $0x18] sm:$0xff]  ;;  %v148_v11 = vld [vmem:[%s9168_s1 + $0x30] sm:$0xff] }
  0x39   :  { %v372_v6 = vld [vmem:[#allocation3 + $0x28] sm:$0xff]  ;;  %v149_v12 = vld [vmem:[%s9168_s1 + $0x38] sm:$0xff]  ;;  %v367_v15 = vld [vmem:[#allocation3] sm:$0xff] }
  0x3a   :  { %v147_v8 = vld [vmem:[%s9168_s1 + $0x28] sm:$0xff]  ;;  %v5260_v9 = vpack.c.bf16 %v372_v6, %v368_v5  ;;  %v374_v13 = vld [vmem:[#allocation3 + $0x38] sm:$0xff]  ;;  %v371_v16 = vld [vmem:[#allocation3 + $0x20] sm:$0xff] }
  0x3b   :  { %v5268_v14 = vpack.c.bf16 %v374_v13, %v370_v10  ;;  %v369_v17 = vld [vmem:[#allocation3 + $0x10] sm:$0xff]  ;;  %v150_v18 = vld [vmem:[%s9168_s1 + $0x40] sm:$0xff]  ;;  %v151_v19 = vld [vmem:[%s9168_s1 + $0x48] sm:$0xff]  ;;  %v5262_v20 = vpack.c.bf16 %v371_v16, %v367_v15 }
  0x3c   :  { %208 = vrot.lane.b32.xlu0 %v143_v3, %s6732_s17  ;;  %212 = vrot.lane.b32.xlu1 %v145_v4, %s6732_s17  ;;  %v373_v21 = vld [vmem:[#allocation3 + $0x30] sm:$0xff]  ;;  %v77_v22 = vld [vmem:[%s9167_s0] sm:$0xff]  ;;  %v376_v24 = vld [vmem:[#allocation3 + $0x48] sm:$0xff] }
  0x3d   :  { %5261 = vmatprep.subr.bf16.mxu0 %v5260_v9  ;;  %v5270_v23 = vpack.c.bf16 %v373_v21, %v369_v17  ;;  %110 = vst.msk [vmem:[#allocation2] sm:$0xff] %vm109_vm0, %v77_v22  ;;  %v380_v25 = vld [vmem:[#allocation3 + $0x68] sm:$0xff]  ;;  %v378_v26 = vld [vmem:[#allocation3 + $0x58] sm:$0xff]  ;;  %5269 = vmatprep.subr.bf16.mxu1 %v5268_v14  ;;  %v375_v29 = vld [vmem:[#allocation3 + $0x40] sm:$0xff] }
  0x3e   :  { %5263 = vmatpush1.bf16.msra.mxu0 %v5262_v20  ;;  %v5264_v27 = vpack.c.bf16 %v380_v25, %v376_v24  ;;  %v382_v28 = vld [vmem:[#allocation3 + $0x78] sm:$0xff]  ;;  %v379_v30 = vld [vmem:[#allocation3 + $0x60] sm:$0xff]  ;;  %v377_v33 = vld [vmem:[#allocation3 + $0x50] sm:$0xff] }
  0x3f   :  { %5271 = vmatpush1.bf16.msra.mxu1 %v5270_v23  ;;  %v5272_v31 = vpack.c.bf16 %v382_v28, %v378_v26  ;;  %v5266_v32 = vpack.c.bf16 %v379_v30, %v375_v29  ;;  %v381_v34 = vld [vmem:[#allocation3 + $0x70] sm:$0xff]  ;;  %v78_v35 = vld [vmem:[%s9167_s0 + $0x8] sm:$0xff]  ;;  %v153_v39 = vld [vmem:[%s9168_s1 + $0x58] sm:$0xff] }
  0x40   :  { %214 = vrot.lane.b32.xlu0 %v146_v7, %s6732_s17  ;;  %216 = vrot.lane.b32.xlu1 %v147_v8, %s6732_s17  ;;  %v152_v36 = vld [vmem:[%s9168_s1 + $0x50] sm:$0xff]  ;;  %v5274_v37 = vpack.c.bf16 %v381_v34, %v377_v33  ;;  %111 = vst.msk [vmem:[#allocation2 + $0x8] sm:$0xff] %vm109_vm0, %v78_v35  ;;  %v384_v38 = vld [vmem:[#allocation3 + $0x88] sm:$0xff]  ;;  %v386_v40 = vld [vmem:[#allocation3 + $0x98] sm:$0xff] }
  0x41   :  { %5265 = vmatprep.subr.bf16.mxu0 %v5264_v27  ;;  %v79_v41 = vld [vmem:[%s9167_s0 + $0x10] sm:$0xff]  ;;  %5273 = vmatprep.subr.bf16.mxu1 %v5272_v31  ;;  %v383_v42 = vld [vmem:[#allocation3 + $0x80] sm:$0xff]  ;;  %v80_v43 = vld [vmem:[%s9167_s0 + $0x18] sm:$0xff] }
  0x42   :  { %5267 = vmatpush1.bf16.msra.mxu0 %v5266_v32  ;;  %112 = vst.msk [vmem:[#allocation2 + $0x10] sm:$0xff] %vm109_vm0, %v79_v41  ;;  %v81_v44 = vld [vmem:[%s9167_s0 + $0x20] sm:$0xff]  ;;  %113 = vst.msk [vmem:[#allocation2 + $0x18] sm:$0xff] %vm109_vm0, %v80_v43  ;;  %v82_v45 = vld [vmem:[%s9167_s0 + $0x28] sm:$0xff] }
  0x43   :  { %5275 = vmatpush1.bf16.msra.mxu1 %v5274_v37  ;;  %514 = vmatprep.subr.mxu0 %v384_v38  ;;  %114 = vst.msk [vmem:[#allocation2 + $0x20] sm:$0xff] %vm109_vm0, %v81_v44  ;;  %v83_v46 = vld [vmem:[%s9167_s0 + $0x30] sm:$0xff]  ;;  %v84_v47 = vld [vmem:[%s9167_s0 + $0x38] sm:$0xff]  ;;  %115 = vst.msk [vmem:[#allocation2 + $0x28] sm:$0xff] %vm109_vm0, %v82_v45 }
  0x44   :  { %218 = vrot.lane.b32.xlu0 %v148_v11, %s6732_s17  ;;  %220 = vrot.lane.b32.xlu1 %v149_v12, %s6732_s17  ;;  %v385_v48 = vld [vmem:[#allocation3 + $0x90] sm:$0xff]  ;;  %116 = vst.msk [vmem:[#allocation2 + $0x30] sm:$0xff] %vm109_vm0, %v83_v46  ;;  %117 = vst.msk [vmem:[#allocation2 + $0x38] sm:$0xff] %vm109_vm0, %v84_v47  ;;  %v85_v49 = vld [vmem:[%s9167_s0 + $0x40] sm:$0xff] }
  0x45   :  { %771 = vmatprep.subr.mxu1 %v386_v40  ;;  %v86_v50 = vld [vmem:[%s9167_s0 + $0x48] sm:$0xff]  ;;  %118 = vst.msk [vmem:[#allocation2 + $0x40] sm:$0xff] %vm109_vm0, %v85_v49  ;;  %v154_v51 = vld [vmem:[%s9168_s1 + $0x60] sm:$0xff]  ;;  %v87_v53 = vld [vmem:[%s9167_s0 + $0x50] sm:$0xff] }
  0x46   :  { %119 = vst.msk [vmem:[#allocation2 + $0x48] sm:$0xff] %vm109_vm0, %v86_v50  ;;  %v155_v52 = vld [vmem:[%s9168_s1 + $0x68] sm:$0xff]  ;;  %515 = vmatpush1.msra.mxu0 %v383_v42  ;;  %120 = vst.msk [vmem:[#allocation2 + $0x50] sm:$0xff] %vm109_vm0, %v87_v53  ;;  %v156_v54 = vld [vmem:[%s9168_s1 + $0x70] sm:$0xff] }
  0x47   :  { %772 = vmatpush1.msra.mxu1 %v385_v48  ;;  %v157_v55 = vld [vmem:[%s9168_s1 + $0x78] sm:$0xff]  ;;  %v158_v57 = vld [vmem:[%s9168_s1 + $0x80] sm:$0xff]  ;;  %v159_v58 = vld [vmem:[%s9168_s1 + $0x88] sm:$0xff] }
  0x48   :  { %222 = vrot.lane.b32.xlu0 %v150_v18, %s6732_s17  ;;  %224 = vrot.lane.b32.xlu1 %v151_v19, %s6732_s17  ;;  %v88_v56 = vld [vmem:[%s9167_s0 + $0x58] sm:$0xff]  ;;  %v89_v59 = vld [vmem:[%s9167_s0 + $0x60] sm:$0xff]  ;;  %v1277_v23 = vld [vmem:[#allocation6 + $0x8] sm:$0xff] }
  0x49   :  { %121 = vst.msk [vmem:[#allocation2 + $0x58] sm:$0xff] %vm109_vm0, %v88_v56  ;;  %122 = vst.msk [vmem:[#allocation2 + $0x60] sm:$0xff] %vm109_vm0, %v89_v59  ;;  %v160_v60 = vld [vmem:[%s9168_s1 + $0x90] sm:$0xff]  ;;  %v161_v61 = vld [vmem:[%s9168_s1 + $0x98] sm:$0xff] }
  0x4a   :  { %v90_v62 = vld [vmem:[%s9167_s0 + $0x68] sm:$0xff]  ;;  %v162_v63 = vld [vmem:[%s9168_s1 + $0xa0] sm:$0xff]  ;;  %v91_v2 = vld [vmem:[%s9167_s0 + $0x70] sm:$0xff] }
  0x4b   :  { %123 = vst.msk [vmem:[#allocation2 + $0x68] sm:$0xff] %vm109_vm0, %v90_v62  ;;  %v163_v1 = vld [vmem:[%s9168_s1 + $0xa8] sm:$0xff]  ;;  %124 = vst.msk [vmem:[#allocation2 + $0x70] sm:$0xff] %vm109_vm0, %v91_v2  ;;  %v164_v3 = vld [vmem:[%s9168_s1 + $0xb0] sm:$0xff] }
  0x4c   :  { %226 = vrot.lane.b32.xlu0 %v152_v36, %s6732_s17  ;;  %228 = vrot.lane.b32.xlu1 %v153_v39, %s6732_s17  ;;  %v165_v4 = vld [vmem:[%s9168_s1 + $0xb8] sm:$0xff]  ;;  %v166_v6 = vld [vmem:[%s9168_s1 + $0xc0] sm:$0xff]  ;;  %v1281_v24 = vld [vmem:[#allocation6 + $0x28] sm:$0xff] }
  0x4d   :  { %v92_v5 = vld [vmem:[%s9167_s0 + $0x78] sm:$0xff]  ;;  %v167_v7 = vld [vmem:[%s9168_s1 + $0xc8] sm:$0xff]  ;;  %v93_v8 = vld [vmem:[%s9167_s0 + $0x80] sm:$0xff]  ;;  %v5276_v26 = vpack.c.bf16 %v1281_v24, %v1277_v23 }
  0x4e   :  { %125 = vst.msk [vmem:[#allocation2 + $0x78] sm:$0xff] %vm109_vm0, %v92_v5  ;;  %126 = vst.msk [vmem:[#allocation2 + $0x80] sm:$0xff] %vm109_vm0, %v93_v8  ;;  %v168_v9 = vld [vmem:[%s9168_s1 + $0xd0] sm:$0xff]  ;;  %v169_v10 = vld [vmem:[%s9168_s1 + $0xd8] sm:$0xff] }
  0x4f   :  { %v94_v11 = vld [vmem:[%s9167_s0 + $0x88] sm:$0xff]  ;;  %v170_v12 = vld [vmem:[%s9168_s1 + $0xe0] sm:$0xff]  ;;  %v95_v14 = vld [vmem:[%s9167_s0 + $0x90] sm:$0xff]  ;;  %5277 = vmatprep.subr.bf16.mxu1 %v5276_v26 }
  0x50   :  { %230 = vrot.lane.b32.xlu0 %v154_v51, %s6732_s17  ;;  %232 = vrot.lane.b32.xlu1 %v155_v52, %s6732_s17  ;;  %127 = vst.msk [vmem:[#allocation2 + $0x88] sm:$0xff] %vm109_vm0, %v94_v11  ;;  %v171_v13 = vld [vmem:[%s9168_s1 + $0xe8] sm:$0xff]  ;;  %128 = vst.msk [vmem:[#allocation2 + $0x90] sm:$0xff] %vm109_vm0, %v95_v14  ;;  %v172_v15 = vld [vmem:[%s9168_s1 + $0xf0] sm:$0xff] }
  0x51   :  { %v173_v16 = vld [vmem:[%s9168_s1 + $0xf8] sm:$0xff]  ;;  %v97_v18 = vld [vmem:[%s9167_s0 + $0xa0] sm:$0xff]  ;;  %v98_v19 = vld [vmem:[%s9167_s0 + $0xa8] sm:$0xff] }
  0x52   :  { %v96_v17 = vld [vmem:[%s9167_s0 + $0x98] sm:$0xff]  ;;  %130 = vst.msk [vmem:[#allocation2 + $0xa0] sm:$0xff] %vm109_vm0, %v97_v18  ;;  %131 = vst.msk [vmem:[#allocation2 + $0xa8] sm:$0xff] %vm109_vm0, %v98_v19  ;;  %v99_v20 = vld [vmem:[%s9167_s0 + $0xb0] sm:$0xff] }
  0x53   :  { %129 = vst.msk [vmem:[#allocation2 + $0x98] sm:$0xff] %vm109_vm0, %v96_v17  ;;  %132 = vst.msk [vmem:[#allocation2 + $0xb0] sm:$0xff] %vm109_vm0, %v99_v20  ;;  %v100_v21 = vld [vmem:[%s9167_s0 + $0xb8] sm:$0xff]  ;;  %v101_v22 = vld [vmem:[%s9167_s0 + $0xc0] sm:$0xff] }
  0x54   :  { %234 = vrot.lane.b32.xlu0 %v156_v54, %s6732_s17  ;;  %236 = vrot.lane.b32.xlu1 %v157_v55, %s6732_s17  ;;  %133 = vst.msk [vmem:[#allocation2 + $0xb8] sm:$0xff] %vm109_vm0, %v100_v21  ;;  %134 = vst.msk [vmem:[#allocation2 + $0xc0] sm:$0xff] %vm109_vm0, %v101_v22  ;;  %v102_v25 = vld [vmem:[%s9167_s0 + $0xc8] sm:$0xff]  ;;  %v103_v27 = vld [vmem:[%s9167_s0 + $0xd0] sm:$0xff] }
  0x55   :  { %135 = vst.msk [vmem:[#allocation2 + $0xc8] sm:$0xff] %vm109_vm0, %v102_v25  ;;  %136 = vst.msk [vmem:[#allocation2 + $0xd0] sm:$0xff] %vm109_vm0, %v103_v27  ;;  %v104_v28 = vld [vmem:[%s9167_s0 + $0xd8] sm:$0xff]  ;;  %v105_v29 = vld [vmem:[%s9167_s0 + $0xe0] sm:$0xff] }
  0x56   :  { %137 = vst.msk [vmem:[#allocation2 + $0xd8] sm:$0xff] %vm109_vm0, %v104_v28  ;;  %138 = vst.msk [vmem:[#allocation2 + $0xe0] sm:$0xff] %vm109_vm0, %v105_v29  ;;  %v106_v30 = vld [vmem:[%s9167_s0 + $0xe8] sm:$0xff]  ;;  %v107_v31 = vld [vmem:[%s9167_s0 + $0xf0] sm:$0xff] }
  0x57   :  { %139 = vst.msk [vmem:[#allocation2 + $0xe8] sm:$0xff] %vm109_vm0, %v106_v30  ;;  %140 = vst.msk [vmem:[#allocation2 + $0xf0] sm:$0xff] %vm109_vm0, %v107_v31  ;;  %v108_v32 = vld [vmem:[%s9167_s0 + $0xf8] sm:$0xff]  ;;  %v1276_v37 = vld [vmem:[#allocation6] sm:$0xff] }
  0x58   :  { %238 = vrot.lane.b32.xlu0 %v158_v57, %s6732_s17  ;;  %240 = vrot.lane.b32.xlu1 %v159_v58, %s6732_s17  ;;  %141 = vst.msk [vmem:[#allocation2 + $0xf8] sm:$0xff] %vm109_vm0, %v108_v32  ;;  %v1280_v38 = vld [vmem:[#allocation6 + $0x20] sm:$0xff]  ;;  %v1285_v39 = vld [vmem:[#allocation6 + $0x48] sm:$0xff] }
  0x59   :  { %v1289_v40 = vld [vmem:[#allocation6 + $0x68] sm:$0xff]  ;;  %v5278_v41 = vpack.c.bf16 %v1280_v38, %v1276_v37  ;;  %v1284_v46 = vld [vmem:[#allocation6 + $0x40] sm:$0xff] }
  0x5a   :  { %v5280_v45 = vpack.c.bf16 %v1289_v40, %v1285_v39  ;;  %v1288_v47 = vld [vmem:[#allocation6 + $0x60] sm:$0xff]  ;;  %v1293_v48 = vld [vmem:[#allocation6 + $0x88] sm:$0xff] }
  0x5b   :  { %v1297_v49 = vld [vmem:[#allocation6 + $0xa8] sm:$0xff]  ;;  %v1292_v50 = vld [vmem:[#allocation6 + $0x80] sm:$0xff]  ;;  %v5282_v52 = vpack.c.bf16 %v1288_v47, %v1284_v46 }
  0x5c   :  { %242 = vrot.lane.b32.xlu0 %v160_v60, %s6732_s17  ;;  %244 = vrot.lane.b32.xlu1 %v161_v61, %s6732_s17  ;;  %v1296_v51 = vld [vmem:[#allocation6 + $0xa0] sm:$0xff]  ;;  %v1301_v53 = vld [vmem:[#allocation6 + $0xc8] sm:$0xff]  ;;  %v5284_v60 = vpack.c.bf16 %v1297_v49, %v1293_v48 }
  0x5d   :  { %v1305_v54 = vld [vmem:[#allocation6 + $0xe8] sm:$0xff]  ;;  %v1412_v5 = vld [vmem:[#allocation6 + $0x440] sm:$0xff] }
  0x5e   :  { %v1405_v55 = vld [vmem:[#allocation6 + $0x408] sm:$0xff]  ;;  %v1300_v8 = vld [vmem:[#allocation6 + $0xc0] sm:$0xff] }
  0x5f   :  { %v1409_v61 = vld [vmem:[#allocation6 + $0x428] sm:$0xff]  ;;  %v1420_v19 = vld [vmem:[#allocation6 + $0x480] sm:$0xff] }
  0x60   :  { %246 = vrot.lane.b32.xlu0 %v162_v63, %s6732_s17  ;;  %248 = vrot.lane.b32.xlu1 %v163_v1, %s6732_s17  ;;  %v5340_v62 = vpack.c.bf16 %v1409_v61, %v1405_v55  ;;  %v1404_v63 = vld [vmem:[#allocation6 + $0x400] sm:$0xff]  ;;  %v1413_v2 = vld [vmem:[#allocation6 + $0x448] sm:$0xff] }
  0x61   :  { %v1408_v1 = vld [vmem:[#allocation6 + $0x420] sm:$0xff]  ;;  %v1309_v14 = vld [vmem:[#allocation6 + $0x108] sm:$0xff] }
  0x62   :  { %5341 = vmatprep.subr.bf16.mxu0 %v5340_v62  ;;  %v1421_v17 = vld [vmem:[#allocation6 + $0x488] sm:$0xff]  ;;  %v1424_v21 = vld [vmem:[#allocation6 + $0x4a0] sm:$0xff] }
  0x63   :  { %v1425_v18 = vld [vmem:[#allocation6 + $0x4a8] sm:$0xff]  ;;  %v1308_v23 = vld [vmem:[#allocation6 + $0x100] sm:$0xff]  ;;  %v5350_v30 = vpack.c.bf16 %v1424_v21, %v1420_v19 }
  0x64   :  { %250 = vrot.lane.b32.xlu0 %v164_v3, %s6732_s17  ;;  %252 = vrot.lane.b32.xlu1 %v165_v4, %s6732_s17  ;;  %v5342_v3 = vpack.c.bf16 %v1408_v1, %v1404_v63  ;;  %v1417_v4 = vld [vmem:[#allocation6 + $0x468] sm:$0xff]  ;;  %v1312_v24 = vld [vmem:[#allocation6 + $0x120] sm:$0xff]  ;;  %v5348_v25 = vpack.c.bf16 %v1425_v18, %v1421_v17 }
  0x65   :  { %v1317_v29 = vld [vmem:[#allocation6 + $0x148] sm:$0xff]  ;;  %v5294_v37 = vpack.c.bf16 %v1312_v24, %v1308_v23  ;;  %v1316_v38 = vld [vmem:[#allocation6 + $0x140] sm:$0xff] }
  0x66   :  { %v1429_v31 = vld [vmem:[#allocation6 + $0x4c8] sm:$0xff]  ;;  %v1320_v39 = vld [vmem:[#allocation6 + $0x160] sm:$0xff] }
  0x67   :  { %v1433_v32 = vld [vmem:[#allocation6 + $0x4e8] sm:$0xff]  ;;  %v1436_v49 = vld [vmem:[#allocation6 + $0x500] sm:$0xff] }
  0x68   :  { %254 = vrot.lane.b32.xlu0 %v166_v6, %s6732_s17  ;;  %256 = vrot.lane.b32.xlu1 %v167_v7, %s6732_s17  ;;  %v1416_v6 = vld [vmem:[#allocation6 + $0x460] sm:$0xff]  ;;  %v5286_v7 = vpack.c.bf16 %v1296_v51, %v1292_v50  ;;  %v5352_v40 = vpack.c.bf16 %v1433_v32, %v1429_v31  ;;  %v1437_v46 = vld [vmem:[#allocation6 + $0x508] sm:$0xff] }
  0x69   :  { %v1441_v47 = vld [vmem:[#allocation6 + $0x528] sm:$0xff]  ;;  %v1440_v50 = vld [vmem:[#allocation6 + $0x520] sm:$0xff] }
  0x6a   :  { %v1329_v48 = vld [vmem:[#allocation6 + $0x1a8] sm:$0xff]  ;;  %v5356_v55 = vpack.c.bf16 %v1441_v47, %v1437_v46  ;;  %v1444_v1 = vld [vmem:[#allocation6 + $0x540] sm:$0xff] }
  0x6b   :  { %v1445_v61 = vld [vmem:[#allocation6 + $0x548] sm:$0xff]  ;;  %v1456_v17 = vld [vmem:[#allocation6 + $0x5a0] sm:$0xff] }
  0x6c   :  { %258 = vrot.lane.b32.xlu0 %v168_v9, %s6732_s17  ;;  %260 = vrot.lane.b32.xlu1 %v169_v10, %s6732_s17  ;;  %v5344_v9 = vpack.c.bf16 %v1417_v4, %v1413_v2  ;;  %v1449_v62 = vld [vmem:[#allocation6 + $0x568] sm:$0xff]  ;;  %v1448_v2 = vld [vmem:[#allocation6 + $0x560] sm:$0xff] }
  0x6d   :  { %v1337_v63 = vld [vmem:[#allocation6 + $0x1e8] sm:$0xff]  ;;  %v1344_v21 = vld [vmem:[#allocation6 + $0x220] sm:$0xff] }
  0x6e   :  { %v1460_v31 = vld [vmem:[#allocation6 + $0x5c0] sm:$0xff] }
  0x6f   :  { %v1464_v32 = vld [vmem:[#allocation6 + $0x5e0] sm:$0xff] }
  0x70   :  { %262 = vrot.lane.b32.xlu0 %v170_v12, %s6732_s17  ;;  %264 = vrot.lane.b32.xlu1 %v171_v13, %s6732_s17  ;;  %v5288_v12 = vpack.c.bf16 %v1305_v54, %v1301_v53  ;;  %v1304_v13 = vld [vmem:[#allocation6 + $0xe0] sm:$0xff] }
  0x71   :  { %v5290_v22 = vpack.c.bf16 %v1304_v13, %v1300_v8  ;;  %v1324_v53 = vld [vmem:[#allocation6 + $0x180] sm:$0xff]  ;;  %v1453_v13 = vld [vmem:[#allocation6 + $0x588] sm:$0xff] }
  0x72   :  { %v1328_v54 = vld [vmem:[#allocation6 + $0x1a0] sm:$0xff] }
  0x73   :  { %v5302_v4 = vpack.c.bf16 %v1328_v54, %v1324_v53  ;;  %v1468_v46 = vld [vmem:[#allocation6 + $0x600] sm:$0xff] }
  0x74   :  { %266 = vrot.lane.b32.xlu0 %v172_v15, %s6732_s17  ;;  %268 = vrot.lane.b32.xlu1 %v173_v16, %s6732_s17  ;;  %v1313_v15 = vld [vmem:[#allocation6 + $0x128] sm:$0xff]  ;;  %v5346_v16 = vpack.c.bf16 %v1416_v6, %v1412_v5  ;;  %v1332_v5 = vld [vmem:[#allocation6 + $0x1c0] sm:$0xff] }
  0x75   :  { %v5292_v28 = vpack.c.bf16 %v1313_v15, %v1309_v14  ;;  %v1336_v6 = vld [vmem:[#allocation6 + $0x1e0] sm:$0xff]  ;;  %v1457_v14 = vld [vmem:[#allocation6 + $0x5a8] sm:$0xff] }
  0x76   :  { %v1345_v15 = vld [vmem:[#allocation6 + $0x228] sm:$0xff]  ;;  %v5306_v19 = vpack.c.bf16 %v1336_v6, %v1332_v5  ;;  %v1472_v47 = vld [vmem:[#allocation6 + $0x620] sm:$0xff] }
  0xaa   :  { %v207_v33 = vpop.permute.xlu0 %206  ;;  %v211_v34 = vpop.permute.xlu1 %210 }
  0xab   :  { %303 = vst.msk [vmem:[#allocation2] sm:$0xff] %vm302_vm1, %v207_v33  ;;  %305 = vst.msk [vmem:[#allocation2 + $0x10] sm:$0xff] %vm302_vm1, %v211_v34  ;;  %v1321_v33 = vld [vmem:[#allocation6 + $0x168] sm:$0xff]  ;;  %v1428_v34 = vld [vmem:[#allocation6 + $0x4c0] sm:$0xff] }
  0xae   :  { %v209_v35 = vpop.permute.xlu0 %208  ;;  %v213_v36 = vpop.permute.xlu1 %212 }
  0xaf   :  { %304 = vst.msk [vmem:[#allocation2 + $0x8] sm:$0xff] %vm302_vm1, %v209_v35  ;;  %306 = vst.msk [vmem:[#allocation2 + $0x18] sm:$0xff] %vm302_vm1, %v213_v36  ;;  %v1432_v35 = vld [vmem:[#allocation6 + $0x4e0] sm:$0xff] }
  0xb2   :  { %v335_v42 = vld [vmem:[#allocation2] sm:$0xff]  ;;  %v215_v43 = vpop.permute.xlu0 %214  ;;  %v217_v44 = vpop.permute.xlu1 %216  ;;  %v337_v57 = vld [vmem:[#allocation2 + $0x10] sm:$0xff] }
  0xb3   :  { %5163 = vmatmul.mubr.msk.f32.vlgmr.msra.gmra.mrb[0].mxu0 %vm409_vm2, %v335_v42  ;;  %5195 = vmatmul.mubr.msk.f32.vlgmr.msra.gmra.mrb[0].mxu1 %vm409_vm2, %v335_v42  ;;  %307 = vst.msk [vmem:[#allocation2 + $0x20] sm:$0xff] %vm302_vm1, %v215_v43  ;;  %308 = vst.msk [vmem:[#allocation2 + $0x28] sm:$0xff] %vm302_vm1, %v217_v44  ;;  %v5296_v43 = vpack.c.bf16 %v1321_v33, %v1317_v29  ;;  %v1325_v44 = vld [vmem:[#allocation6 + $0x188] sm:$0xff] }
  0xb4   :  { %576 = vmatprep.mubr.f32.mxu0 %v6731_v0  ;;  %833 = vmatprep.mubr.f32.mxu1 %v6731_v0  ;;  %v1465_v29 = vld [vmem:[#allocation6 + $0x5e8] sm:$0xff] }
  0xb5   :  { %5279 = vmatpush1.bf16.msra.mxu1 %v5278_v41  ;;  %5343 = vmatpush1.bf16.msra.mxu0 %v5342_v3 }
  0xb6   :  { %v336_v56 = vld [vmem:[#allocation2 + $0x8] sm:$0xff]  ;;  %v219_v58 = vpop.permute.xlu0 %218  ;;  %v221_v59 = vpop.permute.xlu1 %220  ;;  %5281 = vmatprep.subr.bf16.mxu1 %v5280_v45  ;;  %v338_v20 = vld [vmem:[#allocation2 + $0x18] sm:$0xff]  ;;  %5345 = vmatprep.subr.bf16.mxu0 %v5344_v9  ;;  %v5354_v45 = vpack.c.bf16 %v1432_v35, %v1428_v34  ;;  %v1348_v35 = vld [vmem:[#allocation6 + $0x240] sm:$0xff] }
  0xb7   :  { %5164 = vmatmul.mubr.msk.f32.gmra.mrb[2].mxu0 %vm409_vm2, %v336_v56  ;;  %5196 = vmatmul.mubr.msk.f32.gmra.mrb[2].mxu1 %vm409_vm2, %v336_v56  ;;  %309 = vst.msk [vmem:[#allocation2 + $0x30] sm:$0xff] %vm302_vm1, %v219_v58  ;;  %310 = vst.msk [vmem:[#allocation2 + $0x38] sm:$0xff] %vm302_vm1, %v221_v59  ;;  %v5300_v58 = vpack.c.bf16 %v1329_v48, %v1325_v44  ;;  %v1333_v59 = vld [vmem:[#allocation6 + $0x1c8] sm:$0xff] }
  0xb8   :  { %582 = vmatprep.mubr.f32.mxu0 %v6731_v0  ;;  %839 = vmatprep.mubr.f32.mxu1 %v6731_v0  ;;  %v1473_v44 = vld [vmem:[#allocation6 + $0x628] sm:$0xff] }
  0xb9   :  { %5283 = vmatpush1.bf16.msra.mxu1 %v5282_v52  ;;  %5347 = vmatpush1.bf16.msra.mxu0 %v5346_v16  ;;  %v5298_v52 = vpack.c.bf16 %v1320_v39, %v1316_v38  ;;  %v1452_v16 = vld [vmem:[#allocation6 + $0x580] sm:$0xff] }
  0xba   :  { %v223_v10 = vpop.permute.xlu0 %222  ;;  %v225_v11 = vpop.permute.xlu1 %224  ;;  %5285 = vmatprep.subr.bf16.mxu1 %v5284_v60  ;;  %v339_v36 = vld [vmem:[#allocation2 + $0x20] sm:$0xff]  ;;  %5349 = vmatprep.subr.bf16.mxu0 %v5348_v25  ;;  %v340_v51 = vld [vmem:[#allocation2 + $0x28] sm:$0xff]  ;;  %v5358_v60 = vpack.c.bf16 %v1440_v50, %v1436_v49 }
  0xbb   :  { %5165 = vmatmul.mubr.msk.f32.gmra.mrb[4].mxu0 %vm409_vm2, %v337_v57  ;;  %5197 = vmatmul.mubr.msk.f32.gmra.mrb[4].mxu1 %vm409_vm2, %v337_v57  ;;  %311 = vst.msk [vmem:[#allocation2 + $0x40] sm:$0xff] %vm302_vm1, %v223_v10  ;;  %312 = vst.msk [vmem:[#allocation2 + $0x48] sm:$0xff] %vm302_vm1, %v225_v11  ;;  %v5304_v10 = vpack.c.bf16 %v1337_v63, %v1333_v59  ;;  %v1341_v11 = vld [vmem:[#allocation6 + $0x208] sm:$0xff]  ;;  %v1356_v50 = vld [vmem:[#allocation6 + $0x280] sm:$0xff] }
  0xbc   :  { %588 = vmatprep.mubr.f32.mxu0 %v6731_v0  ;;  %845 = vmatprep.mubr.f32.mxu1 %v6731_v0  ;;  %v5308_v25 = vpack.c.bf16 %v1345_v15, %v1341_v11  ;;  %v1481_v59 = vld [vmem:[#allocation6 + $0x668] sm:$0xff] }
  0xbd   :  { %5287 = vmatpush1.bf16.msra.mxu1 %v5286_v7  ;;  %5351 = vmatpush1.bf16.msra.mxu0 %v5350_v30  ;;  %v5360_v7 = vpack.c.bf16 %v1449_v62, %v1445_v61  ;;  %v1353_v30 = vld [vmem:[#allocation6 + $0x268] sm:$0xff]  ;;  %v1476_v61 = vld [vmem:[#allocation6 + $0x640] sm:$0xff] }
  0xbe   :  { %v227_v26 = vpop.permute.xlu0 %226  ;;  %v229_v27 = vpop.permute.xlu1 %228  ;;  %5289 = vmatprep.subr.bf16.mxu1 %v5288_v12  ;;  %5353 = vmatprep.subr.bf16.mxu0 %v5352_v40  ;;  %v341_v3 = vld [vmem:[#allocation2 + $0x30] sm:$0xff]  ;;  %v5362_v12 = vpack.c.bf16 %v1448_v2, %v1444_v1  ;;  %v342_v18 = vld [vmem:[#allocation2 + $0x38] sm:$0xff]  ;;  %v1480_v62 = vld [vmem:[#allocation6 + $0x660] sm:$0xff] }
  0xbf   :  { %5166 = vmatmul.mubr.msk.f32.gmra.mrb[6].mxu0 %vm409_vm2, %v338_v20  ;;  %5198 = vmatmul.mubr.msk.f32.gmra.mrb[6].mxu1 %vm409_vm2, %v338_v20  ;;  %313 = vst.msk [vmem:[#allocation2 + $0x50] sm:$0xff] %vm302_vm1, %v227_v26  ;;  %314 = vst.msk [vmem:[#allocation2 + $0x58] sm:$0xff] %vm302_vm1, %v229_v27  ;;  %v1340_v20 = vld [vmem:[#allocation6 + $0x200] sm:$0xff]  ;;  %v1349_v26 = vld [vmem:[#allocation6 + $0x248] sm:$0xff]  ;;  %v5366_v27 = vpack.c.bf16 %v1456_v17, %v1452_v16 }
  0xc0   :  { %594 = vmatprep.mubr.f32.mxu0 %v6731_v0  ;;  %851 = vmatprep.mubr.f32.mxu1 %v6731_v0  ;;  %v5310_v34 = vpack.c.bf16 %v1344_v21, %v1340_v20  ;;  %v5312_v40 = vpack.c.bf16 %v1353_v30, %v1349_v26  ;;  %v1364_v2 = vld [vmem:[#allocation6 + $0x2c0] sm:$0xff]  ;;  %v1489_v11 = vld [vmem:[#allocation6 + $0x6a8] sm:$0xff] }
  0xc1   :  { %5291 = vmatpush1.bf16.msra.mxu1 %v5290_v22  ;;  %5355 = vmatpush1.bf16.msra.mxu0 %v5354_v45  ;;  %v5364_v22 = vpack.c.bf16 %v1457_v14, %v1453_v13  ;;  %v1361_v45 = vld [vmem:[#allocation6 + $0x2a8] sm:$0xff]  ;;  %v1484_v13 = vld [vmem:[#allocation6 + $0x680] sm:$0xff] }
  0xc2   :  { %v231_v41 = vpop.permute.xlu0 %230  ;;  %v233_v42 = vpop.permute.xlu1 %232  ;;  %5293 = vmatprep.subr.bf16.mxu1 %v5292_v28  ;;  %5357 = vmatprep.subr.bf16.mxu0 %v5356_v55  ;;  %v1461_v28 = vld [vmem:[#allocation6 + $0x5c8] sm:$0xff]  ;;  %v343_v33 = vld [vmem:[#allocation2 + $0x40] sm:$0xff] }
  0xc3   :  { %5167 = vmatmul.mubr.msk.f32.gmra.mrb[8].mxu0 %vm409_vm2, %v339_v36  ;;  %5199 = vmatmul.mubr.msk.f32.gmra.mrb[8].mxu1 %vm409_vm2, %v339_v36  ;;  %315 = vst.msk [vmem:[#allocation2 + $0x60] sm:$0xff] %vm302_vm1, %v231_v41  ;;  %316 = vst.msk [vmem:[#allocation2 + $0x68] sm:$0xff] %vm302_vm1, %v233_v42  ;;  %v1352_v36 = vld [vmem:[#allocation6 + $0x260] sm:$0xff]  ;;  %v1357_v41 = vld [vmem:[#allocation6 + $0x288] sm:$0xff]  ;;  %v5370_v42 = vpack.c.bf16 %v1464_v32, %v1460_v31 }
  0xc4   :  { %600 = vmatprep.mubr.f32.mxu0 %v6731_v0  ;;  %857 = vmatprep.mubr.f32.mxu1 %v6731_v0  ;;  %v344_v48 = vld [vmem:[#allocation2 + $0x48] sm:$0xff]  ;;  %v5314_v49 = vpack.c.bf16 %v1352_v36, %v1348_v35  ;;  %v5316_v55 = vpack.c.bf16 %v1361_v45, %v1357_v41  ;;  %v1488_v14 = vld [vmem:[#allocation6 + $0x6a0] sm:$0xff] }
  0xc5   :  { %5295 = vmatpush1.bf16.msra.mxu1 %v5294_v37  ;;  %5359 = vmatpush1.bf16.msra.mxu0 %v5358_v60  ;;  %v5368_v37 = vpack.c.bf16 %v1465_v29, %v1461_v28  ;;  %v1369_v60 = vld [vmem:[#allocation6 + $0x2e8] sm:$0xff]  ;;  %v1372_v17 = vld [vmem:[#allocation6 + $0x300] sm:$0xff] }
  0xc6   :  { %v235_v56 = vpop.permute.xlu0 %234  ;;  %v237_v57 = vpop.permute.xlu1 %236  ;;  %5297 = vmatprep.subr.bf16.mxu1 %v5296_v43  ;;  %5361 = vmatprep.subr.bf16.mxu0 %v5360_v7  ;;  %v1469_v43 = vld [vmem:[#allocation6 + $0x608] sm:$0xff]  ;;  %v345_v63 = vld [vmem:[#allocation2 + $0x50] sm:$0xff]  ;;  %v346_v15 = vld [vmem:[#allocation2 + $0x58] sm:$0xff] }
  0xc7   :  { %5168 = vmatmul.mubr.msk.f32.gmra.mrb[10].mxu0 %vm409_vm2, %v340_v51  ;;  %5200 = vmatmul.mubr.msk.f32.gmra.mrb[10].mxu1 %vm409_vm2, %v340_v51  ;;  %317 = vst.msk [vmem:[#allocation2 + $0x70] sm:$0xff] %vm302_vm1, %v235_v56  ;;  %318 = vst.msk [vmem:[#allocation2 + $0x78] sm:$0xff] %vm302_vm1, %v237_v57  ;;  %v1360_v51 = vld [vmem:[#allocation6 + $0x2a0] sm:$0xff]  ;;  %v1365_v56 = vld [vmem:[#allocation6 + $0x2c8] sm:$0xff]  ;;  %v5374_v57 = vpack.c.bf16 %v1472_v47, %v1468_v46 }
  0xc8   :  { %606 = vmatprep.mubr.f32.mxu0 %v6731_v0  ;;  %863 = vmatprep.mubr.f32.mxu1 %v6731_v0  ;;  %v5318_v1 = vpack.c.bf16 %v1360_v51, %v1356_v50  ;;  %v5320_v7 = vpack.c.bf16 %v1369_v60, %v1365_v56  ;;  %v1497_v26 = vld [vmem:[#allocation6 + $0x6e8] sm:$0xff]  ;;  %v1492_v28 = vld [vmem:[#allocation6 + $0x6c0] sm:$0xff] }
  0xc9   :  { %5299 = vmatpush1.bf16.msra.mxu1 %v5298_v52  ;;  %5363 = vmatpush1.bf16.msra.mxu0 %v5362_v12  ;;  %v5372_v52 = vpack.c.bf16 %v1473_v44, %v1469_v43  ;;  %v1377_v12 = vld [vmem:[#allocation6 + $0x328] sm:$0xff]  ;;  %v1496_v29 = vld [vmem:[#allocation6 + $0x6e0] sm:$0xff] }
  0xca   :  { %v239_v8 = vpop.permute.xlu0 %238  ;;  %v241_v9 = vpop.permute.xlu1 %240  ;;  %5301 = vmatprep.subr.bf16.mxu1 %v5300_v58  ;;  %5365 = vmatprep.subr.bf16.mxu0 %v5364_v22  ;;  %v1477_v58 = vld [vmem:[#allocation6 + $0x648] sm:$0xff]  ;;  %v347_v30 = vld [vmem:[#allocation2 + $0x60] sm:$0xff] }
  0xcb   :  { %5169 = vmatmul.mubr.msk.f32.gmra.mrb[12].mxu0 %vm409_vm2, %v341_v3  ;;  %5201 = vmatmul.mubr.msk.f32.gmra.mrb[12].mxu1 %vm409_vm2, %v341_v3  ;;  %319 = vst.msk [vmem:[#allocation2 + $0x80] sm:$0xff] %vm302_vm1, %v239_v8  ;;  %320 = vst.msk [vmem:[#allocation2 + $0x88] sm:$0xff] %vm302_vm1, %v241_v9  ;;  %v1368_v3 = vld [vmem:[#allocation6 + $0x2e0] sm:$0xff]  ;;  %v1373_v8 = vld [vmem:[#allocation6 + $0x308] sm:$0xff]  ;;  %v5378_v9 = vpack.c.bf16 %v1480_v62, %v1476_v61 }
  0xcc   :  { %612 = vmatprep.mubr.f32.mxu0 %v6731_v0  ;;  %869 = vmatprep.mubr.f32.mxu1 %v6731_v0  ;;  %v5322_v16 = vpack.c.bf16 %v1368_v3, %v1364_v2  ;;  %v5324_v22 = vpack.c.bf16 %v1377_v12, %v1373_v8  ;;  %v1380_v32 = vld [vmem:[#allocation6 + $0x340] sm:$0xff]  ;;  %v1505_v41 = vld [vmem:[#allocation6 + $0x728] sm:$0xff] }
  0xcd   :  { %5303 = vmatpush1.bf16.msra.mxu1 %v5302_v4  ;;  %5367 = vmatpush1.bf16.msra.mxu0 %v5366_v27  ;;  %v5376_v4 = vpack.c.bf16 %v1481_v59, %v1477_v58  ;;  %v1385_v27 = vld [vmem:[#allocation6 + $0x368] sm:$0xff]  ;;  %v1500_v43 = vld [vmem:[#allocation6 + $0x700] sm:$0xff] }
  0xce   :  { %v243_v23 = vpop.permute.xlu0 %242  ;;  %v245_v24 = vpop.permute.xlu1 %244  ;;  %5305 = vmatprep.subr.bf16.mxu1 %v5304_v10  ;;  %5369 = vmatprep.subr.bf16.mxu0 %v5368_v37  ;;  %v1485_v10 = vld [vmem:[#allocation6 + $0x688] sm:$0xff]  ;;  %v1504_v44 = vld [vmem:[#allocation6 + $0x720] sm:$0xff]  ;;  %v349_v58 = vld [vmem:[#allocation2 + $0x70] sm:$0xff] }
  0xcf   :  { %5170 = vmatmul.mubr.msk.f32.gmra.mrb[14].mxu0 %vm409_vm2, %v342_v18  ;;  %5202 = vmatmul.mubr.msk.f32.gmra.mrb[14].mxu1 %vm409_vm2, %v342_v18  ;;  %321 = vst.msk [vmem:[#allocation2 + $0x90] sm:$0xff] %vm302_vm1, %v243_v23  ;;  %322 = vst.msk [vmem:[#allocation2 + $0x98] sm:$0xff] %vm302_vm1, %v245_v24  ;;  %v1376_v18 = vld [vmem:[#allocation6 + $0x320] sm:$0xff]  ;;  %v1381_v23 = vld [vmem:[#allocation6 + $0x348] sm:$0xff]  ;;  %v5382_v24 = vpack.c.bf16 %v1488_v14, %v1484_v13 }
  0xd0   :  { %618 = vmatprep.mubr.f32.mxu0 %v6731_v0  ;;  %875 = vmatprep.mubr.f32.mxu1 %v6731_v0  ;;  %v5326_v31 = vpack.c.bf16 %v1376_v18, %v1372_v17  ;;  %v5328_v37 = vpack.c.bf16 %v1385_v27, %v1381_v23  ;;  %v348_v45 = vld [vmem:[#allocation2 + $0x68] sm:$0xff]  ;;  %v1388_v47 = vld [vmem:[#allocation6 + $0x380] sm:$0xff]  ;;  %v350_v62 = vld [vmem:[#allocation2 + $0x78] sm:$0xff] }
  0xd1   :  { %5307 = vmatpush1.bf16.msra.mxu1 %v5306_v19  ;;  %5371 = vmatpush1.bf16.msra.mxu0 %v5370_v42  ;;  %v5380_v19 = vpack.c.bf16 %v1489_v11, %v1485_v10  ;;  %v1393_v42 = vld [vmem:[#allocation6 + $0x3a8] sm:$0xff]  ;;  %v1508_v56 = vld [vmem:[#allocation6 + $0x740] sm:$0xff]  ;;  %v1279_v27 = vld [vmem:[#allocation6 + $0x18] sm:$0xff] }
  0xd2   :  { %v247_v38 = vpop.permute.xlu0 %246  ;;  %v249_v39 = vpop.permute.xlu1 %248  ;;  %5309 = vmatprep.subr.bf16.mxu1 %v5308_v25  ;;  %5373 = vmatprep.subr.bf16.mxu0 %v5372_v52  ;;  %v1493_v25 = vld [vmem:[#allocation6 + $0x6c8] sm:$0xff]  ;;  %v1392_v52 = vld [vmem:[#allocation6 + $0x3a0] sm:$0xff] }
  0xd3   :  { %5171 = vmatmul.mubr.msk.f32.gmra.mrb[16].mxu0 %vm409_vm2, %v343_v33  ;;  %5203 = vmatmul.mubr.msk.f32.gmra.mrb[16].mxu1 %vm409_vm2, %v343_v33  ;;  %323 = vst.msk [vmem:[#allocation2 + $0xa0] sm:$0xff] %vm302_vm1, %v247_v38  ;;  %324 = vst.msk [vmem:[#allocation2 + $0xa8] sm:$0xff] %vm302_vm1, %v249_v39  ;;  %v1384_v33 = vld [vmem:[#allocation6 + $0x360] sm:$0xff]  ;;  %v5386_v38 = vpack.c.bf16 %v1496_v29, %v1492_v28  ;;  %v1389_v39 = vld [vmem:[#allocation6 + $0x388] sm:$0xff]  ;;  %v5334_v59 = vpack.c.bf16 %v1392_v52, %v1388_v47 }
  0xd4   :  { %624 = vmatprep.mubr.f32.mxu0 %v6731_v0  ;;  %881 = vmatprep.mubr.f32.mxu1 %v6731_v0  ;;  %v5330_v46 = vpack.c.bf16 %v1384_v33, %v1380_v32  ;;  %v5332_v51 = vpack.c.bf16 %v1393_v42, %v1389_v39  ;;  %v1520_v10 = vld [vmem:[#allocation6 + $0x7a0] sm:$0xff]  ;;  %v1397_v13 = vld [vmem:[#allocation6 + $0x3c8] sm:$0xff]  ;;  %v1283_v28 = vld [vmem:[#allocation6 + $0x38] sm:$0xff] }
  0xd5   :  { %5311 = vmatpush1.bf16.msra.mxu1 %v5310_v34  ;;  %5375 = vmatpush1.bf16.msra.mxu0 %v5374_v57  ;;  %v5384_v34 = vpack.c.bf16 %v1497_v26, %v1493_v25  ;;  %v1512_v57 = vld [vmem:[#allocation6 + $0x760] sm:$0xff]  ;;  %v1401_v14 = vld [vmem:[#allocation6 + $0x3e8] sm:$0xff] }
  0xd6   :  { %v251_v53 = vpop.permute.xlu0 %250  ;;  %v253_v54 = vpop.permute.xlu1 %252  ;;  %5313 = vmatprep.subr.bf16.mxu1 %v5312_v40  ;;  %5377 = vmatprep.subr.bf16.mxu0 %v5376_v4  ;;  %v1501_v40 = vld [vmem:[#allocation6 + $0x708] sm:$0xff]  ;;  %v5394_v61 = vpack.c.bf16 %v1512_v57, %v1508_v56  ;;  %v353_v2 = vld [vmem:[#allocation2 + $0x90] sm:$0xff]  ;;  %v354_v3 = vld [vmem:[#allocation2 + $0x98] sm:$0xff] }
  0xd7   :  { %5172 = vmatmul.mubr.msk.f32.gmra.mrb[18].mxu0 %vm409_vm2, %v344_v48  ;;  %5204 = vmatmul.mubr.msk.f32.gmra.mrb[18].mxu1 %vm409_vm2, %v344_v48  ;;  %325 = vst.msk [vmem:[#allocation2 + $0xb0] sm:$0xff] %vm302_vm1, %v251_v53  ;;  %326 = vst.msk [vmem:[#allocation2 + $0xb8] sm:$0xff] %vm302_vm1, %v253_v54  ;;  %v5388_v48 = vpack.c.bf16 %v1505_v41, %v1501_v40  ;;  %v5390_v53 = vpack.c.bf16 %v1504_v44, %v1500_v43  ;;  %v1509_v54 = vld [vmem:[#allocation6 + $0x748] sm:$0xff]  ;;  %v1396_v17 = vld [vmem:[#allocation6 + $0x3c0] sm:$0xff] }
  0xd8   :  { %630 = vmatprep.mubr.f32.mxu0 %v6731_v0  ;;  %887 = vmatprep.mubr.f32.mxu1 %v6731_v0  ;;  %v1400_v18 = vld [vmem:[#allocation6 + $0x3e0] sm:$0xff]  ;;  %v1278_v57 = vld [vmem:[#allocation6 + $0x10] sm:$0xff] }
  0xd9   :  { %5315 = vmatpush1.bf16.msra.mxu1 %v5314_v49  ;;  %5379 = vmatpush1.bf16.msra.mxu0 %v5378_v9  ;;  %v1516_v9 = vld [vmem:[#allocation6 + $0x780] sm:$0xff] }
  0xda   :  { %v255_v5 = vpop.permute.xlu0 %254  ;;  %v257_v6 = vpop.permute.xlu1 %256  ;;  %5317 = vmatprep.subr.bf16.mxu1 %v5316_v55  ;;  %5381 = vmatprep.subr.bf16.mxu0 %v5380_v19  ;;  %v1513_v55 = vld [vmem:[#allocation6 + $0x768] sm:$0xff]  ;;  %v355_v4 = vld [vmem:[#allocation2 + $0xa0] sm:$0xff]  ;;  %v5398_v11 = vpack.c.bf16 %v1520_v10, %v1516_v9 }
  0xdb   :  { %5173 = vmatmul.mubr.msk.f32.gmra.mrb[20].mxu0 %vm409_vm2, %v345_v63  ;;  %5205 = vmatmul.mubr.msk.f32.gmra.mrb[20].mxu1 %vm409_vm2, %v345_v63  ;;  %327 = vst.msk [vmem:[#allocation2 + $0xc0] sm:$0xff] %vm302_vm1, %v255_v5  ;;  %328 = vst.msk [vmem:[#allocation2 + $0xc8] sm:$0xff] %vm302_vm1, %v257_v6  ;;  %v5392_v60 = vpack.c.bf16 %v1513_v55, %v1509_v54  ;;  %v351_v63 = vld [vmem:[#allocation2 + $0x80] sm:$0xff]  ;;  %v356_v5 = vld [vmem:[#allocation2 + $0xa8] sm:$0xff] }
  0xdc   :  { %636 = vmatprep.mubr.f32.mxu0 %v6731_v0  ;;  %893 = vmatprep.mubr.f32.mxu1 %v6731_v0  ;;  %v1517_v6 = vld [vmem:[#allocation6 + $0x788] sm:$0xff]  ;;  %v1528_v23 = vld [vmem:[#allocation6 + $0x7e0] sm:$0xff] }
  0xdd   :  { %5319 = vmatpush1.bf16.msra.mxu1 %v5318_v1  ;;  %5383 = vmatpush1.bf16.msra.mxu0 %v5382_v24  ;;  %v352_v1 = vld [vmem:[#allocation2 + $0x88] sm:$0xff]  ;;  %v387_v41 = vld [vmem:[%s9170_s3] sm:$0xf] }
  0xde   :  { %v259_v20 = vpop.permute.xlu0 %258  ;;  %v261_v21 = vpop.permute.xlu1 %260  ;;  %5321 = vmatprep.subr.bf16.mxu1 %v5320_v7  ;;  %5385 = vmatprep.subr.bf16.mxu0 %v5384_v34  ;;  %v1521_v7 = vld [vmem:[#allocation6 + $0x7a8] sm:$0xff]  ;;  %v357_v12 = vld [vmem:[#allocation2 + $0xb0] sm:$0xff]  ;;  %v358_v25 = vld [vmem:[#allocation2 + $0xb8] sm:$0xff] }
  0xdf   :  { %5174 = vmatmul.mubr.msk.f32.gmra.mrb[22].mxu0 %vm409_vm2, %v346_v15  ;;  %5206 = vmatmul.mubr.msk.f32.gmra.mrb[22].mxu1 %vm409_vm2, %v346_v15  ;;  %329 = vst.msk [vmem:[#allocation2 + $0xd0] sm:$0xff] %vm302_vm1, %v259_v20  ;;  %330 = vst.msk [vmem:[#allocation2 + $0xd8] sm:$0xff] %vm302_vm1, %v261_v21  ;;  %v5396_v8 = vpack.c.bf16 %v1521_v7, %v1517_v6  ;;  %v1525_v15 = vld [vmem:[#allocation6 + $0x7c8] sm:$0xff]  ;;  %v5338_v20 = vpack.c.bf16 %v1400_v18, %v1396_v17 }
  0xe0   :  { %642 = vmatprep.mubr.f32.mxu0 %v6731_v0  ;;  %899 = vmatprep.mubr.f32.mxu1 %v6731_v0  ;;  %v1529_v19 = vld [vmem:[#allocation6 + $0x7e8] sm:$0xff] }
  0xe1   :  { %5323 = vmatpush1.bf16.msra.mxu1 %v5322_v16  ;;  %5387 = vmatpush1.bf16.msra.mxu0 %v5386_v38  ;;  %v5336_v16 = vpack.c.bf16 %v1401_v14, %v1397_v13  ;;  %v5400_v21 = vpack.c.bf16 %v1529_v19, %v1525_v15  ;;  %v1291_v13 = vld [vmem:[#allocation6 + $0x78] sm:$0xff] }
  0xe2   :  { %v263_v35 = vpop.permute.xlu0 %262  ;;  %v265_v36 = vpop.permute.xlu1 %264  ;;  %5325 = vmatprep.subr.bf16.mxu1 %v5324_v22  ;;  %5389 = vmatprep.subr.bf16.mxu0 %v5388_v48  ;;  %v1524_v22 = vld [vmem:[#allocation6 + $0x7c0] sm:$0xff]  ;;  %v360_v29 = vld [vmem:[#allocation2 + $0xc8] sm:$0xff] }
  0xe3   :  { %5175 = vmatmul.mubr.msk.f32.gmra.mrb[24].mxu0 %vm409_vm2, %v347_v30  ;;  %5207 = vmatmul.mubr.msk.f32.gmra.mrb[24].mxu1 %vm409_vm2, %v347_v30  ;;  %331 = vst.msk [vmem:[#allocation2 + $0xe0] sm:$0xff] %vm302_vm1, %v263_v35  ;;  %332 = vst.msk [vmem:[#allocation2 + $0xe8] sm:$0xff] %vm302_vm1, %v265_v36  ;;  %v5402_v24 = vpack.c.bf16 %v1528_v23, %v1524_v22  ;;  %v359_v26 = vld [vmem:[#allocation2 + $0xc0] sm:$0xff]  ;;  %v5404_v30 = vpack.c.bf16 %v1283_v28, %v1279_v27 }
  0xe4   :  { %648 = vmatprep.mubr.f32.mxu0 %v6731_v0  ;;  %905 = vmatprep.mubr.f32.mxu1 %v6731_v0 }
  0xe5   :  { %5327 = vmatpush1.bf16.msra.mxu1 %v5326_v31  ;;  %5391 = vmatpush1.bf16.msra.mxu0 %v5390_v53 }
  0xe6   :  { %v267_v49 = vpop.permute.xlu0 %266  ;;  %v269_v50 = vpop.permute.xlu1 %268  ;;  %5329 = vmatprep.subr.bf16.mxu1 %v5328_v37  ;;  %5393 = vmatprep.subr.bf16.mxu0 %v5392_v60  ;;  %v361_v31 = vld [vmem:[#allocation2 + $0xd0] sm:$0xff]  ;;  %v362_v32 = vld [vmem:[#allocation2 + $0xd8] sm:$0xff]  ;;  %v389_v37 = vlaneseq }
  0xe7   :  { %5176 = vmatmul.mubr.msk.f32.gmra.mrb[26].mxu0 %vm409_vm2, %v348_v45  ;;  %5208 = vmatmul.mubr.msk.f32.gmra.mrb[26].mxu1 %vm409_vm2, %v348_v45  ;;  %333 = vst.msk [vmem:[#allocation2 + $0xf0] sm:$0xff] %vm302_vm1, %v267_v49  ;;  %334 = vst.msk [vmem:[#allocation2 + $0xf8] sm:$0xff] %vm302_vm1, %v269_v50 }
  0xe8   :  { %654 = vmatprep.mubr.f32.mxu0 %v6731_v0  ;;  %911 = vmatprep.mubr.f32.mxu1 %v6731_v0  ;;  %v390_v38 = vshrl.u32 %v389_v37, 7 }
  0xe9   :  { %5331 = vmatpush1.bf16.msra.mxu1 %v5330_v46  ;;  %5395 = vmatpush1.bf16.msra.mxu0 %v5394_v61 }
  0xea   :  { %5333 = vmatprep.subr.bf16.mxu1 %v5332_v51  ;;  %5397 = vmatprep.subr.bf16.mxu0 %v5396_v8  ;;  %v363_v33 = vld [vmem:[#allocation2 + $0xe0] sm:$0xff]  ;;  %v364_v34 = vld [vmem:[#allocation2 + $0xe8] sm:$0xff]  ;;  %v7260_v39 = vsub.s32 0, %v390_v38  ;;  %v7262_v40 = vsub.s32 2, %v390_v38  ;;  %v7267_v42 = vsub.s32 1, %v390_v38  ;;  %v7269_v43 = vsub.s32 3, %v390_v38 }
  0xeb   :  { %5177 = vmatmul.mubr.msk.f32.gmra.mrb[28].mxu0 %vm409_vm2, %v349_v58  ;;  %5209 = vmatmul.mubr.msk.f32.gmra.mrb[28].mxu1 %vm409_vm2, %v349_v58  ;;  %v1282_v58 = vld [vmem:[#allocation6 + $0x30] sm:$0xff] }
  0xec   :  { %660 = vmatprep.mubr.f32.mxu0 %v6731_v0  ;;  %917 = vmatprep.mubr.f32.mxu1 %v6731_v0  ;;  %9300 = vst [vmem:[#allocation13_spill] sm:$0xff] %v7260_v39  ;;  %9301 = vst [vmem:[#allocation14_spill] sm:$0xff] %v7262_v40  ;;  %v7275_v44 = vrot.slane %v387_v41, %v7262_v40  ;;  %v7278_v45 = vrot.slane %v387_v41, %v7267_v42 }
  0xed   :  { %5335 = vmatpush1.bf16.msra.mxu1 %v5334_v59  ;;  %5399 = vmatpush1.bf16.msra.mxu0 %v5398_v11  ;;  %9302 = vst [vmem:[#allocation15_spill] sm:$0xff] %v7267_v42  ;;  %9303 = vst [vmem:[#allocation16_spill] sm:$0xff] %v7269_v43  ;;  %v7281_v46 = vrot.slane %v387_v41, %v7269_v43  ;;  %v5406_v11 = vpack.c.bf16 %v1282_v58, %v1278_v57  ;;  %v1295_v57 = vld [vmem:[#allocation6 + $0x98] sm:$0xff] }
  0xee   :  { %5337 = vmatprep.subr.bf16.mxu1 %v5336_v16  ;;  %5401 = vmatprep.subr.bf16.mxu0 %v5400_v21  ;;  %v365_v35 = vld [vmem:[#allocation2 + $0xf0] sm:$0xff]  ;;  %v366_v36 = vld [vmem:[#allocation2 + $0xf8] sm:$0xff] }
  0xef   :  { %5178 = vmatmul.mubr.msk.f32.gmra.mrb[30].mxu0 %vm409_vm2, %v350_v62  ;;  %5210 = vmatmul.mubr.msk.f32.gmra.mrb[30].mxu1 %vm409_vm2, %v350_v62  ;;  %v1299_v58 = vld [vmem:[#allocation6 + $0xb8] sm:$0xff] }
  0xf0   :  { %666 = vmatprep.mubr.f32.mxu0 %v6731_v0  ;;  %923 = vmatprep.mubr.f32.mxu1 %v6731_v0  ;;  %v1323_v43 = vld [vmem:[#allocation6 + $0x178] sm:$0xff] }
  0xf1   :  { %5339 = vmatpush1.bf16.msra.mxu1 %v5338_v20  ;;  %5403 = vmatpush1.bf16.msra.mxu0 %v5402_v24 }
  0xf2   :  { %5405 = vmatprep.subr.bf16.mxu1 %v5404_v30 }
  0xf3   :  { %5179 = vmatmul.mubr.msk.f32.gmra.mrb[32].mxu0 %vm409_vm2, %v351_v63  ;;  %5211 = vmatmul.mubr.msk.f32.gmra.mrb[32].mxu1 %vm409_vm2, %v351_v63 }
  0xf4   :  { %672 = vmatprep.mubr.f32.mxu0 %v6731_v0  ;;  %929 = vmatprep.mubr.f32.mxu1 %v6731_v0 }
  0xf7   :  { %5180 = vmatmul.mubr.msk.f32.gmra.mrb[34].mxu0 %vm409_vm2, %v352_v1  ;;  %5212 = vmatmul.mubr.msk.f32.gmra.mrb[34].mxu1 %vm409_vm2, %v352_v1 }
  0xf8   :  { %678 = vmatprep.mubr.f32.mxu0 %v6731_v0  ;;  %935 = vmatprep.mubr.f32.mxu1 %v6731_v0 }
  0xfb   :  { %5181 = vmatmul.mubr.msk.f32.gmra.mrb[36].mxu0 %vm409_vm2, %v353_v2  ;;  %5213 = vmatmul.mubr.msk.f32.gmra.mrb[36].mxu1 %vm409_vm2, %v353_v2 }
  0xfc   :  { %684 = vmatprep.mubr.f32.mxu0 %v6731_v0  ;;  %941 = vmatprep.mubr.f32.mxu1 %v6731_v0 }
  0xff   :  { %5182 = vmatmul.mubr.msk.f32.gmra.mrb[38].mxu0 %vm409_vm2, %v354_v3  ;;  %5214 = vmatmul.mubr.msk.f32.gmra.mrb[38].mxu1 %vm409_vm2, %v354_v3 }
 0x100   :  { %690 = vmatprep.mubr.f32.mxu0 %v6731_v0  ;;  %947 = vmatprep.mubr.f32.mxu1 %v6731_v0 }
 0x103   :  { %5183 = vmatmul.mubr.msk.f32.gmra.mrb[40].mxu0 %vm409_vm2, %v355_v4  ;;  %5215 = vmatmul.mubr.msk.f32.gmra.mrb[40].mxu1 %vm409_vm2, %v355_v4 }
 0x104   :  { %696 = vmatprep.mubr.f32.mxu0 %v6731_v0  ;;  %953 = vmatprep.mubr.f32.mxu1 %v6731_v0 }
 0x107   :  { %5184 = vmatmul.mubr.msk.f32.gmra.mrb[42].mxu0 %vm409_vm2, %v356_v5  ;;  %5216 = vmatmul.mubr.msk.f32.gmra.mrb[42].mxu1 %vm409_vm2, %v356_v5 }
 0x108   :  { %702 = vmatprep.mubr.f32.mxu0 %v6731_v0  ;;  %959 = vmatprep.mubr.f32.mxu1 %v6731_v0 }
 0x10b   :  { %5185 = vmatmul.mubr.msk.f32.gmra.mrb[44].mxu0 %vm409_vm2, %v357_v12  ;;  %5217 = vmatmul.mubr.msk.f32.gmra.mrb[44].mxu1 %vm409_vm2, %v357_v12  ;;  %v1287_v12 = vld [vmem:[#allocation6 + $0x58] sm:$0xff] }
 0x10c   :  { %708 = vmatprep.mubr.f32.mxu0 %v6731_v0  ;;  %965 = vmatprep.mubr.f32.mxu1 %v6731_v0  ;;  %v5408_v30 = vpack.c.bf16 %v1291_v13, %v1287_v12 }
 0x10f   :  { %5186 = vmatmul.mubr.msk.f32.gmra.mrb[46].mxu0 %vm409_vm2, %v358_v25  ;;  %5218 = vmatmul.mubr.msk.f32.gmra.mrb[46].mxu1 %vm409_vm2, %v358_v25 }
 0x110   :  { %714 = vmatprep.mubr.f32.mxu0 %v6731_v0  ;;  %971 = vmatprep.mubr.f32.mxu1 %v6731_v0 }
 0x113   :  { %5187 = vmatmul.mubr.msk.f32.gmra.mrb[48].mxu0 %vm409_vm2, %v359_v26  ;;  %5219 = vmatmul.mubr.msk.f32.gmra.mrb[48].mxu1 %vm409_vm2, %v359_v26 }
 0x114   :  { %720 = vmatprep.mubr.f32.mxu0 %v6731_v0  ;;  %977 = vmatprep.mubr.f32.mxu1 %v6731_v0 }
 0x117   :  { %5188 = vmatmul.mubr.msk.f32.gmra.mrb[50].mxu0 %vm409_vm2, %v360_v29  ;;  %5220 = vmatmul.mubr.msk.f32.gmra.mrb[50].mxu1 %vm409_vm2, %v360_v29 }
 0x118   :  { %726 = vmatprep.mubr.f32.mxu0 %v6731_v0  ;;  %983 = vmatprep.mubr.f32.mxu1 %v6731_v0 }
 0x11b   :  { %5189 = vmatmul.mubr.msk.f32.gmra.mrb[52].mxu0 %vm409_vm2, %v361_v31  ;;  %5221 = vmatmul.mubr.msk.f32.gmra.mrb[52].mxu1 %vm409_vm2, %v361_v31  ;;  %v1286_v31 = vld [vmem:[#allocation6 + $0x50] sm:$0xff] }
 0x11c   :  { %732 = vmatprep.mubr.f32.mxu0 %v6731_v0  ;;  %989 = vmatprep.mubr.f32.mxu1 %v6731_v0 }
 0x11f   :  { %5190 = vmatmul.mubr.msk.f32.gmra.mrb[54].mxu0 %vm409_vm2, %v362_v32  ;;  %5222 = vmatmul.mubr.msk.f32.gmra.mrb[54].mxu1 %vm409_vm2, %v362_v32  ;;  %v1290_v32 = vld [vmem:[#allocation6 + $0x70] sm:$0xff] }
 0x120   :  { %738 = vmatprep.mubr.f32.mxu0 %v6731_v0  ;;  %995 = vmatprep.mubr.f32.mxu1 %v6731_v0 }
 0x123   :  { %5191 = vmatmul.mubr.msk.f32.gmra.mrb[56].mxu0 %vm409_vm2, %v363_v33  ;;  %5223 = vmatmul.mubr.msk.f32.gmra.mrb[56].mxu1 %vm409_vm2, %v363_v33 }
 0x124   :  { %744 = vmatprep.mubr.f32.mxu0 %v6731_v0  ;;  %1001 = vmatprep.mubr.f32.mxu1 %v6731_v0 }
 0x127   :  { %5192 = vmatmul.mubr.msk.f32.gmra.mrb[58].mxu0 %vm409_vm2, %v364_v34  ;;  %5224 = vmatmul.mubr.msk.f32.gmra.mrb[58].mxu1 %vm409_vm2, %v364_v34 }
 0x128   :  { %750 = vmatprep.mubr.f32.mxu0 %v6731_v0  ;;  %1007 = vmatprep.mubr.f32.mxu1 %v6731_v0 }
 0x12b   :  { %5193 = vmatmul.mubr.msk.f32.gmra.mrb[60].mxu0 %vm409_vm2, %v365_v35  ;;  %5225 = vmatmul.mubr.msk.f32.gmra.mrb[60].mxu1 %vm409_vm2, %v365_v35 }
 0x12c   :  { %756 = vmatprep.mubr.f32.mxu0 %v6731_v0  ;;  %1013 = vmatprep.mubr.f32.mxu1 %v6731_v0  ;;  %v7272_v0 = vrot.slane %v387_v41, %v7260_v39 }
 0x12f   :  { %5194 = vmatmul.mubr.msk.f32.gmra.mrb[62].mxu0 %vm409_vm2, %v366_v36  ;;  %5226 = vmatmul.mubr.msk.f32.gmra.mrb[62].mxu1 %vm409_vm2, %v366_v36 }
 0x186   :  { %v572_v47 = vpop.f32.mrb[0].mxu0  ;;  %v829_v48 = vpop.f32.mrb[0].mxu1 }
 0x187   :  { %v573_v49 = vadd.f32 %v572_v47, %v7272_v0  ;;  %v830_v50 = vadd.f32 %v829_v48, %v7275_v44  ;;  %v574_v51 = vpop.f32.mrb[1].mxu0  ;;  %v831_v52 = vpop.f32.mrb[1].mxu1 }
 0x188   :  { %v575_v53 = vadd.f32 %v574_v51, %v7278_v45  ;;  %v832_v54 = vadd.f32 %v831_v52, %v7281_v46 }
 0x189   :  { %v1020_v55 = vmul.f32 0.01, %v573_v49  ;;  %v1022_v56 = vmul.f32 0.01, %v830_v50 }
 0x18a   :  { %v1021_v59 = vmul.f32 0.01, %v575_v53  ;;  %v1023_v60 = vmul.f32 0.01, %v832_v54  ;;  %v578_v61 = vpop.f32.mrb[2].mxu0  ;;  %v835_v62 = vpop.f32.mrb[2].mxu1 }
 0x18b   :  { %v579_v63 = vadd.f32 %v578_v61, %v7272_v0  ;;  %v836_v1 = vadd.f32 %v835_v62, %v7275_v44  ;;  %v580_v2 = vpop.f32.mrb[3].mxu0  ;;  %v837_v3 = vpop.f32.mrb[3].mxu1  ;;  %v7295_v8 = vmax.f32 %v573_v49, %v1020_v55  ;;  %v7297_v14 = vmax.f32 %v830_v50, %v1022_v56 }
 0x18c   :  { %v7289_v4 = vmax.f32 %v575_v53, %v1021_v59  ;;  %v7291_v5 = vmax.f32 %v832_v54, %v1023_v60  ;;  %v581_v6 = vadd.f32 %v580_v2, %v7278_v45  ;;  %v838_v7 = vadd.f32 %v837_v3, %v7281_v46 }
 0x18d   :  { %v1024_v9 = vmul.f32 0.01, %v579_v63  ;;  %v1026_v10 = vmul.f32 0.01, %v836_v1  ;;  %9305 = vst [vmem:[#allocation18_spill] sm:$0xff] %v7297_v14  ;;  %v5410_v56 = vpack.c.bf16 %v1290_v32, %v1286_v31 }
 0x18e   :  { %9304 = vst [vmem:[#allocation17_spill] sm:$0xff] %v7291_v5  ;;  %v1025_v15 = vmul.f32 0.01, %v581_v6  ;;  %v1027_v16 = vmul.f32 0.01, %v838_v7  ;;  %v584_v17 = vpop.f32.mrb[4].mxu0  ;;  %1618 = vmatprep.mubr.f32.mxu1 %v7289_v4  ;;  %1875 = vmatprep.mubr.f32.mxu0 %v7291_v5 }
 0x18f   :  { %v841_v18 = vpop.f32.mrb[4].mxu1  ;;  %v585_v19 = vadd.f32 %v584_v17, %v7272_v0  ;;  %v586_v21 = vpop.f32.mrb[5].mxu0  ;;  %1619 = vmatmul.mubr.f32.vlgmr.msra.gmra.mrb[64].mxu1 %v7295_v8  ;;  %1876 = vmatmul.mubr.f32.vlgmr.msra.gmra.mrb[64].mxu0 %v7297_v14  ;;  %v7311_v27 = vmax.f32 %v579_v63, %v1024_v9  ;;  %v7313_v33 = vmax.f32 %v836_v1, %v1026_v10  ;;  %v1294_v17 = vld [vmem:[#allocation6 + $0x90] sm:$0xff] }
 0x190   :  { %v842_v20 = vadd.f32 %v841_v18, %v7275_v44  ;;  %v843_v22 = vpop.f32.mrb[5].mxu1  ;;  %v7304_v23 = vmax.f32 %v581_v6, %v1025_v15  ;;  %v7306_v24 = vmax.f32 %v838_v7, %v1027_v16  ;;  %v587_v25 = vadd.f32 %v586_v21, %v7278_v45  ;;  %5407 = vmatpush1.bf16.msra.mxu1 %v5406_v11  ;;  %v1298_v18 = vld [vmem:[#allocation6 + $0xb0] sm:$0xff] }
 0x191   :  { %v844_v26 = vadd.f32 %v843_v22, %v7281_v46  ;;  %v1028_v28 = vmul.f32 0.01, %v585_v19  ;;  %9307 = vst [vmem:[#allocation20_spill] sm:$0xff] %v7313_v33  ;;  %5409 = vmatprep.subr.bf16.mxu1 %v5408_v30  ;;  %v5412_v16 = vpack.c.bf16 %v1299_v58, %v1295_v57 }
 0x192   :  { %9306 = vst [vmem:[#allocation19_spill] sm:$0xff] %v7306_v24  ;;  %v1030_v29 = vmul.f32 0.01, %v842_v20  ;;  %v1029_v34 = vmul.f32 0.01, %v587_v25  ;;  %v590_v36 = vpop.f32.mrb[6].mxu0  ;;  %1624 = vmatprep.mubr.f32.mxu1 %v7304_v23  ;;  %1881 = vmatprep.mubr.f32.mxu0 %v7306_v24 }
 0x193   :  { %v1031_v35 = vmul.f32 0.01, %v844_v26  ;;  %v847_v37 = vpop.f32.mrb[6].mxu1  ;;  %v591_v38 = vadd.f32 %v590_v36, %v7272_v0  ;;  %v592_v47 = vpop.f32.mrb[7].mxu0  ;;  %1625 = vmatmul.mubr.f32.gmra.mrb[66].mxu1 %v7311_v27  ;;  %1882 = vmatmul.mubr.f32.gmra.mrb[66].mxu0 %v7313_v33  ;;  %v7327_v53 = vmax.f32 %v585_v19, %v1028_v28 }
 0x194   :  { %v848_v41 = vadd.f32 %v847_v37, %v7275_v44  ;;  %v849_v48 = vpop.f32.mrb[7].mxu1  ;;  %v7320_v49 = vmax.f32 %v587_v25, %v1029_v34  ;;  %v593_v51 = vadd.f32 %v592_v47, %v7278_v45  ;;  %v7329_v59 = vmax.f32 %v842_v20, %v1030_v29  ;;  %5411 = vmatpush1.bf16.msra.mxu1 %v5410_v56  ;;  %v1303_v47 = vld [vmem:[#allocation6 + $0xd8] sm:$0xff] }
 0x195   :  { %v7322_v50 = vmax.f32 %v844_v26, %v1031_v35  ;;  %v850_v52 = vadd.f32 %v849_v48, %v7281_v46  ;;  %v1032_v54 = vmul.f32 0.01, %v591_v38  ;;  %5413 = vmatprep.subr.bf16.mxu1 %v5412_v16  ;;  %v1307_v48 = vld [vmem:[#allocation6 + $0xf8] sm:$0xff] }
 0x196   :  { %v1034_v55 = vmul.f32 0.01, %v848_v41  ;;  %9309 = vst [vmem:[#allocation22_spill] sm:$0xff] %v7329_v59  ;;  %v1033_v60 = vmul.f32 0.01, %v593_v51  ;;  %v596_v62 = vpop.f32.mrb[8].mxu0  ;;  %1630 = vmatprep.mubr.f32.mxu1 %v7320_v49 }
 0x197   :  { %9308 = vst [vmem:[#allocation21_spill] sm:$0xff] %v7322_v50  ;;  %v1035_v61 = vmul.f32 0.01, %v850_v52  ;;  %v853_v63 = vpop.f32.mrb[8].mxu1  ;;  %1887 = vmatprep.mubr.f32.mxu0 %v7322_v50  ;;  %v597_v1 = vadd.f32 %v596_v62, %v7272_v0  ;;  %v598_v3 = vpop.f32.mrb[9].mxu0  ;;  %1631 = vmatmul.mubr.f32.gmra.mrb[68].mxu1 %v7327_v53  ;;  %v7343_v12 = vmax.f32 %v591_v38, %v1032_v54 }
 0x198   :  { %v854_v2 = vadd.f32 %v853_v63, %v7275_v44  ;;  %v855_v6 = vpop.f32.mrb[9].mxu1  ;;  %v7336_v7 = vmax.f32 %v593_v51, %v1033_v60  ;;  %v599_v10 = vadd.f32 %v598_v3, %v7278_v45  ;;  %1888 = vmatmul.mubr.f32.gmra.mrb[68].mxu0 %v7329_v59  ;;  %v7345_v19 = vmax.f32 %v848_v41, %v1034_v55 }
 0x199   :  { %v7338_v9 = vmax.f32 %v850_v52, %v1035_v61  ;;  %v856_v11 = vadd.f32 %v855_v6, %v7281_v46  ;;  %v1036_v13 = vmul.f32 0.01, %v597_v1  ;;  %v5414_v41 = vpack.c.bf16 %v1298_v18, %v1294_v17 }
 0x19a   :  { %v1038_v15 = vmul.f32 0.01, %v854_v2  ;;  %9311 = vst [vmem:[#allocation24_spill] sm:$0xff] %v7345_v19  ;;  %v1037_v20 = vmul.f32 0.01, %v599_v10  ;;  %v602_v22 = vpop.f32.mrb[10].mxu0  ;;  %1636 = vmatprep.mubr.f32.mxu1 %v7336_v7 }
 0x19b   :  { %9310 = vst [vmem:[#allocation23_spill] sm:$0xff] %v7338_v9  ;;  %v1039_v21 = vmul.f32 0.01, %v856_v11  ;;  %v859_v25 = vpop.f32.mrb[10].mxu1  ;;  %1893 = vmatprep.mubr.f32.mxu0 %v7338_v9  ;;  %v603_v26 = vadd.f32 %v602_v22, %v7272_v0  ;;  %v604_v29 = vpop.f32.mrb[11].mxu0  ;;  %1637 = vmatmul.mubr.f32.gmra.mrb[70].mxu1 %v7343_v12  ;;  %v7359_v36 = vmax.f32 %v597_v1, %v1036_v13  ;;  %v1302_v13 = vld [vmem:[#allocation6 + $0xd0] sm:$0xff] }
 0x19c   :  { %v860_v28 = vadd.f32 %v859_v25, %v7275_v44  ;;  %v861_v30 = vpop.f32.mrb[11].mxu1  ;;  %v7352_v31 = vmax.f32 %v599_v10, %v1037_v20  ;;  %v605_v34 = vadd.f32 %v604_v29, %v7278_v45  ;;  %1894 = vmatmul.mubr.f32.gmra.mrb[70].mxu0 %v7345_v19  ;;  %v7361_v51 = vmax.f32 %v854_v2, %v1038_v15  ;;  %v1306_v15 = vld [vmem:[#allocation6 + $0xf0] sm:$0xff] }
 0x19d   :  { %v7354_v32 = vmax.f32 %v856_v11, %v1039_v21  ;;  %v862_v35 = vadd.f32 %v861_v30, %v7281_v46  ;;  %v1040_v37 = vmul.f32 0.01, %v603_v26  ;;  %5415 = vmatpush1.bf16.msra.mxu1 %v5414_v41  ;;  %v5416_v11 = vpack.c.bf16 %v1307_v48, %v1303_v47  ;;  %v1311_v48 = vld [vmem:[#allocation6 + $0x118] sm:$0xff] }
 0x19e   :  { %v1042_v38 = vmul.f32 0.01, %v860_v28  ;;  %9313 = vst [vmem:[#allocation26_spill] sm:$0xff] %v7361_v51  ;;  %v1041_v52 = vmul.f32 0.01, %v605_v34  ;;  %v608_v55 = vpop.f32.mrb[12].mxu0  ;;  %1642 = vmatprep.mubr.f32.mxu1 %v7352_v31  ;;  %v5418_v47 = vpack.c.bf16 %v1306_v15, %v1302_v13 }
 0x19f   :  { %9312 = vst [vmem:[#allocation25_spill] sm:$0xff] %v7354_v32  ;;  %v1043_v54 = vmul.f32 0.01, %v862_v35  ;;  %v865_v56 = vpop.f32.mrb[12].mxu1  ;;  %1899 = vmatprep.mubr.f32.mxu0 %v7354_v32  ;;  %v609_v57 = vadd.f32 %v608_v55, %v7272_v0  ;;  %v610_v60 = vpop.f32.mrb[13].mxu0  ;;  %1643 = vmatmul.mubr.f32.gmra.mrb[72].mxu1 %v7359_v36  ;;  %v7375_v3 = vmax.f32 %v603_v26, %v1040_v37  ;;  %v1310_v15 = vld [vmem:[#allocation6 + $0x110] sm:$0xff] }
 0x1a0   :  { %v866_v58 = vadd.f32 %v865_v56, %v7275_v44  ;;  %v867_v61 = vpop.f32.mrb[13].mxu1  ;;  %v7368_v62 = vmax.f32 %v605_v34, %v1041_v52  ;;  %v611_v1 = vadd.f32 %v610_v60, %v7278_v45  ;;  %1900 = vmatmul.mubr.f32.gmra.mrb[72].mxu0 %v7361_v51  ;;  %v7377_v16 = vmax.f32 %v860_v28, %v1042_v38  ;;  %v1315_v52 = vld [vmem:[#allocation6 + $0x138] sm:$0xff] }
 0x1a1   :  { %v7370_v63 = vmax.f32 %v862_v35, %v1043_v54  ;;  %v868_v2 = vadd.f32 %v867_v61, %v7281_v46  ;;  %v1044_v6 = vmul.f32 0.01, %v609_v57  ;;  %5417 = vmatprep.subr.bf16.mxu1 %v5416_v11 }
 0x1a2   :  { %v1046_v10 = vmul.f32 0.01, %v866_v58  ;;  %9315 = vst [vmem:[#allocation28_spill] sm:$0xff] %v7377_v16  ;;  %v1045_v17 = vmul.f32 0.01, %v611_v1  ;;  %v614_v20 = vpop.f32.mrb[14].mxu0  ;;  %1648 = vmatprep.mubr.f32.mxu1 %v7368_v62  ;;  %5419 = vmatpush1.bf16.msra.mxu1 %v5418_v47 }
 0x1a3   :  { %9314 = vst [vmem:[#allocation27_spill] sm:$0xff] %v7370_v63  ;;  %v1047_v18 = vmul.f32 0.01, %v868_v2  ;;  %v871_v21 = vpop.f32.mrb[14].mxu1  ;;  %1905 = vmatprep.mubr.f32.mxu0 %v7370_v63  ;;  %v615_v22 = vadd.f32 %v614_v20, %v7272_v0  ;;  %v616_v26 = vpop.f32.mrb[15].mxu0  ;;  %1649 = vmatmul.mubr.f32.gmra.mrb[74].mxu1 %v7375_v3  ;;  %v7391_v37 = vmax.f32 %v609_v57, %v1044_v6 }
 0x1a4   :  { %v872_v25 = vadd.f32 %v871_v21, %v7275_v44  ;;  %v873_v29 = vpop.f32.mrb[15].mxu1  ;;  %v7384_v30 = vmax.f32 %v611_v1, %v1045_v17  ;;  %v617_v34 = vadd.f32 %v616_v26, %v7278_v45  ;;  %1906 = vmatmul.mubr.f32.gmra.mrb[74].mxu0 %v7377_v16  ;;  %v7393_v54 = vmax.f32 %v866_v58, %v1046_v10  ;;  %v1314_v17 = vld [vmem:[#allocation6 + $0x130] sm:$0xff] }
 0x1a5   :  { %v7386_v28 = vmax.f32 %v868_v2, %v1047_v18  ;;  %v874_v35 = vadd.f32 %v873_v29, %v7281_v46  ;;  %v1048_v38 = vmul.f32 0.01, %v615_v22  ;;  %v5420_v26 = vpack.c.bf16 %v1315_v52, %v1311_v48  ;;  %v2839_v48 = vld [vmem:[#allocation8 + $0x8] sm:$0xff] }
 0x1a6   :  { %v1050_v41 = vmul.f32 0.01, %v872_v25  ;;  %9317 = vst [vmem:[#allocation30_spill] sm:$0xff] %v7393_v54  ;;  %v1049_v55 = vmul.f32 0.01, %v617_v34  ;;  %v620_v60 = vpop.f32.mrb[16].mxu0  ;;  %1654 = vmatprep.mubr.f32.mxu1 %v7384_v30  ;;  %v5422_v47 = vpack.c.bf16 %v1314_v17, %v1310_v15 }
 0x1a7   :  { %9316 = vst [vmem:[#allocation29_spill] sm:$0xff] %v7386_v28  ;;  %v1051_v56 = vmul.f32 0.01, %v874_v35  ;;  %v877_v61 = vpop.f32.mrb[16].mxu1  ;;  %1911 = vmatprep.mubr.f32.mxu0 %v7386_v28  ;;  %v621_v1 = vadd.f32 %v620_v60, %v7272_v0  ;;  %v622_v2 = vpop.f32.mrb[17].mxu0  ;;  %1655 = vmatmul.mubr.f32.gmra.mrb[76].mxu1 %v7391_v37  ;;  %v7407_v18 = vmax.f32 %v615_v22, %v1048_v38  ;;  %v2838_v17 = vld [vmem:[#allocation8] sm:$0xff] }
 0x1a8   :  { %v878_v57 = vadd.f32 %v877_v61, %v7275_v44  ;;  %v879_v6 = vpop.f32.mrb[17].mxu1  ;;  %v7400_v11 = vmax.f32 %v617_v34, %v1049_v55  ;;  %v623_v10 = vadd.f32 %v622_v2, %v7278_v45  ;;  %1912 = vmatmul.mubr.f32.gmra.mrb[76].mxu0 %v7393_v54  ;;  %v7409_v29 = vmax.f32 %v872_v25, %v1050_v41  ;;  %v2843_v25 = vld [vmem:[#allocation8 + $0x28] sm:$0xff]  ;;  %v2842_v54 = vld [vmem:[#allocation8 + $0x20] sm:$0xff]  ;;  %v1322_v28 = vld [vmem:[#allocation6 + $0x170] sm:$0xff] }
 0x1a9   :  { %v7402_v58 = vmax.f32 %v874_v35, %v1051_v56  ;;  %v880_v13 = vadd.f32 %v879_v6, %v7281_v46  ;;  %v1052_v20 = vmul.f32 0.01, %v621_v1  ;;  %5421 = vmatprep.subr.bf16.mxu1 %v5420_v26  ;;  %v5532_v15 = vpack.c.bf16 %v2843_v25, %v2839_v48 }
 0x1aa   :  { %v1054_v21 = vmul.f32 0.01, %v878_v57  ;;  %9319 = vst [vmem:[#allocation32_spill] sm:$0xff] %v7409_v29  ;;  %v1053_v34 = vmul.f32 0.01, %v623_v10  ;;  %v626_v35 = vpop.f32.mrb[18].mxu0  ;;  %1660 = vmatprep.mubr.f32.mxu1 %v7400_v11  ;;  %5423 = vmatpush1.bf16.msra.mxu1 %v5422_v47  ;;  %v5534_v63 = vpack.c.bf16 %v2842_v54, %v2838_v17 }
 0x1ab   :  { %9318 = vst [vmem:[#allocation31_spill] sm:$0xff] %v7402_v58  ;;  %v1055_v55 = vmul.f32 0.01, %v880_v13  ;;  %v883_v56 = vpop.f32.mrb[18].mxu1  ;;  %1917 = vmatprep.mubr.f32.mxu0 %v7402_v58  ;;  %v627_v60 = vadd.f32 %v626_v35, %v7272_v0  ;;  %v628_v22 = vpop.f32.mrb[19].mxu0  ;;  %1661 = vmatmul.mubr.f32.gmra.mrb[78].mxu1 %v7407_v18  ;;  %v1319_v35 = vld [vmem:[#allocation6 + $0x158] sm:$0xff] }
 0x1ac   :  { %v884_v61 = vadd.f32 %v883_v56, %v7275_v44  ;;  %v885_v38 = vpop.f32.mrb[19].mxu1  ;;  %v7416_v41 = vmax.f32 %v623_v10, %v1053_v34  ;;  %v629_v2 = vadd.f32 %v628_v22, %v7278_v45  ;;  %1918 = vmatmul.mubr.f32.gmra.mrb[78].mxu0 %v7409_v29  ;;  %v7423_v56 = vmax.f32 %v621_v1, %v1052_v20 }
 0x1ad   :  { %v7418_v52 = vmax.f32 %v880_v13, %v1055_v55  ;;  %v886_v6 = vadd.f32 %v885_v38, %v7281_v46  ;;  %v1056_v40 = vmul.f32 0.01, %v627_v60  ;;  %v7425_v10 = vmax.f32 %v878_v57, %v1054_v21  ;;  %5533 = vmatprep.subr.bf16.mxu0 %v5532_v15 }
 0x1ae   :  { %v1058_v58 = vmul.f32 0.01, %v884_v61  ;;  %v1057_v13 = vmul.f32 0.01, %v629_v2  ;;  %v632_v55 = vpop.f32.mrb[20].mxu0  ;;  %v889_v22 = vpop.f32.mrb[20].mxu1  ;;  %1666 = vmatprep.mubr.f32.mxu1 %v7416_v41  ;;  %v5424_v26 = vpack.c.bf16 %v1323_v43, %v1319_v35  ;;  %5535 = vmatpush1.bf16.msra.mxu0 %v5534_v63 }
 0x1af   :  { %9320 = vst [vmem:[#allocation33_spill] sm:$0xff] %v7418_v52  ;;  %9321 = vst [vmem:[#allocation34_spill] sm:$0xff] %v7425_v10  ;;  %v1059_v34 = vmul.f32 0.01, %v886_v6  ;;  %1923 = vmatprep.mubr.f32.mxu0 %v7418_v52  ;;  %v633_v38 = vadd.f32 %v632_v55, %v7272_v0  ;;  %v890_v1 = vadd.f32 %v889_v22, %v7275_v44  ;;  %v634_v20 = vpop.f32.mrb[21].mxu0  ;;  %v891_v29 = vpop.f32.mrb[21].mxu1  ;;  %1667 = vmatmul.mubr.f32.gmra.mrb[80].mxu1 %v7423_v56 }
 0x1b0   :  { %v7432_v48 = vmax.f32 %v629_v2, %v1057_v13  ;;  %v635_v21 = vadd.f32 %v634_v20, %v7278_v45  ;;  %v892_v25 = vadd.f32 %v891_v29, %v7281_v46  ;;  %1924 = vmatmul.mubr.f32.gmra.mrb[80].mxu0 %v7425_v10  ;;  %v1318_v52 = vld [vmem:[#allocation6 + $0x150] sm:$0xff]  ;;  %v7439_v55 = vmax.f32 %v627_v60, %v1056_v40  ;;  %v2847_v43 = vld [vmem:[#allocation8 + $0x48] sm:$0xff]  ;;  %v1331_v10 = vld [vmem:[#allocation6 + $0x1b8] sm:$0xff] }
 0x1b1   :  { %v7434_v57 = vmax.f32 %v886_v6, %v1059_v34  ;;  %v1060_v22 = vmul.f32 0.01, %v633_v38  ;;  %v1062_v16 = vmul.f32 0.01, %v890_v1  ;;  %v2851_v2 = vld [vmem:[#allocation8 + $0x68] sm:$0xff]  ;;  %v7441_v35 = vmax.f32 %v884_v61, %v1058_v58  ;;  %5425 = vmatprep.subr.bf16.mxu1 %v5424_v26 }
 0x1b2   :  { %v1061_v6 = vmul.f32 0.01, %v635_v21  ;;  %v1063_v13 = vmul.f32 0.01, %v892_v25  ;;  %v638_v34 = vpop.f32.mrb[22].mxu0  ;;  %v895_v20 = vpop.f32.mrb[22].mxu1  ;;  %1672 = vmatprep.mubr.f32.mxu1 %v7432_v48  ;;  %v5426_v54 = vpack.c.bf16 %v1322_v28, %v1318_v52  ;;  %v5536_v32 = vpack.c.bf16 %v2851_v2, %v2847_v43 }
 0x1b3   :  { %9322 = vst [vmem:[#allocation35_spill] sm:$0xff] %v7434_v57  ;;  %9323 = vst [vmem:[#allocation36_spill] sm:$0xff] %v7441_v35  ;;  %1929 = vmatprep.mubr.f32.mxu0 %v7434_v57  ;;  %v639_v40 = vadd.f32 %v638_v34, %v7272_v0  ;;  %v896_v29 = vadd.f32 %v895_v20, %v7275_v44  ;;  %v640_v60 = vpop.f32.mrb[23].mxu0  ;;  %v897_v47 = vpop.f32.mrb[23].mxu1  ;;  %1673 = vmatmul.mubr.f32.gmra.mrb[82].mxu1 %v7439_v55  ;;  %v1327_v57 = vld [vmem:[#allocation6 + $0x198] sm:$0xff]  ;;  %v2846_v28 = vld [vmem:[#allocation8 + $0x40] sm:$0xff] }
 0x1b4   :  { %v7448_v15 = vmax.f32 %v635_v21, %v1061_v6  ;;  %v7450_v58 = vmax.f32 %v892_v25, %v1063_v13  ;;  %v641_v61 = vadd.f32 %v640_v60, %v7278_v45  ;;  %v898_v17 = vadd.f32 %v897_v47, %v7281_v46  ;;  %1930 = vmatmul.mubr.f32.gmra.mrb[82].mxu0 %v7441_v35  ;;  %v2850_v52 = vld [vmem:[#allocation8 + $0x60] sm:$0xff]  ;;  %v1330_v35 = vld [vmem:[#allocation6 + $0x1b0] sm:$0xff] }
 0x1b5   :  { %v7455_v34 = vmax.f32 %v633_v38, %v1060_v22  ;;  %v1064_v20 = vmul.f32 0.01, %v639_v40  ;;  %v1066_v51 = vmul.f32 0.01, %v896_v29  ;;  %v7457_v21 = vmax.f32 %v890_v1, %v1062_v16  ;;  %5427 = vmatpush1.bf16.msra.mxu1 %v5426_v54  ;;  %5537 = vmatprep.subr.bf16.mxu0 %v5536_v32 }
 0x1b6   :  { %9324 = vst [vmem:[#allocation37_spill] sm:$0xff] %v7450_v58  ;;  %v1065_v25 = vmul.f32 0.01, %v641_v61  ;;  %v1067_v6 = vmul.f32 0.01, %v898_v17  ;;  %v644_v13 = vpop.f32.mrb[24].mxu0  ;;  %1678 = vmatprep.mubr.f32.mxu1 %v7448_v15  ;;  %1935 = vmatprep.mubr.f32.mxu0 %v7450_v58  ;;  %v5428_v63 = vpack.c.bf16 %v1331_v10, %v1327_v57  ;;  %v5538_v9 = vpack.c.bf16 %v2850_v52, %v2846_v28 }
 0x1b7   :  { %9325 = vst [vmem:[#allocation38_spill] sm:$0xff] %v7457_v21  ;;  %v901_v60 = vpop.f32.mrb[24].mxu1  ;;  %v645_v38 = vadd.f32 %v644_v13, %v7272_v0  ;;  %v646_v47 = vpop.f32.mrb[25].mxu0  ;;  %1679 = vmatmul.mubr.f32.gmra.mrb[84].mxu1 %v7455_v34  ;;  %v1326_v58 = vld [vmem:[#allocation6 + $0x190] sm:$0xff]  ;;  %v7471_v13 = vmax.f32 %v639_v40, %v1064_v20  ;;  %v2855_v10 = vld [vmem:[#allocation8 + $0x88] sm:$0xff] }
 0x1b8   :  { %v902_v22 = vadd.f32 %v901_v60, %v7275_v44  ;;  %v903_v26 = vpop.f32.mrb[25].mxu1  ;;  %v7464_v43 = vmax.f32 %v641_v61, %v1065_v25  ;;  %v7466_v16 = vmax.f32 %v898_v17, %v1067_v6  ;;  %v647_v1 = vadd.f32 %v646_v47, %v7278_v45  ;;  %1936 = vmatmul.mubr.f32.gmra.mrb[84].mxu0 %v7457_v21  ;;  %v2859_v57 = vld [vmem:[#allocation8 + $0xa8] sm:$0xff]  ;;  %v1339_v21 = vld [vmem:[#allocation6 + $0x1f8] sm:$0xff] }
 0x1b9   :  { %v904_v2 = vadd.f32 %v903_v26, %v7281_v46  ;;  %v1068_v60 = vmul.f32 0.01, %v645_v38  ;;  %v7473_v61 = vmax.f32 %v896_v29, %v1066_v51  ;;  %v5430_v32 = vpack.c.bf16 %v1330_v35, %v1326_v58  ;;  %5429 = vmatprep.subr.bf16.mxu1 %v5428_v63  ;;  %5539 = vmatpush1.bf16.msra.mxu0 %v5538_v9  ;;  %v2854_v35 = vld [vmem:[#allocation8 + $0x80] sm:$0xff] }
 0x1ba   :  { %9326 = vst [vmem:[#allocation39_spill] sm:$0xff] %v7466_v16  ;;  %v1070_v19 = vmul.f32 0.01, %v902_v22  ;;  %v1069_v17 = vmul.f32 0.01, %v647_v1  ;;  %v650_v6 = vpop.f32.mrb[26].mxu0  ;;  %1684 = vmatprep.mubr.f32.mxu1 %v7464_v43  ;;  %1941 = vmatprep.mubr.f32.mxu0 %v7466_v16  ;;  %v5540_v50 = vpack.c.bf16 %v2859_v57, %v2855_v10 }
 0x1bb   :  { %9327 = vst [vmem:[#allocation40_spill] sm:$0xff] %v7473_v61  ;;  %v1071_v25 = vmul.f32 0.01, %v904_v2  ;;  %v907_v47 = vpop.f32.mrb[26].mxu1  ;;  %v651_v40 = vadd.f32 %v650_v6, %v7272_v0  ;;  %v652_v26 = vpop.f32.mrb[27].mxu0  ;;  %1685 = vmatmul.mubr.f32.gmra.mrb[86].mxu1 %v7471_v13  ;;  %v1335_v16 = vld [vmem:[#allocation6 + $0x1d8] sm:$0xff]  ;;  %v7487_v6 = vmax.f32 %v645_v38, %v1068_v60 }
 0x1bc   :  { %v908_v20 = vadd.f32 %v907_v47, %v7275_v44  ;;  %v909_v54 = vpop.f32.mrb[27].mxu1  ;;  %v7480_v28 = vmax.f32 %v647_v1, %v1069_v17  ;;  %v653_v29 = vadd.f32 %v652_v26, %v7278_v45  ;;  %1942 = vmatmul.mubr.f32.gmra.mrb[86].mxu0 %v7473_v61  ;;  %v2858_v58 = vld [vmem:[#allocation8 + $0xa0] sm:$0xff]  ;;  %v7489_v1 = vmax.f32 %v902_v22, %v1070_v19  ;;  %v1338_v61 = vld [vmem:[#allocation6 + $0x1f0] sm:$0xff] }
 0x1bd   :  { %v7482_v51 = vmax.f32 %v904_v2, %v1071_v25  ;;  %v910_v52 = vadd.f32 %v909_v54, %v7281_v46  ;;  %v1072_v47 = vmul.f32 0.01, %v651_v40  ;;  %v5432_v9 = vpack.c.bf16 %v1339_v21, %v1335_v16  ;;  %5431 = vmatpush1.bf16.msra.mxu1 %v5430_v32  ;;  %5541 = vmatprep.subr.bf16.mxu0 %v5540_v50  ;;  %v2863_v21 = vld [vmem:[#allocation8 + $0xc8] sm:$0xff] }
 0x1be   :  { %v1074_v59 = vmul.f32 0.01, %v908_v20  ;;  %9329 = vst [vmem:[#allocation42_spill] sm:$0xff] %v7489_v1  ;;  %v1073_v2 = vmul.f32 0.01, %v653_v29  ;;  %v656_v25 = vpop.f32.mrb[28].mxu0  ;;  %1690 = vmatprep.mubr.f32.mxu1 %v7480_v28  ;;  %v5542_v24 = vpack.c.bf16 %v2858_v58, %v2854_v35 }
 0x1bf   :  { %9328 = vst [vmem:[#allocation41_spill] sm:$0xff] %v7482_v51  ;;  %v1075_v17 = vmul.f32 0.01, %v910_v52  ;;  %v913_v26 = vpop.f32.mrb[28].mxu1  ;;  %1947 = vmatprep.mubr.f32.mxu0 %v7482_v51  ;;  %v657_v38 = vadd.f32 %v656_v25, %v7272_v0  ;;  %v658_v54 = vpop.f32.mrb[29].mxu0  ;;  %1691 = vmatmul.mubr.f32.gmra.mrb[88].mxu1 %v7487_v6  ;;  %v1334_v51 = vld [vmem:[#allocation6 + $0x1d0] sm:$0xff]  ;;  %v7503_v25 = vmax.f32 %v651_v40, %v1072_v47 }
 0x1c0   :  { %v914_v60 = vadd.f32 %v913_v26, %v7275_v44  ;;  %v915_v63 = vpop.f32.mrb[29].mxu1  ;;  %v7496_v10 = vmax.f32 %v653_v29, %v1073_v2  ;;  %v659_v22 = vadd.f32 %v658_v54, %v7278_v45  ;;  %1948 = vmatmul.mubr.f32.gmra.mrb[88].mxu0 %v7489_v1  ;;  %v2867_v16 = vld [vmem:[#allocation8 + $0xe8] sm:$0xff]  ;;  %v7505_v29 = vmax.f32 %v908_v20, %v1074_v59  ;;  %v1347_v1 = vld [vmem:[#allocation6 + $0x238] sm:$0xff] }
 0x1c1   :  { %v7498_v19 = vmax.f32 %v910_v52, %v1075_v17  ;;  %v916_v57 = vadd.f32 %v915_v63, %v7281_v46  ;;  %9331 = vst [vmem:[#allocation44_spill] sm:$0xff] %v7503_v25  ;;  %v1076_v26 = vmul.f32 0.01, %v657_v38  ;;  %v5434_v50 = vpack.c.bf16 %v1338_v61, %v1334_v51  ;;  %5433 = vmatprep.subr.bf16.mxu1 %v5432_v9  ;;  %v2862_v61 = vld [vmem:[#allocation8 + $0xc0] sm:$0xff] }
 0x1c2   :  { %v1078_v33 = vmul.f32 0.01, %v914_v60  ;;  %9332 = vst [vmem:[#allocation45_spill] sm:$0xff] %v7505_v29  ;;  %v1077_v52 = vmul.f32 0.01, %v659_v22  ;;  %v662_v17 = vpop.f32.mrb[30].mxu0  ;;  %1696 = vmatprep.mubr.f32.mxu1 %v7496_v10  ;;  %5543 = vmatpush1.bf16.msra.mxu0 %v5542_v24  ;;  %v5544_v5 = vpack.c.bf16 %v2867_v16, %v2863_v21 }
 0x1c3   :  { %9330 = vst [vmem:[#allocation43_spill] sm:$0xff] %v7498_v19  ;;  %v1079_v2 = vmul.f32 0.01, %v916_v57  ;;  %v919_v54 = vpop.f32.mrb[30].mxu1  ;;  %1953 = vmatprep.mubr.f32.mxu0 %v7498_v19  ;;  %v663_v40 = vadd.f32 %v662_v17, %v7272_v0  ;;  %v664_v63 = vpop.f32.mrb[31].mxu0  ;;  %1697 = vmatmul.mubr.f32.gmra.mrb[90].mxu1 %v7503_v25  ;;  %v1343_v19 = vld [vmem:[#allocation6 + $0x218] sm:$0xff]  ;;  %v7519_v17 = vmax.f32 %v657_v38, %v1076_v26 }
 0x1c4   :  { %v920_v47 = vadd.f32 %v919_v54, %v7275_v44  ;;  %v921_v32 = vpop.f32.mrb[31].mxu1  ;;  %v7512_v35 = vmax.f32 %v659_v22, %v1077_v52  ;;  %v665_v20 = vadd.f32 %v664_v63, %v7278_v45  ;;  %1954 = vmatmul.mubr.f32.gmra.mrb[90].mxu0 %v7505_v29  ;;  %v2866_v51 = vld [vmem:[#allocation8 + $0xe0] sm:$0xff]  ;;  %v7521_v22 = vmax.f32 %v914_v60, %v1078_v33  ;;  %v1346_v29 = vld [vmem:[#allocation6 + $0x230] sm:$0xff] }
 0x1c5   :  { %v7514_v59 = vmax.f32 %v916_v57, %v1079_v2  ;;  %v922_v58 = vadd.f32 %v921_v32, %v7281_v46  ;;  %9335 = vst [vmem:[#allocation48_spill] sm:$0xff] %v7519_v17  ;;  %v1080_v54 = vmul.f32 0.01, %v663_v40  ;;  %v5436_v24 = vpack.c.bf16 %v1347_v1, %v1343_v19  ;;  %5435 = vmatpush1.bf16.msra.mxu1 %v5434_v50  ;;  %v2871_v1 = vld [vmem:[#allocation8 + $0x108] sm:$0xff] }
 0x1c6   :  { %9333 = vst [vmem:[#allocation46_spill] sm:$0xff] %v7512_v35  ;;  %v1082_v14 = vmul.f32 0.01, %v920_v47  ;;  %9336 = vst [vmem:[#allocation49_spill] sm:$0xff] %v7521_v22  ;;  %v1081_v57 = vmul.f32 0.01, %v665_v20  ;;  %1702 = vmatprep.mubr.f32.mxu1 %v7512_v35  ;;  %5545 = vmatprep.subr.bf16.mxu0 %v5544_v5  ;;  %v5546_v39 = vpack.c.bf16 %v2866_v51, %v2862_v61 }
 0x1c7   :  { %9334 = vst [vmem:[#allocation47_spill] sm:$0xff] %v7514_v59  ;;  %v1083_v52 = vmul.f32 0.01, %v922_v58  ;;  %v668_v2 = vpop.f32.mrb[32].mxu0  ;;  %v925_v63 = vpop.f32.mrb[32].mxu1  ;;  %1959 = vmatprep.mubr.f32.mxu0 %v7514_v59  ;;  %1703 = vmatmul.mubr.f32.gmra.mrb[92].mxu1 %v7519_v17  ;;  %v1342_v59 = vld [vmem:[#allocation6 + $0x210] sm:$0xff] }
 0x1c8   :  { %v669_v38 = vadd.f32 %v668_v2, %v7272_v0  ;;  %v926_v26 = vadd.f32 %v925_v63, %v7275_v44  ;;  %v670_v32 = vpop.f32.mrb[33].mxu0  ;;  %v927_v9 = vpop.f32.mrb[33].mxu1  ;;  %v7528_v21 = vmax.f32 %v665_v20, %v1081_v57  ;;  %1960 = vmatmul.mubr.f32.gmra.mrb[92].mxu0 %v7521_v22  ;;  %v7535_v2 = vmax.f32 %v663_v40, %v1080_v54  ;;  %v2875_v19 = vld [vmem:[#allocation8 + $0x128] sm:$0xff]  ;;  %v1355_v22 = vld [vmem:[#allocation6 + $0x278] sm:$0xff] }
 0x1c9   :  { %v7530_v33 = vmax.f32 %v922_v58, %v1083_v52  ;;  %v671_v60 = vadd.f32 %v670_v32, %v7278_v45  ;;  %v928_v16 = vadd.f32 %v927_v9, %v7281_v46  ;;  %v7537_v20 = vmax.f32 %v920_v47, %v1082_v14  ;;  %5437 = vmatprep.subr.bf16.mxu1 %v5436_v24  ;;  %v2931_v17 = vld [vmem:[#allocation8 + $0x2e8] sm:$0xff] }
 0x1ca   :  { %9337 = vst [vmem:[#allocation50_spill] sm:$0xff] %v7528_v21  ;;  %9339 = vst [vmem:[#allocation52_spill] sm:$0xff] %v7535_v2  ;;  %v1084_v63 = vmul.f32 0.01, %v669_v38  ;;  %v1086_v42 = vmul.f32 0.01, %v926_v26  ;;  %1708 = vmatprep.mubr.f32.mxu1 %v7528_v21  ;;  %v5438_v5 = vpack.c.bf16 %v1346_v29, %v1342_v59  ;;  %5547 = vmatpush1.bf16.msra.mxu0 %v5546_v39 }
 0x1cb   :  { %9338 = vst [vmem:[#allocation51_spill] sm:$0xff] %v7530_v33  ;;  %9340 = vst [vmem:[#allocation53_spill] sm:$0xff] %v7537_v20  ;;  %v1085_v58 = vmul.f32 0.01, %v671_v60  ;;  %v1087_v57 = vmul.f32 0.01, %v928_v16  ;;  %1965 = vmatprep.mubr.f32.mxu0 %v7530_v33  ;;  %1709 = vmatmul.mubr.f32.gmra.mrb[94].mxu1 %v7535_v2  ;;  %v5548_v2 = vpack.c.bf16 %v2875_v19, %v2871_v1 }
 0x1cc   :  { %v674_v52 = vpop.f32.mrb[34].mxu0  ;;  %v931_v32 = vpop.f32.mrb[34].mxu1  ;;  %1966 = vmatmul.mubr.f32.gmra.mrb[94].mxu0 %v7537_v20  ;;  %v1351_v33 = vld [vmem:[#allocation6 + $0x258] sm:$0xff]  ;;  %v2870_v29 = vld [vmem:[#allocation8 + $0x100] sm:$0xff]  ;;  %v1354_v20 = vld [vmem:[#allocation6 + $0x270] sm:$0xff]  ;;  %5439 = vmatpush1.bf16.msra.mxu1 %v5438_v5 }
 0x1cd   :  { %v675_v40 = vadd.f32 %v674_v52, %v7272_v0  ;;  %v932_v54 = vadd.f32 %v931_v32, %v7275_v44  ;;  %v676_v9 = vpop.f32.mrb[35].mxu0  ;;  %v933_v50 = vpop.f32.mrb[35].mxu1  ;;  %v7544_v61 = vmax.f32 %v671_v60, %v1085_v58  ;;  %v7546_v14 = vmax.f32 %v928_v16, %v1087_v57  ;;  %v2874_v59 = vld [vmem:[#allocation8 + $0x120] sm:$0xff]  ;;  %5549 = vmatprep.subr.bf16.mxu0 %v5548_v2 }
 0x1ce   :  { %v677_v47 = vadd.f32 %v676_v9, %v7278_v45  ;;  %v934_v51 = vadd.f32 %v933_v50, %v7281_v46  ;;  %v7551_v52 = vmax.f32 %v669_v38, %v1084_v63  ;;  %v7553_v60 = vmax.f32 %v926_v26, %v1086_v42  ;;  %v680_v57 = vpop.f32.mrb[36].mxu0  ;;  %v937_v9 = vpop.f32.mrb[36].mxu1 }
 0x1cf   :  { %9341 = vst [vmem:[#allocation54_spill] sm:$0xff] %v7544_v61  ;;  %9342 = vst [vmem:[#allocation55_spill] sm:$0xff] %v7546_v14  ;;  %v1088_v32 = vmul.f32 0.01, %v675_v40  ;;  %v1090_v21 = vmul.f32 0.01, %v932_v54  ;;  %1714 = vmatprep.mubr.f32.mxu1 %v7544_v61  ;;  %1971 = vmatprep.mubr.f32.mxu0 %v7546_v14  ;;  %v681_v38 = vadd.f32 %v680_v57, %v7272_v0 }
 0x1d0   :  { %9343 = vst [vmem:[#allocation56_spill] sm:$0xff] %v7551_v52  ;;  %9344 = vst [vmem:[#allocation57_spill] sm:$0xff] %v7553_v60  ;;  %v1089_v16 = vmul.f32 0.01, %v677_v47  ;;  %v1091_v58 = vmul.f32 0.01, %v934_v51  ;;  %v938_v63 = vadd.f32 %v937_v9, %v7275_v44  ;;  %1715 = vmatmul.mubr.f32.gmra.mrb[96].mxu1 %v7551_v52  ;;  %v5440_v39 = vpack.c.bf16 %v1355_v22, %v1351_v33 }
 0x1d1   :  { %v682_v50 = vpop.f32.mrb[37].mxu0  ;;  %v939_v24 = vpop.f32.mrb[37].mxu1  ;;  %1972 = vmatmul.mubr.f32.gmra.mrb[96].mxu0 %v7553_v60  ;;  %v1350_v14 = vld [vmem:[#allocation6 + $0x250] sm:$0xff]  ;;  %v7567_v57 = vmax.f32 %v675_v40, %v1088_v32  ;;  %v1092_v9 = vmul.f32 0.01, %v681_v38  ;;  %v5550_v52 = vpack.c.bf16 %v2874_v59, %v2870_v29  ;;  %v2879_v22 = vld [vmem:[#allocation8 + $0x148] sm:$0xff] }
 0x1d2   :  { %v7560_v1 = vmax.f32 %v677_v47, %v1089_v16  ;;  %v7562_v42 = vmax.f32 %v934_v51, %v1091_v58  ;;  %v683_v26 = vadd.f32 %v682_v50, %v7278_v45  ;;  %v940_v19 = vadd.f32 %v939_v24, %v7281_v46  ;;  %v2883_v33 = vld [vmem:[#allocation8 + $0x168] sm:$0xff]  ;;  %v686_v58 = vpop.f32.mrb[38].mxu0  ;;  %v943_v50 = vpop.f32.mrb[38].mxu1  ;;  %v1363_v60 = vld [vmem:[#allocation6 + $0x2b8] sm:$0xff]  ;;  %5441 = vmatprep.subr.bf16.mxu1 %v5440_v39 }
 0x1d3   :  { %9347 = vst [vmem:[#allocation60_spill] sm:$0xff] %v7567_v57  ;;  %v1094_v61 = vmul.f32 0.01, %v938_v63  ;;  %v7569_v47 = vmax.f32 %v932_v54, %v1090_v21  ;;  %v687_v40 = vadd.f32 %v686_v58, %v7272_v0  ;;  %v944_v32 = vadd.f32 %v943_v50, %v7275_v44  ;;  %v688_v24 = vpop.f32.mrb[39].mxu0  ;;  %v945_v5 = vpop.f32.mrb[39].mxu1  ;;  %5551 = vmatpush1.bf16.msra.mxu0 %v5550_v52 }
 0x1d4   :  { %9345 = vst [vmem:[#allocation58_spill] sm:$0xff] %v7560_v1  ;;  %9346 = vst [vmem:[#allocation59_spill] sm:$0xff] %v7562_v42  ;;  %v1093_v51 = vmul.f32 0.01, %v683_v26  ;;  %v1095_v16 = vmul.f32 0.01, %v940_v19  ;;  %1720 = vmatprep.mubr.f32.mxu1 %v7560_v1  ;;  %1977 = vmatprep.mubr.f32.mxu0 %v7562_v42  ;;  %v5442_v2 = vpack.c.bf16 %v1354_v20, %v1350_v14 }
 0x1d5   :  { %9348 = vst [vmem:[#allocation61_spill] sm:$0xff] %v7569_v47  ;;  %1721 = vmatmul.mubr.f32.gmra.mrb[98].mxu1 %v7567_v57  ;;  %v689_v54 = vadd.f32 %v688_v24, %v7278_v45  ;;  %v946_v59 = vadd.f32 %v945_v5, %v7281_v46  ;;  %1978 = vmatmul.mubr.f32.gmra.mrb[98].mxu0 %v7569_v47  ;;  %v1359_v42 = vld [vmem:[#allocation6 + $0x298] sm:$0xff]  ;;  %v1096_v50 = vmul.f32 0.01, %v687_v40  ;;  %v1098_v1 = vmul.f32 0.01, %v944_v32 }
 0x1d6   :  { %v7576_v29 = vmax.f32 %v683_v26, %v1093_v51  ;;  %v7578_v21 = vmax.f32 %v940_v19, %v1095_v16  ;;  %v7583_v58 = vmax.f32 %v681_v38, %v1092_v9  ;;  %v5552_v57 = vpack.c.bf16 %v2883_v33, %v2879_v22  ;;  %v2878_v20 = vld [vmem:[#allocation8 + $0x140] sm:$0xff]  ;;  %v692_v16 = vpop.f32.mrb[40].mxu0  ;;  %v949_v24 = vpop.f32.mrb[40].mxu1  ;;  %v1362_v47 = vld [vmem:[#allocation6 + $0x2b0] sm:$0xff]  ;;  %5443 = vmatpush1.bf16.msra.mxu1 %v5442_v2 }
 0x1d7   :  { %v2882_v14 = vld [vmem:[#allocation8 + $0x160] sm:$0xff]  ;;  %v7585_v26 = vmax.f32 %v938_v63, %v1094_v61  ;;  %v1097_v19 = vmul.f32 0.01, %v689_v54  ;;  %v1099_v51 = vmul.f32 0.01, %v946_v59  ;;  %v693_v38 = vadd.f32 %v692_v16, %v7272_v0  ;;  %v694_v5 = vpop.f32.mrb[41].mxu0 }
 0x1d8   :  { %9349 = vst [vmem:[#allocation62_spill] sm:$0xff] %v7576_v29  ;;  %9350 = vst [vmem:[#allocation63_spill] sm:$0xff] %v7578_v21  ;;  %1726 = vmatprep.mubr.f32.mxu1 %v7576_v29  ;;  %1983 = vmatprep.mubr.f32.mxu0 %v7578_v21  ;;  %v950_v9 = vadd.f32 %v949_v24, %v7275_v44  ;;  %v951_v39 = vpop.f32.mrb[41].mxu1  ;;  %v5444_v52 = vpack.c.bf16 %v1363_v60, %v1359_v42  ;;  %v1358_v21 = vld [vmem:[#allocation6 + $0x290] sm:$0xff]  ;;  %v2887_v60 = vld [vmem:[#allocation8 + $0x188] sm:$0xff] }
 0x1d9   :  { %9351 = vst [vmem:[#allocation64_spill] sm:$0xff] %v7583_v58  ;;  %9352 = vst [vmem:[#allocation65_spill] sm:$0xff] %v7585_v26  ;;  %1727 = vmatmul.mubr.f32.gmra.mrb[100].mxu1 %v7583_v58  ;;  %v7592_v22 = vmax.f32 %v689_v54, %v1097_v19  ;;  %v7594_v61 = vmax.f32 %v946_v59, %v1099_v51  ;;  %v695_v63 = vadd.f32 %v694_v5, %v7278_v45  ;;  %v2891_v42 = vld [vmem:[#allocation8 + $0x1a8] sm:$0xff] }
 0x1da   :  { %v952_v33 = vadd.f32 %v951_v39, %v7281_v46  ;;  %1984 = vmatmul.mubr.f32.gmra.mrb[100].mxu0 %v7585_v26  ;;  %v7599_v16 = vmax.f32 %v687_v40, %v1096_v50  ;;  %v1100_v24 = vmul.f32 0.01, %v693_v38  ;;  %v1102_v29 = vmul.f32 0.01, %v950_v9  ;;  %5553 = vmatprep.subr.bf16.mxu0 %v5552_v57  ;;  %v698_v51 = vpop.f32.mrb[42].mxu0  ;;  %v955_v5 = vpop.f32.mrb[42].mxu1 }
 0x1db   :  { %9353 = vst [vmem:[#allocation66_spill] sm:$0xff] %v7592_v22  ;;  %9354 = vst [vmem:[#allocation67_spill] sm:$0xff] %v7594_v61  ;;  %v5554_v58 = vpack.c.bf16 %v2882_v14, %v2878_v20  ;;  %v7601_v54 = vmax.f32 %v944_v32, %v1098_v1  ;;  %v1101_v59 = vmul.f32 0.01, %v695_v63  ;;  %1732 = vmatprep.mubr.f32.mxu1 %v7592_v22  ;;  %1989 = vmatprep.mubr.f32.mxu0 %v7594_v61  ;;  %v700_v39 = vpop.f32.mrb[43].mxu0  ;;  %v957_v2 = vpop.f32.mrb[43].mxu1 }
 0x1dc   :  { %9355 = vst [vmem:[#allocation68_spill] sm:$0xff] %v7599_v16  ;;  %v1103_v19 = vmul.f32 0.01, %v952_v33  ;;  %v699_v40 = vadd.f32 %v698_v51, %v7272_v0  ;;  %v956_v50 = vadd.f32 %v955_v5, %v7275_v44  ;;  %v5446_v57 = vpack.c.bf16 %v1362_v47, %v1358_v21  ;;  %v1367_v61 = vld [vmem:[#allocation6 + $0x2d8] sm:$0xff]  ;;  %5445 = vmatprep.subr.bf16.mxu1 %v5444_v52  ;;  %v2886_v47 = vld [vmem:[#allocation8 + $0x180] sm:$0xff] }
 0x1dd   :  { %9356 = vst [vmem:[#allocation69_spill] sm:$0xff] %v7601_v54  ;;  %1733 = vmatmul.mubr.f32.gmra.mrb[102].mxu1 %v7599_v16  ;;  %v7608_v20 = vmax.f32 %v695_v63, %v1101_v59  ;;  %v701_v32 = vadd.f32 %v700_v39, %v7278_v45  ;;  %v958_v14 = vadd.f32 %v957_v2, %v7281_v46  ;;  %v1371_v26 = vld [vmem:[#allocation6 + $0x2f8] sm:$0xff]  ;;  %v2890_v21 = vld [vmem:[#allocation8 + $0x1a0] sm:$0xff] }
 0x1de   :  { %v7610_v1 = vmax.f32 %v952_v33, %v1103_v19  ;;  %1990 = vmatmul.mubr.f32.gmra.mrb[102].mxu0 %v7601_v54  ;;  %v7615_v51 = vmax.f32 %v693_v38, %v1100_v24  ;;  %v1104_v5 = vmul.f32 0.01, %v699_v40  ;;  %v1106_v22 = vmul.f32 0.01, %v956_v50  ;;  %v704_v19 = vpop.f32.mrb[44].mxu0  ;;  %v961_v39 = vpop.f32.mrb[44].mxu1  ;;  %5447 = vmatpush1.bf16.msra.mxu1 %v5446_v57 }
 0x1df   :  { %9357 = vst [vmem:[#allocation70_spill] sm:$0xff] %v7608_v20  ;;  %5555 = vmatpush1.bf16.msra.mxu0 %v5554_v58  ;;  %v5556_v16 = vpack.c.bf16 %v2891_v42, %v2887_v60  ;;  %v7617_v63 = vmax.f32 %v950_v9, %v1102_v29  ;;  %v1105_v33 = vmul.f32 0.01, %v701_v32  ;;  %v1107_v59 = vmul.f32 0.01, %v958_v14  ;;  %1738 = vmatprep.mubr.f32.mxu1 %v7608_v20  ;;  %v706_v2 = vpop.f32.mrb[45].mxu0 }
 0x1e0   :  { %9358 = vst [vmem:[#allocation71_spill] sm:$0xff] %v7610_v1  ;;  %9359 = vst [vmem:[#allocation72_spill] sm:$0xff] %v7615_v51  ;;  %1995 = vmatprep.mubr.f32.mxu0 %v7610_v1  ;;  %v705_v38 = vadd.f32 %v704_v19, %v7272_v0  ;;  %v962_v24 = vadd.f32 %v961_v39, %v7275_v44  ;;  %v963_v52 = vpop.f32.mrb[45].mxu1  ;;  %v5448_v58 = vpack.c.bf16 %v1371_v26, %v1367_v61  ;;  %v1366_v1 = vld [vmem:[#allocation6 + $0x2d0] sm:$0xff]  ;;  %v2895_v26 = vld [vmem:[#allocation8 + $0x1c8] sm:$0xff] }
 0x1e1   :  { %9360 = vst [vmem:[#allocation73_spill] sm:$0xff] %v7617_v63  ;;  %1739 = vmatmul.mubr.f32.gmra.mrb[104].mxu1 %v7615_v51  ;;  %v7624_v60 = vmax.f32 %v701_v32, %v1105_v33  ;;  %v7626_v29 = vmax.f32 %v958_v14, %v1107_v59  ;;  %v707_v9 = vadd.f32 %v706_v2, %v7278_v45  ;;  %v1370_v54 = vld [vmem:[#allocation6 + $0x2f0] sm:$0xff]  ;;  %v2899_v61 = vld [vmem:[#allocation8 + $0x1e8] sm:$0xff] }
 0x1e2   :  { %v964_v42 = vadd.f32 %v963_v52, %v7281_v46  ;;  %1996 = vmatmul.mubr.f32.gmra.mrb[104].mxu0 %v7617_v63  ;;  %v7631_v19 = vmax.f32 %v699_v40, %v1104_v5  ;;  %v1108_v39 = vmul.f32 0.01, %v705_v38  ;;  %v1110_v20 = vmul.f32 0.01, %v962_v24  ;;  %5557 = vmatprep.subr.bf16.mxu0 %v5556_v16  ;;  %v710_v59 = vpop.f32.mrb[46].mxu0  ;;  %v967_v2 = vpop.f32.mrb[46].mxu1 }
 0x1e3   :  { %9361 = vst [vmem:[#allocation74_spill] sm:$0xff] %v7624_v60  ;;  %9362 = vst [vmem:[#allocation75_spill] sm:$0xff] %v7626_v29  ;;  %v5558_v51 = vpack.c.bf16 %v2890_v21, %v2886_v47  ;;  %v7633_v32 = vmax.f32 %v956_v50, %v1106_v22  ;;  %v1109_v14 = vmul.f32 0.01, %v707_v9  ;;  %1744 = vmatprep.mubr.f32.mxu1 %v7624_v60  ;;  %2001 = vmatprep.mubr.f32.mxu0 %v7626_v29  ;;  %v712_v52 = vpop.f32.mrb[47].mxu0  ;;  %v969_v57 = vpop.f32.mrb[47].mxu1 }
 0x1e4   :  { %9363 = vst [vmem:[#allocation76_spill] sm:$0xff] %v7631_v19  ;;  %v1111_v33 = vmul.f32 0.01, %v964_v42  ;;  %v711_v40 = vadd.f32 %v710_v59, %v7272_v0  ;;  %v968_v5 = vadd.f32 %v967_v2, %v7275_v44  ;;  %v5450_v16 = vpack.c.bf16 %v1370_v54, %v1366_v1  ;;  %v1375_v29 = vld [vmem:[#allocation6 + $0x318] sm:$0xff]  ;;  %5449 = vmatprep.subr.bf16.mxu1 %v5448_v58  ;;  %v2894_v54 = vld [vmem:[#allocation8 + $0x1c0] sm:$0xff] }
 0x1e5   :  { %9364 = vst [vmem:[#allocation77_spill] sm:$0xff] %v7633_v32  ;;  %1745 = vmatmul.mubr.f32.gmra.mrb[106].mxu1 %v7631_v19  ;;  %v7640_v47 = vmax.f32 %v707_v9, %v1109_v14  ;;  %v713_v50 = vadd.f32 %v712_v52, %v7278_v45  ;;  %v970_v21 = vadd.f32 %v969_v57, %v7281_v46  ;;  %v1379_v63 = vld [vmem:[#allocation6 + $0x338] sm:$0xff]  ;;  %v2898_v1 = vld [vmem:[#allocation8 + $0x1e0] sm:$0xff] }
 0x1e6   :  { %v7642_v22 = vmax.f32 %v964_v42, %v1111_v33  ;;  %2002 = vmatmul.mubr.f32.gmra.mrb[106].mxu0 %v7633_v32  ;;  %v7647_v59 = vmax.f32 %v705_v38, %v1108_v39  ;;  %v1112_v2 = vmul.f32 0.01, %v711_v40  ;;  %v1114_v60 = vmul.f32 0.01, %v968_v5  ;;  %v716_v33 = vpop.f32.mrb[48].mxu0  ;;  %v973_v52 = vpop.f32.mrb[48].mxu1  ;;  %5451 = vmatpush1.bf16.msra.mxu1 %v5450_v16 }
 0x1e7   :  { %9365 = vst [vmem:[#allocation78_spill] sm:$0xff] %v7640_v47  ;;  %5559 = vmatpush1.bf16.msra.mxu0 %v5558_v51  ;;  %v5560_v19 = vpack.c.bf16 %v2899_v61, %v2895_v26  ;;  %v7649_v9 = vmax.f32 %v962_v24, %v1110_v20  ;;  %v1113_v42 = vmul.f32 0.01, %v713_v50  ;;  %v1115_v14 = vmul.f32 0.01, %v970_v21  ;;  %1750 = vmatprep.mubr.f32.mxu1 %v7640_v47  ;;  %v718_v57 = vpop.f32.mrb[49].mxu0 }
 0x1e8   :  { %9366 = vst [vmem:[#allocation79_spill] sm:$0xff] %v7642_v22  ;;  %9367 = vst [vmem:[#allocation80_spill] sm:$0xff] %v7647_v59  ;;  %2007 = vmatprep.mubr.f32.mxu0 %v7642_v22  ;;  %v717_v38 = vadd.f32 %v716_v33, %v7272_v0  ;;  %v974_v39 = vadd.f32 %v973_v52, %v7275_v44  ;;  %v975_v58 = vpop.f32.mrb[49].mxu1  ;;  %v5452_v51 = vpack.c.bf16 %v1379_v63, %v1375_v29  ;;  %v1374_v22 = vld [vmem:[#allocation6 + $0x310] sm:$0xff]  ;;  %v2903_v63 = vld [vmem:[#allocation8 + $0x208] sm:$0xff] }
 0x1e9   :  { %9368 = vst [vmem:[#allocation81_spill] sm:$0xff] %v7649_v9  ;;  %1751 = vmatmul.mubr.f32.gmra.mrb[108].mxu1 %v7647_v59  ;;  %v7656_v26 = vmax.f32 %v713_v50, %v1113_v42  ;;  %v7658_v20 = vmax.f32 %v970_v21, %v1115_v14  ;;  %v719_v24 = vadd.f32 %v718_v57, %v7278_v45  ;;  %v1378_v32 = vld [vmem:[#allocation6 + $0x330] sm:$0xff]  ;;  %v2907_v29 = vld [vmem:[#allocation8 + $0x228] sm:$0xff] }
 0x1ea   :  { %v976_v61 = vadd.f32 %v975_v58, %v7281_v46  ;;  %2008 = vmatmul.mubr.f32.gmra.mrb[108].mxu0 %v7649_v9  ;;  %v7663_v33 = vmax.f32 %v711_v40, %v1112_v2  ;;  %v1116_v52 = vmul.f32 0.01, %v717_v38  ;;  %v1118_v47 = vmul.f32 0.01, %v974_v39  ;;  %5561 = vmatprep.subr.bf16.mxu0 %v5560_v19  ;;  %v722_v14 = vpop.f32.mrb[50].mxu0  ;;  %v979_v57 = vpop.f32.mrb[50].mxu1 }
 0x1eb   :  { %9369 = vst [vmem:[#allocation82_spill] sm:$0xff] %v7656_v26  ;;  %9370 = vst [vmem:[#allocation83_spill] sm:$0xff] %v7658_v20  ;;  %v5562_v59 = vpack.c.bf16 %v2898_v1, %v2894_v54  ;;  %v7665_v50 = vmax.f32 %v968_v5, %v1114_v60  ;;  %v1117_v21 = vmul.f32 0.01, %v719_v24  ;;  %1756 = vmatprep.mubr.f32.mxu1 %v7656_v26  ;;  %2013 = vmatprep.mubr.f32.mxu0 %v7658_v20  ;;  %v724_v58 = vpop.f32.mrb[51].mxu0  ;;  %v981_v16 = vpop.f32.mrb[51].mxu1 }
 0x1ec   :  { %9371 = vst [vmem:[#allocation84_spill] sm:$0xff] %v7663_v33  ;;  %v1119_v42 = vmul.f32 0.01, %v976_v61  ;;  %v723_v40 = vadd.f32 %v722_v14, %v7272_v0  ;;  %v980_v2 = vadd.f32 %v979_v57, %v7275_v44  ;;  %v5454_v19 = vpack.c.bf16 %v1378_v32, %v1374_v22  ;;  %v1383_v20 = vld [vmem:[#allocation6 + $0x358] sm:$0xff]  ;;  %5453 = vmatprep.subr.bf16.mxu1 %v5452_v51  ;;  %v2902_v32 = vld [vmem:[#allocation8 + $0x200] sm:$0xff] }
 0x1ed   :  { %9372 = vst [vmem:[#allocation85_spill] sm:$0xff] %v7665_v50  ;;  %1757 = vmatmul.mubr.f32.gmra.mrb[110].mxu1 %v7663_v33  ;;  %v7672_v54 = vmax.f32 %v719_v24, %v1117_v21  ;;  %v725_v5 = vadd.f32 %v724_v58, %v7278_v45  ;;  %v982_v1 = vadd.f32 %v981_v16, %v7281_v46  ;;  %v1387_v9 = vld [vmem:[#allocation6 + $0x378] sm:$0xff]  ;;  %v2906_v22 = vld [vmem:[#allocation8 + $0x220] sm:$0xff] }
 0x1ee   :  { %v7674_v60 = vmax.f32 %v976_v61, %v1119_v42  ;;  %2014 = vmatmul.mubr.f32.gmra.mrb[110].mxu0 %v7665_v50  ;;  %v7679_v14 = vmax.f32 %v717_v38, %v1116_v52  ;;  %v1120_v57 = vmul.f32 0.01, %v723_v40  ;;  %v1122_v26 = vmul.f32 0.01, %v980_v2  ;;  %v728_v42 = vpop.f32.mrb[52].mxu0  ;;  %v985_v58 = vpop.f32.mrb[52].mxu1  ;;  %5455 = vmatpush1.bf16.msra.mxu1 %v5454_v19 }
 0x1ef   :  { %9373 = vst [vmem:[#allocation86_spill] sm:$0xff] %v7672_v54  ;;  %5563 = vmatpush1.bf16.msra.mxu0 %v5562_v59  ;;  %v5564_v33 = vpack.c.bf16 %v2907_v29, %v2903_v63  ;;  %v7681_v24 = vmax.f32 %v974_v39, %v1118_v47  ;;  %v1121_v61 = vmul.f32 0.01, %v725_v5  ;;  %v1123_v21 = vmul.f32 0.01, %v982_v1  ;;  %1762 = vmatprep.mubr.f32.mxu1 %v7672_v54  ;;  %v730_v16 = vpop.f32.mrb[53].mxu0 }
 0x1f0   :  { %9374 = vst [vmem:[#allocation87_spill] sm:$0xff] %v7674_v60  ;;  %9375 = vst [vmem:[#allocation88_spill] sm:$0xff] %v7679_v14  ;;  %2019 = vmatprep.mubr.f32.mxu0 %v7674_v60  ;;  %v729_v38 = vadd.f32 %v728_v42, %v7272_v0  ;;  %v986_v52 = vadd.f32 %v985_v58, %v7275_v44  ;;  %v987_v51 = vpop.f32.mrb[53].mxu1  ;;  %v5456_v59 = vpack.c.bf16 %v1387_v9, %v1383_v20  ;;  %v1382_v60 = vld [vmem:[#allocation6 + $0x350] sm:$0xff]  ;;  %v2911_v9 = vld [vmem:[#allocation8 + $0x248] sm:$0xff] }
 0x1f1   :  { %9376 = vst [vmem:[#allocation89_spill] sm:$0xff] %v7681_v24  ;;  %1763 = vmatmul.mubr.f32.gmra.mrb[112].mxu1 %v7679_v14  ;;  %v7688_v63 = vmax.f32 %v725_v5, %v1121_v61  ;;  %v7690_v47 = vmax.f32 %v982_v1, %v1123_v21  ;;  %v731_v39 = vadd.f32 %v730_v16, %v7278_v45  ;;  %v1386_v50 = vld [vmem:[#allocation6 + $0x370] sm:$0xff]  ;;  %v2915_v20 = vld [vmem:[#allocation8 + $0x268] sm:$0xff] }
 0x1f2   :  { %v988_v29 = vadd.f32 %v987_v51, %v7281_v46  ;;  %2020 = vmatmul.mubr.f32.gmra.mrb[112].mxu0 %v7681_v24  ;;  %v7695_v42 = vmax.f32 %v723_v40, %v1120_v57  ;;  %v1124_v58 = vmul.f32 0.01, %v729_v38  ;;  %v1126_v54 = vmul.f32 0.01, %v986_v52  ;;  %5565 = vmatprep.subr.bf16.mxu0 %v5564_v33  ;;  %v734_v21 = vpop.f32.mrb[54].mxu0  ;;  %v991_v16 = vpop.f32.mrb[54].mxu1 }
 0x1f3   :  { %9377 = vst [vmem:[#allocation90_spill] sm:$0xff] %v7688_v63  ;;  %9378 = vst [vmem:[#allocation91_spill] sm:$0xff] %v7690_v47  ;;  %v5566_v14 = vpack.c.bf16 %v2906_v22, %v2902_v32  ;;  %v7697_v5 = vmax.f32 %v980_v2, %v1122_v26  ;;  %v1125_v1 = vmul.f32 0.01, %v731_v39  ;;  %1768 = vmatprep.mubr.f32.mxu1 %v7688_v63  ;;  %2025 = vmatprep.mubr.f32.mxu0 %v7690_v47  ;;  %v736_v51 = vpop.f32.mrb[55].mxu0  ;;  %v993_v19 = vpop.f32.mrb[55].mxu1 }
 0x1f4   :  { %9379 = vst [vmem:[#allocation92_spill] sm:$0xff] %v7695_v42  ;;  %v1127_v61 = vmul.f32 0.01, %v988_v29  ;;  %v735_v40 = vadd.f32 %v734_v21, %v7272_v0  ;;  %v992_v57 = vadd.f32 %v991_v16, %v7275_v44  ;;  %v5458_v33 = vpack.c.bf16 %v1386_v50, %v1382_v60  ;;  %v1391_v47 = vld [vmem:[#allocation6 + $0x398] sm:$0xff]  ;;  %5457 = vmatprep.subr.bf16.mxu1 %v5456_v59  ;;  %v2910_v50 = vld [vmem:[#allocation8 + $0x240] sm:$0xff] }
 0x1f5   :  { %9380 = vst [vmem:[#allocation93_spill] sm:$0xff] %v7697_v5  ;;  %1769 = vmatmul.mubr.f32.gmra.mrb[114].mxu1 %v7695_v42  ;;  %v7704_v32 = vmax.f32 %v731_v39, %v1125_v1  ;;  %v737_v2 = vadd.f32 %v736_v51, %v7278_v45  ;;  %v994_v22 = vadd.f32 %v993_v19, %v7281_v46  ;;  %v1395_v24 = vld [vmem:[#allocation6 + $0x3b8] sm:$0xff]  ;;  %v2914_v60 = vld [vmem:[#allocation8 + $0x260] sm:$0xff] }
 0x1f6   :  { %v7706_v26 = vmax.f32 %v988_v29, %v1127_v61  ;;  %2026 = vmatmul.mubr.f32.gmra.mrb[114].mxu0 %v7697_v5  ;;  %v7711_v21 = vmax.f32 %v729_v38, %v1124_v58  ;;  %v1128_v16 = vmul.f32 0.01, %v735_v40  ;;  %v1130_v63 = vmul.f32 0.01, %v992_v57  ;;  %v740_v61 = vpop.f32.mrb[56].mxu0  ;;  %v997_v51 = vpop.f32.mrb[56].mxu1  ;;  %5459 = vmatpush1.bf16.msra.mxu1 %v5458_v33 }
 0x1f7   :  { %9381 = vst [vmem:[#allocation94_spill] sm:$0xff] %v7704_v32  ;;  %5567 = vmatpush1.bf16.msra.mxu0 %v5566_v14  ;;  %v5568_v42 = vpack.c.bf16 %v2915_v20, %v2911_v9  ;;  %v7713_v39 = vmax.f32 %v986_v52, %v1126_v54  ;;  %v1129_v29 = vmul.f32 0.01, %v737_v2  ;;  %v1131_v1 = vmul.f32 0.01, %v994_v22  ;;  %1774 = vmatprep.mubr.f32.mxu1 %v7704_v32  ;;  %v742_v19 = vpop.f32.mrb[57].mxu0 }
 0x1f8   :  { %9382 = vst [vmem:[#allocation95_spill] sm:$0xff] %v7706_v26  ;;  %9383 = vst [vmem:[#allocation96_spill] sm:$0xff] %v7711_v21  ;;  %2031 = vmatprep.mubr.f32.mxu0 %v7706_v26  ;;  %v741_v38 = vadd.f32 %v740_v61, %v7272_v0  ;;  %v998_v58 = vadd.f32 %v997_v51, %v7275_v44  ;;  %v999_v59 = vpop.f32.mrb[57].mxu1  ;;  %v5460_v14 = vpack.c.bf16 %v1395_v24, %v1391_v47  ;;  %v7727_v26 = vld [vmem:[#allocation6 + $0x390] sm:$0xff]  ;;  %v2919_v47 = vld [vmem:[#allocation8 + $0x288] sm:$0xff] }
 0x1f9   :  { %9384 = vst [vmem:[#allocation97_spill] sm:$0xff] %v7713_v39  ;;  %1775 = vmatmul.mubr.f32.gmra.mrb[116].mxu1 %v7711_v21  ;;  %v7720_v9 = vmax.f32 %v737_v2, %v1129_v29  ;;  %v7722_v54 = vmax.f32 %v994_v22, %v1131_v1  ;;  %v743_v52 = vadd.f32 %v742_v19, %v7278_v45  ;;  %v7729_v61 = vld [vmem:[#allocation6 + $0x3b0] sm:$0xff]  ;;  %v2923_v2 = vld [vmem:[#allocation8 + $0x2a8] sm:$0xff] }
 0x1fa   :  { %v1000_v20 = vadd.f32 %v999_v59, %v7281_v46  ;;  %2032 = vmatmul.mubr.f32.gmra.mrb[116].mxu0 %v7713_v39  ;;  %v7731_v51 = vmax.f32 %v735_v40, %v1128_v16  ;;  %v1132_v5 = vmul.f32 0.01, %v741_v38  ;;  %v1134_v32 = vmul.f32 0.01, %v998_v58  ;;  %5569 = vmatprep.subr.bf16.mxu0 %v5568_v42  ;;  %v746_v19 = vpop.f32.mrb[58].mxu0  ;;  %v1003_v59 = vpop.f32.mrb[58].mxu1 }
 0x1fb   :  { %9385 = vst [vmem:[#allocation98_spill] sm:$0xff] %v7720_v9  ;;  %9386 = vst [vmem:[#allocation99_spill] sm:$0xff] %v7722_v54  ;;  %v5570_v24 = vpack.c.bf16 %v2914_v60, %v2910_v50  ;;  %v7733_v22 = vmax.f32 %v992_v57, %v1130_v63  ;;  %v1133_v29 = vmul.f32 0.01, %v743_v52  ;;  %1780 = vmatprep.mubr.f32.mxu1 %v7720_v9  ;;  %2037 = vmatprep.mubr.f32.mxu0 %v7722_v54  ;;  %v748_v39 = vpop.f32.mrb[59].mxu0  ;;  %v1005_v33 = vpop.f32.mrb[59].mxu1 }
 0x1fc   :  { %9387 = vst [vmem:[#allocation100_spill] sm:$0xff] %v7731_v51  ;;  %v1135_v1 = vmul.f32 0.01, %v1000_v20  ;;  %v747_v40 = vadd.f32 %v746_v19, %v7272_v0  ;;  %v1004_v16 = vadd.f32 %v1003_v59, %v7275_v44  ;;  %v5462_v63 = vpack.c.bf16 %v7729_v61, %v7727_v26  ;;  %v7749_v19 = vld [vmem:[#allocation6 + $0x3d8] sm:$0xff]  ;;  %5461 = vmatprep.subr.bf16.mxu1 %v5460_v14  ;;  %v2927_v21 = vld [vmem:[#allocation8 + $0x2c8] sm:$0xff] }
 0x1fd   :  { %9388 = vst [vmem:[#allocation101_spill] sm:$0xff] %v7733_v22  ;;  %1781 = vmatmul.mubr.f32.gmra.mrb[118].mxu1 %v7731_v51  ;;  %v7742_v42 = vmax.f32 %v743_v52, %v1133_v29  ;;  %v749_v50 = vadd.f32 %v748_v39, %v7278_v45  ;;  %v1006_v60 = vadd.f32 %v1005_v33, %v7281_v46  ;;  %v7751_v59 = vld [vmem:[#allocation6 + $0x3f8] sm:$0xff]  ;;  %v2918_v52 = vld [vmem:[#allocation8 + $0x280] sm:$0xff] }
 0x1fe   :  { %v7744_v57 = vmax.f32 %v1000_v20, %v1135_v1  ;;  %2038 = vmatmul.mubr.f32.gmra.mrb[118].mxu0 %v7733_v22  ;;  %v7753_v54 = vmax.f32 %v741_v38, %v1132_v5  ;;  %v1136_v51 = vmul.f32 0.01, %v747_v40  ;;  %v1138_v9 = vmul.f32 0.01, %v1004_v16  ;;  %v2922_v20 = vld [vmem:[#allocation8 + $0x2a0] sm:$0xff]  ;;  %v752_v1 = vpop.f32.mrb[60].mxu0  ;;  %5463 = vmatpush1.bf16.msra.mxu1 %v5462_v63 }
 0x1ff   :  { %9389 = vst [vmem:[#allocation102_spill] sm:$0xff] %v7742_v42  ;;  %5571 = vmatpush1.bf16.msra.mxu0 %v5570_v24  ;;  %v5572_v26 = vpack.c.bf16 %v2923_v2, %v2919_v47  ;;  %v7755_v61 = vmax.f32 %v998_v58, %v1134_v32  ;;  %v1137_v39 = vmul.f32 0.01, %v749_v50  ;;  %v1139_v29 = vmul.f32 0.01, %v1006_v60  ;;  %v1009_v33 = vpop.f32.mrb[60].mxu1  ;;  %1786 = vmatprep.mubr.f32.mxu1 %v7742_v42 }
 0x200   :  { %9390 = vst [vmem:[#allocation103_spill] sm:$0xff] %v7744_v57  ;;  %9391 = vst [vmem:[#allocation104_spill] sm:$0xff] %v7753_v54  ;;  %2043 = vmatprep.mubr.f32.mxu0 %v7744_v57  ;;  %v753_v5 = vadd.f32 %v752_v1, %v7272_v0  ;;  %v1010_v38 = vadd.f32 %v1009_v33, %v7275_v44  ;;  %v754_v22 = vpop.f32.mrb[61].mxu0  ;;  %v1011_v14 = vpop.f32.mrb[61].mxu1  ;;  %v5464_v32 = vpack.c.bf16 %v7751_v59, %v7749_v19  ;;  %v1398_v58 = vld [vmem:[#allocation6 + $0x3d0] sm:$0xff]  ;;  %v1407_v1 = vld [vmem:[#allocation6 + $0x418] sm:$0xff] }
 0x201   :  { %9392 = vst [vmem:[#allocation105_spill] sm:$0xff] %v7755_v61  ;;  %1787 = vmatmul.mubr.f32.gmra.mrb[120].mxu1 %v7753_v54  ;;  %v1402_v24 = vld [vmem:[#allocation6 + $0x3f0] sm:$0xff]  ;;  %v7764_v47 = vmax.f32 %v749_v50, %v1137_v39  ;;  %v7766_v2 = vmax.f32 %v1006_v60, %v1139_v29  ;;  %v755_v42 = vadd.f32 %v754_v22, %v7278_v45  ;;  %v1411_v33 = vld [vmem:[#allocation6 + $0x438] sm:$0xff]  ;;  %v2926_v59 = vld [vmem:[#allocation8 + $0x2c0] sm:$0xff] }
 0x202   :  { %v1012_v57 = vadd.f32 %v1011_v14, %v7281_v46  ;;  %2044 = vmatmul.mubr.f32.gmra.mrb[120].mxu0 %v7755_v61  ;;  %v7771_v54 = vmax.f32 %v747_v40, %v1136_v51  ;;  %v1140_v35 = vmul.f32 0.01, %v753_v5  ;;  %v1142_v19 = vmul.f32 0.01, %v1010_v38  ;;  %5573 = vmatprep.subr.bf16.mxu0 %v5572_v26  ;;  %v2930_v60 = vld [vmem:[#allocation8 + $0x2e0] sm:$0xff]  ;;  %v758_v14 = vpop.f32.mrb[62].mxu0 }
 0x203   :  { %9393 = vst [vmem:[#allocation106_spill] sm:$0xff] %v7764_v47  ;;  %9394 = vst [vmem:[#allocation107_spill] sm:$0xff] %v7766_v2  ;;  %v5574_v50 = vpack.c.bf16 %v2922_v20, %v2918_v52  ;;  %v7773_v39 = vmax.f32 %v1004_v16, %v1138_v9  ;;  %v1141_v22 = vmul.f32 0.01, %v755_v42  ;;  %v1015_v25 = vpop.f32.mrb[62].mxu1  ;;  %1792 = vmatprep.mubr.f32.mxu1 %v7764_v47  ;;  %2049 = vmatprep.mubr.f32.mxu0 %v7766_v2  ;;  %v760_v61 = vpop.f32.mrb[63].mxu0 }
 0x204   :  { %v1143_v29 = vmul.f32 0.01, %v1012_v57  ;;  %v759_v51 = vadd.f32 %v758_v14, %v7272_v0  ;;  %v1016_v40 = vadd.f32 %v1015_v25, %v7275_v44  ;;  %v1017_v63 = vpop.f32.mrb[63].mxu1  ;;  %v5466_v26 = vpack.c.bf16 %v1402_v24, %v1398_v58  ;;  %v2935_v2 = vld [vmem:[#allocation8 + $0x308] sm:$0xff]  ;;  %5465 = vmatprep.subr.bf16.mxu1 %v5464_v32 }
 0x205   :  { %1793 = vmatmul.mubr.f32.gmra.mrb[122].mxu1 %v7771_v54  ;;  %v5576_v52 = vpack.c.bf16 %v2931_v17, %v2927_v21  ;;  %v7780_v9 = vmax.f32 %v755_v42, %v1141_v22  ;;  %v761_v20 = vadd.f32 %v760_v61, %v7278_v45  ;;  %v1018_v47 = vadd.f32 %v1017_v63, %v7281_v46  ;;  %v2939_v0 = vld [vmem:[#allocation8 + $0x328] sm:$0xff]  ;;  %v2934_v17 = vld [vmem:[#allocation8 + $0x300] sm:$0xff] }
 0x206   :  { %v7782_v16 = vmax.f32 %v1012_v57, %v1143_v29  ;;  %2050 = vmatmul.mubr.f32.gmra.mrb[122].mxu0 %v7773_v39  ;;  %v7787_v14 = vmax.f32 %v753_v5, %v1140_v35  ;;  %v1144_v44 = vmul.f32 0.01, %v759_v51  ;;  %v5468_v25 = vpack.c.bf16 %v1411_v33, %v1407_v1  ;;  %v2938_v21 = vld [vmem:[#allocation8 + $0x320] sm:$0xff]  ;;  %v2943_v35 = vld [vmem:[#allocation8 + $0x348] sm:$0xff]  ;;  %5467 = vmatpush1.bf16.msra.mxu1 %v5466_v26  ;;  %v1406_v1 = vld [vmem:[#allocation6 + $0x410] sm:$0xff] }
 0x207   :  { %5575 = vmatpush1.bf16.msra.mxu0 %v5574_v50  ;;  %v5578_v58 = vpack.c.bf16 %v2930_v60, %v2926_v59  ;;  %v7789_v42 = vmax.f32 %v1010_v38, %v1142_v19  ;;  %v1146_v57 = vmul.f32 0.01, %v1016_v40  ;;  %v1145_v24 = vmul.f32 0.01, %v761_v20  ;;  %1798 = vmatprep.mubr.f32.mxu1 %v7780_v9  ;;  %v2947_v61 = vld [vmem:[#allocation8 + $0x368] sm:$0xff]  ;;  %v1410_v33 = vld [vmem:[#allocation6 + $0x430] sm:$0xff] }
 0x208   :  { %v1147_v45 = vmul.f32 0.01, %v1018_v47  ;;  %2055 = vmatprep.mubr.f32.mxu0 %v7782_v16  ;;  %5577 = vmatprep.subr.bf16.mxu0 %v5576_v52  ;;  %v5580_v46 = vpack.c.bf16 %v2939_v0, %v2935_v2  ;;  %v7799_v38 = vmax.f32 %v759_v51, %v1144_v44  ;;  %v1415_v19 = vld [vmem:[#allocation6 + $0x458] sm:$0xff]  ;;  %v5582_v50 = vpack.c.bf16 %v2938_v21, %v2934_v17  ;;  %v2942_v60 = vld [vmem:[#allocation8 + $0x340] sm:$0xff]  ;;  %v2951_v29 = vld [vmem:[#allocation8 + $0x388] sm:$0xff] }
 0x209   :  { %1799 = vmatmul.mubr.f32.gmra.mrb[124].mxu1 %v7787_v14  ;;  %v7794_v5 = vmax.f32 %v761_v20, %v1145_v24  ;;  %5469 = vmatprep.subr.bf16.mxu1 %v5468_v25  ;;  %v7801_v59 = vmax.f32 %v1016_v40, %v1146_v57  ;;  %v1419_v2 = vld [vmem:[#allocation6 + $0x478] sm:$0xff]  ;;  %v2946_v22 = vld [vmem:[#allocation8 + $0x360] sm:$0xff]  ;;  %v2955_v51 = vld [vmem:[#allocation8 + $0x3a8] sm:$0xff]  ;;  %v5470_v63 = vpack.c.bf16 %v1410_v33, %v1406_v1 }
 0x20a   :  { %v7796_v32 = vmax.f32 %v1018_v47, %v1147_v45  ;;  %2056 = vmatmul.mubr.f32.gmra.mrb[124].mxu0 %v7789_v42  ;;  %v5584_v47 = vpack.c.bf16 %v2947_v61, %v2943_v35  ;;  %v5472_v40 = vpack.c.bf16 %v1419_v2, %v1415_v19  ;;  %v1414_v26 = vld [vmem:[#allocation6 + $0x450] sm:$0xff]  ;;  %v1423_v20 = vld [vmem:[#allocation6 + $0x498] sm:$0xff]  ;;  %v5586_v0 = vpack.c.bf16 %v2946_v22, %v2942_v60  ;;  %v2954_v17 = vld [vmem:[#allocation8 + $0x3a0] sm:$0xff] }
 0x20b   :  { %5579 = vmatpush1.bf16.msra.mxu0 %v5578_v58  ;;  %1804 = vmatprep.mubr.f32.mxu1 %v7794_v5  ;;  %v1418_v52 = vld [vmem:[#allocation6 + $0x470] sm:$0xff]  ;;  %v1427_v44 = vld [vmem:[#allocation6 + $0x4b8] sm:$0xff]  ;;  %v5588_v25 = vpack.c.bf16 %v2955_v51, %v2951_v29  ;;  %v2950_v58 = vld [vmem:[#allocation8 + $0x380] sm:$0xff] }
 0x20c   :  { %2061 = vmatprep.mubr.f32.mxu0 %v7796_v32  ;;  %5581 = vmatprep.subr.bf16.mxu0 %v5580_v46  ;;  %v2959_v21 = vld [vmem:[#allocation8 + $0x3c8] sm:$0xff]  ;;  %v5476_v24 = vpack.c.bf16 %v1427_v44, %v1423_v20  ;;  %v1422_v45 = vld [vmem:[#allocation6 + $0x490] sm:$0xff]  ;;  %v1431_v35 = vld [vmem:[#allocation6 + $0x4d8] sm:$0xff]  ;;  %v5590_v61 = vpack.c.bf16 %v2954_v17, %v2950_v58 }
 0x20d   :  { %1805 = vmatmul.mubr.f32.gmra.mrb[126].mxu1 %v7799_v38  ;;  %v2963_v57 = vld [vmem:[#allocation8 + $0x3e8] sm:$0xff]  ;;  %v1426_v46 = vld [vmem:[#allocation6 + $0x4b0] sm:$0xff]  ;;  %v1435_v1 = vld [vmem:[#allocation6 + $0x4f8] sm:$0xff] }
 0x20e   :  { %2062 = vmatmul.mubr.f32.gmra.mrb[126].mxu0 %v7801_v59  ;;  %2132 = vmatprep.mubr.f32.mxu1 %v7289_v4  ;;  %v5474_v4 = vpack.c.bf16 %v1418_v52, %v1414_v26  ;;  %v5592_v33 = vpack.c.bf16 %v2963_v57, %v2959_v21  ;;  %v2958_v19 = vld [vmem:[#allocation8 + $0x3c0] sm:$0xff]  ;;  %v1430_v2 = vld [vmem:[#allocation6 + $0x4d0] sm:$0xff]  ;;  %v1439_v22 = vld [vmem:[#allocation6 + $0x518] sm:$0xff] }
 0x20f   :  { %5583 = vmatpush1.bf16.msra.mxu0 %v5582_v50  ;;  %v2962_v50 = vld [vmem:[#allocation8 + $0x3e0] sm:$0xff]  ;;  %v1443_v29 = vld [vmem:[#allocation6 + $0x538] sm:$0xff]  ;;  %v1454_v17 = vld [vmem:[#allocation6 + $0x590] sm:$0xff] }
 0x210   :  { %5585 = vmatprep.subr.bf16.mxu0 %v5584_v47  ;;  %v1434_v47 = vld [vmem:[#allocation6 + $0x4f0] sm:$0xff]  ;;  %v5594_v60 = vpack.c.bf16 %v2962_v50, %v2958_v19  ;;  %v1451_v26 = vld [vmem:[#allocation6 + $0x578] sm:$0xff] }
 0x211   :  { %2133 = vmatmul.mubr.f32.vlgmr.msra.gmra.mrb[128].mxu1 %v7295_v8  ;;  %v5478_v8 = vpack.c.bf16 %v1426_v46, %v1422_v45  ;;  %v5482_v51 = vpack.c.bf16 %v1434_v47, %v1430_v2  ;;  %v1459_v44 = vld [vmem:[#allocation6 + $0x5b8] sm:$0xff]  ;;  %v1478_v50 = vld [vmem:[#allocation6 + $0x650] sm:$0xff] }
 0x212   :  { %5471 = vmatpush1.bf16.msra.mxu1 %v5470_v63  ;;  %2138 = vmatprep.mubr.f32.mxu1 %v7304_v23  ;;  %v5480_v23 = vpack.c.bf16 %v1435_v1, %v1431_v35  ;;  %v1442_v63 = vld [vmem:[#allocation6 + $0x530] sm:$0xff]  ;;  %v1463_v21 = vld [vmem:[#allocation6 + $0x5d8] sm:$0xff] }
 0x213   :  { %5473 = vmatprep.subr.bf16.mxu1 %v5472_v40  ;;  %5587 = vmatpush1.bf16.msra.mxu0 %v5586_v0  ;;  %v1447_v40 = vld [vmem:[#allocation6 + $0x558] sm:$0xff]  ;;  %v1450_v0 = vld [vmem:[#allocation6 + $0x570] sm:$0xff] }
 0x214   :  { %5589 = vmatprep.subr.bf16.mxu0 %v5588_v25  ;;  %v5488_v20 = vpack.c.bf16 %v1451_v26, %v1447_v40  ;;  %v1471_v45 = vld [vmem:[#allocation6 + $0x618] sm:$0xff]  ;;  %v1486_v47 = vld [vmem:[#allocation6 + $0x690] sm:$0xff] }
 0x215   :  { %2139 = vmatmul.mubr.f32.gmra.mrb[130].mxu1 %v7311_v27  ;;  %v5484_v27 = vpack.c.bf16 %v1443_v29, %v1439_v22  ;;  %v1479_v1 = vld [vmem:[#allocation6 + $0x658] sm:$0xff]  ;;  %v1502_v40 = vld [vmem:[#allocation6 + $0x710] sm:$0xff] }
 0x216   :  { %2144 = vmatprep.mubr.f32.mxu1 %v7320_v49  ;;  %5475 = vmatpush1.bf16.msra.mxu1 %v5474_v4  ;;  %v1438_v49 = vld [vmem:[#allocation6 + $0x510] sm:$0xff]  ;;  %v1511_v26 = vld [vmem:[#allocation6 + $0x758] sm:$0xff] }
 0x217   :  { %5477 = vmatprep.subr.bf16.mxu1 %v5476_v24  ;;  %5591 = vmatpush1.bf16.msra.mxu0 %v5590_v61  ;;  %v5486_v52 = vpack.c.bf16 %v1442_v63, %v1438_v49  ;;  %v1462_v24 = vld [vmem:[#allocation6 + $0x5d0] sm:$0xff] }
 0x218   :  { %5593 = vmatprep.subr.bf16.mxu0 %v5592_v33  ;;  %v1470_v61 = vld [vmem:[#allocation6 + $0x610] sm:$0xff] }
 0x219   :  { %2145 = vmatmul.mubr.f32.gmra.mrb[132].mxu1 %v7327_v53  ;;  %v1446_v53 = vld [vmem:[#allocation6 + $0x550] sm:$0xff] }
 0x21a   :  { %2150 = vmatprep.mubr.f32.mxu1 %v7336_v7  ;;  %5479 = vmatpush1.bf16.msra.mxu1 %v5478_v8  ;;  %v1455_v7 = vld [vmem:[#allocation6 + $0x598] sm:$0xff]  ;;  %v5490_v25 = vpack.c.bf16 %v1450_v0, %v1446_v53  ;;  %v1510_v53 = vld [vmem:[#allocation6 + $0x750] sm:$0xff] }
 0x21b   :  { %5481 = vmatprep.subr.bf16.mxu1 %v5480_v23  ;;  %5595 = vmatpush1.bf16.msra.mxu0 %v5594_v60  ;;  %v5492_v58 = vpack.c.bf16 %v1459_v44, %v1455_v7  ;;  %v1487_v8 = vld [vmem:[#allocation6 + $0x698] sm:$0xff] }
 0x21c   :  { %v1495_v60 = vld [vmem:[#allocation6 + $0x6d8] sm:$0xff] }
 0x21d   :  { %2151 = vmatmul.mubr.f32.gmra.mrb[134].mxu1 %v7343_v12  ;;  %v1458_v12 = vld [vmem:[#allocation6 + $0x5b0] sm:$0xff]  ;;  %v1519_v0 = vld [vmem:[#allocation6 + $0x798] sm:$0xff] }
 0x21e   :  { %2156 = vmatprep.mubr.f32.mxu1 %v7352_v31  ;;  %5483 = vmatpush1.bf16.msra.mxu1 %v5482_v51  ;;  %v1467_v31 = vld [vmem:[#allocation6 + $0x5f8] sm:$0xff]  ;;  %v5494_v57 = vpack.c.bf16 %v1458_v12, %v1454_v17  ;;  %v1494_v51 = vld [vmem:[#allocation6 + $0x6d0] sm:$0xff]  ;;  %v9396_v12 = vld [vmem:[#allocation46_spill] sm:$0xff] }
 0x21f   :  { %5485 = vmatprep.subr.bf16.mxu1 %v5484_v27  ;;  %v5496_v4 = vpack.c.bf16 %v1467_v31, %v1463_v21  ;;  %v1503_v27 = vld [vmem:[#allocation6 + $0x718] sm:$0xff] }
 0x220   :  { %v9395_v17 = vld [vmem:[#allocation44_spill] sm:$0xff] }
 0x221   :  { %2157 = vmatmul.mubr.f32.gmra.mrb[136].mxu1 %v7359_v36  ;;  %v1466_v36 = vld [vmem:[#allocation6 + $0x5f0] sm:$0xff] }
 0x222   :  { %2162 = vmatprep.mubr.f32.mxu1 %v7368_v62  ;;  %5487 = vmatpush1.bf16.msra.mxu1 %v5486_v52  ;;  %v1475_v62 = vld [vmem:[#allocation6 + $0x638] sm:$0xff]  ;;  %v5498_v46 = vpack.c.bf16 %v1466_v36, %v1462_v24 }
 0x223   :  { %5489 = vmatprep.subr.bf16.mxu1 %v5488_v20  ;;  %v5500_v35 = vpack.c.bf16 %v1475_v62, %v1471_v45  ;;  %v9399_v36 = vld [vmem:[#allocation52_spill] sm:$0xff]  ;;  %v9400_v45 = vld [vmem:[#allocation54_spill] sm:$0xff] }
 0x224   :  { %v2841_v62 = vld [vmem:[#allocation8 + $0x18] sm:$0xff] }
 0x225   :  { %2163 = vmatmul.mubr.f32.gmra.mrb[138].mxu1 %v7375_v3  ;;  %v1474_v3 = vld [vmem:[#allocation6 + $0x630] sm:$0xff] }
 0x226   :  { %2168 = vmatprep.mubr.f32.mxu1 %v7384_v30  ;;  %5491 = vmatpush1.bf16.msra.mxu1 %v5490_v25  ;;  %v1483_v30 = vld [vmem:[#allocation6 + $0x678] sm:$0xff]  ;;  %v5502_v33 = vpack.c.bf16 %v1474_v3, %v1470_v61  ;;  %v1518_v25 = vld [vmem:[#allocation6 + $0x790] sm:$0xff]  ;;  %v9402_v3 = vld [vmem:[#allocation58_spill] sm:$0xff] }
 0x227   :  { %5493 = vmatprep.subr.bf16.mxu1 %v5492_v58  ;;  %v5504_v19 = vpack.c.bf16 %v1483_v30, %v1479_v1  ;;  %v1527_v58 = vld [vmem:[#allocation6 + $0x7d8] sm:$0xff]  ;;  %v9404_v30 = vld [vmem:[#allocation62_spill] sm:$0xff] }
 0x228   :  { %v9401_v61 = vld [vmem:[#allocation56_spill] sm:$0xff] }
 0x229   :  { %2169 = vmatmul.mubr.f32.gmra.mrb[140].mxu1 %v7391_v37  ;;  %v1482_v37 = vld [vmem:[#allocation6 + $0x670] sm:$0xff]  ;;  %v9403_v1 = vld [vmem:[#allocation60_spill] sm:$0xff] }
 0x22a   :  { %2174 = vmatprep.mubr.f32.mxu1 %v7400_v11  ;;  %5495 = vmatpush1.bf16.msra.mxu1 %v5494_v57  ;;  %v1491_v11 = vld [vmem:[#allocation6 + $0x6b8] sm:$0xff]  ;;  %v5506_v23 = vpack.c.bf16 %v1482_v37, %v1478_v50  ;;  %v1526_v57 = vld [vmem:[#allocation6 + $0x7d0] sm:$0xff]  ;;  %v9408_v37 = vld [vmem:[#allocation70_spill] sm:$0xff] }
 0x22b   :  { %5497 = vmatprep.subr.bf16.mxu1 %v5496_v4  ;;  %v5508_v2 = vpack.c.bf16 %v1491_v11, %v1487_v8  ;;  %v9397_v4 = vld [vmem:[#allocation48_spill] sm:$0xff]  ;;  %v1532_v8 = vld [vmem:[%s9172_s5] sm:$0xf] }
 0x22c   :  { %v9407_v50 = vld [vmem:[#allocation68_spill] sm:$0xff] }
 0x22d   :  { %2175 = vmatmul.mubr.f32.gmra.mrb[142].mxu1 %v7407_v18  ;;  %v1490_v18 = vld [vmem:[#allocation6 + $0x6b0] sm:$0xff]  ;;  %v9409_v11 = vld [vmem:[#allocation72_spill] sm:$0xff] }
 0x22e   :  { %2180 = vmatprep.mubr.f32.mxu1 %v7416_v41  ;;  %5499 = vmatpush1.bf16.msra.mxu1 %v5498_v46  ;;  %v1499_v41 = vld [vmem:[#allocation6 + $0x6f8] sm:$0xff]  ;;  %v5510_v22 = vpack.c.bf16 %v1490_v18, %v1486_v47  ;;  %v9411_v47 = vld [vmem:[#allocation74_spill] sm:$0xff]  ;;  %v9412_v18 = vld [vmem:[#allocation15_spill] sm:$0xff] }
 0x22f   :  { %5501 = vmatprep.subr.bf16.mxu1 %v5500_v35  ;;  %v5512_v29 = vpack.c.bf16 %v1499_v41, %v1495_v60  ;;  %v2845_v46 = vld [vmem:[#allocation8 + $0x38] sm:$0xff]  ;;  %v7857_v60 = vrot.slane %v1532_v8, %v9412_v18 }
 0x230   :  { %v5660_v35 = vpack.c.bf16 %v2845_v46, %v2841_v62 }
 0x231   :  { %2181 = vmatmul.mubr.f32.gmra.mrb[144].mxu1 %v7423_v56  ;;  %v1498_v56 = vld [vmem:[#allocation6 + $0x6f0] sm:$0xff] }
 0x232   :  { %2186 = vmatprep.mubr.f32.mxu1 %v7432_v48  ;;  %5503 = vmatpush1.bf16.msra.mxu1 %v5502_v33  ;;  %v1507_v48 = vld [vmem:[#allocation6 + $0x738] sm:$0xff]  ;;  %v5514_v49 = vpack.c.bf16 %v1498_v56, %v1494_v51 }
 0x233   :  { %5505 = vmatprep.subr.bf16.mxu1 %v5504_v19  ;;  %v5516_v63 = vpack.c.bf16 %v1507_v48, %v1503_v27  ;;  %v9405_v33 = vld [vmem:[#allocation64_spill] sm:$0xff]  ;;  %v9406_v19 = vld [vmem:[#allocation66_spill] sm:$0xff] }
 0x234   :  { %v9413_v56 = vld [vmem:[#allocation76_spill] sm:$0xff] }
 0x235   :  { %2187 = vmatmul.mubr.f32.gmra.mrb[146].mxu1 %v7439_v55  ;;  %v1506_v55 = vld [vmem:[#allocation6 + $0x730] sm:$0xff] }
 0x236   :  { %2192 = vmatprep.mubr.f32.mxu1 %v7448_v15  ;;  %5507 = vmatpush1.bf16.msra.mxu1 %v5506_v23  ;;  %v1515_v15 = vld [vmem:[#allocation6 + $0x778] sm:$0xff]  ;;  %v5518_v52 = vpack.c.bf16 %v1506_v55, %v1502_v40  ;;  %v9410_v23 = vld [vmem:[#allocation13_spill] sm:$0xff] }
 0x237   :  { %5509 = vmatprep.subr.bf16.mxu1 %v5508_v2  ;;  %v5520_v20 = vpack.c.bf16 %v1515_v15, %v1511_v26  ;;  %v7853_v2 = vrot.slane %v1532_v8, %v9410_v23 }
 0x239   :  { %2193 = vmatmul.mubr.f32.gmra.mrb[148].mxu1 %v7455_v34  ;;  %v1514_v34 = vld [vmem:[#allocation6 + $0x770] sm:$0xff] }
 0x23a   :  { %2198 = vmatprep.mubr.f32.mxu1 %v7464_v43  ;;  %5511 = vmatpush1.bf16.msra.mxu1 %v5510_v22  ;;  %v1523_v43 = vld [vmem:[#allocation6 + $0x7b8] sm:$0xff]  ;;  %v5522_v7 = vpack.c.bf16 %v1514_v34, %v1510_v53 }
 0x23b   :  { %5513 = vmatprep.subr.bf16.mxu1 %v5512_v29  ;;  %v5524_v44 = vpack.c.bf16 %v1523_v43, %v1519_v0  ;;  %v9415_v53 = vld [vmem:[#allocation80_spill] sm:$0xff] }
 0x23d   :  { %2199 = vmatmul.mubr.f32.gmra.mrb[150].mxu1 %v7471_v13  ;;  %v1522_v13 = vld [vmem:[#allocation6 + $0x7b0] sm:$0xff] }
 0x23e   :  { %2204 = vmatprep.mubr.f32.mxu1 %v7480_v28  ;;  %5515 = vmatpush1.bf16.msra.mxu1 %v5514_v49  ;;  %v1531_v28 = vld [vmem:[#allocation6 + $0x7f8] sm:$0xff]  ;;  %v5526_v21 = vpack.c.bf16 %v1522_v13, %v1518_v25  ;;  %v9414_v49 = vld [vmem:[#allocation78_spill] sm:$0xff] }
 0x23f   :  { %5517 = vmatprep.subr.bf16.mxu1 %v5516_v63  ;;  %v5528_v31 = vpack.c.bf16 %v1531_v28, %v1527_v58  ;;  %v2967_v25 = vld [vmem:[#allocation8 + $0x408] sm:$0xff] }
 0x240   :  { %v2971_v13 = vld [vmem:[#allocation8 + $0x428] sm:$0xff] }
 0x241   :  { %2205 = vmatmul.mubr.f32.gmra.mrb[152].mxu1 %v7487_v6  ;;  %v1530_v6 = vld [vmem:[#allocation6 + $0x7f0] sm:$0xff] }
 0x242   :  { %2210 = vmatprep.mubr.f32.mxu1 %v7496_v10  ;;  %5519 = vmatpush1.bf16.msra.mxu1 %v5518_v52  ;;  %v9398_v10 = vld [vmem:[#allocation50_spill] sm:$0xff]  ;;  %v5530_v24 = vpack.c.bf16 %v1530_v6, %v1526_v57 }
 0x243   :  { %5521 = vmatprep.subr.bf16.mxu1 %v5520_v20 }
 0x245   :  { %2211 = vmatmul.mubr.f32.gmra.mrb[154].mxu1 %v9395_v17 }
 0x246   :  { %2216 = vmatprep.mubr.f32.mxu1 %v9396_v12  ;;  %5523 = vmatpush1.bf16.msra.mxu1 %v5522_v7  ;;  %v9416_v7 = vld [vmem:[#allocation82_spill] sm:$0xff]  ;;  %v5596_v12 = vpack.c.bf16 %v2971_v13, %v2967_v25 }
 0x247   :  { %5525 = vmatprep.subr.bf16.mxu1 %v5524_v44  ;;  %v9422_v13 = vld [vmem:[#allocation94_spill] sm:$0xff] }
 0x248   :  { %5597 = vmatprep.subr.bf16.mxu0 %v5596_v12 }
 0x249   :  { %2217 = vmatmul.mubr.f32.gmra.mrb[156].mxu1 %v9397_v4 }
 0x24a   :  { %2222 = vmatprep.mubr.f32.mxu1 %v9398_v10  ;;  %5527 = vmatpush1.bf16.msra.mxu1 %v5526_v21  ;;  %v9417_v10 = vld [vmem:[#allocation84_spill] sm:$0xff] }
 0x24b   :  { %5529 = vmatprep.subr.bf16.mxu1 %v5528_v31 }
 0x24d   :  { %2223 = vmatmul.mubr.f32.gmra.mrb[158].mxu1 %v9399_v36  ;;  %v2970_v36 = vld [vmem:[#allocation8 + $0x420] sm:$0xff] }
 0x24e   :  { %2228 = vmatprep.mubr.f32.mxu1 %v9400_v45  ;;  %5531 = vmatpush1.bf16.msra.mxu1 %v5530_v24  ;;  %v2966_v24 = vld [vmem:[#allocation8 + $0x400] sm:$0xff] }
 0x24f   :  { %5661 = vmatprep.subr.bf16.mxu1 %v5660_v35  ;;  %v9418_v35 = vld [vmem:[#allocation86_spill] sm:$0xff] }
 0x251   :  { %2229 = vmatmul.mubr.f32.gmra.mrb[160].mxu1 %v9401_v61  ;;  %v5598_v61 = vpack.c.bf16 %v2970_v36, %v2966_v24 }
 0x252   :  { %2234 = vmatprep.mubr.f32.mxu1 %v9402_v3 }
 0x255   :  { %2235 = vmatmul.mubr.f32.gmra.mrb[162].mxu1 %v9403_v1 }
 0x256   :  { %2240 = vmatprep.mubr.f32.mxu1 %v9404_v30 }
 0x259   :  { %2241 = vmatmul.mubr.f32.gmra.mrb[164].mxu1 %v9405_v33 }
 0x25a   :  { %2246 = vmatprep.mubr.f32.mxu1 %v9406_v19 }
 0x25d   :  { %2247 = vmatmul.mubr.f32.gmra.mrb[166].mxu1 %v9407_v50 }
 0x25e   :  { %2252 = vmatprep.mubr.f32.mxu1 %v9408_v37 }
 0x261   :  { %2253 = vmatmul.mubr.f32.gmra.mrb[168].mxu1 %v9409_v11 }
 0x262   :  { %2258 = vmatprep.mubr.f32.mxu1 %v9411_v47  ;;  %v1620_v41 = vpop.f32.mrb[64].mxu1  ;;  %v1877_v29 = vpop.f32.mrb[64].mxu0  ;;  %v9419_v47 = vld [vmem:[#allocation88_spill] sm:$0xff] }
 0x263   :  { %v1621_v22 = vadd.f32 %v1620_v41, %v7853_v2  ;;  %v1622_v51 = vpop.f32.mrb[65].mxu1  ;;  %v1879_v48 = vpop.f32.mrb[65].mxu0 }
 0x264   :  { %v1623_v27 = vadd.f32 %v1622_v51, %v7857_v60  ;;  %v9420_v51 = vld [vmem:[#allocation90_spill] sm:$0xff] }
 0x265   :  { %2259 = vmatmul.mubr.f32.gmra.mrb[170].mxu1 %v9413_v56  ;;  %v1878_v63 = vadd.f32 %v1877_v29, %v1621_v22  ;;  %v2975_v56 = vld [vmem:[#allocation8 + $0x448] sm:$0xff] }
 0x266   :  { %2264 = vmatprep.mubr.f32.mxu1 %v9414_v49  ;;  %v1880_v40 = vadd.f32 %v1879_v48, %v1623_v27  ;;  %v1626_v55 = vpop.f32.mrb[66].mxu1  ;;  %v1883_v52 = vpop.f32.mrb[66].mxu0  ;;  %v2979_v27 = vld [vmem:[#allocation8 + $0x468] sm:$0xff] }
 0x267   :  { %v2582_v26 = vmul.f32 0.01, %v1878_v63  ;;  %v1627_v15 = vadd.f32 %v1626_v55, %v7853_v2  ;;  %v1628_v20 = vpop.f32.mrb[67].mxu1  ;;  %v1885_v43 = vpop.f32.mrb[67].mxu0  ;;  %v5600_v49 = vpack.c.bf16 %v2979_v27, %v2975_v56  ;;  %v9425_v56 = vld [vmem:[#allocation100_spill] sm:$0xff]  ;;  %v2982_v27 = vld [vmem:[#allocation8 + $0x480] sm:$0xff] }
 0x268   :  { %v2583_v34 = vmul.f32 0.01, %v1880_v40  ;;  %v1629_v0 = vadd.f32 %v1628_v20, %v7857_v60 }
 0x269   :  { %2265 = vmatmul.mubr.f32.gmra.mrb[172].mxu1 %v9415_v53  ;;  %v1884_v44 = vadd.f32 %v1883_v52, %v1627_v15  ;;  %v7869_v21 = vmax.f32 %v1878_v63, %v2582_v26 }
 0x26a   :  { %2270 = vmatprep.mubr.f32.mxu1 %v9416_v7  ;;  %v7867_v58 = vmax.f32 %v1880_v40, %v2583_v34  ;;  %v1886_v28 = vadd.f32 %v1885_v43, %v1629_v0  ;;  %v1632_v17 = vpop.f32.mrb[68].mxu1  ;;  %v9421_v34 = vld [vmem:[#allocation92_spill] sm:$0xff]  ;;  %v2974_v0 = vld [vmem:[#allocation8 + $0x440] sm:$0xff] }
 0x26b   :  { %v2586_v31 = vmul.f32 0.01, %v1884_v44  ;;  %v1633_v57 = vadd.f32 %v1632_v17, %v7853_v2  ;;  %v1889_v6 = vpop.f32.mrb[68].mxu0  ;;  %v1634_v4 = vpop.f32.mrb[69].mxu1  ;;  %v2978_v43 = vld [vmem:[#allocation8 + $0x460] sm:$0xff] }
 0x26c   :  { %v2587_v45 = vmul.f32 0.01, %v1886_v28  ;;  %v1635_v62 = vadd.f32 %v1634_v4, %v7857_v60  ;;  %v1891_v46 = vpop.f32.mrb[69].mxu0  ;;  %3180 = vmatprep.mubr.f32.mxu0 %v7867_v58 }
 0x26d   :  { %2271 = vmatmul.mubr.f32.gmra.mrb[174].mxu1 %v9417_v10  ;;  %v1890_v3 = vadd.f32 %v1889_v6, %v1633_v57  ;;  %3181 = vmatmul.mubr.f32.vlgmr.msra.gmra.mrb[128].mxu0 %v7869_v21  ;;  %v7879_v19 = vmax.f32 %v1884_v44, %v2586_v31 }
 0x26e   :  { %2276 = vmatprep.mubr.f32.mxu1 %v9418_v35  ;;  %v7877_v1 = vmax.f32 %v1886_v28, %v2587_v45  ;;  %v1892_v30 = vadd.f32 %v1891_v46, %v1635_v62  ;;  %v1638_v33 = vpop.f32.mrb[70].mxu1  ;;  %5599 = vmatpush1.bf16.msra.mxu0 %v5598_v61  ;;  %v5602_v28 = vpack.c.bf16 %v2978_v43, %v2974_v0  ;;  %v9423_v45 = vld [vmem:[#allocation96_spill] sm:$0xff]  ;;  %v9424_v61 = vld [vmem:[#allocation98_spill] sm:$0xff] }
 0x26f   :  { %v2590_v50 = vmul.f32 0.01, %v1890_v3  ;;  %v1639_v37 = vadd.f32 %v1638_v33, %v7853_v2  ;;  %v1895_v8 = vpop.f32.mrb[70].mxu0  ;;  %v1640_v11 = vpop.f32.mrb[71].mxu1  ;;  %5601 = vmatprep.subr.bf16.mxu0 %v5600_v49 }
 0x270   :  { %v2591_v41 = vmul.f32 0.01, %v1892_v30  ;;  %v1641_v22 = vadd.f32 %v1640_v11, %v7857_v60  ;;  %v1897_v29 = vpop.f32.mrb[71].mxu0  ;;  %3186 = vmatprep.mubr.f32.mxu0 %v7877_v1 }
 0x271   :  { %2277 = vmatmul.mubr.f32.gmra.mrb[176].mxu1 %v9419_v47  ;;  %v1896_v48 = vadd.f32 %v1895_v8, %v1639_v37  ;;  %3187 = vmatmul.mubr.f32.gmra.mrb[130].mxu0 %v7879_v19  ;;  %v7889_v26 = vmax.f32 %v1890_v3, %v2590_v50  ;;  %v2983_v3 = vld [vmem:[#allocation8 + $0x488] sm:$0xff] }
 0x272   :  { %2282 = vmatprep.mubr.f32.mxu1 %v9420_v51  ;;  %v7887_v63 = vmax.f32 %v1892_v30, %v2591_v41  ;;  %v1898_v40 = vadd.f32 %v1897_v29, %v1641_v22  ;;  %v1644_v55 = vpop.f32.mrb[72].mxu1  ;;  %5603 = vmatpush1.bf16.msra.mxu0 %v5602_v28  ;;  %v2987_v30 = vld [vmem:[#allocation8 + $0x4a8] sm:$0xff]  ;;  %v9427_v28 = vld [vmem:[#allocation104_spill] sm:$0xff] }
 0x273   :  { %v2594_v15 = vmul.f32 0.01, %v1896_v48  ;;  %v1645_v52 = vadd.f32 %v1644_v55, %v7853_v2  ;;  %v1901_v20 = vpop.f32.mrb[72].mxu0  ;;  %v1646_v53 = vpop.f32.mrb[73].mxu1  ;;  %v5604_v50 = vpack.c.bf16 %v2987_v30, %v2983_v3 }
 0x274   :  { %v2595_v7 = vmul.f32 0.01, %v1898_v40  ;;  %v1647_v44 = vadd.f32 %v1646_v53, %v7857_v60  ;;  %v1903_v25 = vpop.f32.mrb[73].mxu0  ;;  %3192 = vmatprep.mubr.f32.mxu0 %v7887_v63 }
 0x275   :  { %2283 = vmatmul.mubr.f32.gmra.mrb[178].mxu1 %v9421_v34  ;;  %v1902_v17 = vadd.f32 %v1901_v20, %v1645_v52  ;;  %3193 = vmatmul.mubr.f32.gmra.mrb[132].mxu0 %v7889_v26  ;;  %v7899_v6 = vmax.f32 %v1896_v48, %v2594_v15  ;;  %v2986_v48 = vld [vmem:[#allocation8 + $0x4a0] sm:$0xff]  ;;  %v9426_v15 = vld [vmem:[#allocation102_spill] sm:$0xff] }
 0x276   :  { %2288 = vmatprep.mubr.f32.mxu1 %v9422_v13  ;;  %v7897_v12 = vmax.f32 %v1898_v40, %v2595_v7  ;;  %v1904_v31 = vadd.f32 %v1903_v25, %v1647_v44  ;;  %v1650_v57 = vpop.f32.mrb[74].mxu1  ;;  %5605 = vmatprep.subr.bf16.mxu0 %v5604_v50  ;;  %v5606_v52 = vpack.c.bf16 %v2986_v48, %v2982_v27 }
 0x277   :  { %v2598_v4 = vmul.f32 0.01, %v1902_v17  ;;  %v1651_v10 = vadd.f32 %v1650_v57, %v7853_v2  ;;  %v1907_v24 = vpop.f32.mrb[74].mxu0  ;;  %v1652_v36 = vpop.f32.mrb[75].mxu1 }
 0x278   :  { %v2599_v62 = vmul.f32 0.01, %v1904_v31  ;;  %v1653_v46 = vadd.f32 %v1652_v36, %v7857_v60  ;;  %v1909_v35 = vpop.f32.mrb[75].mxu0  ;;  %3198 = vmatprep.mubr.f32.mxu0 %v7897_v12  ;;  %5607 = vmatpush1.bf16.msra.mxu0 %v5606_v52 }
 0x279   :  { %2289 = vmatmul.mubr.f32.gmra.mrb[180].mxu1 %v9423_v45  ;;  %v1908_v33 = vadd.f32 %v1907_v24, %v1651_v10  ;;  %3199 = vmatmul.mubr.f32.gmra.mrb[134].mxu0 %v7899_v6  ;;  %v7909_v47 = vmax.f32 %v1902_v17, %v2598_v4  ;;  %v9428_v4 = vld [vmem:[#allocation106_spill] sm:$0xff] }
 0x27a   :  { %2294 = vmatprep.mubr.f32.mxu1 %v9424_v61  ;;  %v7907_v37 = vmax.f32 %v1904_v31, %v2599_v62  ;;  %v1910_v8 = vadd.f32 %v1909_v35, %v1653_v46  ;;  %v1656_v11 = vpop.f32.mrb[76].mxu1  ;;  %v2991_v10 = vld [vmem:[#allocation8 + $0x4c8] sm:$0xff] }
 0x27b   :  { %v2602_v41 = vmul.f32 0.01, %v1908_v33  ;;  %v1657_v22 = vadd.f32 %v1656_v11, %v7853_v2  ;;  %v1913_v29 = vpop.f32.mrb[76].mxu0  ;;  %v1658_v51 = vpop.f32.mrb[77].mxu1  ;;  %v2995_v24 = vld [vmem:[#allocation8 + $0x4e8] sm:$0xff]  ;;  %v2994_v11 = vld [vmem:[#allocation8 + $0x4e0] sm:$0xff] }
 0x27c   :  { %v2603_v49 = vmul.f32 0.01, %v1910_v8  ;;  %v1659_v40 = vadd.f32 %v1658_v51, %v7857_v60  ;;  %v1915_v55 = vpop.f32.mrb[77].mxu0  ;;  %3204 = vmatprep.mubr.f32.mxu0 %v7907_v37  ;;  %v5608_v45 = vpack.c.bf16 %v2995_v24, %v2991_v10 }
 0x27d   :  { %2295 = vmatmul.mubr.f32.gmra.mrb[182].mxu1 %v9425_v56  ;;  %v1914_v20 = vadd.f32 %v1913_v29, %v1657_v22  ;;  %3205 = vmatmul.mubr.f32.gmra.mrb[136].mxu0 %v7909_v47  ;;  %v7919_v43 = vmax.f32 %v1908_v33, %v2602_v41 }
 0x27e   :  { %2300 = vmatprep.mubr.f32.mxu1 %v9426_v15  ;;  %v7917_v53 = vmax.f32 %v1910_v8, %v2603_v49  ;;  %v1916_v34 = vadd.f32 %v1915_v55, %v1659_v40  ;;  %v1662_v0 = vpop.f32.mrb[78].mxu1  ;;  %5609 = vmatprep.subr.bf16.mxu0 %v5608_v45  ;;  %v2990_v8 = vld [vmem:[#allocation8 + $0x4c0] sm:$0xff] }
 0x27f   :  { %v2606_v7 = vmul.f32 0.01, %v1914_v20  ;;  %v1663_v44 = vadd.f32 %v1662_v0, %v7853_v2  ;;  %v1919_v25 = vpop.f32.mrb[78].mxu0  ;;  %v1664_v13 = vpop.f32.mrb[79].mxu1  ;;  %v5610_v51 = vpack.c.bf16 %v2994_v11, %v2990_v8  ;;  %v2999_v0 = vld [vmem:[#allocation8 + $0x508] sm:$0xff] }
 0x280   :  { %v2607_v17 = vmul.f32 0.01, %v1916_v34  ;;  %v1665_v31 = vadd.f32 %v1664_v13, %v7857_v60  ;;  %v1921_v57 = vpop.f32.mrb[79].mxu0  ;;  %3210 = vmatprep.mubr.f32.mxu0 %v7917_v53 }
 0x281   :  { %2301 = vmatmul.mubr.f32.gmra.mrb[184].mxu1 %v9427_v28  ;;  %v1920_v36 = vadd.f32 %v1919_v25, %v1663_v44  ;;  %3211 = vmatmul.mubr.f32.gmra.mrb[138].mxu0 %v7919_v43  ;;  %v7929_v61 = vmax.f32 %v1914_v20, %v2606_v7  ;;  %v3003_v7 = vld [vmem:[#allocation8 + $0x528] sm:$0xff]  ;;  %v2840_v25 = vld [vmem:[#allocation8 + $0x10] sm:$0xff] }
 0x282   :  { %2306 = vmatprep.mubr.f32.mxu1 %v9428_v4  ;;  %v7927_v62 = vmax.f32 %v1916_v34, %v2607_v17  ;;  %v1922_v46 = vadd.f32 %v1921_v57, %v1665_v31  ;;  %v1668_v35 = vpop.f32.mrb[80].mxu1  ;;  %5611 = vmatpush1.bf16.msra.mxu0 %v5610_v51  ;;  %v5612_v13 = vpack.c.bf16 %v3003_v7, %v2999_v0  ;;  %v2849_v57 = vld [vmem:[#allocation8 + $0x58] sm:$0xff] }
 0x283   :  { %v2610_v3 = vmul.f32 0.01, %v1920_v36  ;;  %v1669_v30 = vadd.f32 %v1668_v35, %v7853_v2  ;;  %v1925_v33 = vpop.f32.mrb[80].mxu0  ;;  %v1670_v50 = vpop.f32.mrb[81].mxu1  ;;  %v2853_v4 = vld [vmem:[#allocation8 + $0x78] sm:$0xff]  ;;  %v3002_v35 = vld [vmem:[#allocation8 + $0x520] sm:$0xff] }
 0x284   :  { %v2611_v41 = vmul.f32 0.01, %v1922_v46  ;;  %v1671_v22 = vadd.f32 %v1670_v50, %v7857_v60  ;;  %v1927_v29 = vpop.f32.mrb[81].mxu0  ;;  %3216 = vmatprep.mubr.f32.mxu0 %v7927_v62  ;;  %5613 = vmatprep.subr.bf16.mxu0 %v5612_v13  ;;  %v9429_v50 = vld [vmem:[#allocation17_spill] sm:$0xff]  ;;  %v5664_v51 = vpack.c.bf16 %v2853_v4, %v2849_v57  ;;  %v9431_v13 = vld [vmem:[#allocation19_spill] sm:$0xff] }
 0x285   :  { %2307 = vmatmul.mubr.f32.gmra.mrb[186].mxu1 %v7771_v54  ;;  %v1926_v56 = vadd.f32 %v1925_v33, %v1669_v30  ;;  %3217 = vmatmul.mubr.f32.gmra.mrb[140].mxu0 %v7929_v61  ;;  %v7939_v54 = vmax.f32 %v1920_v36, %v2610_v3 }
 0x286   :  { %2312 = vmatprep.mubr.f32.mxu1 %v7780_v9  ;;  %v7937_v27 = vmax.f32 %v1922_v46, %v2611_v41  ;;  %v1928_v48 = vadd.f32 %v1927_v29, %v1671_v22  ;;  %v1674_v49 = vpop.f32.mrb[82].mxu1  ;;  %v2998_v46 = vld [vmem:[#allocation8 + $0x500] sm:$0xff] }
 0x287   :  { %v2614_v40 = vmul.f32 0.01, %v1926_v56  ;;  %v1675_v55 = vadd.f32 %v1674_v49, %v7853_v2  ;;  %v1931_v15 = vpop.f32.mrb[82].mxu0  ;;  %v1676_v52 = vpop.f32.mrb[83].mxu1  ;;  %v5614_v8 = vpack.c.bf16 %v3002_v35, %v2998_v46  ;;  %v2856_v35 = vld [vmem:[#allocation8 + $0x90] sm:$0xff] }
 0x288   :  { %v2615_v9 = vmul.f32 0.01, %v1928_v48  ;;  %v1677_v20 = vadd.f32 %v1676_v52, %v7857_v60  ;;  %v1933_v34 = vpop.f32.mrb[83].mxu0  ;;  %3222 = vmatprep.mubr.f32.mxu0 %v7937_v27 }
 0x289   :  { %2313 = vmatmul.mubr.f32.gmra.mrb[188].mxu1 %v7787_v14  ;;  %v1932_v44 = vadd.f32 %v1931_v15, %v1675_v55  ;;  %3223 = vmatmul.mubr.f32.gmra.mrb[142].mxu0 %v7939_v54  ;;  %v2844_v14 = vld [vmem:[#allocation8 + $0x30] sm:$0xff]  ;;  %v7949_v10 = vmax.f32 %v1926_v56, %v2614_v40 }
 0x28a   :  { %2318 = vmatprep.mubr.f32.mxu1 %v7794_v5  ;;  %v7947_v28 = vmax.f32 %v1928_v48, %v2615_v9  ;;  %v1934_v17 = vadd.f32 %v1933_v34, %v1677_v20  ;;  %v1680_v31 = vpop.f32.mrb[84].mxu1  ;;  %v5662_v41 = vpack.c.bf16 %v2844_v14, %v2840_v25  ;;  %v2848_v56 = vld [vmem:[#allocation8 + $0x50] sm:$0xff]  ;;  %5615 = vmatpush1.bf16.msra.mxu0 %v5614_v8  ;;  %v9430_v9 = vld [vmem:[#allocation18_spill] sm:$0xff]  ;;  %v2857_v20 = vld [vmem:[#allocation8 + $0x98] sm:$0xff] }
 0x28b   :  { %v2618_v24 = vmul.f32 0.01, %v1932_v44  ;;  %v1681_v5 = vadd.f32 %v1680_v31, %v7853_v2  ;;  %v1937_v36 = vpop.f32.mrb[84].mxu0  ;;  %v1682_v45 = vpop.f32.mrb[85].mxu1  ;;  %v2852_v48 = vld [vmem:[#allocation8 + $0x70] sm:$0xff]  ;;  %v2861_v34 = vld [vmem:[#allocation8 + $0xb8] sm:$0xff] }
 0x28c   :  { %v2619_v3 = vmul.f32 0.01, %v1934_v17  ;;  %v1683_v30 = vadd.f32 %v1682_v45, %v7857_v60  ;;  %v1939_v33 = vpop.f32.mrb[85].mxu0  ;;  %3228 = vmatprep.mubr.f32.mxu0 %v7947_v28  ;;  %v3006_v31 = vld [vmem:[#allocation8 + $0x540] sm:$0xff]  ;;  %v5666_v57 = vpack.c.bf16 %v2852_v48, %v2848_v56  ;;  %v5668_v46 = vpack.c.bf16 %v2861_v34, %v2857_v20  ;;  %v2865_v56 = vld [vmem:[#allocation8 + $0xd8] sm:$0xff] }
 0x28d   :  { %2319 = vmatmul.mubr.f32.gmra.mrb[190].mxu1 %v7799_v38  ;;  %v1938_v11 = vadd.f32 %v1937_v36, %v1681_v5  ;;  %3229 = vmatmul.mubr.f32.gmra.mrb[144].mxu0 %v7949_v10  ;;  %v7959_v49 = vmax.f32 %v1932_v44, %v2618_v24  ;;  %v3011_v44 = vld [vmem:[#allocation8 + $0x568] sm:$0xff]  ;;  %v3010_v24 = vld [vmem:[#allocation8 + $0x560] sm:$0xff]  ;;  %v2869_v48 = vld [vmem:[#allocation8 + $0xf8] sm:$0xff] }
 0x28e   :  { %2389 = vmatprep.mubr.f32.mxu1 %v9429_v50  ;;  %v7957_v22 = vmax.f32 %v1934_v17, %v2619_v3  ;;  %v1940_v29 = vadd.f32 %v1939_v33, %v1683_v30  ;;  %v1686_v38 = vpop.f32.mrb[86].mxu1  ;;  %v3007_v17 = vld [vmem:[#allocation8 + $0x548] sm:$0xff]  ;;  %v2860_v3 = vld [vmem:[#allocation8 + $0xb0] sm:$0xff]  ;;  %v5618_v30 = vpack.c.bf16 %v3010_v24, %v3006_v31 }
 0x28f   :  { %v2622_v40 = vmul.f32 0.01, %v1938_v11  ;;  %v1687_v55 = vadd.f32 %v1686_v38, %v7853_v2  ;;  %v1943_v15 = vpop.f32.mrb[86].mxu0  ;;  %v1688_v52 = vpop.f32.mrb[87].mxu1  ;;  %v5616_v4 = vpack.c.bf16 %v3011_v44, %v3007_v17  ;;  %v9434_v24 = vld [vmem:[#allocation22_spill] sm:$0xff] }
 0x290   :  { %v2623_v0 = vmul.f32 0.01, %v1940_v29  ;;  %v1689_v7 = vadd.f32 %v1688_v52, %v7857_v60  ;;  %v1945_v25 = vpop.f32.mrb[87].mxu0  ;;  %3234 = vmatprep.mubr.f32.mxu0 %v7957_v22  ;;  %v9433_v52 = vld [vmem:[#allocation21_spill] sm:$0xff] }
 0x291   :  { %2390 = vmatmul.mubr.f32.vlgmr.msra.gmra.mrb[128].mxu1 %v9430_v9  ;;  %v1944_v14 = vadd.f32 %v1943_v15, %v1687_v55  ;;  %3235 = vmatmul.mubr.f32.gmra.mrb[146].mxu0 %v7959_v49  ;;  %v7969_v33 = vmax.f32 %v1938_v11, %v2622_v40  ;;  %v5670_v40 = vpack.c.bf16 %v2860_v3, %v2856_v35 }
 0x292   :  { %2395 = vmatprep.mubr.f32.mxu1 %v9431_v13  ;;  %5663 = vmatpush1.bf16.msra.mxu1 %v5662_v41  ;;  %v7967_v5 = vmax.f32 %v1940_v29, %v2623_v0  ;;  %v1946_v36 = vadd.f32 %v1945_v25, %v1689_v7  ;;  %v1692_v45 = vpop.f32.mrb[88].mxu1  ;;  %v9432_v41 = vld [vmem:[#allocation20_spill] sm:$0xff]  ;;  %v5672_v0 = vpack.c.bf16 %v2869_v48, %v2865_v56  ;;  %v2864_v7 = vld [vmem:[#allocation8 + $0xd0] sm:$0xff] }
 0x293   :  { %5665 = vmatprep.subr.bf16.mxu1 %v5664_v51  ;;  %v2626_v50 = vmul.f32 0.01, %v1944_v14  ;;  %v1693_v8 = vadd.f32 %v1692_v45, %v7853_v2  ;;  %v1949_v38 = vpop.f32.mrb[88].mxu0  ;;  %v1694_v55 = vpop.f32.mrb[89].mxu1  ;;  %5617 = vmatprep.subr.bf16.mxu0 %v5616_v4  ;;  %v2868_v25 = vld [vmem:[#allocation8 + $0xf0] sm:$0xff]  ;;  %v2877_v45 = vld [vmem:[#allocation8 + $0x138] sm:$0xff] }
 0x294   :  { %v2627_v29 = vmul.f32 0.01, %v1946_v36  ;;  %v1695_v15 = vadd.f32 %v1694_v55, %v7857_v60  ;;  %v1951_v51 = vpop.f32.mrb[89].mxu0  ;;  %3240 = vmatprep.mubr.f32.mxu0 %v7967_v5  ;;  %5619 = vmatpush1.bf16.msra.mxu0 %v5618_v30  ;;  %v3015_v30 = vld [vmem:[#allocation8 + $0x588] sm:$0xff] }
 0x295   :  { %2396 = vmatmul.mubr.f32.gmra.mrb[130].mxu1 %v9432_v41  ;;  %v1950_v11 = vadd.f32 %v1949_v38, %v1693_v8  ;;  %3241 = vmatmul.mubr.f32.gmra.mrb[148].mxu0 %v7969_v33  ;;  %v7979_v13 = vmax.f32 %v1944_v14, %v2626_v50  ;;  %v3019_v14 = vld [vmem:[#allocation8 + $0x5a8] sm:$0xff]  ;;  %v3014_v50 = vld [vmem:[#allocation8 + $0x580] sm:$0xff]  ;;  %v5674_v38 = vpack.c.bf16 %v2868_v25, %v2864_v7  ;;  %v2881_v7 = vld [vmem:[#allocation8 + $0x158] sm:$0xff] }
 0x296   :  { %2401 = vmatprep.mubr.f32.mxu1 %v9433_v52  ;;  %5667 = vmatpush1.bf16.msra.mxu1 %v5666_v57  ;;  %v7977_v9 = vmax.f32 %v1946_v36, %v2627_v29  ;;  %v1952_v20 = vadd.f32 %v1951_v51, %v1695_v15  ;;  %v1698_v34 = vpop.f32.mrb[90].mxu1  ;;  %v2873_v57 = vld [vmem:[#allocation8 + $0x118] sm:$0xff]  ;;  %v5620_v55 = vpack.c.bf16 %v3019_v14, %v3015_v30  ;;  %v3018_v41 = vld [vmem:[#allocation8 + $0x5a0] sm:$0xff]  ;;  %v2872_v51 = vld [vmem:[#allocation8 + $0x110] sm:$0xff] }
 0x297   :  { %5669 = vmatprep.subr.bf16.mxu1 %v5668_v46  ;;  %v2630_v17 = vmul.f32 0.01, %v1950_v11  ;;  %v1699_v44 = vadd.f32 %v1698_v34, %v7853_v2  ;;  %v1955_v31 = vpop.f32.mrb[90].mxu0  ;;  %v1700_v4 = vpop.f32.mrb[91].mxu1  ;;  %v9435_v46 = vld [vmem:[#allocation23_spill] sm:$0xff]  ;;  %v5676_v15 = vpack.c.bf16 %v2877_v45, %v2873_v57  ;;  %v5622_v34 = vpack.c.bf16 %v3018_v41, %v3014_v50  ;;  %v2885_v25 = vld [vmem:[#allocation8 + $0x178] sm:$0xff] }
 0x298   :  { %v2631_v36 = vmul.f32 0.01, %v1952_v20  ;;  %v1701_v35 = vadd.f32 %v1700_v4, %v7857_v60  ;;  %v1957_v3 = vpop.f32.mrb[91].mxu0  ;;  %3246 = vmatprep.mubr.f32.mxu0 %v7977_v9  ;;  %v2876_v52 = vld [vmem:[#allocation8 + $0x130] sm:$0xff]  ;;  %5621 = vmatprep.subr.bf16.mxu0 %v5620_v55  ;;  %v9437_v57 = vld [vmem:[#allocation25_spill] sm:$0xff]  ;;  %v5680_v30 = vpack.c.bf16 %v2885_v25, %v2881_v7 }
 0x299   :  { %2402 = vmatmul.mubr.f32.gmra.mrb[132].mxu1 %v9434_v24  ;;  %v1956_v8 = vadd.f32 %v1955_v31, %v1699_v44  ;;  %3247 = vmatmul.mubr.f32.gmra.mrb[150].mxu0 %v7979_v13  ;;  %v7989_v4 = vmax.f32 %v1950_v11, %v2630_v17  ;;  %v5678_v17 = vpack.c.bf16 %v2876_v52, %v2872_v51  ;;  %v2880_v14 = vld [vmem:[#allocation8 + $0x150] sm:$0xff]  ;;  %v2893_v51 = vld [vmem:[#allocation8 + $0x1b8] sm:$0xff] }
 0x29a   :  { %2407 = vmatprep.mubr.f32.mxu1 %v9435_v46  ;;  %5671 = vmatpush1.bf16.msra.mxu1 %v5670_v40  ;;  %v7987_v56 = vmax.f32 %v1952_v20, %v2631_v36  ;;  %v1958_v48 = vadd.f32 %v1957_v3, %v1701_v35  ;;  %v1704_v29 = vpop.f32.mrb[92].mxu1  ;;  %v9436_v40 = vld [vmem:[#allocation24_spill] sm:$0xff]  ;;  %v2884_v50 = vld [vmem:[#allocation8 + $0x170] sm:$0xff] }
 0x29b   :  { %5673 = vmatprep.subr.bf16.mxu1 %v5672_v0  ;;  %v2634_v24 = vmul.f32 0.01, %v1956_v8  ;;  %v1705_v44 = vadd.f32 %v1704_v29, %v7853_v2  ;;  %v1961_v31 = vpop.f32.mrb[92].mxu0  ;;  %v1706_v46 = vpop.f32.mrb[93].mxu1  ;;  %5623 = vmatpush1.bf16.msra.mxu0 %v5622_v34  ;;  %v3023_v34 = vld [vmem:[#allocation8 + $0x5c8] sm:$0xff]  ;;  %v5682_v25 = vpack.c.bf16 %v2884_v50, %v2880_v14  ;;  %v2897_v14 = vld [vmem:[#allocation8 + $0x1d8] sm:$0xff] }
 0x29c   :  { %v2635_v20 = vmul.f32 0.01, %v1958_v48  ;;  %v1707_v36 = vadd.f32 %v1706_v46, %v7857_v60  ;;  %v1963_v0 = vpop.f32.mrb[93].mxu0  ;;  %3252 = vmatprep.mubr.f32.mxu0 %v7987_v56  ;;  %v2901_v50 = vld [vmem:[#allocation8 + $0x1f8] sm:$0xff] }
 0x29d   :  { %2408 = vmatmul.mubr.f32.gmra.mrb[134].mxu1 %v9436_v40  ;;  %v1962_v11 = vadd.f32 %v1961_v31, %v1705_v44  ;;  %3253 = vmatmul.mubr.f32.gmra.mrb[152].mxu0 %v7989_v4  ;;  %v7999_v55 = vmax.f32 %v1956_v8, %v2634_v24  ;;  %v9440_v31 = vld [vmem:[#allocation26_spill] sm:$0xff]  ;;  %v3022_v24 = vld [vmem:[#allocation8 + $0x5c0] sm:$0xff] }
 0x29e   :  { %2413 = vmatprep.mubr.f32.mxu1 %v9437_v57  ;;  %5675 = vmatpush1.bf16.msra.mxu1 %v5674_v38  ;;  %v7997_v45 = vmax.f32 %v1958_v48, %v2635_v20  ;;  %v1964_v35 = vadd.f32 %v1963_v0, %v1707_v36  ;;  %v1710_v3 = vpop.f32.mrb[94].mxu1  ;;  %v2889_v38 = vld [vmem:[#allocation8 + $0x198] sm:$0xff]  ;;  %v3027_v8 = vld [vmem:[#allocation8 + $0x5e8] sm:$0xff]  ;;  %v3026_v36 = vld [vmem:[#allocation8 + $0x5e0] sm:$0xff] }
 0x29f   :  { %5677 = vmatprep.subr.bf16.mxu1 %v5676_v15  ;;  %9439 = vst [vmem:[#allocation46_spill] sm:$0xff] %v7999_v55  ;;  %v2638_v41 = vmul.f32 0.01, %v1962_v11  ;;  %v1711_v29 = vadd.f32 %v1710_v3, %v7853_v2  ;;  %v1967_v46 = vpop.f32.mrb[94].mxu0  ;;  %v1712_v44 = vpop.f32.mrb[95].mxu1  ;;  %v9441_v15 = vld [vmem:[#allocation27_spill] sm:$0xff]  ;;  %v5624_v20 = vpack.c.bf16 %v3027_v8, %v3023_v34  ;;  %v5626_v18 = vpack.c.bf16 %v3026_v36, %v3022_v24 }
 0x2a0   :  { %9438 = vst [vmem:[#allocation44_spill] sm:$0xff] %v7997_v45  ;;  %v2639_v48 = vmul.f32 0.01, %v1964_v35  ;;  %v1713_v52 = vadd.f32 %v1712_v44, %v7857_v60  ;;  %v1969_v40 = vpop.f32.mrb[95].mxu0  ;;  %3258 = vmatprep.mubr.f32.mxu0 %v7997_v45  ;;  %v5684_v44 = vpack.c.bf16 %v2893_v51, %v2889_v38  ;;  %v9445_v38 = vld [vmem:[#allocation29_spill] sm:$0xff]  ;;  %v5688_v34 = vpack.c.bf16 %v2901_v50, %v2897_v14  ;;  %v2896_v8 = vld [vmem:[#allocation8 + $0x1d0] sm:$0xff] }
 0x2a1   :  { %2414 = vmatmul.mubr.f32.gmra.mrb[136].mxu1 %v9440_v31  ;;  %v1968_v7 = vadd.f32 %v1967_v46, %v1711_v29  ;;  %3259 = vmatmul.mubr.f32.gmra.mrb[154].mxu0 %v7999_v55  ;;  %v2888_v31 = vld [vmem:[#allocation8 + $0x190] sm:$0xff]  ;;  %v8009_v23 = vmax.f32 %v1962_v11, %v2638_v41 }
 0x2a2   :  { %2419 = vmatprep.mubr.f32.mxu1 %v9441_v15  ;;  %5679 = vmatpush1.bf16.msra.mxu1 %v5678_v17  ;;  %v8007_v0 = vmax.f32 %v1964_v35, %v2639_v48  ;;  %v1970_v57 = vadd.f32 %v1969_v40, %v1713_v52  ;;  %v2892_v15 = vld [vmem:[#allocation8 + $0x1b0] sm:$0xff]  ;;  %v9444_v17 = vld [vmem:[#allocation28_spill] sm:$0xff] }
 0x2a3   :  { %v1716_v3 = vpop.f32.mrb[96].mxu1  ;;  %5681 = vmatprep.subr.bf16.mxu1 %v5680_v30  ;;  %9443 = vst [vmem:[#allocation50_spill] sm:$0xff] %v8009_v23  ;;  %v2642_v45 = vmul.f32 0.01, %v1968_v7  ;;  %5625 = vmatprep.subr.bf16.mxu0 %v5624_v20  ;;  %v5686_v41 = vpack.c.bf16 %v2892_v15, %v2888_v31  ;;  %v2900_v24 = vld [vmem:[#allocation8 + $0x1f0] sm:$0xff]  ;;  %v2909_v31 = vld [vmem:[#allocation8 + $0x238] sm:$0xff] }
 0x2a4   :  { %9442 = vst [vmem:[#allocation48_spill] sm:$0xff] %v8007_v0  ;;  %v1717_v29 = vadd.f32 %v1716_v3, %v7853_v2  ;;  %v1973_v46 = vpop.f32.mrb[96].mxu0  ;;  %v1718_v55 = vpop.f32.mrb[97].mxu1  ;;  %v2643_v35 = vmul.f32 0.01, %v1970_v57  ;;  %3264 = vmatprep.mubr.f32.mxu0 %v8007_v0  ;;  %5627 = vmatpush1.bf16.msra.mxu0 %v5626_v18  ;;  %v3031_v18 = vld [vmem:[#allocation8 + $0x608] sm:$0xff]  ;;  %v5690_v50 = vpack.c.bf16 %v2900_v24, %v2896_v8 }
 0x2a5   :  { %2420 = vmatmul.mubr.f32.gmra.mrb[138].mxu1 %v9444_v17  ;;  %v1719_v48 = vadd.f32 %v1718_v55, %v7857_v60  ;;  %v1975_v30 = vpop.f32.mrb[97].mxu0  ;;  %3265 = vmatmul.mubr.f32.gmra.mrb[156].mxu0 %v8009_v23  ;;  %v8019_v55 = vmax.f32 %v1968_v7, %v2642_v45  ;;  %v3035_v45 = vld [vmem:[#allocation8 + $0x628] sm:$0xff]  ;;  %v3030_v7 = vld [vmem:[#allocation8 + $0x600] sm:$0xff]  ;;  %v2913_v8 = vld [vmem:[#allocation8 + $0x258] sm:$0xff] }
 0x2a6   :  { %2425 = vmatprep.mubr.f32.mxu1 %v9445_v38  ;;  %v1974_v11 = vadd.f32 %v1973_v46, %v1717_v29  ;;  %5683 = vmatpush1.bf16.msra.mxu1 %v5682_v25  ;;  %v8017_v51 = vmax.f32 %v1970_v57, %v2643_v35  ;;  %v9448_v46 = vld [vmem:[#allocation30_spill] sm:$0xff]  ;;  %v2905_v25 = vld [vmem:[#allocation8 + $0x218] sm:$0xff]  ;;  %v5628_v35 = vpack.c.bf16 %v3035_v45, %v3031_v18  ;;  %v2912_v45 = vld [vmem:[#allocation8 + $0x250] sm:$0xff] }
 0x2a7   :  { %v1976_v52 = vadd.f32 %v1975_v30, %v1719_v48  ;;  %5685 = vmatprep.subr.bf16.mxu1 %v5684_v44  ;;  %9447 = vst [vmem:[#allocation54_spill] sm:$0xff] %v8019_v55  ;;  %v9449_v44 = vld [vmem:[#allocation31_spill] sm:$0xff]  ;;  %v3034_v48 = vld [vmem:[#allocation8 + $0x620] sm:$0xff]  ;;  %v2917_v24 = vld [vmem:[#allocation8 + $0x278] sm:$0xff] }
 0x2a8   :  { %9446 = vst [vmem:[#allocation52_spill] sm:$0xff] %v8017_v51  ;;  %v1722_v40 = vpop.f32.mrb[98].mxu1  ;;  %v2646_v20 = vmul.f32 0.01, %v1974_v11  ;;  %v1979_v3 = vpop.f32.mrb[98].mxu0  ;;  %3270 = vmatprep.mubr.f32.mxu0 %v8017_v51  ;;  %v5630_v23 = vpack.c.bf16 %v3034_v48, %v3030_v7  ;;  %5629 = vmatprep.subr.bf16.mxu0 %v5628_v35  ;;  %v5696_v18 = vpack.c.bf16 %v2917_v24, %v2913_v8  ;;  %v2916_v7 = vld [vmem:[#allocation8 + $0x270] sm:$0xff] }
 0x2a9   :  { %v1723_v36 = vadd.f32 %v1722_v40, %v7853_v2  ;;  %v1724_v29 = vpop.f32.mrb[99].mxu1  ;;  %2426 = vmatmul.mubr.f32.gmra.mrb[140].mxu1 %v9448_v46  ;;  %v2647_v57 = vmul.f32 0.01, %v1976_v52  ;;  %v1981_v17 = vpop.f32.mrb[99].mxu0  ;;  %3271 = vmatmul.mubr.f32.gmra.mrb[158].mxu0 %v8019_v55  ;;  %v2904_v46 = vld [vmem:[#allocation8 + $0x210] sm:$0xff]  ;;  %v5698_v24 = vpack.c.bf16 %v2916_v7, %v2912_v45  ;;  %v2929_v45 = vld [vmem:[#allocation8 + $0x2d8] sm:$0xff] }
 0x2aa   :  { %v1725_v15 = vadd.f32 %v1724_v29, %v7857_v60  ;;  %2431 = vmatprep.mubr.f32.mxu1 %v9449_v44  ;;  %5687 = vmatpush1.bf16.msra.mxu1 %v5686_v41  ;;  %v5692_v29 = vpack.c.bf16 %v2909_v31, %v2905_v25  ;;  %v2908_v44 = vld [vmem:[#allocation8 + $0x230] sm:$0xff]  ;;  %v8029_v51 = vmax.f32 %v1974_v11, %v2646_v20  ;;  %v9452_v41 = vld [vmem:[#allocation32_spill] sm:$0xff]  ;;  %v9453_v25 = vld [vmem:[#allocation33_spill] sm:$0xff] }
 0x2ab   :  { %v1980_v14 = vadd.f32 %v1979_v3, %v1723_v36  ;;  %v8027_v30 = vmax.f32 %v1976_v52, %v2647_v57  ;;  %5689 = vmatprep.subr.bf16.mxu1 %v5688_v34  ;;  %v5694_v20 = vpack.c.bf16 %v2908_v44, %v2904_v46  ;;  %5631 = vmatpush1.bf16.msra.mxu0 %v5630_v23  ;;  %v2925_v46 = vld [vmem:[#allocation8 + $0x2b8] sm:$0xff]  ;;  %v3039_v23 = vld [vmem:[#allocation8 + $0x648] sm:$0xff] }
 0x2ac   :  { %v1982_v38 = vadd.f32 %v1981_v17, %v1725_v15  ;;  %v1728_v40 = vpop.f32.mrb[100].mxu1  ;;  %9451 = vst [vmem:[#allocation58_spill] sm:$0xff] %v8029_v51  ;;  %v2933_v7 = vld [vmem:[#allocation8 + $0x2f8] sm:$0xff] }
 0x2ad   :  { %9450 = vst [vmem:[#allocation56_spill] sm:$0xff] %v8027_v30  ;;  %v2650_v0 = vmul.f32 0.01, %v1980_v14  ;;  %v1729_v36 = vadd.f32 %v1728_v40, %v7853_v2  ;;  %v1985_v3 = vpop.f32.mrb[100].mxu0  ;;  %v1730_v55 = vpop.f32.mrb[101].mxu1  ;;  %2432 = vmatmul.mubr.f32.gmra.mrb[142].mxu1 %v9452_v41  ;;  %3276 = vmatprep.mubr.f32.mxu0 %v8027_v30 }
 0x2ae   :  { %v2651_v52 = vmul.f32 0.01, %v1982_v38  ;;  %v1731_v57 = vadd.f32 %v1730_v55, %v7857_v60  ;;  %v1987_v34 = vpop.f32.mrb[101].mxu0  ;;  %2437 = vmatprep.mubr.f32.mxu1 %v9453_v25  ;;  %3277 = vmatmul.mubr.f32.gmra.mrb[160].mxu0 %v8029_v51 }
 0x2af   :  { %v1986_v11 = vadd.f32 %v1985_v3, %v1729_v36  ;;  %5691 = vmatpush1.bf16.msra.mxu1 %v5690_v50  ;;  %v8039_v55 = vmax.f32 %v1980_v14, %v2650_v0  ;;  %v9456_v3 = vld [vmem:[#allocation34_spill] sm:$0xff]  ;;  %v2921_v50 = vld [vmem:[#allocation8 + $0x298] sm:$0xff]  ;;  %v3038_v14 = vld [vmem:[#allocation8 + $0x640] sm:$0xff] }
 0x2b0   :  { %v8037_v31 = vmax.f32 %v1982_v38, %v2651_v52  ;;  %v1988_v15 = vadd.f32 %v1987_v34, %v1731_v57  ;;  %v1734_v17 = vpop.f32.mrb[102].mxu1  ;;  %5693 = vmatprep.subr.bf16.mxu1 %v5692_v29  ;;  %v9457_v29 = vld [vmem:[#allocation35_spill] sm:$0xff]  ;;  %v3043_v0 = vld [vmem:[#allocation8 + $0x668] sm:$0xff]  ;;  %v3042_v57 = vld [vmem:[#allocation8 + $0x660] sm:$0xff] }
 0x2b1   :  { %9455 = vst [vmem:[#allocation62_spill] sm:$0xff] %v8039_v55  ;;  %v2654_v35 = vmul.f32 0.01, %v1986_v11  ;;  %v1735_v48 = vadd.f32 %v1734_v17, %v7853_v2  ;;  %v1991_v40 = vpop.f32.mrb[102].mxu0  ;;  %v1736_v36 = vpop.f32.mrb[103].mxu1  ;;  %2438 = vmatmul.mubr.f32.gmra.mrb[144].mxu1 %v9456_v3  ;;  %v5632_v52 = vpack.c.bf16 %v3043_v0, %v3039_v23  ;;  %v2920_v3 = vld [vmem:[#allocation8 + $0x290] sm:$0xff]  ;;  %v5634_v51 = vpack.c.bf16 %v3042_v57, %v3038_v14 }
 0x2b2   :  { %9454 = vst [vmem:[#allocation60_spill] sm:$0xff] %v8037_v31  ;;  %v2655_v38 = vmul.f32 0.01, %v1988_v15  ;;  %v1737_v44 = vadd.f32 %v1736_v36, %v7857_v60  ;;  %v1993_v41 = vpop.f32.mrb[103].mxu0  ;;  %2443 = vmatprep.mubr.f32.mxu1 %v9457_v29  ;;  %3282 = vmatprep.mubr.f32.mxu0 %v8037_v31  ;;  %v5700_v36 = vpack.c.bf16 %v2925_v46, %v2921_v50  ;;  %v2924_v29 = vld [vmem:[#allocation8 + $0x2b0] sm:$0xff]  ;;  %v9461_v50 = vld [vmem:[#allocation37_spill] sm:$0xff] }
 0x2b3   :  { %v1992_v8 = vadd.f32 %v1991_v40, %v1735_v48  ;;  %3283 = vmatmul.mubr.f32.gmra.mrb[162].mxu0 %v8039_v55  ;;  %5695 = vmatpush1.bf16.msra.mxu1 %v5694_v20  ;;  %v8049_v31 = vmax.f32 %v1986_v11, %v2654_v35  ;;  %v9460_v20 = vld [vmem:[#allocation36_spill] sm:$0xff]  ;;  %v5702_v35 = vpack.c.bf16 %v2924_v29, %v2920_v3  ;;  %v2928_v0 = vld [vmem:[#allocation8 + $0x2d0] sm:$0xff] }
 0x2b4   :  { %v8047_v34 = vmax.f32 %v1988_v15, %v2655_v38  ;;  %v1994_v25 = vadd.f32 %v1993_v41, %v1737_v44  ;;  %v1740_v17 = vpop.f32.mrb[104].mxu1  ;;  %5697 = vmatprep.subr.bf16.mxu1 %v5696_v18  ;;  %5633 = vmatprep.subr.bf16.mxu0 %v5632_v52  ;;  %v5704_v23 = vpack.c.bf16 %v2933_v7, %v2929_v45  ;;  %v2932_v14 = vld [vmem:[#allocation8 + $0x2f0] sm:$0xff]  ;;  %v2941_v3 = vld [vmem:[#allocation8 + $0x338] sm:$0xff] }
 0x2b5   :  { %9459 = vst [vmem:[#allocation66_spill] sm:$0xff] %v8049_v31  ;;  %v2658_v30 = vmul.f32 0.01, %v1992_v8  ;;  %v1741_v48 = vadd.f32 %v1740_v17, %v7853_v2  ;;  %v1997_v40 = vpop.f32.mrb[104].mxu0  ;;  %v1742_v55 = vpop.f32.mrb[105].mxu1  ;;  %2444 = vmatmul.mubr.f32.gmra.mrb[146].mxu1 %v9460_v20  ;;  %5635 = vmatpush1.bf16.msra.mxu0 %v5634_v51  ;;  %v3047_v51 = vld [vmem:[#allocation8 + $0x688] sm:$0xff]  ;;  %v5706_v7 = vpack.c.bf16 %v2932_v14, %v2928_v0 }
 0x2b6   :  { %9458 = vst [vmem:[#allocation64_spill] sm:$0xff] %v8047_v34  ;;  %v2659_v15 = vmul.f32 0.01, %v1994_v25  ;;  %v1743_v38 = vadd.f32 %v1742_v55, %v7857_v60  ;;  %v1999_v18 = vpop.f32.mrb[105].mxu0  ;;  %2449 = vmatprep.mubr.f32.mxu1 %v9461_v50  ;;  %3288 = vmatprep.mubr.f32.mxu0 %v8047_v34  ;;  %v2945_v0 = vld [vmem:[#allocation8 + $0x358] sm:$0xff] }
 0x2b7   :  { %v1998_v11 = vadd.f32 %v1997_v40, %v1741_v48  ;;  %3289 = vmatmul.mubr.f32.gmra.mrb[164].mxu0 %v8049_v31  ;;  %5699 = vmatpush1.bf16.msra.mxu1 %v5698_v24  ;;  %v8059_v55 = vmax.f32 %v1992_v8, %v2658_v30  ;;  %v9464_v40 = vld [vmem:[#allocation38_spill] sm:$0xff]  ;;  %v2937_v24 = vld [vmem:[#allocation8 + $0x318] sm:$0xff]  ;;  %v3046_v8 = vld [vmem:[#allocation8 + $0x680] sm:$0xff] }
 0x2b8   :  { %v8057_v46 = vmax.f32 %v1994_v25, %v2659_v15  ;;  %v2000_v44 = vadd.f32 %v1999_v18, %v1743_v38  ;;  %v1746_v41 = vpop.f32.mrb[106].mxu1  ;;  %5701 = vmatprep.subr.bf16.mxu1 %v5700_v36  ;;  %v9465_v36 = vld [vmem:[#allocation39_spill] sm:$0xff]  ;;  %v3051_v30 = vld [vmem:[#allocation8 + $0x6a8] sm:$0xff]  ;;  %v3050_v38 = vld [vmem:[#allocation8 + $0x6a0] sm:$0xff] }
 0x2b9   :  { %9463 = vst [vmem:[#allocation70_spill] sm:$0xff] %v8059_v55  ;;  %v2662_v52 = vmul.f32 0.01, %v1998_v11  ;;  %v1747_v57 = vadd.f32 %v1746_v41, %v7853_v2  ;;  %v2003_v17 = vpop.f32.mrb[106].mxu0  ;;  %v1748_v48 = vpop.f32.mrb[107].mxu1  ;;  %2450 = vmatmul.mubr.f32.gmra.mrb[148].mxu1 %v9464_v40  ;;  %v5636_v15 = vpack.c.bf16 %v3051_v30, %v3047_v51  ;;  %v2936_v40 = vld [vmem:[#allocation8 + $0x310] sm:$0xff]  ;;  %v5638_v31 = vpack.c.bf16 %v3050_v38, %v3046_v8 }
 0x2ba   :  { %9462 = vst [vmem:[#allocation68_spill] sm:$0xff] %v8057_v46  ;;  %v2663_v25 = vmul.f32 0.01, %v2000_v44  ;;  %v1749_v29 = vadd.f32 %v1748_v48, %v7857_v60  ;;  %v2005_v20 = vpop.f32.mrb[107].mxu0  ;;  %2455 = vmatprep.mubr.f32.mxu1 %v9465_v36  ;;  %3294 = vmatprep.mubr.f32.mxu0 %v8057_v46  ;;  %v5708_v48 = vpack.c.bf16 %v2941_v3, %v2937_v24  ;;  %v2940_v36 = vld [vmem:[#allocation8 + $0x330] sm:$0xff]  ;;  %v2949_v14 = vld [vmem:[#allocation8 + $0x378] sm:$0xff] }
 0x2bb   :  { %v2004_v45 = vadd.f32 %v2003_v17, %v1747_v57  ;;  %3295 = vmatmul.mubr.f32.gmra.mrb[166].mxu0 %v8059_v55  ;;  %5703 = vmatpush1.bf16.msra.mxu1 %v5702_v35  ;;  %v8069_v46 = vmax.f32 %v1998_v11, %v2662_v52  ;;  %v9468_v35 = vld [vmem:[#allocation40_spill] sm:$0xff]  ;;  %v9469_v24 = vld [vmem:[#allocation41_spill] sm:$0xff]  ;;  %v5710_v52 = vpack.c.bf16 %v2940_v36, %v2936_v40  ;;  %v2944_v30 = vld [vmem:[#allocation8 + $0x350] sm:$0xff] }
 0x2bc   :  { %v8067_v18 = vmax.f32 %v2000_v44, %v2663_v25  ;;  %v2006_v50 = vadd.f32 %v2005_v20, %v1749_v29  ;;  %v1752_v41 = vpop.f32.mrb[108].mxu1  ;;  %5705 = vmatprep.subr.bf16.mxu1 %v5704_v23  ;;  %5637 = vmatprep.subr.bf16.mxu0 %v5636_v15  ;;  %v5712_v51 = vpack.c.bf16 %v2949_v14, %v2945_v0  ;;  %v2948_v8 = vld [vmem:[#allocation8 + $0x370] sm:$0xff]  ;;  %v2957_v40 = vld [vmem:[#allocation8 + $0x3b8] sm:$0xff] }
 0x2bd   :  { %9467 = vst [vmem:[#allocation74_spill] sm:$0xff] %v8069_v46  ;;  %v2666_v34 = vmul.f32 0.01, %v2004_v45  ;;  %v1753_v57 = vadd.f32 %v1752_v41, %v7853_v2  ;;  %v2009_v17 = vpop.f32.mrb[108].mxu0  ;;  %v1754_v55 = vpop.f32.mrb[109].mxu1  ;;  %2456 = vmatmul.mubr.f32.gmra.mrb[150].mxu1 %v9468_v35  ;;  %5639 = vmatpush1.bf16.msra.mxu0 %v5638_v31  ;;  %v3055_v31 = vld [vmem:[#allocation8 + $0x6c8] sm:$0xff]  ;;  %v5714_v14 = vpack.c.bf16 %v2948_v8, %v2944_v30 }
 0x2be   :  { %9466 = vst [vmem:[#allocation72_spill] sm:$0xff] %v8067_v18  ;;  %v2667_v44 = vmul.f32 0.01, %v2006_v50  ;;  %v1755_v25 = vadd.f32 %v1754_v55, %v7857_v60  ;;  %v2011_v23 = vpop.f32.mrb[109].mxu0  ;;  %2461 = vmatprep.mubr.f32.mxu1 %v9469_v24  ;;  %3300 = vmatprep.mubr.f32.mxu0 %v8067_v18  ;;  %v2961_v30 = vld [vmem:[#allocation8 + $0x3d8] sm:$0xff] }
 0x2bf   :  { %v2010_v11 = vadd.f32 %v2009_v17, %v1753_v57  ;;  %3301 = vmatmul.mubr.f32.gmra.mrb[168].mxu0 %v8069_v46  ;;  %5707 = vmatpush1.bf16.msra.mxu1 %v5706_v7  ;;  %v8079_v55 = vmax.f32 %v2004_v45, %v2666_v34  ;;  %v9472_v17 = vld [vmem:[#allocation42_spill] sm:$0xff]  ;;  %v2953_v7 = vld [vmem:[#allocation8 + $0x398] sm:$0xff]  ;;  %v3054_v45 = vld [vmem:[#allocation8 + $0x6c0] sm:$0xff] }
 0x2c0   :  { %v8077_v3 = vmax.f32 %v2006_v50, %v2667_v44  ;;  %v2012_v29 = vadd.f32 %v2011_v23, %v1755_v25  ;;  %v1758_v20 = vpop.f32.mrb[110].mxu1  ;;  %5709 = vmatprep.subr.bf16.mxu1 %v5708_v48  ;;  %v9473_v48 = vld [vmem:[#allocation43_spill] sm:$0xff]  ;;  %v3059_v34 = vld [vmem:[#allocation8 + $0x6e8] sm:$0xff]  ;;  %v3058_v25 = vld [vmem:[#allocation8 + $0x6e0] sm:$0xff] }
 0x2c1   :  { %9471 = vst [vmem:[#allocation78_spill] sm:$0xff] %v8079_v55  ;;  %v2670_v15 = vmul.f32 0.01, %v2010_v11  ;;  %v1759_v38 = vadd.f32 %v1758_v20, %v7853_v2  ;;  %v2015_v41 = vpop.f32.mrb[110].mxu0  ;;  %v1760_v57 = vpop.f32.mrb[111].mxu1  ;;  %2462 = vmatmul.mubr.f32.gmra.mrb[152].mxu1 %v9472_v17  ;;  %v5640_v44 = vpack.c.bf16 %v3059_v34, %v3055_v31  ;;  %v2952_v17 = vld [vmem:[#allocation8 + $0x390] sm:$0xff]  ;;  %v5642_v46 = vpack.c.bf16 %v3058_v25, %v3054_v45 }
 0x2c2   :  { %9470 = vst [vmem:[#allocation76_spill] sm:$0xff] %v8077_v3  ;;  %v2671_v50 = vmul.f32 0.01, %v2012_v29  ;;  %v1761_v36 = vadd.f32 %v1760_v57, %v7857_v60  ;;  %v2017_v35 = vpop.f32.mrb[111].mxu0  ;;  %2467 = vmatprep.mubr.f32.mxu1 %v9473_v48  ;;  %3306 = vmatprep.mubr.f32.mxu0 %v8077_v3  ;;  %v5716_v57 = vpack.c.bf16 %v2957_v40, %v2953_v7  ;;  %v2956_v48 = vld [vmem:[#allocation8 + $0x3b0] sm:$0xff]  ;;  %v2965_v8 = vld [vmem:[#allocation8 + $0x3f8] sm:$0xff] }
 0x2c3   :  { %v2016_v0 = vadd.f32 %v2015_v41, %v1759_v38  ;;  %3307 = vmatmul.mubr.f32.gmra.mrb[170].mxu0 %v8079_v55  ;;  %5711 = vmatpush1.bf16.msra.mxu1 %v5710_v52  ;;  %v8089_v3 = vmax.f32 %v2010_v11, %v2670_v15  ;;  %v9474_v52 = vld [vmem:[#allocation45_spill] sm:$0xff]  ;;  %v9475_v7 = vld [vmem:[#allocation47_spill] sm:$0xff]  ;;  %v5718_v15 = vpack.c.bf16 %v2956_v48, %v2952_v17 }
 0x2c4   :  { %v8087_v23 = vmax.f32 %v2012_v29, %v2671_v50  ;;  %v2018_v24 = vadd.f32 %v2017_v35, %v1761_v36  ;;  %v1764_v20 = vpop.f32.mrb[112].mxu1  ;;  %5713 = vmatprep.subr.bf16.mxu1 %v5712_v51  ;;  %5641 = vmatprep.subr.bf16.mxu0 %v5640_v44  ;;  %v5720_v31 = vpack.c.bf16 %v2965_v8, %v2961_v30  ;;  %v2960_v34 = vld [vmem:[#allocation8 + $0x3d0] sm:$0xff]  ;;  %v3066_v8 = vld [vmem:[#allocation8 + $0x720] sm:$0xff] }
 0x2c5   :  { %v2674_v18 = vmul.f32 0.01, %v2016_v0  ;;  %v1765_v38 = vadd.f32 %v1764_v20, %v7853_v2  ;;  %v2021_v41 = vpop.f32.mrb[112].mxu0  ;;  %v1766_v55 = vpop.f32.mrb[113].mxu1  ;;  %2468 = vmatmul.mubr.f32.gmra.mrb[154].mxu1 %v9474_v52  ;;  %v2964_v45 = vld [vmem:[#allocation8 + $0x3f0] sm:$0xff]  ;;  %5643 = vmatpush1.bf16.msra.mxu0 %v5642_v46  ;;  %v3067_v52 = vld [vmem:[#allocation8 + $0x728] sm:$0xff] }
 0x2c6   :  { %v2675_v29 = vmul.f32 0.01, %v2018_v24  ;;  %v1767_v50 = vadd.f32 %v1766_v55, %v7857_v60  ;;  %v2023_v51 = vpop.f32.mrb[113].mxu0  ;;  %2473 = vmatprep.mubr.f32.mxu1 %v9475_v7  ;;  %3312 = vmatprep.mubr.f32.mxu0 %v8087_v23  ;;  %v9478_v48 = vld [vmem:[#allocation51_spill] sm:$0xff]  ;;  %v3062_v46 = vld [vmem:[#allocation8 + $0x700] sm:$0xff] }
 0x2c7   :  { %v2022_v11 = vadd.f32 %v2021_v41, %v1765_v38  ;;  %3313 = vmatmul.mubr.f32.gmra.mrb[172].mxu0 %v8089_v3  ;;  %5715 = vmatpush1.bf16.msra.mxu1 %v5714_v14  ;;  %v8099_v55 = vmax.f32 %v2016_v0, %v2674_v18  ;;  %v9477_v41 = vld [vmem:[#allocation49_spill] sm:$0xff]  ;;  %v5722_v0 = vpack.c.bf16 %v2964_v45, %v2960_v34 }
 0x2c8   :  { %v8097_v40 = vmax.f32 %v2018_v24, %v2675_v29  ;;  %v2024_v36 = vadd.f32 %v2023_v51, %v1767_v50  ;;  %v1770_v35 = vpop.f32.mrb[114].mxu1  ;;  %5717 = vmatprep.subr.bf16.mxu1 %v5716_v57  ;;  %v3063_v57 = vld [vmem:[#allocation8 + $0x708] sm:$0xff]  ;;  %v5646_v7 = vpack.c.bf16 %v3066_v8, %v3062_v46  ;;  %v9482_v8 = vld [vmem:[#allocation57_spill] sm:$0xff] }
 0x2c9   :  { %v2678_v44 = vmul.f32 0.01, %v2022_v11  ;;  %v1771_v25 = vadd.f32 %v1770_v35, %v7853_v2  ;;  %v2027_v20 = vpop.f32.mrb[114].mxu0  ;;  %v1772_v38 = vpop.f32.mrb[115].mxu1  ;;  %2474 = vmatmul.mubr.f32.gmra.mrb[156].mxu1 %v9477_v41  ;;  %v5644_v30 = vpack.c.bf16 %v3067_v52, %v3063_v57 }
 0x2ca   :  { %9476 = vst [vmem:[#allocation80_spill] sm:$0xff] %v8097_v40  ;;  %v2679_v14 = vmul.f32 0.01, %v2024_v36  ;;  %v1773_v24 = vadd.f32 %v1772_v38, %v7857_v60  ;;  %v2029_v17 = vpop.f32.mrb[115].mxu0  ;;  %2479 = vmatprep.mubr.f32.mxu1 %v9478_v48  ;;  %3318 = vmatprep.mubr.f32.mxu0 %v8097_v40 }
 0x2cb   :  { %v2028_v18 = vadd.f32 %v2027_v20, %v1771_v25  ;;  %3319 = vmatmul.mubr.f32.gmra.mrb[174].mxu0 %v8099_v55  ;;  %5719 = vmatpush1.bf16.msra.mxu1 %v5718_v15  ;;  %v8109_v35 = vmax.f32 %v2022_v11, %v2678_v44  ;;  %v9479_v25 = vld [vmem:[#allocation53_spill] sm:$0xff]  ;;  %v2969_v11 = vld [vmem:[#allocation8 + $0x418] sm:$0xff] }
 0x2cc   :  { %v8107_v29 = vmax.f32 %v2024_v36, %v2679_v14  ;;  %v2030_v50 = vadd.f32 %v2029_v17, %v1773_v24  ;;  %v1776_v51 = vpop.f32.mrb[116].mxu1  ;;  %5721 = vmatprep.subr.bf16.mxu1 %v5720_v31  ;;  %5645 = vmatprep.subr.bf16.mxu0 %v5644_v30  ;;  %v9480_v36 = vld [vmem:[#allocation55_spill] sm:$0xff]  ;;  %v2973_v44 = vld [vmem:[#allocation8 + $0x438] sm:$0xff] }
 0x2cd   :  { %v2682_v38 = vmul.f32 0.01, %v2028_v18  ;;  %v1777_v41 = vadd.f32 %v1776_v51, %v7853_v2  ;;  %v2033_v48 = vpop.f32.mrb[116].mxu0  ;;  %v1778_v40 = vpop.f32.mrb[117].mxu1  ;;  %2480 = vmatmul.mubr.f32.gmra.mrb[158].mxu1 %v9479_v25  ;;  %5647 = vmatpush1.bf16.msra.mxu0 %v5646_v7  ;;  %v5724_v17 = vpack.c.bf16 %v2973_v44, %v2969_v11  ;;  %v3075_v7 = vld [vmem:[#allocation8 + $0x768] sm:$0xff]  ;;  %v3070_v25 = vld [vmem:[#allocation8 + $0x740] sm:$0xff] }
 0x2ce   :  { %v2683_v15 = vmul.f32 0.01, %v2030_v50  ;;  %v1779_v34 = vadd.f32 %v1778_v40, %v7857_v60  ;;  %v2035_v45 = vpop.f32.mrb[117].mxu0  ;;  %2485 = vmatprep.mubr.f32.mxu1 %v9480_v36  ;;  %3324 = vmatprep.mubr.f32.mxu0 %v8107_v29 }
 0x2cf   :  { %v2034_v31 = vadd.f32 %v2033_v48, %v1777_v41  ;;  %3325 = vmatmul.mubr.f32.gmra.mrb[176].mxu0 %v8109_v35  ;;  %5723 = vmatpush1.bf16.msra.mxu1 %v5722_v0  ;;  %v8119_v57 = vmax.f32 %v2028_v18, %v2682_v38  ;;  %v9483_v48 = vld [vmem:[#allocation59_spill] sm:$0xff] }
 0x2d0   :  { %v8117_v20 = vmax.f32 %v2030_v50, %v2683_v15  ;;  %v2036_v14 = vadd.f32 %v2035_v45, %v1779_v34  ;;  %v1782_v24 = vpop.f32.mrb[118].mxu1  ;;  %v3071_v50 = vld [vmem:[#allocation8 + $0x748] sm:$0xff]  ;;  %5725 = vmatprep.subr.bf16.mxu1 %v5724_v17  ;;  %v3074_v15 = vld [vmem:[#allocation8 + $0x760] sm:$0xff] }
 0x2d1   :  { %v2686_v40 = vmul.f32 0.01, %v2034_v31  ;;  %v1783_v52 = vadd.f32 %v1782_v24, %v7853_v2  ;;  %v2039_v46 = vpop.f32.mrb[118].mxu0  ;;  %v1784_v30 = vpop.f32.mrb[119].mxu1  ;;  %2486 = vmatmul.mubr.f32.gmra.mrb[160].mxu1 %v9482_v8  ;;  %v5648_v38 = vpack.c.bf16 %v3075_v7, %v3071_v50  ;;  %v5650_v11 = vpack.c.bf16 %v3074_v15, %v3070_v25  ;;  %v9487_v50 = vld [vmem:[#allocation63_spill] sm:$0xff] }
 0x2d2   :  { %9481 = vst [vmem:[#allocation82_spill] sm:$0xff] %v8117_v20  ;;  %v2687_v51 = vmul.f32 0.01, %v2036_v14  ;;  %v1785_v0 = vadd.f32 %v1784_v30, %v7857_v60  ;;  %v2041_v41 = vpop.f32.mrb[119].mxu0  ;;  %2491 = vmatprep.mubr.f32.mxu1 %v9483_v48  ;;  %3330 = vmatprep.mubr.f32.mxu0 %v8117_v20  ;;  %v9486_v20 = vld [vmem:[#allocation61_spill] sm:$0xff] }
 0x2d3   :  { %v2040_v18 = vadd.f32 %v2039_v46, %v1783_v52  ;;  %3331 = vmatmul.mubr.f32.gmra.mrb[178].mxu0 %v8119_v57  ;;  %v8129_v44 = vmax.f32 %v2034_v31, %v2686_v40  ;;  %5649 = vmatprep.subr.bf16.mxu0 %v5648_v38  ;;  %v9489_v38 = vld [vmem:[#allocation65_spill] sm:$0xff] }
 0x2d4   :  { %v8127_v34 = vmax.f32 %v2036_v14, %v2687_v51  ;;  %v2042_v45 = vadd.f32 %v2041_v41, %v1785_v0  ;;  %v1788_v36 = vpop.f32.mrb[120].mxu1  ;;  %5651 = vmatpush1.bf16.msra.mxu0 %v5650_v11  ;;  %v3078_v11 = vld [vmem:[#allocation8 + $0x780] sm:$0xff] }
 0x2d5   :  { %9485 = vst [vmem:[#allocation86_spill] sm:$0xff] %v8129_v44  ;;  %v2690_v24 = vmul.f32 0.01, %v2040_v18  ;;  %v1789_v30 = vadd.f32 %v1788_v36, %v7853_v2  ;;  %v2045_v8 = vpop.f32.mrb[120].mxu0  ;;  %v1790_v48 = vpop.f32.mrb[121].mxu1  ;;  %2492 = vmatmul.mubr.f32.gmra.mrb[162].mxu1 %v9486_v20 }
 0x2d6   :  { %9484 = vst [vmem:[#allocation84_spill] sm:$0xff] %v8127_v34  ;;  %v2691_v52 = vmul.f32 0.01, %v2042_v45  ;;  %v1791_v17 = vadd.f32 %v1790_v48, %v7857_v60  ;;  %v2047_v46 = vpop.f32.mrb[121].mxu0  ;;  %2497 = vmatprep.mubr.f32.mxu1 %v9487_v50  ;;  %3336 = vmatprep.mubr.f32.mxu0 %v8127_v34  ;;  %v3083_v48 = vld [vmem:[#allocation8 + $0x7a8] sm:$0xff]  ;;  %v9491_v34 = vld [vmem:[#allocation69_spill] sm:$0xff] }
 0x2d7   :  { %v2046_v14 = vadd.f32 %v2045_v8, %v1789_v30  ;;  %3337 = vmatmul.mubr.f32.gmra.mrb[180].mxu0 %v8129_v44  ;;  %v8139_v0 = vmax.f32 %v2040_v18, %v2690_v24  ;;  %v9490_v8 = vld [vmem:[#allocation67_spill] sm:$0xff] }
 0x2d8   :  { %v8137_v31 = vmax.f32 %v2042_v45, %v2691_v52  ;;  %v2048_v40 = vadd.f32 %v2047_v46, %v1791_v17  ;;  %v1794_v51 = vpop.f32.mrb[122].mxu1  ;;  %v3079_v45 = vld [vmem:[#allocation8 + $0x788] sm:$0xff]  ;;  %v3082_v52 = vld [vmem:[#allocation8 + $0x7a0] sm:$0xff] }
 0x2d9   :  { %v2694_v20 = vmul.f32 0.01, %v2046_v14  ;;  %v1795_v41 = vadd.f32 %v1794_v51, %v7853_v2  ;;  %v2051_v7 = vpop.f32.mrb[122].mxu0  ;;  %v1796_v25 = vpop.f32.mrb[123].mxu1  ;;  %2498 = vmatmul.mubr.f32.gmra.mrb[164].mxu1 %v9489_v38  ;;  %v5652_v24 = vpack.c.bf16 %v3083_v48, %v3079_v45  ;;  %v5654_v51 = vpack.c.bf16 %v3082_v52, %v3078_v11  ;;  %v9492_v48 = vld [vmem:[#allocation71_spill] sm:$0xff] }
 0x2da   :  { %9488 = vst [vmem:[#allocation88_spill] sm:$0xff] %v8137_v31  ;;  %v2695_v15 = vmul.f32 0.01, %v2048_v40  ;;  %v1797_v36 = vadd.f32 %v1796_v25, %v7857_v60  ;;  %v2053_v30 = vpop.f32.mrb[123].mxu0  ;;  %2503 = vmatprep.mubr.f32.mxu1 %v9490_v8  ;;  %3342 = vmatprep.mubr.f32.mxu0 %v8137_v31 }
 0x2db   :  { %v2052_v18 = vadd.f32 %v2051_v7, %v1795_v41  ;;  %3343 = vmatmul.mubr.f32.gmra.mrb[182].mxu0 %v8139_v0  ;;  %v8149_v38 = vmax.f32 %v2046_v14, %v2694_v20  ;;  %5653 = vmatprep.subr.bf16.mxu0 %v5652_v24  ;;  %v9493_v24 = vld [vmem:[#allocation73_spill] sm:$0xff] }
 0x2dc   :  { %v8147_v17 = vmax.f32 %v2048_v40, %v2695_v15  ;;  %v2054_v46 = vadd.f32 %v2053_v30, %v1797_v36  ;;  %v1800_v50 = vpop.f32.mrb[124].mxu1  ;;  %5655 = vmatpush1.bf16.msra.mxu0 %v5654_v51 }
 0x2dd   :  { %v2698_v25 = vmul.f32 0.01, %v2052_v18  ;;  %v1801_v8 = vadd.f32 %v1800_v50, %v7853_v2  ;;  %v2057_v44 = vpop.f32.mrb[124].mxu0  ;;  %v1802_v31 = vpop.f32.mrb[125].mxu1  ;;  %2504 = vmatmul.mubr.f32.gmra.mrb[166].mxu1 %v9491_v34 }
 0x2de   :  { %v2699_v41 = vmul.f32 0.01, %v2054_v46  ;;  %v1803_v7 = vadd.f32 %v1802_v31, %v7857_v60  ;;  %v2059_v45 = vpop.f32.mrb[125].mxu0  ;;  %2509 = vmatprep.mubr.f32.mxu1 %v9492_v48  ;;  %3348 = vmatprep.mubr.f32.mxu0 %v8147_v17  ;;  %v3091_v48 = vld [vmem:[#allocation8 + $0x7e8] sm:$0xff] }
 0x2df   :  { %v2058_v40 = vadd.f32 %v2057_v44, %v1801_v8  ;;  %3349 = vmatmul.mubr.f32.gmra.mrb[184].mxu0 %v8149_v38  ;;  %v8159_v36 = vmax.f32 %v2052_v18, %v2698_v25  ;;  %v9494_v8 = vld [vmem:[#allocation75_spill] sm:$0xff] }
 0x2e0   :  { %v8157_v14 = vmax.f32 %v2054_v46, %v2699_v41  ;;  %v2060_v20 = vadd.f32 %v2059_v45, %v1803_v7  ;;  %v1806_v15 = vpop.f32.mrb[126].mxu1  ;;  %v9495_v41 = vld [vmem:[#allocation77_spill] sm:$0xff]  ;;  %v9496_v45 = vld [vmem:[#allocation79_spill] sm:$0xff] }
 0x2e1   :  { %v2702_v34 = vmul.f32 0.01, %v2058_v40  ;;  %v1807_v30 = vadd.f32 %v1806_v15, %v7853_v2  ;;  %v2063_v11 = vpop.f32.mrb[126].mxu0  ;;  %v1808_v31 = vpop.f32.mrb[127].mxu1  ;;  %2510 = vmatmul.mubr.f32.gmra.mrb[168].mxu1 %v9493_v24  ;;  %v9498_v24 = vld [vmem:[#allocation83_spill] sm:$0xff] }
 0x2e2   :  { %v2703_v52 = vmul.f32 0.01, %v2060_v20  ;;  %v1809_v50 = vadd.f32 %v1808_v31, %v7857_v60  ;;  %v2065_v44 = vpop.f32.mrb[127].mxu0  ;;  %2515 = vmatprep.mubr.f32.mxu1 %v9494_v8  ;;  %3354 = vmatprep.mubr.f32.mxu0 %v8157_v14  ;;  %v3087_v60 = vld [vmem:[#allocation8 + $0x7c8] sm:$0xff]  ;;  %v9502_v8 = vld [vmem:[#allocation91_spill] sm:$0xff] }
 0x2e3   :  { %v2064_v46 = vadd.f32 %v2063_v11, %v1807_v30  ;;  %3355 = vmatmul.mubr.f32.gmra.mrb[186].mxu0 %v8159_v36  ;;  %v8169_v25 = vmax.f32 %v2058_v40, %v2702_v34  ;;  %v5656_v30 = vpack.c.bf16 %v3091_v48, %v3087_v60  ;;  %v3090_v11 = vld [vmem:[#allocation8 + $0x7e0] sm:$0xff]  ;;  %v9510_v48 = vld [vmem:[#allocation107_spill] sm:$0xff] }
 0x2e4   :  { %v8167_v18 = vmax.f32 %v2060_v20, %v2703_v52  ;;  %v2066_v51 = vadd.f32 %v2065_v44, %v1809_v50  ;;  %v3086_v20 = vld [vmem:[#allocation8 + $0x7c0] sm:$0xff]  ;;  %v9500_v50 = vld [vmem:[#allocation87_spill] sm:$0xff] }
 0x2e5   :  { %v2706_v2 = vmul.f32 0.01, %v2064_v46  ;;  %2516 = vmatmul.mubr.f32.gmra.mrb[170].mxu1 %v9495_v41  ;;  %v9497_v40 = vld [vmem:[#allocation81_spill] sm:$0xff]  ;;  %v5658_v34 = vpack.c.bf16 %v3090_v11, %v3086_v20  ;;  %5657 = vmatprep.subr.bf16.mxu0 %v5656_v30  ;;  %v9506_v41 = vld [vmem:[#allocation99_spill] sm:$0xff]  ;;  %v2977_v11 = vld [vmem:[#allocation8 + $0x458] sm:$0xff] }
 0x2e6   :  { %v2707_v7 = vmul.f32 0.01, %v2066_v51  ;;  %2521 = vmatprep.mubr.f32.mxu1 %v9496_v45  ;;  %3360 = vmatprep.mubr.f32.mxu0 %v8167_v18  ;;  %v9499_v52 = vld [vmem:[#allocation85_spill] sm:$0xff]  ;;  %v9508_v45 = vld [vmem:[#allocation103_spill] sm:$0xff] }
 0x2e7   :  { %3361 = vmatmul.mubr.f32.gmra.mrb[188].mxu0 %v8169_v25  ;;  %v8177_v31 = vmax.f32 %v2064_v46, %v2706_v2  ;;  %v9501_v44 = vld [vmem:[#allocation89_spill] sm:$0xff]  ;;  %v2968_v30 = vld [vmem:[#allocation8 + $0x410] sm:$0xff] }
 0x2e8   :  { %v8175_v15 = vmax.f32 %v2066_v51, %v2707_v7  ;;  %5659 = vmatpush1.bf16.msra.mxu0 %v5658_v34  ;;  %v9503_v46 = vld [vmem:[#allocation93_spill] sm:$0xff]  ;;  %v9504_v51 = vld [vmem:[#allocation95_spill] sm:$0xff] }
 0x2e9   :  { %2522 = vmatmul.mubr.f32.gmra.mrb[172].mxu1 %v9497_v40  ;;  %v9505_v2 = vld [vmem:[#allocation97_spill] sm:$0xff]  ;;  %v2972_v20 = vld [vmem:[#allocation8 + $0x430] sm:$0xff]  ;;  %v2981_v40 = vld [vmem:[#allocation8 + $0x478] sm:$0xff] }
 0x2ea   :  { %2527 = vmatprep.mubr.f32.mxu1 %v9498_v24  ;;  %3366 = vmatprep.mubr.f32.mxu0 %v8175_v15  ;;  %v9507_v7 = vld [vmem:[#allocation101_spill] sm:$0xff]  ;;  %v5726_v34 = vpack.c.bf16 %v2972_v20, %v2968_v30  ;;  %v5728_v24 = vpack.c.bf16 %v2981_v40, %v2977_v11  ;;  %v3008_v11 = vld [vmem:[#allocation8 + $0x550] sm:$0xff]  ;;  %v3017_v40 = vld [vmem:[#allocation8 + $0x598] sm:$0xff] }
 0x2eb   :  { %3367 = vmatmul.mubr.f32.gmra.mrb[190].mxu0 %v8177_v31  ;;  %v9509_v60 = vld [vmem:[#allocation105_spill] sm:$0xff] }
 0x2ed   :  { %2528 = vmatmul.mubr.f32.gmra.mrb[174].mxu1 %v9499_v52  ;;  %v2976_v52 = vld [vmem:[#allocation8 + $0x450] sm:$0xff] }
 0x2ee   :  { %2533 = vmatprep.mubr.f32.mxu1 %v9500_v50  ;;  %v2980_v50 = vld [vmem:[#allocation8 + $0x470] sm:$0xff] }
 0x2f1   :  { %2534 = vmatmul.mubr.f32.gmra.mrb[176].mxu1 %v9501_v44  ;;  %v2985_v44 = vld [vmem:[#allocation8 + $0x498] sm:$0xff] }
 0x2f2   :  { %2539 = vmatprep.mubr.f32.mxu1 %v9502_v8  ;;  %v2988_v8 = vld [vmem:[#allocation8 + $0x4b0] sm:$0xff] }
 0x2f5   :  { %2540 = vmatmul.mubr.f32.gmra.mrb[178].mxu1 %v9503_v46  ;;  %v2993_v46 = vld [vmem:[#allocation8 + $0x4d8] sm:$0xff] }
 0x2f6   :  { %2545 = vmatprep.mubr.f32.mxu1 %v9504_v51 }
 0x2f9   :  { %2546 = vmatmul.mubr.f32.gmra.mrb[180].mxu1 %v9505_v2  ;;  %v2992_v2 = vld [vmem:[#allocation8 + $0x4d0] sm:$0xff] }
 0x2fa   :  { %2551 = vmatprep.mubr.f32.mxu1 %v9506_v41  ;;  %v3001_v41 = vld [vmem:[#allocation8 + $0x518] sm:$0xff] }
 0x2fd   :  { %2552 = vmatmul.mubr.f32.gmra.mrb[182].mxu1 %v9507_v7 }
 0x2fe   :  { %2557 = vmatprep.mubr.f32.mxu1 %v9508_v45 }
 0x301   :  { %2558 = vmatmul.mubr.f32.gmra.mrb[184].mxu1 %v9509_v60  ;;  %v3000_v60 = vld [vmem:[#allocation8 + $0x510] sm:$0xff] }
 0x302   :  { %2563 = vmatprep.mubr.f32.mxu1 %v9510_v48  ;;  %v3009_v48 = vld [vmem:[#allocation8 + $0x558] sm:$0xff] }
 0x305   :  { %2564 = vmatmul.mubr.f32.gmra.mrb[186].mxu1 %v7773_v39  ;;  %v2989_v39 = vld [vmem:[#allocation8 + $0x4b8] sm:$0xff] }
 0x306   :  { %2569 = vmatprep.mubr.f32.mxu1 %v7782_v16  ;;  %v5730_v16 = vpack.c.bf16 %v2980_v50, %v2976_v52  ;;  %v3016_v52 = vld [vmem:[#allocation8 + $0x590] sm:$0xff]  ;;  %v3025_v50 = vld [vmem:[#allocation8 + $0x5d8] sm:$0xff] }
 0x309   :  { %2570 = vmatmul.mubr.f32.gmra.mrb[188].mxu1 %v7789_v42  ;;  %v5732_v42 = vpack.c.bf16 %v2989_v39, %v2985_v44 }
 0x30a   :  { %2575 = vmatprep.mubr.f32.mxu1 %v7796_v32  ;;  %v2984_v32 = vld [vmem:[#allocation8 + $0x490] sm:$0xff] }
 0x30d   :  { %2576 = vmatmul.mubr.f32.gmra.mrb[190].mxu1 %v7801_v59  ;;  %v2997_v59 = vld [vmem:[#allocation8 + $0x4f8] sm:$0xff] }
 0x30e   :  { %3694 = vmatprep.mubr.f32.mxu1 %v7867_v58  ;;  %v5734_v58 = vpack.c.bf16 %v2988_v8, %v2984_v32  ;;  %v5736_v51 = vpack.c.bf16 %v2997_v59, %v2993_v46  ;;  %v3032_v46 = vld [vmem:[#allocation8 + $0x610] sm:$0xff]  ;;  %v3041_v59 = vld [vmem:[#allocation8 + $0x658] sm:$0xff] }
 0x311   :  { %3695 = vmatmul.mubr.f32.vlgmr.msra.gmra.mrb[192].mxu1 %v7869_v21  ;;  %v2996_v21 = vld [vmem:[#allocation8 + $0x4f0] sm:$0xff] }
 0x312   :  { %3700 = vmatprep.mubr.f32.mxu1 %v7877_v1  ;;  %5727 = vmatpush1.bf16.msra.mxu1 %v5726_v34  ;;  %v3005_v1 = vld [vmem:[#allocation8 + $0x538] sm:$0xff]  ;;  %v5738_v7 = vpack.c.bf16 %v2996_v21, %v2992_v2  ;;  %v3040_v2 = vld [vmem:[#allocation8 + $0x650] sm:$0xff] }
 0x313   :  { %5729 = vmatprep.subr.bf16.mxu1 %v5728_v24  ;;  %v5740_v45 = vpack.c.bf16 %v3005_v1, %v3001_v41  ;;  %v3049_v21 = vld [vmem:[#allocation8 + $0x698] sm:$0xff] }
 0x315   :  { %3701 = vmatmul.mubr.f32.gmra.mrb[194].mxu1 %v7879_v19  ;;  %v3004_v19 = vld [vmem:[#allocation8 + $0x530] sm:$0xff] }
 0x316   :  { %3706 = vmatprep.mubr.f32.mxu1 %v7887_v63  ;;  %5731 = vmatpush1.bf16.msra.mxu1 %v5730_v16  ;;  %v3013_v63 = vld [vmem:[#allocation8 + $0x578] sm:$0xff]  ;;  %v5742_v30 = vpack.c.bf16 %v3004_v19, %v3000_v60  ;;  %v3024_v16 = vld [vmem:[#allocation8 + $0x5d0] sm:$0xff] }
 0x317   :  { %5733 = vmatprep.subr.bf16.mxu1 %v5732_v42  ;;  %v5744_v20 = vpack.c.bf16 %v3013_v63, %v3009_v48  ;;  %v3033_v42 = vld [vmem:[#allocation8 + $0x618] sm:$0xff]  ;;  %v3056_v48 = vld [vmem:[#allocation8 + $0x6d0] sm:$0xff] }
 0x318   :  { %v3065_v63 = vld [vmem:[#allocation8 + $0x718] sm:$0xff] }
 0x319   :  { %3707 = vmatmul.mubr.f32.gmra.mrb[196].mxu1 %v7889_v26  ;;  %v3012_v26 = vld [vmem:[#allocation8 + $0x570] sm:$0xff] }
 0x31a   :  { %3712 = vmatprep.mubr.f32.mxu1 %v7897_v12  ;;  %5735 = vmatpush1.bf16.msra.mxu1 %v5734_v58  ;;  %v3021_v12 = vld [vmem:[#allocation8 + $0x5b8] sm:$0xff]  ;;  %v5746_v34 = vpack.c.bf16 %v3012_v26, %v3008_v11  ;;  %v3064_v11 = vld [vmem:[#allocation8 + $0x710] sm:$0xff] }
 0x31b   :  { %5737 = vmatprep.subr.bf16.mxu1 %v5736_v51  ;;  %v5748_v24 = vpack.c.bf16 %v3021_v12, %v3017_v40  ;;  %v3073_v26 = vld [vmem:[#allocation8 + $0x758] sm:$0xff] }
 0x31d   :  { %3713 = vmatmul.mubr.f32.gmra.mrb[198].mxu1 %v7899_v6  ;;  %v3020_v6 = vld [vmem:[#allocation8 + $0x5b0] sm:$0xff] }
 0x31e   :  { %3718 = vmatprep.mubr.f32.mxu1 %v7907_v37  ;;  %5739 = vmatpush1.bf16.msra.mxu1 %v5738_v7  ;;  %v3029_v37 = vld [vmem:[#allocation8 + $0x5f8] sm:$0xff]  ;;  %v5750_v44 = vpack.c.bf16 %v3020_v6, %v3016_v52  ;;  %v3048_v7 = vld [vmem:[#allocation8 + $0x690] sm:$0xff] }
 0x31f   :  { %5741 = vmatprep.subr.bf16.mxu1 %v5740_v45  ;;  %v5752_v39 = vpack.c.bf16 %v3029_v37, %v3025_v50  ;;  %v3057_v45 = vld [vmem:[#allocation8 + $0x6d8] sm:$0xff]  ;;  %v3080_v37 = vld [vmem:[#allocation8 + $0x790] sm:$0xff] }
 0x320   :  { %v9511_v52 = vld [vmem:[#allocation44_spill] sm:$0xff] }
 0x321   :  { %3719 = vmatmul.mubr.f32.gmra.mrb[200].mxu1 %v7909_v47  ;;  %v3028_v47 = vld [vmem:[#allocation8 + $0x5f0] sm:$0xff] }
 0x322   :  { %3724 = vmatprep.mubr.f32.mxu1 %v7917_v53  ;;  %5743 = vmatpush1.bf16.msra.mxu1 %v5742_v30  ;;  %v3037_v53 = vld [vmem:[#allocation8 + $0x638] sm:$0xff]  ;;  %v5754_v32 = vpack.c.bf16 %v3028_v47, %v3024_v16 }
 0x323   :  { %5745 = vmatprep.subr.bf16.mxu1 %v5744_v20  ;;  %v5756_v8 = vpack.c.bf16 %v3037_v53, %v3033_v42  ;;  %v9513_v16 = vld [vmem:[#allocation48_spill] sm:$0xff]  ;;  %v3088_v53 = vld [vmem:[#allocation8 + $0x7d0] sm:$0xff] }
 0x325   :  { %3725 = vmatmul.mubr.f32.gmra.mrb[202].mxu1 %v7919_v43  ;;  %v3036_v43 = vld [vmem:[#allocation8 + $0x630] sm:$0xff] }
 0x326   :  { %3730 = vmatprep.mubr.f32.mxu1 %v7927_v62  ;;  %5747 = vmatpush1.bf16.msra.mxu1 %v5746_v34  ;;  %v3045_v62 = vld [vmem:[#allocation8 + $0x678] sm:$0xff]  ;;  %v5758_v58 = vpack.c.bf16 %v3036_v43, %v3032_v46  ;;  %v3072_v34 = vld [vmem:[#allocation8 + $0x750] sm:$0xff]  ;;  %v9516_v43 = vld [vmem:[#allocation54_spill] sm:$0xff] }
 0x327   :  { %5749 = vmatprep.subr.bf16.mxu1 %v5748_v24  ;;  %v5760_v51 = vpack.c.bf16 %v3045_v62, %v3041_v59  ;;  %v3081_v24 = vld [vmem:[#allocation8 + $0x798] sm:$0xff]  ;;  %v6733_v62 = vmov 0.0|0.0  }
 0x328   :  { %v9517_v59 = vld [vmem:[#allocation56_spill] sm:$0xff]  ;;  %5788 = vmatprep.subr.bf16.mxu0 %v6733_v62 }
 0x329   :  { %3731 = vmatmul.mubr.f32.gmra.mrb[204].mxu1 %v7929_v61  ;;  %v3044_v61 = vld [vmem:[#allocation8 + $0x670] sm:$0xff] }
 0x32a   :  { %3736 = vmatprep.mubr.f32.mxu1 %v7937_v27  ;;  %5751 = vmatpush1.bf16.msra.mxu1 %v5750_v44  ;;  %v3053_v27 = vld [vmem:[#allocation8 + $0x6b8] sm:$0xff]  ;;  %v5762_v41 = vpack.c.bf16 %v3044_v61, %v3040_v2  ;;  %v9520_v2 = vld [vmem:[#allocation62_spill] sm:$0xff] }
 0x32b   :  { %5753 = vmatprep.subr.bf16.mxu1 %v5752_v39  ;;  %v5764_v1 = vpack.c.bf16 %v3053_v27, %v3049_v21  ;;  %v3089_v44 = vld [vmem:[#allocation8 + $0x7d8] sm:$0xff]  ;;  %v9512_v39 = vld [vmem:[#allocation46_spill] sm:$0xff] }
 0x32c   :  { %v9521_v61 = vld [vmem:[#allocation64_spill] sm:$0xff]  ;;  %v9522_v21 = vld [vmem:[#allocation66_spill] sm:$0xff] }
 0x32d   :  { %3737 = vmatmul.mubr.f32.gmra.mrb[206].mxu1 %v7939_v54  ;;  %v3052_v54 = vld [vmem:[#allocation8 + $0x6b0] sm:$0xff]  ;;  %v9523_v27 = vld [vmem:[#allocation68_spill] sm:$0xff] }
 0x32e   :  { %3742 = vmatprep.mubr.f32.mxu1 %v7947_v28  ;;  %5755 = vmatpush1.bf16.msra.mxu1 %v5754_v32  ;;  %v3061_v28 = vld [vmem:[#allocation8 + $0x6f8] sm:$0xff]  ;;  %v5766_v60 = vpack.c.bf16 %v3052_v54, %v3048_v7  ;;  %v9514_v32 = vld [vmem:[#allocation50_spill] sm:$0xff]  ;;  %v6631_v54 = vld [vmem:[%s9172_s5] sm:$0xf] }
 0x32f   :  { %5757 = vmatprep.subr.bf16.mxu1 %v5756_v8  ;;  %v5768_v19 = vpack.c.bf16 %v3061_v28, %v3057_v45  ;;  %v9515_v8 = vld [vmem:[#allocation52_spill] sm:$0xff]  ;;  %v9526_v7 = vld [vmem:[#allocation74_spill] sm:$0xff] }
 0x330   :  { %v9527_v45 = vld [vmem:[#allocation14_spill] sm:$0xff] }
 0x331   :  { %3743 = vmatmul.mubr.f32.gmra.mrb[208].mxu1 %v7949_v10  ;;  %v3060_v10 = vld [vmem:[#allocation8 + $0x6f0] sm:$0xff]  ;;  %v8247_v28 = vrot.slane %v6631_v54, %v9527_v45 }
 0x332   :  { %3748 = vmatprep.mubr.f32.mxu1 %v7957_v22  ;;  %5759 = vmatpush1.bf16.msra.mxu1 %v5758_v58  ;;  %v3069_v22 = vld [vmem:[#allocation8 + $0x738] sm:$0xff]  ;;  %v5770_v30 = vpack.c.bf16 %v3060_v10, %v3056_v48  ;;  %v9518_v58 = vld [vmem:[#allocation58_spill] sm:$0xff] }
 0x333   :  { %5761 = vmatprep.subr.bf16.mxu1 %v5760_v51  ;;  %v5772_v20 = vpack.c.bf16 %v3069_v22, %v3065_v63  ;;  %v9519_v51 = vld [vmem:[#allocation60_spill] sm:$0xff] }
 0x335   :  { %3749 = vmatmul.mubr.f32.gmra.mrb[210].mxu1 %v7959_v49  ;;  %v3068_v49 = vld [vmem:[#allocation8 + $0x730] sm:$0xff] }
 0x336   :  { %3754 = vmatprep.mubr.f32.mxu1 %v7967_v5  ;;  %5763 = vmatpush1.bf16.msra.mxu1 %v5762_v41  ;;  %v3077_v5 = vld [vmem:[#allocation8 + $0x778] sm:$0xff]  ;;  %v5774_v40 = vpack.c.bf16 %v3068_v49, %v3064_v11  ;;  %v9524_v41 = vld [vmem:[#allocation70_spill] sm:$0xff]  ;;  %v4400_v49 = vld [vmem:[%s9175_s8] sm:$0xff] }
 0x337   :  { %5765 = vmatprep.subr.bf16.mxu1 %v5764_v1  ;;  %v5776_v12 = vpack.c.bf16 %v3077_v5, %v3073_v26  ;;  %v9525_v1 = vld [vmem:[#allocation72_spill] sm:$0xff]  ;;  %v4401_v26 = vld [vmem:[%s9175_s8 + $0x8] sm:$0xff] }
 0x339   :  { %3755 = vmatmul.mubr.f32.gmra.mrb[212].mxu1 %v7969_v33  ;;  %v3076_v33 = vld [vmem:[#allocation8 + $0x770] sm:$0xff] }
 0x33a   :  { %3760 = vmatprep.mubr.f32.mxu1 %v7977_v9  ;;  %5767 = vmatpush1.bf16.msra.mxu1 %v5766_v60  ;;  %v3085_v9 = vld [vmem:[#allocation8 + $0x7b8] sm:$0xff]  ;;  %v5778_v6 = vpack.c.bf16 %v3076_v33, %v3072_v34 }
 0x33b   :  { %5769 = vmatprep.subr.bf16.mxu1 %v5768_v19  ;;  %v5780_v50 = vpack.c.bf16 %v3085_v9, %v3081_v24  ;;  %v9528_v60 = vld [vmem:[#allocation76_spill] sm:$0xff]  ;;  %v5789_v9 = vpack.c.bf16 %v4401_v26, %v4400_v49 }
 0x33c   :  { %v9529_v19 = vld [vmem:[#allocation16_spill] sm:$0xff] }
 0x33d   :  { %3761 = vmatmul.mubr.f32.gmra.mrb[214].mxu1 %v7979_v13  ;;  %v3084_v13 = vld [vmem:[#allocation8 + $0x7b0] sm:$0xff]  ;;  %v8251_v48 = vrot.slane %v6631_v54, %v9529_v19  ;;  %v9531_v24 = vld [vmem:[#allocation80_spill] sm:$0xff] }
 0x33e   :  { %3766 = vmatprep.mubr.f32.mxu1 %v7987_v56  ;;  %5771 = vmatpush1.bf16.msra.mxu1 %v5770_v30  ;;  %v3093_v56 = vld [vmem:[#allocation8 + $0x7f8] sm:$0xff]  ;;  %v5782_v47 = vpack.c.bf16 %v3084_v13, %v3080_v37  ;;  %v9530_v30 = vld [vmem:[#allocation78_spill] sm:$0xff] }
 0x33f   :  { %5773 = vmatprep.subr.bf16.mxu1 %v5772_v20  ;;  %v5784_v42 = vpack.c.bf16 %v3093_v56, %v3089_v44  ;;  %v4403_v37 = vld [vmem:[%s9175_s8 + $0x18] sm:$0xff] }
 0x341   :  { %3767 = vmatmul.mubr.f32.gmra.mrb[216].mxu1 %v7989_v4  ;;  %v3092_v4 = vld [vmem:[#allocation8 + $0x7f0] sm:$0xff] }
 0x342   :  { %3772 = vmatprep.mubr.f32.mxu1 %v9511_v52  ;;  %5775 = vmatpush1.bf16.msra.mxu1 %v5774_v40  ;;  %v5786_v46 = vpack.c.bf16 %v3092_v4, %v3088_v53  ;;  %v4404_v4 = vld [vmem:[%s9175_s8 + $0x20] sm:$0xff] }
 0x343   :  { %5777 = vmatprep.subr.bf16.mxu1 %v5776_v12 }
 0x345   :  { %3773 = vmatmul.mubr.f32.gmra.mrb[218].mxu1 %v9512_v39 }
 0x346   :  { %3778 = vmatprep.mubr.f32.mxu1 %v9513_v16  ;;  %5779 = vmatpush1.bf16.msra.mxu1 %v5778_v6 }
 0x347   :  { %5781 = vmatprep.subr.bf16.mxu1 %v5780_v50  ;;  %v4402_v50 = vld [vmem:[%s9175_s8 + $0x10] sm:$0xff] }
 0x349   :  { %3779 = vmatmul.mubr.f32.gmra.mrb[220].mxu1 %v9514_v32 }
 0x34a   :  { %3784 = vmatprep.mubr.f32.mxu1 %v9515_v8  ;;  %5783 = vmatpush1.bf16.msra.mxu1 %v5782_v47  ;;  %v5792_v47 = vpack.c.bf16 %v4403_v37, %v4402_v50  ;;  %v4410_v50 = vld [vmem:[%s9175_s8 + $0x50] sm:$0xff]  ;;  %v4411_v37 = vld [vmem:[%s9175_s8 + $0x58] sm:$0xff] }
 0x34b   :  { %5785 = vmatprep.subr.bf16.mxu1 %v5784_v42 }
 0x34d   :  { %3785 = vmatmul.mubr.f32.gmra.mrb[222].mxu1 %v9516_v43 }
 0x34e   :  { %3790 = vmatprep.mubr.f32.mxu1 %v9517_v59  ;;  %5787 = vmatpush1.bf16.msra.mxu1 %v5786_v46 }
 0x351   :  { %3791 = vmatmul.mubr.f32.gmra.mrb[224].mxu1 %v9518_v58  ;;  %v9532_v58 = vld [vmem:[#allocation82_spill] sm:$0xff] }
 0x352   :  { %3796 = vmatprep.mubr.f32.mxu1 %v9519_v51 }
 0x355   :  { %3797 = vmatmul.mubr.f32.gmra.mrb[226].mxu1 %v9520_v2 }
 0x356   :  { %3802 = vmatprep.mubr.f32.mxu1 %v9521_v61 }
 0x359   :  { %3803 = vmatmul.mubr.f32.gmra.mrb[228].mxu1 %v9522_v21  ;;  %v4406_v21 = vld [vmem:[%s9175_s8 + $0x30] sm:$0xff] }
 0x35a   :  { %3808 = vmatprep.mubr.f32.mxu1 %v9523_v27 }
 0x35d   :  { %3809 = vmatmul.mubr.f32.gmra.mrb[230].mxu1 %v9524_v41 }
 0x35e   :  { %3814 = vmatprep.mubr.f32.mxu1 %v9525_v1 }
 0x361   :  { %3815 = vmatmul.mubr.f32.gmra.mrb[232].mxu1 %v9526_v7 }
 0x362   :  { %3820 = vmatprep.mubr.f32.mxu1 %v9528_v60 }
 0x364   :  { %v2391_v10 = vpop.f32.mrb[128].mxu1 }
 0x365   :  { %v6012_v63 = vadd.f32 %v2391_v10, %v8247_v28  ;;  %v2393_v22 = vpop.f32.mrb[129].mxu1  ;;  %3821 = vmatmul.mubr.f32.gmra.mrb[234].mxu1 %v9530_v30  ;;  %v9533_v10 = vld [vmem:[#allocation84_spill] sm:$0xff] }
 0x366   :  { %v6013_v20 = vadd.f32 %v2393_v22, %v8251_v48  ;;  %3826 = vmatprep.mubr.f32.mxu1 %v8087_v23 }
 0x367   :  { %v2584_v11 = vmul.f32 0.01, %v6012_v63 }
 0x368   :  { %v2585_v5 = vmul.f32 0.01, %v6013_v20  ;;  %v2397_v40 = vpop.f32.mrb[130].mxu1 }
 0x369   :  { %v6014_v12 = vadd.f32 %v2397_v40, %v8247_v28  ;;  %v2399_v34 = vpop.f32.mrb[131].mxu1  ;;  %3827 = vmatmul.mubr.f32.gmra.mrb[236].mxu1 %v8089_v3  ;;  %v8269_v52 = vmax.f32 %v6012_v63, %v2584_v11  ;;  %v9534_v40 = vld [vmem:[#allocation86_spill] sm:$0xff] }
 0x36a   :  { %v8265_v33 = vmax.f32 %v6013_v20, %v2585_v5  ;;  %v6015_v23 = vadd.f32 %v2399_v34, %v8251_v48  ;;  %3832 = vmatprep.mubr.f32.mxu1 %v9531_v24  ;;  %v4408_v20 = vld [vmem:[%s9175_s8 + $0x40] sm:$0xff] }
 0x36b   :  { %v2588_v6 = vmul.f32 0.01, %v6014_v12 }
 0x36c   :  { %v2589_v13 = vmul.f32 0.01, %v6015_v23  ;;  %v2403_v3 = vpop.f32.mrb[132].mxu1  ;;  %3437 = vmatprep.mubr.f32.mxu0 %v8265_v33 }
 0x36d   :  { %v6016_v44 = vadd.f32 %v2403_v3, %v8247_v28  ;;  %v2405_v56 = vpop.f32.mrb[133].mxu1  ;;  %3438 = vmatmul.mubr.f32.vlgmr.msra.gmra.mrb[128].mxu0 %v8269_v52  ;;  %3833 = vmatmul.mubr.f32.gmra.mrb[238].mxu1 %v8099_v55  ;;  %v8285_v42 = vmax.f32 %v6014_v12, %v2588_v6  ;;  %v4405_v55 = vld [vmem:[%s9175_s8 + $0x28] sm:$0xff] }
 0x36e   :  { %v8281_v39 = vmax.f32 %v6015_v23, %v2589_v13  ;;  %v6017_v16 = vadd.f32 %v2405_v56, %v8251_v48  ;;  %3838 = vmatprep.mubr.f32.mxu1 %v8107_v29  ;;  %5790 = vmatpush1.bf16.msra.mxu0 %v5789_v9  ;;  %v5795_v51 = vpack.c.bf16 %v4405_v55, %v4404_v4  ;;  %v9535_v23 = vld [vmem:[#allocation88_spill] sm:$0xff] }
 0x36f   :  { %v2592_v53 = vmul.f32 0.01, %v6016_v44  ;;  %5791 = vmatprep.subr.bf16.mxu0 %v6733_v62 }
 0x370   :  { %v2593_v32 = vmul.f32 0.01, %v6017_v16  ;;  %v2409_v8 = vpop.f32.mrb[134].mxu1  ;;  %3443 = vmatprep.mubr.f32.mxu0 %v8281_v39 }
 0x371   :  { %v6018_v29 = vadd.f32 %v2409_v8, %v8247_v28  ;;  %v2411_v46 = vpop.f32.mrb[135].mxu1  ;;  %3444 = vmatmul.mubr.f32.gmra.mrb[130].mxu0 %v8285_v42  ;;  %3839 = vmatmul.mubr.f32.gmra.mrb[240].mxu1 %v8109_v35  ;;  %v8302_v2 = vmax.f32 %v6016_v44, %v2592_v53  ;;  %v4407_v35 = vld [vmem:[%s9175_s8 + $0x38] sm:$0xff]  ;;  %v5804_v53 = vpack.c.bf16 %v4411_v37, %v4410_v50 }
 0x372   :  { %v8298_v43 = vmax.f32 %v6017_v16, %v2593_v32  ;;  %v6019_v59 = vadd.f32 %v2411_v46, %v8251_v48  ;;  %3844 = vmatprep.mubr.f32.mxu1 %v9532_v58  ;;  %5793 = vmatpush1.bf16.msra.mxu0 %v5792_v47  ;;  %v5798_v63 = vpack.c.bf16 %v4407_v35, %v4406_v21  ;;  %v4412_v32 = vld [vmem:[%s9175_s8 + $0x60] sm:$0xff]  ;;  %v4414_v35 = vld [vmem:[%s9175_s8 + $0x70] sm:$0xff]  ;;  %v4419_v37 = vld [vmem:[%s9175_s8 + $0x98] sm:$0xff] }
 0x373   :  { %v2596_v61 = vmul.f32 0.01, %v6018_v29  ;;  %5794 = vmatprep.subr.bf16.mxu0 %v6733_v62 }
 0x374   :  { %v2597_v27 = vmul.f32 0.01, %v6019_v59  ;;  %v2415_v41 = vpop.f32.mrb[136].mxu1  ;;  %3449 = vmatprep.mubr.f32.mxu0 %v8298_v43 }
 0x375   :  { %v6020_v1 = vadd.f32 %v2415_v41, %v8247_v28  ;;  %v2417_v7 = vpop.f32.mrb[137].mxu1  ;;  %3450 = vmatmul.mubr.f32.gmra.mrb[132].mxu0 %v8302_v2  ;;  %3845 = vmatmul.mubr.f32.gmra.mrb[242].mxu1 %v8119_v57  ;;  %v8319_v22 = vmax.f32 %v6018_v29, %v2596_v61  ;;  %v4409_v57 = vld [vmem:[%s9175_s8 + $0x48] sm:$0xff] }
 0x376   :  { %v8315_v54 = vmax.f32 %v6019_v59, %v2597_v27  ;;  %v6021_v60 = vadd.f32 %v2417_v7, %v8251_v48  ;;  %3850 = vmatprep.mubr.f32.mxu1 %v9533_v10  ;;  %5796 = vmatpush1.bf16.msra.mxu0 %v5795_v51  ;;  %v5801_v24 = vpack.c.bf16 %v4409_v57, %v4408_v20 }
 0x377   :  { %v2600_v30 = vmul.f32 0.01, %v6020_v1  ;;  %5797 = vmatprep.subr.bf16.mxu0 %v6733_v62 }
 0x378   :  { %v2601_v11 = vmul.f32 0.01, %v6021_v60  ;;  %v2421_v49 = vpop.f32.mrb[138].mxu1  ;;  %3455 = vmatprep.mubr.f32.mxu0 %v8315_v54 }
 0x379   :  { %v6022_v26 = vadd.f32 %v2421_v49, %v8247_v28  ;;  %v2423_v5 = vpop.f32.mrb[139].mxu1  ;;  %3456 = vmatmul.mubr.f32.gmra.mrb[134].mxu0 %v8319_v22  ;;  %3851 = vmatmul.mubr.f32.gmra.mrb[244].mxu1 %v9534_v40  ;;  %v8336_v9 = vmax.f32 %v6020_v1, %v2600_v30  ;;  %v4417_v49 = vld [vmem:[%s9175_s8 + $0x88] sm:$0xff] }
 0x37a   :  { %v8332_v12 = vmax.f32 %v6021_v60, %v2601_v11  ;;  %v6023_v34 = vadd.f32 %v2423_v5, %v8251_v48  ;;  %3856 = vmatprep.mubr.f32.mxu1 %v9535_v23  ;;  %5799 = vmatpush1.bf16.msra.mxu0 %v5798_v63 }
 0x37b   :  { %v2604_v6 = vmul.f32 0.01, %v6022_v26  ;;  %5800 = vmatprep.subr.bf16.mxu0 %v6733_v62 }
 0x37c   :  { %v2605_v13 = vmul.f32 0.01, %v6023_v34  ;;  %v2427_v3 = vpop.f32.mrb[140].mxu1  ;;  %3461 = vmatprep.mubr.f32.mxu0 %v8332_v12 }
 0x37d   :  { %v6024_v44 = vadd.f32 %v2427_v3, %v8247_v28  ;;  %v2429_v56 = vpop.f32.mrb[141].mxu1  ;;  %3462 = vmatmul.mubr.f32.gmra.mrb[136].mxu0 %v8336_v9  ;;  %3857 = vmatmul.mubr.f32.gmra.mrb[246].mxu1 %v8139_v0  ;;  %v8353_v4 = vmax.f32 %v6022_v26, %v2604_v6  ;;  %v4413_v0 = vld [vmem:[%s9175_s8 + $0x68] sm:$0xff] }
 0x37e   :  { %v8349_v16 = vmax.f32 %v6023_v34, %v2605_v13  ;;  %v6025_v47 = vadd.f32 %v2429_v56, %v8251_v48  ;;  %3862 = vmatprep.mubr.f32.mxu1 %v8147_v17  ;;  %5802 = vmatpush1.bf16.msra.mxu0 %v5801_v24  ;;  %v5807_v51 = vpack.c.bf16 %v4413_v0, %v4412_v32 }
 0x37f   :  { %v2608_v55 = vmul.f32 0.01, %v6024_v44  ;;  %5803 = vmatprep.subr.bf16.mxu0 %v6733_v62 }
 0x380   :  { %v2609_v8 = vmul.f32 0.01, %v6025_v47  ;;  %v2433_v29 = vpop.f32.mrb[142].mxu1  ;;  %3467 = vmatprep.mubr.f32.mxu0 %v8349_v16 }
 0x381   :  { %v6026_v17 = vadd.f32 %v2433_v29, %v8247_v28  ;;  %v2435_v46 = vpop.f32.mrb[143].mxu1  ;;  %3468 = vmatmul.mubr.f32.gmra.mrb[138].mxu0 %v8353_v4  ;;  %3863 = vmatmul.mubr.f32.gmra.mrb[248].mxu1 %v8149_v38  ;;  %v8370_v61 = vmax.f32 %v6024_v44, %v2608_v55  ;;  %v4415_v38 = vld [vmem:[%s9175_s8 + $0x78] sm:$0xff] }
 0x382   :  { %v8366_v59 = vmax.f32 %v6025_v47, %v2609_v8  ;;  %v6027_v58 = vadd.f32 %v2435_v46, %v8251_v48  ;;  %3868 = vmatprep.mubr.f32.mxu1 %v8157_v14  ;;  %5805 = vmatpush1.bf16.msra.mxu0 %v5804_v53  ;;  %v5810_v10 = vpack.c.bf16 %v4415_v38, %v4414_v35  ;;  %v4421_v53 = vld [vmem:[%s9175_s8 + $0xa8] sm:$0xff] }
 0x383   :  { %v2612_v21 = vmul.f32 0.01, %v6026_v17  ;;  %5806 = vmatprep.subr.bf16.mxu0 %v6733_v62 }
 0x384   :  { %v2613_v27 = vmul.f32 0.01, %v6027_v58  ;;  %v2439_v41 = vpop.f32.mrb[144].mxu1  ;;  %3473 = vmatprep.mubr.f32.mxu0 %v8366_v59 }
 0x385   :  { %v6028_v14 = vadd.f32 %v2439_v41, %v8247_v28  ;;  %v2441_v1 = vpop.f32.mrb[145].mxu1  ;;  %3474 = vmatmul.mubr.f32.gmra.mrb[140].mxu0 %v8370_v61  ;;  %3869 = vmatmul.mubr.f32.gmra.mrb[250].mxu1 %v8159_v36  ;;  %v8387_v63 = vmax.f32 %v6026_v17, %v2612_v21 }
 0x386   :  { %v8383_v7 = vmax.f32 %v6027_v58, %v2613_v27  ;;  %v6029_v60 = vadd.f32 %v2441_v1, %v8251_v48  ;;  %3874 = vmatprep.mubr.f32.mxu1 %v8167_v18  ;;  %5808 = vmatpush1.bf16.msra.mxu0 %v5807_v51  ;;  %v4416_v18 = vld [vmem:[%s9175_s8 + $0x80] sm:$0xff]  ;;  %v4422_v51 = vld [vmem:[%s9175_s8 + $0xb0] sm:$0xff] }
 0x387   :  { %v2616_v30 = vmul.f32 0.01, %v6028_v14  ;;  %5809 = vmatprep.subr.bf16.mxu0 %v6733_v62  ;;  %v5813_v40 = vpack.c.bf16 %v4417_v49, %v4416_v18 }
 0x388   :  { %v2617_v20 = vmul.f32 0.01, %v6029_v60  ;;  %v2445_v57 = vpop.f32.mrb[146].mxu1  ;;  %3479 = vmatprep.mubr.f32.mxu0 %v8383_v7 }
 0x389   :  { %v6030_v11 = vadd.f32 %v2445_v57, %v8247_v28  ;;  %v2447_v36 = vpop.f32.mrb[147].mxu1  ;;  %3480 = vmatmul.mubr.f32.gmra.mrb[142].mxu0 %v8387_v63  ;;  %3875 = vmatmul.mubr.f32.gmra.mrb[252].mxu1 %v8169_v25  ;;  %v8404_v34 = vmax.f32 %v6028_v14, %v2616_v30 }
 0x38a   :  { %v8400_v26 = vmax.f32 %v6029_v60, %v2617_v20  ;;  %v6031_v5 = vadd.f32 %v2447_v36, %v8251_v48  ;;  %3880 = vmatprep.mubr.f32.mxu1 %v8175_v15  ;;  %5811 = vmatpush1.bf16.msra.mxu0 %v5810_v10  ;;  %v4418_v15 = vld [vmem:[%s9175_s8 + $0x90] sm:$0xff]  ;;  %v4424_v10 = vld [vmem:[%s9175_s8 + $0xc0] sm:$0xff] }
 0x38b   :  { %v2620_v23 = vmul.f32 0.01, %v6030_v11  ;;  %5812 = vmatprep.subr.bf16.mxu0 %v6733_v62  ;;  %v5816_v44 = vpack.c.bf16 %v4419_v37, %v4418_v15 }
 0x38c   :  { %v2621_v25 = vmul.f32 0.01, %v6031_v5  ;;  %v2451_v24 = vpop.f32.mrb[148].mxu1  ;;  %3485 = vmatprep.mubr.f32.mxu0 %v8400_v26 }
 0x38d   :  { %v6032_v6 = vadd.f32 %v2451_v24, %v8247_v28  ;;  %v2453_v50 = vpop.f32.mrb[149].mxu1  ;;  %3486 = vmatmul.mubr.f32.gmra.mrb[144].mxu0 %v8404_v34  ;;  %3881 = vmatmul.mubr.f32.gmra.mrb[254].mxu1 %v8177_v31  ;;  %v8421_v56 = vmax.f32 %v6030_v11, %v2620_v23  ;;  %v4420_v31 = vld [vmem:[%s9175_s8 + $0xa0] sm:$0xff] }
 0x38e   :  { %v8417_v13 = vmax.f32 %v6031_v5, %v2621_v25  ;;  %v6033_v3 = vadd.f32 %v2453_v50, %v8251_v48  ;;  %3951 = vmatprep.mubr.f32.mxu1 %v8265_v33  ;;  %5814 = vmatpush1.bf16.msra.mxu0 %v5813_v40  ;;  %v5819_v17 = vpack.c.bf16 %v4421_v53, %v4420_v31  ;;  %v4426_v40 = vld [vmem:[%s9175_s8 + $0xd0] sm:$0xff] }
 0x38f   :  { %v2624_v47 = vmul.f32 0.01, %v6032_v6  ;;  %5815 = vmatprep.subr.bf16.mxu0 %v6733_v62 }
 0x390   :  { %v2625_v55 = vmul.f32 0.01, %v6033_v3  ;;  %v2457_v32 = vpop.f32.mrb[150].mxu1  ;;  %3491 = vmatprep.mubr.f32.mxu0 %v8417_v13 }
 0x391   :  { %v6034_v33 = vadd.f32 %v2457_v32, %v8247_v28  ;;  %v2459_v0 = vpop.f32.mrb[151].mxu1  ;;  %3492 = vmatmul.mubr.f32.gmra.mrb[146].mxu0 %v8421_v56  ;;  %3952 = vmatmul.mubr.f32.vlgmr.msra.gmra.mrb[192].mxu1 %v8269_v52  ;;  %v8438_v46 = vmax.f32 %v6032_v6, %v2624_v47  ;;  %v4423_v52 = vld [vmem:[%s9175_s8 + $0xb8] sm:$0xff] }
 0x392   :  { %v8434_v8 = vmax.f32 %v6033_v3, %v2625_v55  ;;  %v6035_v29 = vadd.f32 %v2459_v0, %v8251_v48  ;;  %3957 = vmatprep.mubr.f32.mxu1 %v8281_v39  ;;  %5817 = vmatpush1.bf16.msra.mxu0 %v5816_v44  ;;  %v5822_v14 = vpack.c.bf16 %v4423_v52, %v4422_v51  ;;  %v4428_v44 = vld [vmem:[%s9175_s8 + $0xe0] sm:$0xff] }
 0x393   :  { %v2628_v58 = vmul.f32 0.01, %v6034_v33  ;;  %5818 = vmatprep.subr.bf16.mxu0 %v6733_v62 }
 0x394   :  { %v2629_v21 = vmul.f32 0.01, %v6035_v29  ;;  %v2463_v35 = vpop.f32.mrb[152].mxu1  ;;  %3497 = vmatprep.mubr.f32.mxu0 %v8434_v8 }
 0x395   :  { %v6036_v39 = vadd.f32 %v2463_v35, %v8247_v28  ;;  %v2465_v38 = vpop.f32.mrb[153].mxu1  ;;  %3498 = vmatmul.mubr.f32.gmra.mrb[148].mxu0 %v8438_v46  ;;  %3958 = vmatmul.mubr.f32.gmra.mrb[194].mxu1 %v8285_v42  ;;  %v8455_v1 = vmax.f32 %v6034_v33, %v2628_v58  ;;  %v4425_v42 = vld [vmem:[%s9175_s8 + $0xc8] sm:$0xff] }
 0x396   :  { %v8451_v27 = vmax.f32 %v6035_v29, %v2629_v21  ;;  %v6037_v41 = vadd.f32 %v2465_v38, %v8251_v48  ;;  %3963 = vmatprep.mubr.f32.mxu1 %v8298_v43  ;;  %5820 = vmatpush1.bf16.msra.mxu0 %v5819_v17  ;;  %v5825_v18 = vpack.c.bf16 %v4425_v42, %v4424_v10 }
 0x397   :  { %v2632_v60 = vmul.f32 0.01, %v6036_v39  ;;  %5821 = vmatprep.subr.bf16.mxu0 %v6733_v62 }
 0x398   :  { %v2633_v30 = vmul.f32 0.01, %v6037_v41  ;;  %v2469_v20 = vpop.f32.mrb[154].mxu1  ;;  %3503 = vmatprep.mubr.f32.mxu0 %v8451_v27 }
 0x399   :  { %v6038_v43 = vadd.f32 %v2469_v20, %v8247_v28  ;;  %v2471_v57 = vpop.f32.mrb[155].mxu1  ;;  %3504 = vmatmul.mubr.f32.gmra.mrb[150].mxu0 %v8455_v1  ;;  %3964 = vmatmul.mubr.f32.gmra.mrb[196].mxu1 %v8302_v2  ;;  %v8472_v49 = vmax.f32 %v6036_v39, %v2632_v60  ;;  %v4427_v2 = vld [vmem:[%s9175_s8 + $0xd8] sm:$0xff] }
 0x39a   :  { %v8468_v11 = vmax.f32 %v6037_v41, %v2633_v30  ;;  %v6039_v36 = vadd.f32 %v2471_v57, %v8251_v48  ;;  %3969 = vmatprep.mubr.f32.mxu1 %v8315_v54  ;;  %5823 = vmatpush1.bf16.msra.mxu0 %v5822_v14  ;;  %v5828_v15 = vpack.c.bf16 %v4427_v2, %v4426_v40 }
 0x39b   :  { %v2636_v5 = vmul.f32 0.01, %v6038_v43  ;;  %5824 = vmatprep.subr.bf16.mxu0 %v6733_v62 }
 0x39c   :  { %v2637_v23 = vmul.f32 0.01, %v6039_v36  ;;  %v2475_v25 = vpop.f32.mrb[156].mxu1  ;;  %3509 = vmatprep.mubr.f32.mxu0 %v8468_v11 }
 0x39d   :  { %v6040_v54 = vadd.f32 %v2475_v25, %v8247_v28  ;;  %v2477_v24 = vpop.f32.mrb[157].mxu1  ;;  %3510 = vmatmul.mubr.f32.gmra.mrb[152].mxu0 %v8472_v49  ;;  %3970 = vmatmul.mubr.f32.gmra.mrb[198].mxu1 %v8319_v22  ;;  %v8489_v37 = vmax.f32 %v6038_v43, %v2636_v5  ;;  %v4429_v22 = vld [vmem:[%s9175_s8 + $0xe8] sm:$0xff] }
 0x39e   :  { %v8485_v6 = vmax.f32 %v6039_v36, %v2637_v23  ;;  %v6041_v50 = vadd.f32 %v2477_v24, %v8251_v48  ;;  %3975 = vmatprep.mubr.f32.mxu1 %v8332_v12  ;;  %5826 = vmatpush1.bf16.msra.mxu0 %v5825_v18  ;;  %v5831_v33 = vpack.c.bf16 %v4429_v22, %v4428_v44 }
 0x39f   :  { %v2640_v3 = vmul.f32 0.01, %v6040_v54  ;;  %5827 = vmatprep.subr.bf16.mxu0 %v6733_v62 }
 0x3a0   :  { %v2641_v47 = vmul.f32 0.01, %v6041_v50  ;;  %v2481_v31 = vpop.f32.mrb[158].mxu1  ;;  %3515 = vmatprep.mubr.f32.mxu0 %v8485_v6 }
 0x3a1   :  { %v6042_v12 = vadd.f32 %v2481_v31, %v8247_v28  ;;  %v2483_v53 = vpop.f32.mrb[159].mxu1  ;;  %3516 = vmatmul.mubr.f32.gmra.mrb[154].mxu0 %v8489_v37  ;;  %3976 = vmatmul.mubr.f32.gmra.mrb[200].mxu1 %v8336_v9  ;;  %v8506_v0 = vmax.f32 %v6040_v54, %v2640_v3 }
 0x3a2   :  { %v8502_v55 = vmax.f32 %v6041_v50, %v2641_v47  ;;  %v6043_v32 = vadd.f32 %v2483_v53, %v8251_v48  ;;  %3981 = vmatprep.mubr.f32.mxu1 %v8349_v16  ;;  %5829 = vmatpush1.bf16.msra.mxu0 %v5828_v15 }
 0x3a3   :  { %v2644_v29 = vmul.f32 0.01, %v6042_v12  ;;  %5830 = vmatprep.subr.bf16.mxu0 %v6733_v62 }
 0x3a4   :  { %v2645_v17 = vmul.f32 0.01, %v6043_v32  ;;  %v2487_v58 = vpop.f32.mrb[160].mxu1  ;;  %3521 = vmatprep.mubr.f32.mxu0 %v8502_v55 }
 0x3a5   :  { %v6044_v51 = vadd.f32 %v2487_v58, %v8247_v28  ;;  %v2489_v9 = vpop.f32.mrb[161].mxu1  ;;  %3522 = vmatmul.mubr.f32.gmra.mrb[156].mxu0 %v8506_v0  ;;  %3982 = vmatmul.mubr.f32.gmra.mrb[202].mxu1 %v8353_v4  ;;  %v8517_v21 = vmax.f32 %v6042_v12, %v2644_v29 }
 0x3a6   :  { %v8513_v52 = vmax.f32 %v6043_v32, %v2645_v17  ;;  %v6045_v16 = vadd.f32 %v2489_v9, %v8251_v48  ;;  %3987 = vmatprep.mubr.f32.mxu1 %v8366_v59  ;;  %5832 = vmatpush1.bf16.msra.mxu0 %v5831_v33 }
 0x3a7   :  { %v2648_v35 = vmul.f32 0.01, %v6044_v51  ;;  %5833 = vmatprep.subr.bf16.mxu0 %v6733_v62 }
 0x3a8   :  { %v2649_v39 = vmul.f32 0.01, %v6045_v16  ;;  %v2493_v38 = vpop.f32.mrb[162].mxu1  ;;  %3527 = vmatprep.mubr.f32.mxu0 %v8513_v52 }
 0x3a9   :  { %v6046_v41 = vadd.f32 %v2493_v38, %v8247_v28  ;;  %v2495_v14 = vpop.f32.mrb[163].mxu1  ;;  %3528 = vmatmul.mubr.f32.gmra.mrb[158].mxu0 %v8517_v21  ;;  %3988 = vmatmul.mubr.f32.gmra.mrb[204].mxu1 %v8370_v61  ;;  %v8528_v60 = vmax.f32 %v6044_v51, %v2648_v35 }
 0x3aa   :  { %v8524_v4 = vmax.f32 %v6045_v16, %v2649_v39  ;;  %v6047_v59 = vadd.f32 %v2495_v14, %v8251_v48  ;;  %3993 = vmatprep.mubr.f32.mxu1 %v8383_v7 }
 0x3ab   :  { %v2652_v10 = vmul.f32 0.01, %v6046_v41 }
 0x3ac   :  { %v2653_v42 = vmul.f32 0.01, %v6047_v59  ;;  %v2499_v30 = vpop.f32.mrb[164].mxu1  ;;  %3533 = vmatprep.mubr.f32.mxu0 %v8524_v4 }
 0x3ad   :  { %v6048_v20 = vadd.f32 %v2499_v30, %v8247_v28  ;;  %v2501_v43 = vpop.f32.mrb[165].mxu1  ;;  %3534 = vmatmul.mubr.f32.gmra.mrb[160].mxu0 %v8528_v60  ;;  %3994 = vmatmul.mubr.f32.gmra.mrb[206].mxu1 %v8387_v63  ;;  %v8538_v7 = vmax.f32 %v6046_v41, %v2652_v10 }
 0x3ae   :  { %v8534_v61 = vmax.f32 %v6047_v59, %v2653_v42  ;;  %v6049_v57 = vadd.f32 %v2501_v43, %v8251_v48  ;;  %3999 = vmatprep.mubr.f32.mxu1 %v8400_v26  ;;  %v4430_v42 = vld [vmem:[%s9175_s8 + $0xf0] sm:$0xff] }
 0x3af   :  { %v2656_v36 = vmul.f32 0.01, %v6048_v20 }
 0x3b0   :  { %v2657_v18 = vmul.f32 0.01, %v6049_v57  ;;  %v2505_v5 = vpop.f32.mrb[166].mxu1  ;;  %3539 = vmatprep.mubr.f32.mxu0 %v8534_v61 }
 0x3b1   :  { %v6050_v40 = vadd.f32 %v2505_v5, %v8247_v28  ;;  %v2507_v2 = vpop.f32.mrb[167].mxu1  ;;  %3540 = vmatmul.mubr.f32.gmra.mrb[162].mxu0 %v8538_v7  ;;  %4000 = vmatmul.mubr.f32.gmra.mrb[208].mxu1 %v8404_v34  ;;  %v8548_v26 = vmax.f32 %v6048_v20, %v2656_v36 }
 0x3b2   :  { %v8544_v63 = vmax.f32 %v6049_v57, %v2657_v18  ;;  %v6051_v23 = vadd.f32 %v2507_v2, %v8251_v48  ;;  %4005 = vmatprep.mubr.f32.mxu1 %v8417_v13 }
 0x3b3   :  { %v2660_v25 = vmul.f32 0.01, %v6050_v40 }
 0x3b4   :  { %v2661_v54 = vmul.f32 0.01, %v6051_v23  ;;  %v2511_v24 = vpop.f32.mrb[168].mxu1  ;;  %3545 = vmatprep.mubr.f32.mxu0 %v8544_v63 }
 0x3b5   :  { %v6052_v50 = vadd.f32 %v2511_v24, %v8247_v28  ;;  %v2513_v15 = vpop.f32.mrb[169].mxu1  ;;  %3546 = vmatmul.mubr.f32.gmra.mrb[164].mxu0 %v8548_v26  ;;  %4006 = vmatmul.mubr.f32.gmra.mrb[210].mxu1 %v8421_v56  ;;  %v8558_v13 = vmax.f32 %v6050_v40, %v2660_v25 }
 0x3b6   :  { %v8554_v34 = vmax.f32 %v6051_v23, %v2661_v54  ;;  %v6053_v3 = vadd.f32 %v2513_v15, %v8251_v48  ;;  %4011 = vmatprep.mubr.f32.mxu1 %v8434_v8 }
 0x3b7   :  { %v2664_v44 = vmul.f32 0.01, %v6052_v50 }
 0x3b8   :  { %v2665_v22 = vmul.f32 0.01, %v6053_v3  ;;  %v2517_v47 = vpop.f32.mrb[170].mxu1  ;;  %3551 = vmatprep.mubr.f32.mxu0 %v8554_v34 }
 0x3b9   :  { %v6054_v31 = vadd.f32 %v2517_v47, %v8247_v28  ;;  %v2519_v12 = vpop.f32.mrb[171].mxu1  ;;  %3552 = vmatmul.mubr.f32.gmra.mrb[166].mxu0 %v8558_v13  ;;  %4012 = vmatmul.mubr.f32.gmra.mrb[212].mxu1 %v8438_v46  ;;  %v8568_v8 = vmax.f32 %v6052_v50, %v2664_v44 }
 0x3ba   :  { %v8564_v56 = vmax.f32 %v6053_v3, %v2665_v22  ;;  %v6055_v53 = vadd.f32 %v2519_v12, %v8251_v48  ;;  %4017 = vmatprep.mubr.f32.mxu1 %v8451_v27 }
 0x3bb   :  { %v2668_v32 = vmul.f32 0.01, %v6054_v31 }
 0x3bc   :  { %v2669_v33 = vmul.f32 0.01, %v6055_v53  ;;  %v2523_v29 = vpop.f32.mrb[172].mxu1  ;;  %3557 = vmatprep.mubr.f32.mxu0 %v8564_v56 }
 0x3bd   :  { %v6056_v17 = vadd.f32 %v2523_v29, %v8247_v28  ;;  %v2525_v58 = vpop.f32.mrb[173].mxu1  ;;  %3558 = vmatmul.mubr.f32.gmra.mrb[168].mxu0 %v8568_v8  ;;  %4018 = vmatmul.mubr.f32.gmra.mrb[214].mxu1 %v8455_v1  ;;  %v8578_v27 = vmax.f32 %v6054_v31, %v2668_v32 }
 0x3be   :  { %v8574_v46 = vmax.f32 %v6055_v53, %v2669_v33  ;;  %v6057_v51 = vadd.f32 %v2525_v58, %v8251_v48  ;;  %4023 = vmatprep.mubr.f32.mxu1 %v8468_v11 }
 0x3bf   :  { %v2672_v9 = vmul.f32 0.01, %v6056_v17 }
 0x3c0   :  { %v2673_v16 = vmul.f32 0.01, %v6057_v51  ;;  %v2529_v35 = vpop.f32.mrb[174].mxu1  ;;  %3563 = vmatprep.mubr.f32.mxu0 %v8574_v46 }
 0x3c1   :  { %v6058_v39 = vadd.f32 %v2529_v35, %v8247_v28  ;;  %v2531_v38 = vpop.f32.mrb[175].mxu1  ;;  %3564 = vmatmul.mubr.f32.gmra.mrb[170].mxu0 %v8578_v27  ;;  %4024 = vmatmul.mubr.f32.gmra.mrb[216].mxu1 %v8472_v49  ;;  %v8588_v11 = vmax.f32 %v6056_v17, %v2672_v9  ;;  %v4431_v49 = vld [vmem:[%s9175_s8 + $0xf8] sm:$0xff] }
 0x3c2   :  { %v8584_v1 = vmax.f32 %v6057_v51, %v2673_v16  ;;  %v6059_v41 = vadd.f32 %v2531_v38, %v8251_v48  ;;  %4029 = vmatprep.mubr.f32.mxu1 %v8485_v6  ;;  %v5834_v6 = vpack.c.bf16 %v4431_v49, %v4430_v42 }
 0x3c3   :  { %v2676_v14 = vmul.f32 0.01, %v6058_v39 }
 0x3c4   :  { %v2677_v59 = vmul.f32 0.01, %v6059_v41  ;;  %v2535_v10 = vpop.f32.mrb[176].mxu1  ;;  %3569 = vmatprep.mubr.f32.mxu0 %v8584_v1  ;;  %5835 = vmatpush1.bf16.msra.mxu0 %v5834_v6 }
 0x3c5   :  { %v6060_v30 = vadd.f32 %v2535_v10, %v8247_v28  ;;  %v2537_v20 = vpop.f32.mrb[177].mxu1  ;;  %3570 = vmatmul.mubr.f32.gmra.mrb[172].mxu0 %v8588_v11  ;;  %4030 = vmatmul.mubr.f32.gmra.mrb[218].mxu1 %v8489_v37  ;;  %v8604_v36 = vmax.f32 %v6058_v39, %v2676_v14 }
 0x3c6   :  { %v8600_v43 = vmax.f32 %v6059_v41, %v2677_v59  ;;  %v6061_v57 = vadd.f32 %v2537_v20, %v8251_v48  ;;  %4035 = vmatprep.mubr.f32.mxu1 %v8502_v55  ;;  %5836 = vmatprep.subr.bf16.mxu0 %v6733_v62 }
 0x3c7   :  { %v2680_v18 = vmul.f32 0.01, %v6060_v30 }
 0x3c8   :  { %v2681_v5 = vmul.f32 0.01, %v6061_v57  ;;  %v2541_v40 = vpop.f32.mrb[178].mxu1  ;;  %3575 = vmatprep.mubr.f32.mxu0 %v8600_v43 }
 0x3c9   :  { %v6062_v2 = vadd.f32 %v2541_v40, %v8247_v28  ;;  %v2543_v37 = vpop.f32.mrb[179].mxu1  ;;  %3576 = vmatmul.mubr.f32.gmra.mrb[174].mxu0 %v8604_v36  ;;  %4036 = vmatmul.mubr.f32.gmra.mrb[220].mxu1 %v8506_v0  ;;  %v8615_v25 = vmax.f32 %v6060_v30, %v2680_v18 }
 0x3ca   :  { %v8611_v23 = vmax.f32 %v6061_v57, %v2681_v5  ;;  %v6063_v55 = vadd.f32 %v2543_v37, %v8251_v48  ;;  %4041 = vmatprep.mubr.f32.mxu1 %v8513_v52 }
 0x3cb   :  { %v2684_v54 = vmul.f32 0.01, %v6062_v2 }
 0x3cc   :  { %v2685_v24 = vmul.f32 0.01, %v6063_v55  ;;  %v2547_v50 = vpop.f32.mrb[180].mxu1  ;;  %3581 = vmatprep.mubr.f32.mxu0 %v8611_v23 }
 0x3cd   :  { %v6064_v15 = vadd.f32 %v2547_v50, %v8247_v28  ;;  %v2549_v3 = vpop.f32.mrb[181].mxu1  ;;  %3582 = vmatmul.mubr.f32.gmra.mrb[176].mxu0 %v8615_v25  ;;  %4042 = vmatmul.mubr.f32.gmra.mrb[222].mxu1 %v8517_v21  ;;  %v8625_v52 = vmax.f32 %v6062_v2, %v2684_v54  ;;  %v4433_v50 = vld [vmem:[%s9175_s8 + $0x108] sm:$0xff] }
 0x3ce   :  { %v8621_v0 = vmax.f32 %v6063_v55, %v2685_v24  ;;  %v6065_v44 = vadd.f32 %v2549_v3, %v8251_v48  ;;  %4047 = vmatprep.mubr.f32.mxu1 %v8524_v4  ;;  %v4432_v24 = vld [vmem:[%s9175_s8 + $0x100] sm:$0xff] }
 0x3cf   :  { %v2688_v22 = vmul.f32 0.01, %v6064_v15 }
 0x3d0   :  { %v2689_v47 = vmul.f32 0.01, %v6065_v44  ;;  %v2553_v31 = vpop.f32.mrb[182].mxu1  ;;  %3587 = vmatprep.mubr.f32.mxu0 %v8621_v0 }
 0x3d1   :  { %v6066_v12 = vadd.f32 %v2553_v31, %v8247_v28  ;;  %v2555_v53 = vpop.f32.mrb[183].mxu1  ;;  %3588 = vmatmul.mubr.f32.gmra.mrb[178].mxu0 %v8625_v52  ;;  %4048 = vmatmul.mubr.f32.gmra.mrb[224].mxu1 %v8528_v60  ;;  %v8635_v4 = vmax.f32 %v6064_v15, %v2688_v22 }
 0x3d2   :  { %v8631_v21 = vmax.f32 %v6065_v44, %v2689_v47  ;;  %v6067_v32 = vadd.f32 %v2555_v53, %v8251_v48  ;;  %4053 = vmatprep.mubr.f32.mxu1 %v8534_v61  ;;  %v5837_v47 = vpack.c.bf16 %v4433_v50, %v4432_v24  ;;  %v4434_v53 = vld [vmem:[%s9175_s8 + $0x110] sm:$0xff] }
 0x3d3   :  { %v2692_v33 = vmul.f32 0.01, %v6066_v12 }
 0x3d4   :  { %v2693_v29 = vmul.f32 0.01, %v6067_v32  ;;  %v2559_v17 = vpop.f32.mrb[184].mxu1  ;;  %3593 = vmatprep.mubr.f32.mxu0 %v8631_v21 }
 0x3d5   :  { %v6068_v58 = vadd.f32 %v2559_v17, %v8247_v28  ;;  %v2561_v51 = vpop.f32.mrb[185].mxu1  ;;  %3594 = vmatmul.mubr.f32.gmra.mrb[180].mxu0 %v8635_v4  ;;  %4054 = vmatmul.mubr.f32.gmra.mrb[226].mxu1 %v8538_v7  ;;  %v2820_v61 = vmax.f32 %v6066_v12, %v2692_v33 }
 0x3d6   :  { %v2821_v60 = vmax.f32 %v6067_v32, %v2693_v29  ;;  %v6069_v9 = vadd.f32 %v2561_v51, %v8251_v48  ;;  %4059 = vmatprep.mubr.f32.mxu1 %v8544_v63 }
 0x3d7   :  { %v2696_v16 = vmul.f32 0.01, %v6068_v58 }
 0x3d8   :  { %v2697_v35 = vmul.f32 0.01, %v6069_v9  ;;  %v2565_v39 = vpop.f32.mrb[186].mxu1  ;;  %3599 = vmatprep.mubr.f32.mxu0 %v2821_v60 }
 0x3d9   :  { %v6070_v38 = vadd.f32 %v2565_v39, %v8247_v28  ;;  %v2567_v41 = vpop.f32.mrb[187].mxu1  ;;  %3600 = vmatmul.mubr.f32.gmra.mrb[182].mxu0 %v2820_v61  ;;  %4060 = vmatmul.mubr.f32.gmra.mrb[228].mxu1 %v8548_v26  ;;  %v2824_v7 = vmax.f32 %v6068_v58, %v2696_v16  ;;  %v4437_v16 = vld [vmem:[%s9175_s8 + $0x128] sm:$0xff] }
 0x3da   :  { %v2825_v14 = vmax.f32 %v6069_v9, %v2697_v35  ;;  %v6071_v59 = vadd.f32 %v2567_v41, %v8251_v48  ;;  %4065 = vmatprep.mubr.f32.mxu1 %v8554_v34 }
 0x3db   :  { %v2700_v10 = vmul.f32 0.01, %v6070_v38 }
 0x3dc   :  { %v2701_v42 = vmul.f32 0.01, %v6071_v59  ;;  %v2571_v63 = vpop.f32.mrb[188].mxu1  ;;  %3605 = vmatprep.mubr.f32.mxu0 %v2825_v14 }
 0x3dd   :  { %v6072_v49 = vadd.f32 %v2571_v63, %v8247_v28  ;;  %v2573_v30 = vpop.f32.mrb[189].mxu1  ;;  %3606 = vmatmul.mubr.f32.gmra.mrb[184].mxu0 %v2824_v7  ;;  %4066 = vmatmul.mubr.f32.gmra.mrb[230].mxu1 %v8558_v13  ;;  %v2828_v26 = vmax.f32 %v6070_v38, %v2700_v10  ;;  %v4438_v63 = vld [vmem:[%s9175_s8 + $0x130] sm:$0xff] }
 0x3de   :  { %v2829_v20 = vmax.f32 %v6071_v59, %v2701_v42  ;;  %v6073_v6 = vadd.f32 %v2573_v30, %v8251_v48  ;;  %4071 = vmatprep.mubr.f32.mxu1 %v8564_v56 }
 0x3df   :  { %v2704_v57 = vmul.f32 0.01, %v6072_v49 }
 0x3e0   :  { %v2705_v18 = vmul.f32 0.01, %v6073_v6  ;;  %v2577_v34 = vpop.f32.mrb[190].mxu1  ;;  %3611 = vmatprep.mubr.f32.mxu0 %v2829_v20 }
 0x3e1   :  { %v6074_v5 = vadd.f32 %v2577_v34, %v8247_v28  ;;  %v2579_v40 = vpop.f32.mrb[191].mxu1  ;;  %3612 = vmatmul.mubr.f32.gmra.mrb[186].mxu0 %v2828_v26  ;;  %4072 = vmatmul.mubr.f32.gmra.mrb[232].mxu1 %v8568_v8  ;;  %v2832_v13 = vmax.f32 %v6072_v49, %v2704_v57  ;;  %v9536_v8 = vld [vmem:[#allocation13_spill] sm:$0xff]  ;;  %v4439_v49 = vld [vmem:[%s9175_s8 + $0x138] sm:$0xff] }
 0x3e2   :  { %v2833_v2 = vmax.f32 %v6073_v6, %v2705_v18  ;;  %v6075_v37 = vadd.f32 %v2579_v40, %v8251_v48  ;;  %4077 = vmatprep.mubr.f32.mxu1 %v8574_v46  ;;  %v8669_v48 = vld [vmem:[%s9174_s7] sm:$0xf]  ;;  %v5846_v34 = vpack.c.bf16 %v4439_v49, %v4438_v63 }
 0x3e3   :  { %v2708_v55 = vmul.f32 0.01, %v6074_v5  ;;  %v8673_v46 = vrot.slane %v8669_v48, %v9536_v8 }
 0x3e4   :  { %v2709_v54 = vmul.f32 0.01, %v6075_v37  ;;  %3617 = vmatprep.mubr.f32.mxu0 %v2833_v2 }
 0x3e5   :  { %3618 = vmatmul.mubr.f32.gmra.mrb[188].mxu0 %v2832_v13  ;;  %4078 = vmatmul.mubr.f32.gmra.mrb[234].mxu1 %v8578_v27  ;;  %v2836_v28 = vmax.f32 %v6074_v5, %v2708_v55  ;;  %v9537_v27 = vld [vmem:[#allocation15_spill] sm:$0xff] }
 0x3e6   :  { %v2837_v56 = vmax.f32 %v6075_v37, %v2709_v54  ;;  %4083 = vmatprep.mubr.f32.mxu1 %v8584_v1  ;;  %v8677_v1 = vrot.slane %v8669_v48, %v9537_v27  ;;  %v4441_v37 = vld [vmem:[%s9175_s8 + $0x148] sm:$0xff] }
 0x3e8   :  { %3623 = vmatprep.mubr.f32.mxu0 %v2837_v56 }
 0x3e9   :  { %3624 = vmatmul.mubr.f32.gmra.mrb[190].mxu0 %v2836_v28  ;;  %4084 = vmatmul.mubr.f32.gmra.mrb[236].mxu1 %v8588_v11 }
 0x3ea   :  { %4089 = vmatprep.mubr.f32.mxu1 %v8600_v43 }
 0x3ed   :  { %4090 = vmatmul.mubr.f32.gmra.mrb[238].mxu1 %v8604_v36 }
 0x3ee   :  { %4095 = vmatprep.mubr.f32.mxu1 %v8611_v23 }
 0x3f1   :  { %4096 = vmatmul.mubr.f32.gmra.mrb[240].mxu1 %v8615_v25 }
 0x3f2   :  { %4101 = vmatprep.mubr.f32.mxu1 %v8621_v0 }
 0x3f5   :  { %4102 = vmatmul.mubr.f32.gmra.mrb[242].mxu1 %v8625_v52 }
 0x3f6   :  { %4107 = vmatprep.mubr.f32.mxu1 %v8631_v21  ;;  %v4435_v21 = vld [vmem:[%s9175_s8 + $0x118] sm:$0xff] }
 0x3f7   :  { %v5840_v51 = vpack.c.bf16 %v4435_v21, %v4434_v53 }
 0x3f9   :  { %4108 = vmatmul.mubr.f32.gmra.mrb[244].mxu1 %v8635_v4 }
 0x3fa   :  { %4113 = vmatprep.mubr.f32.mxu1 %v2821_v60 }
 0x3fd   :  { %4114 = vmatmul.mubr.f32.gmra.mrb[246].mxu1 %v2820_v61  ;;  %v4436_v61 = vld [vmem:[%s9175_s8 + $0x120] sm:$0xff] }
 0x3fe   :  { %4119 = vmatprep.mubr.f32.mxu1 %v2825_v14 }
 0x401   :  { %4120 = vmatmul.mubr.f32.gmra.mrb[248].mxu1 %v2824_v7  ;;  %v5843_v7 = vpack.c.bf16 %v4437_v16, %v4436_v61 }
 0x402   :  { %4125 = vmatprep.mubr.f32.mxu1 %v2829_v20 }
 0x405   :  { %4126 = vmatmul.mubr.f32.gmra.mrb[250].mxu1 %v2828_v26 }
 0x406   :  { %4131 = vmatprep.mubr.f32.mxu1 %v2833_v2  ;;  %v4440_v2 = vld [vmem:[%s9175_s8 + $0x140] sm:$0xff] }
 0x407   :  { %v5849_v27 = vpack.c.bf16 %v4441_v37, %v4440_v2  ;;  %v4451_v2 = vld [vmem:[%s9175_s8 + $0x198] sm:$0xff] }
 0x409   :  { %4132 = vmatmul.mubr.f32.gmra.mrb[252].mxu1 %v2832_v13 }
 0x40a   :  { %4137 = vmatprep.mubr.f32.mxu1 %v2837_v56 }
 0x40d   :  { %4138 = vmatmul.mubr.f32.gmra.mrb[254].mxu1 %v2836_v28 }
 0x440   :  { %v3439_v11 = vpop.f32.mrb[128].mxu0 }
 0x441   :  { %v6076_v43 = vadd.f32 %v3439_v11, %v8673_v46  ;;  %v3441_v36 = vpop.f32.mrb[129].mxu0 }
 0x442   :  { %v6077_v23 = vadd.f32 %v3441_v36, %v8677_v1  ;;  %v4442_v36 = vld [vmem:[%s9175_s8 + $0x150] sm:$0xff] }
 0x443   :  { %v4144_v25 = vmul.f32 0.01, %v6076_v43 }
 0x444   :  { %v4145_v15 = vmul.f32 0.01, %v6077_v23  ;;  %v3445_v3 = vpop.f32.mrb[130].mxu0 }
 0x445   :  { %v6078_v0 = vadd.f32 %v3445_v3, %v8673_v46  ;;  %v3447_v44 = vpop.f32.mrb[131].mxu0  ;;  %v4272_v31 = vmax.f32 %v6076_v43, %v4144_v25 }
 0x446   :  { %v4273_v52 = vmax.f32 %v6077_v23, %v4145_v15  ;;  %v6079_v22 = vadd.f32 %v3447_v44, %v8677_v1  ;;  %v4443_v23 = vld [vmem:[%s9175_s8 + $0x158] sm:$0xff] }
 0x447   :  { %v4148_v12 = vmul.f32 0.01, %v6078_v0  ;;  %v5852_v44 = vpack.c.bf16 %v4443_v23, %v4442_v36  ;;  %v4452_v23 = vld [vmem:[%s9175_s8 + $0x1a0] sm:$0xff] }
 0x448   :  { %v4149_v32 = vmul.f32 0.01, %v6079_v22  ;;  %v3451_v4 = vpop.f32.mrb[132].mxu0  ;;  %4535 = vmatprep.mubr.f32.mxu0 %v4273_v52 }
 0x449   :  { %v6080_v33 = vadd.f32 %v3451_v4, %v8673_v46  ;;  %v3453_v29 = vpop.f32.mrb[133].mxu0  ;;  %4536 = vmatmul.mubr.f32.vlgmr.msra.gmra.mrb[192].mxu0 %v4272_v31  ;;  %v4276_v60 = vmax.f32 %v6078_v0, %v4148_v12  ;;  %v4445_v31 = vld [vmem:[%s9175_s8 + $0x168] sm:$0xff] }
 0x44a   :  { %v4277_v17 = vmax.f32 %v6079_v22, %v4149_v32  ;;  %v6081_v58 = vadd.f32 %v3453_v29, %v8677_v1  ;;  %5838 = vmatpush1.bf16.msra.mxu0 %v5837_v47  ;;  %v4444_v47 = vld [vmem:[%s9175_s8 + $0x160] sm:$0xff] }
 0x44b   :  { %v4152_v9 = vmul.f32 0.01, %v6080_v33  ;;  %5839 = vmatprep.subr.bf16.mxu0 %v6733_v62  ;;  %v5855_v29 = vpack.c.bf16 %v4445_v31, %v4444_v47 }
 0x44c   :  { %v4153_v35 = vmul.f32 0.01, %v6081_v58  ;;  %v3457_v39 = vpop.f32.mrb[134].mxu0  ;;  %4540 = vmatprep.mubr.f32.mxu0 %v4277_v17 }
 0x44d   :  { %v6082_v38 = vadd.f32 %v3457_v39, %v8673_v46  ;;  %v3459_v41 = vpop.f32.mrb[135].mxu0  ;;  %4541 = vmatmul.mubr.f32.gmra.mrb[194].mxu0 %v4276_v60  ;;  %v4280_v10 = vmax.f32 %v6080_v33, %v4152_v9  ;;  %v4447_v60 = vld [vmem:[%s9175_s8 + $0x178] sm:$0xff] }
 0x44e   :  { %v4281_v14 = vmax.f32 %v6081_v58, %v4153_v35  ;;  %v6083_v59 = vadd.f32 %v3459_v41, %v8677_v1  ;;  %5841 = vmatpush1.bf16.msra.mxu0 %v5840_v51  ;;  %v4446_v51 = vld [vmem:[%s9175_s8 + $0x170] sm:$0xff] }
 0x44f   :  { %v4156_v42 = vmul.f32 0.01, %v6082_v38  ;;  %5842 = vmatprep.subr.bf16.mxu0 %v6733_v62  ;;  %v5858_v41 = vpack.c.bf16 %v4447_v60, %v4446_v51 }
 0x450   :  { %v4157_v30 = vmul.f32 0.01, %v6083_v59  ;;  %v3463_v20 = vpop.f32.mrb[136].mxu0  ;;  %4545 = vmatprep.mubr.f32.mxu0 %v4281_v14 }
 0x451   :  { %v6084_v6 = vadd.f32 %v3463_v20, %v8673_v46  ;;  %v3465_v26 = vpop.f32.mrb[137].mxu0  ;;  %4546 = vmatmul.mubr.f32.gmra.mrb[196].mxu0 %v4280_v10  ;;  %v4284_v5 = vmax.f32 %v6082_v38, %v4156_v42  ;;  %v4449_v10 = vld [vmem:[%s9175_s8 + $0x188] sm:$0xff] }
 0x452   :  { %v4285_v57 = vmax.f32 %v6083_v59, %v4157_v30  ;;  %v6085_v18 = vadd.f32 %v3465_v26, %v8677_v1  ;;  %5844 = vmatpush1.bf16.msra.mxu0 %v5843_v7  ;;  %v4448_v7 = vld [vmem:[%s9175_s8 + $0x180] sm:$0xff] }
 0x453   :  { %v4160_v40 = vmul.f32 0.01, %v6084_v6  ;;  %5845 = vmatprep.subr.bf16.mxu0 %v6733_v62 }
 0x454   :  { %v4161_v13 = vmul.f32 0.01, %v6085_v18  ;;  %v3469_v55 = vpop.f32.mrb[138].mxu0  ;;  %4550 = vmatprep.mubr.f32.mxu0 %v4285_v57 }
 0x455   :  { %v6086_v54 = vadd.f32 %v3469_v55, %v8673_v46  ;;  %v3471_v56 = vpop.f32.mrb[139].mxu0  ;;  %4551 = vmatmul.mubr.f32.gmra.mrb[198].mxu0 %v4284_v5  ;;  %v4288_v11 = vmax.f32 %v6084_v6, %v4160_v40  ;;  %v4450_v40 = vld [vmem:[%s9175_s8 + $0x190] sm:$0xff] }
 0x456   :  { %v4289_v28 = vmax.f32 %v6085_v18, %v4161_v13  ;;  %v6087_v8 = vadd.f32 %v3471_v56, %v8677_v1  ;;  %5847 = vmatpush1.bf16.msra.mxu0 %v5846_v34  ;;  %v5861_v18 = vpack.c.bf16 %v4449_v10, %v4448_v7 }
 0x457   :  { %v4164_v43 = vmul.f32 0.01, %v6086_v54  ;;  %5848 = vmatprep.subr.bf16.mxu0 %v6733_v62 }
 0x458   :  { %v4165_v25 = vmul.f32 0.01, %v6087_v8  ;;  %v3475_v24 = vpop.f32.mrb[140].mxu0  ;;  %4555 = vmatprep.mubr.f32.mxu0 %v4289_v28 }
 0x459   :  { %v6088_v50 = vadd.f32 %v3475_v24, %v8673_v46  ;;  %v3477_v15 = vpop.f32.mrb[141].mxu0  ;;  %4556 = vmatmul.mubr.f32.gmra.mrb[200].mxu0 %v4288_v11  ;;  %v4292_v52 = vmax.f32 %v6086_v54, %v4164_v43  ;;  %v5864_v11 = vpack.c.bf16 %v4451_v2, %v4450_v40 }
 0x45a   :  { %v4293_v3 = vmax.f32 %v6087_v8, %v4165_v25  ;;  %v6089_v0 = vadd.f32 %v3477_v15, %v8677_v1  ;;  %5850 = vmatpush1.bf16.msra.mxu0 %v5849_v27  ;;  %v4453_v25 = vld [vmem:[%s9175_s8 + $0x1a8] sm:$0xff] }
 0x45b   :  { %v4168_v22 = vmul.f32 0.01, %v6088_v50  ;;  %5851 = vmatprep.subr.bf16.mxu0 %v6733_v62  ;;  %v5867_v47 = vpack.c.bf16 %v4453_v25, %v4452_v23 }
 0x45c   :  { %v4169_v12 = vmul.f32 0.01, %v6089_v0  ;;  %v3481_v53 = vpop.f32.mrb[142].mxu0  ;;  %4560 = vmatprep.mubr.f32.mxu0 %v4293_v3 }
 0x45d   :  { %v6090_v21 = vadd.f32 %v3481_v53, %v8673_v46  ;;  %v3483_v32 = vpop.f32.mrb[143].mxu0  ;;  %4561 = vmatmul.mubr.f32.gmra.mrb[202].mxu0 %v4292_v52  ;;  %v4296_v17 = vmax.f32 %v6088_v50, %v4168_v22  ;;  %v4454_v53 = vld [vmem:[%s9175_s8 + $0x1b0] sm:$0xff] }
 0x45e   :  { %v4297_v4 = vmax.f32 %v6089_v0, %v4169_v12  ;;  %v6091_v33 = vadd.f32 %v3483_v32, %v8677_v1  ;;  %5853 = vmatpush1.bf16.msra.mxu0 %v5852_v44 }
 0x45f   :  { %v4172_v58 = vmul.f32 0.01, %v6090_v21  ;;  %5854 = vmatprep.subr.bf16.mxu0 %v6733_v62 }
 0x460   :  { %v4173_v9 = vmul.f32 0.01, %v6091_v33  ;;  %v3487_v61 = vpop.f32.mrb[144].mxu0  ;;  %4565 = vmatprep.mubr.f32.mxu0 %v4297_v4 }
 0x461   :  { %v6092_v16 = vadd.f32 %v3487_v61, %v8673_v46  ;;  %v3489_v35 = vpop.f32.mrb[145].mxu0  ;;  %4566 = vmatmul.mubr.f32.gmra.mrb[204].mxu0 %v4296_v17  ;;  %v4300_v14 = vmax.f32 %v6090_v21, %v4172_v58  ;;  %v4455_v21 = vld [vmem:[%s9175_s8 + $0x1b8] sm:$0xff] }
 0x462   :  { %v4301_v39 = vmax.f32 %v6091_v33, %v4173_v9  ;;  %v6093_v38 = vadd.f32 %v3489_v35, %v8677_v1  ;;  %5856 = vmatpush1.bf16.msra.mxu0 %v5855_v29  ;;  %v5870_v9 = vpack.c.bf16 %v4455_v21, %v4454_v53  ;;  %v4456_v35 = vld [vmem:[%s9175_s8 + $0x1c0] sm:$0xff]  ;;  %v4462_v53 = vld [vmem:[%s9175_s8 + $0x1f0] sm:$0xff]  ;;  %v4463_v21 = vld [vmem:[%s9175_s8 + $0x1f8] sm:$0xff] }
 0x463   :  { %v4176_v59 = vmul.f32 0.01, %v6092_v16  ;;  %5857 = vmatprep.subr.bf16.mxu0 %v6733_v62 }
 0x464   :  { %v4177_v42 = vmul.f32 0.01, %v6093_v38  ;;  %v3493_v63 = vpop.f32.mrb[146].mxu0  ;;  %v8758_v49 = vpop.f32.mrb[192].mxu1  ;;  %4570 = vmatprep.mubr.f32.mxu0 %v4301_v39  ;;  %v4457_v39 = vld [vmem:[%s9175_s8 + $0x1c8] sm:$0xff] }
 0x465   :  { %v6094_v30 = vadd.f32 %v3493_v63, %v8673_v46  ;;  %v3495_v20 = vpop.f32.mrb[147].mxu0  ;;  %v8761_v6 = vpop.f32.mrb[193].mxu1  ;;  %4571 = vmatmul.mubr.f32.gmra.mrb[206].mxu0 %v4300_v14  ;;  %v4304_v34 = vmax.f32 %v6092_v16, %v4176_v59 }
 0x466   :  { %v4305_v26 = vmax.f32 %v6093_v38, %v4177_v42  ;;  %v6095_v57 = vadd.f32 %v3495_v20, %v8677_v1  ;;  %5859 = vmatpush1.bf16.msra.mxu0 %v5858_v41 }
 0x467   :  { %v4180_v5 = vmul.f32 0.01, %v6094_v30  ;;  %5860 = vmatprep.subr.bf16.mxu0 %v6733_v62 }
 0x468   :  { %v4181_v37 = vmul.f32 0.01, %v6095_v57  ;;  %v3499_v13 = vpop.f32.mrb[148].mxu0  ;;  %v8771_v55 = vpop.f32.mrb[194].mxu1  ;;  %4575 = vmatprep.mubr.f32.mxu0 %v4305_v26 }
 0x469   :  { %v6096_v54 = vadd.f32 %v3499_v13, %v8673_v46  ;;  %v3501_v56 = vpop.f32.mrb[149].mxu0  ;;  %v8774_v28 = vpop.f32.mrb[195].mxu1  ;;  %4576 = vmatmul.mubr.f32.gmra.mrb[208].mxu0 %v4304_v34  ;;  %v4308_v43 = vmax.f32 %v6094_v30, %v4180_v5  ;;  %v5873_v30 = vpack.c.bf16 %v4457_v39, %v4456_v35 }
 0x46a   :  { %v4309_v8 = vmax.f32 %v6095_v57, %v4181_v37  ;;  %v6097_v27 = vadd.f32 %v3501_v56, %v8677_v1  ;;  %5862 = vmatpush1.bf16.msra.mxu0 %v5861_v18  ;;  %v4458_v57 = vld [vmem:[%s9175_s8 + $0x1d0] sm:$0xff]  ;;  %v4459_v18 = vld [vmem:[%s9175_s8 + $0x1d8] sm:$0xff] }
 0x46b   :  { %v4184_v36 = vmul.f32 0.01, %v6096_v54  ;;  %5863 = vmatprep.subr.bf16.mxu0 %v6733_v62 }
 0x46c   :  { %v4185_v24 = vmul.f32 0.01, %v6097_v27  ;;  %v3505_v50 = vpop.f32.mrb[150].mxu0  ;;  %v8784_v15 = vpop.f32.mrb[196].mxu1  ;;  %4580 = vmatprep.mubr.f32.mxu0 %v4309_v8  ;;  %v5876_v8 = vpack.c.bf16 %v4459_v18, %v4458_v57 }
 0x46d   :  { %v6098_v3 = vadd.f32 %v3505_v50, %v8673_v46  ;;  %v3507_v0 = vpop.f32.mrb[151].mxu0  ;;  %v8787_v44 = vpop.f32.mrb[197].mxu1  ;;  %4581 = vmatmul.mubr.f32.gmra.mrb[210].mxu0 %v4308_v43  ;;  %v4312_v31 = vmax.f32 %v6096_v54, %v4184_v36  ;;  %v4460_v43 = vld [vmem:[%s9175_s8 + $0x1e0] sm:$0xff]  ;;  %v4461_v36 = vld [vmem:[%s9175_s8 + $0x1e8] sm:$0xff] }
 0x46e   :  { %v4313_v52 = vmax.f32 %v6097_v27, %v4185_v24  ;;  %v6099_v22 = vadd.f32 %v3507_v0, %v8677_v1  ;;  %5865 = vmatpush1.bf16.msra.mxu0 %v5864_v11 }
 0x46f   :  { %v4188_v12 = vmul.f32 0.01, %v6098_v3  ;;  %5866 = vmatprep.subr.bf16.mxu0 %v6733_v62 }
 0x470   :  { %v4189_v32 = vmul.f32 0.01, %v6099_v22  ;;  %v3511_v4 = vpop.f32.mrb[152].mxu0  ;;  %v8797_v33 = vpop.f32.mrb[198].mxu1  ;;  %4585 = vmatprep.mubr.f32.mxu0 %v4313_v52 }
 0x471   :  { %v6100_v29 = vadd.f32 %v3511_v4, %v8673_v46  ;;  %v3513_v17 = vpop.f32.mrb[153].mxu0  ;;  %v8800_v58 = vpop.f32.mrb[199].mxu1  ;;  %4586 = vmatmul.mubr.f32.gmra.mrb[212].mxu0 %v4312_v31  ;;  %v4316_v61 = vmax.f32 %v6098_v3, %v4188_v12 }
 0x472   :  { %v4317_v51 = vmax.f32 %v6099_v22, %v4189_v32  ;;  %v6101_v60 = vadd.f32 %v3513_v17, %v8677_v1  ;;  %5868 = vmatpush1.bf16.msra.mxu0 %v5867_v47  ;;  %v5879_v47 = vpack.c.bf16 %v4461_v36, %v4460_v43 }
 0x473   :  { %v4192_v16 = vmul.f32 0.01, %v6100_v29  ;;  %5869 = vmatprep.subr.bf16.mxu0 %v6733_v62 }
 0x474   :  { %v4193_v38 = vmul.f32 0.01, %v6101_v60  ;;  %v3517_v41 = vpop.f32.mrb[154].mxu0  ;;  %v8810_v14 = vpop.f32.mrb[200].mxu1  ;;  %4590 = vmatprep.mubr.f32.mxu0 %v4317_v51 }
 0x475   :  { %v6102_v59 = vadd.f32 %v3517_v41, %v8673_v46  ;;  %v3519_v7 = vpop.f32.mrb[155].mxu0  ;;  %v8813_v10 = vpop.f32.mrb[201].mxu1  ;;  %4591 = vmatmul.mubr.f32.gmra.mrb[214].mxu0 %v4316_v61  ;;  %v4320_v20 = vmax.f32 %v6100_v29, %v4192_v16  ;;  %v5882_v16 = vpack.c.bf16 %v4463_v21, %v4462_v53 }
 0x476   :  { %v4321_v42 = vmax.f32 %v6101_v60, %v4193_v38  ;;  %v6103_v63 = vadd.f32 %v3519_v7, %v8677_v1  ;;  %5871 = vmatpush1.bf16.msra.mxu0 %v5870_v9 }
 0x477   :  { %v4196_v26 = vmul.f32 0.01, %v6102_v59  ;;  %5872 = vmatprep.subr.bf16.mxu0 %v6733_v62 }
 0x478   :  { %v4197_v34 = vmul.f32 0.01, %v6103_v63  ;;  %v3523_v5 = vpop.f32.mrb[156].mxu0  ;;  %v8823_v40 = vpop.f32.mrb[202].mxu1  ;;  %4595 = vmatprep.mubr.f32.mxu0 %v4321_v42 }
 0x479   :  { %v6104_v2 = vadd.f32 %v3523_v5, %v8673_v46  ;;  %v3525_v37 = vpop.f32.mrb[157].mxu0  ;;  %v8826_v13 = vpop.f32.mrb[203].mxu1  ;;  %4596 = vmatmul.mubr.f32.gmra.mrb[216].mxu0 %v4320_v20  ;;  %v4324_v27 = vmax.f32 %v6102_v59, %v4196_v26 }
 0x47a   :  { %v4325_v54 = vmax.f32 %v6103_v63, %v4197_v34  ;;  %v6105_v56 = vadd.f32 %v3525_v37, %v8677_v1  ;;  %5874 = vmatpush1.bf16.msra.mxu0 %v5873_v30 }
 0x47b   :  { %v4200_v11 = vmul.f32 0.01, %v6104_v2  ;;  %5875 = vmatprep.subr.bf16.mxu0 %v6733_v62 }
 0x47c   :  { %v4201_v23 = vmul.f32 0.01, %v6105_v56  ;;  %v3529_v25 = vpop.f32.mrb[158].mxu0  ;;  %v8836_v24 = vpop.f32.mrb[204].mxu1  ;;  %4600 = vmatprep.mubr.f32.mxu0 %v4325_v54 }
 0x47d   :  { %v6106_v50 = vadd.f32 %v3529_v25, %v8673_v46  ;;  %v3531_v3 = vpop.f32.mrb[159].mxu0  ;;  %v8839_v0 = vpop.f32.mrb[205].mxu1  ;;  %4601 = vmatmul.mubr.f32.gmra.mrb[218].mxu0 %v4324_v27  ;;  %v4328_v31 = vmax.f32 %v6104_v2, %v4200_v11 }
 0x47e   :  { %v4329_v52 = vmax.f32 %v6105_v56, %v4201_v23  ;;  %v6107_v22 = vadd.f32 %v3531_v3, %v8677_v1  ;;  %5877 = vmatpush1.bf16.msra.mxu0 %v5876_v8 }
 0x47f   :  { %v4204_v12 = vmul.f32 0.01, %v6106_v50  ;;  %5878 = vmatprep.subr.bf16.mxu0 %v6733_v62 }
 0x480   :  { %v4205_v32 = vmul.f32 0.01, %v6107_v22  ;;  %v3535_v4 = vpop.f32.mrb[160].mxu0  ;;  %v8849_v29 = vpop.f32.mrb[206].mxu1  ;;  %4605 = vmatprep.mubr.f32.mxu0 %v4329_v52 }
 0x481   :  { %v6108_v17 = vadd.f32 %v3535_v4, %v8673_v46  ;;  %v3537_v51 = vpop.f32.mrb[161].mxu0  ;;  %v8852_v60 = vpop.f32.mrb[207].mxu1  ;;  %4606 = vmatmul.mubr.f32.gmra.mrb[220].mxu0 %v4328_v31  ;;  %v4332_v35 = vmax.f32 %v6106_v50, %v4204_v12 }
 0x482   :  { %v4333_v9 = vmax.f32 %v6107_v22, %v4205_v32  ;;  %v6109_v61 = vadd.f32 %v3537_v51, %v8677_v1  ;;  %5880 = vmatpush1.bf16.msra.mxu0 %v5879_v47 }
 0x483   :  { %v4208_v39 = vmul.f32 0.01, %v6108_v17  ;;  %5881 = vmatprep.subr.bf16.mxu0 %v6733_v62 }
 0x484   :  { %v4209_v38 = vmul.f32 0.01, %v6109_v61  ;;  %v3541_v41 = vpop.f32.mrb[162].mxu0  ;;  %v8856_v59 = vpop.f32.mrb[208].mxu1  ;;  %4610 = vmatprep.mubr.f32.mxu0 %v4333_v9 }
 0x485   :  { %v6110_v7 = vadd.f32 %v3541_v41, %v8673_v46  ;;  %v3543_v42 = vpop.f32.mrb[163].mxu0  ;;  %v8859_v63 = vpop.f32.mrb[209].mxu1  ;;  %4611 = vmatmul.mubr.f32.gmra.mrb[222].mxu0 %v4332_v35  ;;  %v4336_v26 = vmax.f32 %v6108_v17, %v4208_v39 }
 0x486   :  { %v4337_v30 = vmax.f32 %v6109_v61, %v4209_v38  ;;  %v6111_v20 = vadd.f32 %v3543_v42, %v8677_v1  ;;  %5883 = vmatpush1.bf16.msra.mxu0 %v5882_v16 }
 0x487   :  { %v4212_v57 = vmul.f32 0.01, %v6110_v7 }
 0x488   :  { %v4213_v18 = vmul.f32 0.01, %v6111_v20  ;;  %v3547_v34 = vpop.f32.mrb[164].mxu0  ;;  %v8862_v62 = vpop.f32.mrb[210].mxu1  ;;  %4615 = vmatprep.mubr.f32.mxu0 %v4337_v30 }
 0x489   :  { %v6112_v5 = vadd.f32 %v3547_v34, %v8673_v46  ;;  %v3549_v2 = vpop.f32.mrb[165].mxu0  ;;  %v8865_v37 = vpop.f32.mrb[211].mxu1  ;;  %4616 = vmatmul.mubr.f32.gmra.mrb[224].mxu0 %v4336_v26  ;;  %v4340_v8 = vmax.f32 %v6110_v7, %v4212_v57 }
 0x48a   :  { %v4341_v54 = vmax.f32 %v6111_v20, %v4213_v18  ;;  %v6113_v56 = vadd.f32 %v3549_v2, %v8677_v1 }
 0x48b   :  { %v4216_v27 = vmul.f32 0.01, %v6112_v5 }
 0x48c   :  { %v4217_v11 = vmul.f32 0.01, %v6113_v56  ;;  %v3553_v43 = vpop.f32.mrb[166].mxu0  ;;  %v8868_v36 = vpop.f32.mrb[212].mxu1  ;;  %4620 = vmatprep.mubr.f32.mxu0 %v4341_v54 }
 0x48d   :  { %v6114_v23 = vadd.f32 %v3553_v43, %v8673_v46  ;;  %v3555_v25 = vpop.f32.mrb[167].mxu0  ;;  %v8871_v50 = vpop.f32.mrb[213].mxu1  ;;  %4621 = vmatmul.mubr.f32.gmra.mrb[226].mxu0 %v4340_v8  ;;  %v4344_v22 = vmax.f32 %v6112_v5, %v4216_v27 }
 0x48e   :  { %v4345_v3 = vmax.f32 %v6113_v56, %v4217_v11  ;;  %v6115_v52 = vadd.f32 %v3555_v25, %v8677_v1 }
 0x48f   :  { %v4220_v47 = vmul.f32 0.01, %v6114_v23 }
 0x490   :  { %v4221_v31 = vmul.f32 0.01, %v6115_v52  ;;  %v3559_v12 = vpop.f32.mrb[168].mxu0  ;;  %v8874_v53 = vpop.f32.mrb[214].mxu1  ;;  %4625 = vmatprep.mubr.f32.mxu0 %v4345_v3 }
 0x491   :  { %v6116_v21 = vadd.f32 %v3559_v12, %v8673_v46  ;;  %v3561_v32 = vpop.f32.mrb[169].mxu0  ;;  %v8877_v4 = vpop.f32.mrb[215].mxu1  ;;  %4626 = vmatmul.mubr.f32.gmra.mrb[228].mxu0 %v4344_v22  ;;  %v4348_v9 = vmax.f32 %v6114_v23, %v4220_v47 }
 0x492   :  { %v4349_v17 = vmax.f32 %v6115_v52, %v4221_v31  ;;  %v6117_v51 = vadd.f32 %v3561_v32, %v8677_v1 }
 0x493   :  { %v4224_v61 = vmul.f32 0.01, %v6116_v21 }
 0x494   :  { %v4225_v16 = vmul.f32 0.01, %v6117_v51  ;;  %v3565_v35 = vpop.f32.mrb[170].mxu0  ;;  %v8880_v39 = vpop.f32.mrb[216].mxu1  ;;  %4630 = vmatprep.mubr.f32.mxu0 %v4349_v17 }
 0x495   :  { %v6118_v38 = vadd.f32 %v3565_v35, %v8673_v46  ;;  %v3567_v41 = vpop.f32.mrb[171].mxu0  ;;  %v8883_v7 = vpop.f32.mrb[217].mxu1  ;;  %4631 = vmatmul.mubr.f32.gmra.mrb[230].mxu0 %v4348_v9  ;;  %v4352_v20 = vmax.f32 %v6116_v21, %v4224_v61 }
 0x496   :  { %v4353_v42 = vmax.f32 %v6117_v51, %v4225_v16  ;;  %v6119_v30 = vadd.f32 %v3567_v41, %v8677_v1 }
 0x497   :  { %v4228_v26 = vmul.f32 0.01, %v6118_v38 }
 0x498   :  { %v4229_v57 = vmul.f32 0.01, %v6119_v30  ;;  %v3571_v18 = vpop.f32.mrb[172].mxu0  ;;  %v8886_v34 = vpop.f32.mrb[218].mxu1  ;;  %4635 = vmatprep.mubr.f32.mxu0 %v4353_v42 }
 0x499   :  { %v6120_v5 = vadd.f32 %v3571_v18, %v8673_v46  ;;  %v3573_v2 = vpop.f32.mrb[173].mxu0  ;;  %v8889_v54 = vpop.f32.mrb[219].mxu1  ;;  %4636 = vmatmul.mubr.f32.gmra.mrb[232].mxu0 %v4352_v20  ;;  %v4356_v27 = vmax.f32 %v6118_v38, %v4228_v26 }
 0x49a   :  { %v4357_v56 = vmax.f32 %v6119_v30, %v4229_v57  ;;  %v6121_v8 = vadd.f32 %v3573_v2, %v8677_v1 }
 0x49b   :  { %v4232_v11 = vmul.f32 0.01, %v6120_v5 }
 0x49c   :  { %v4233_v43 = vmul.f32 0.01, %v6121_v8  ;;  %v3577_v23 = vpop.f32.mrb[174].mxu0  ;;  %v8892_v25 = vpop.f32.mrb[220].mxu1  ;;  %4640 = vmatprep.mubr.f32.mxu0 %v4357_v56 }
 0x49d   :  { %v6122_v3 = vadd.f32 %v3577_v23, %v8673_v46  ;;  %v3579_v52 = vpop.f32.mrb[175].mxu0  ;;  %v8895_v22 = vpop.f32.mrb[221].mxu1  ;;  %4641 = vmatmul.mubr.f32.gmra.mrb[234].mxu0 %v4356_v27  ;;  %v4360_v12 = vmax.f32 %v6120_v5, %v4232_v11 }
 0x49e   :  { %v4361_v47 = vmax.f32 %v6121_v8, %v4233_v43  ;;  %v6123_v31 = vadd.f32 %v3579_v52, %v8677_v1 }
 0x49f   :  { %v4236_v21 = vmul.f32 0.01, %v6122_v3 }
 0x4a0   :  { %v4237_v32 = vmul.f32 0.01, %v6123_v31  ;;  %v3583_v17 = vpop.f32.mrb[176].mxu0  ;;  %v8898_v51 = vpop.f32.mrb[222].mxu1  ;;  %4645 = vmatprep.mubr.f32.mxu0 %v4361_v47 }
 0x4a1   :  { %v6124_v9 = vadd.f32 %v3583_v17, %v8673_v46  ;;  %v3585_v61 = vpop.f32.mrb[177].mxu0  ;;  %v8901_v16 = vpop.f32.mrb[223].mxu1  ;;  %4646 = vmatmul.mubr.f32.gmra.mrb[236].mxu0 %v4360_v12  ;;  %v4364_v41 = vmax.f32 %v6122_v3, %v4236_v21 }
 0x4a2   :  { %v4365_v35 = vmax.f32 %v6123_v31, %v4237_v32  ;;  %v6125_v38 = vadd.f32 %v3585_v61, %v8677_v1 }
 0x4a3   :  { %v4240_v42 = vmul.f32 0.01, %v6124_v9 }
 0x4a4   :  { %v4241_v30 = vmul.f32 0.01, %v6125_v38  ;;  %v3589_v20 = vpop.f32.mrb[178].mxu0  ;;  %v8904_v26 = vpop.f32.mrb[224].mxu1  ;;  %4650 = vmatprep.mubr.f32.mxu0 %v4365_v35 }
 0x4a5   :  { %v6126_v57 = vadd.f32 %v3589_v20, %v8673_v46  ;;  %v3591_v18 = vpop.f32.mrb[179].mxu0  ;;  %v8907_v5 = vpop.f32.mrb[225].mxu1  ;;  %4651 = vmatmul.mubr.f32.gmra.mrb[238].mxu0 %v4364_v41  ;;  %v4368_v8 = vmax.f32 %v6124_v9, %v4240_v42 }
 0x4a6   :  { %v4369_v2 = vmax.f32 %v6125_v38, %v4241_v30  ;;  %v6127_v56 = vadd.f32 %v3591_v18, %v8677_v1 }
 0x4a7   :  { %v4244_v27 = vmul.f32 0.01, %v6126_v57 }
 0x4a8   :  { %v4245_v11 = vmul.f32 0.01, %v6127_v56  ;;  %v3595_v43 = vpop.f32.mrb[180].mxu0  ;;  %v8910_v23 = vpop.f32.mrb[226].mxu1  ;;  %4655 = vmatprep.mubr.f32.mxu0 %v4369_v2 }
 0x4a9   :  { %v6128_v3 = vadd.f32 %v3595_v43, %v8673_v46  ;;  %v3597_v52 = vpop.f32.mrb[181].mxu0  ;;  %v8913_v47 = vpop.f32.mrb[227].mxu1  ;;  %4656 = vmatmul.mubr.f32.gmra.mrb[240].mxu0 %v4368_v8  ;;  %v4372_v21 = vmax.f32 %v6126_v57, %v4244_v27 }
 0x4aa   :  { %v4373_v31 = vmax.f32 %v6127_v56, %v4245_v11  ;;  %v6129_v12 = vadd.f32 %v3597_v52, %v8677_v1 }
 0x4ab   :  { %v4248_v32 = vmul.f32 0.01, %v6128_v3 }
 0x4ac   :  { %v4249_v17 = vmul.f32 0.01, %v6129_v12  ;;  %v3601_v61 = vpop.f32.mrb[182].mxu0  ;;  %v8916_v9 = vpop.f32.mrb[228].mxu1  ;;  %4660 = vmatprep.mubr.f32.mxu0 %v4373_v31 }
 0x4ad   :  { %v6130_v35 = vadd.f32 %v3601_v61, %v8673_v46  ;;  %v3603_v38 = vpop.f32.mrb[183].mxu0  ;;  %v8919_v41 = vpop.f32.mrb[229].mxu1  ;;  %4661 = vmatmul.mubr.f32.gmra.mrb[242].mxu0 %v4372_v21  ;;  %v4376_v20 = vmax.f32 %v6128_v3, %v4248_v32 }
 0x4ae   :  { %v4377_v42 = vmax.f32 %v6129_v12, %v4249_v17  ;;  %v6131_v30 = vadd.f32 %v3603_v38, %v8677_v1 }
 0x4af   :  { %v4252_v18 = vmul.f32 0.01, %v6130_v35 }
 0x4b0   :  { %v4253_v2 = vmul.f32 0.01, %v6131_v30  ;;  %v3607_v56 = vpop.f32.mrb[184].mxu0  ;;  %v8922_v57 = vpop.f32.mrb[230].mxu1  ;;  %4665 = vmatprep.mubr.f32.mxu0 %v4377_v42 }
 0x4b1   :  { %v6132_v8 = vadd.f32 %v3607_v56, %v8673_v46  ;;  %v3609_v27 = vpop.f32.mrb[185].mxu0  ;;  %v8925_v11 = vpop.f32.mrb[231].mxu1  ;;  %4666 = vmatmul.mubr.f32.gmra.mrb[244].mxu0 %v4376_v20  ;;  %v4380_v31 = vmax.f32 %v6130_v35, %v4252_v18  ;;  %v8936_v35 = vrot.slane %v8669_v48, %v9529_v19 }
 0x4b2   :  { %v4381_v43 = vmax.f32 %v6131_v30, %v4253_v2  ;;  %v6133_v52 = vadd.f32 %v3609_v27, %v8677_v1 }
 0x4b3   :  { %v4256_v12 = vmul.f32 0.01, %v6132_v8 }
 0x4b4   :  { %v4257_v21 = vmul.f32 0.01, %v6133_v52  ;;  %v3613_v17 = vpop.f32.mrb[186].mxu0  ;;  %v8928_v3 = vpop.f32.mrb[232].mxu1  ;;  %4670 = vmatprep.mubr.f32.mxu0 %v4381_v43 }
 0x4b5   :  { %9538 = vst [vmem:[#allocation90_spill] sm:$0xff] %v8928_v3  ;;  %v6134_v32 = vadd.f32 %v3613_v17, %v8673_v46  ;;  %v3615_v61 = vpop.f32.mrb[187].mxu0  ;;  %v8931_v38 = vpop.f32.mrb[233].mxu1  ;;  %4671 = vmatmul.mubr.f32.gmra.mrb[246].mxu0 %v4380_v31  ;;  %v4384_v20 = vmax.f32 %v6132_v8, %v4256_v12  ;;  %v8946_v8 = vrot.slane %v8669_v48, %v9527_v45 }
 0x4b6   :  { %v4385_v42 = vmax.f32 %v6133_v52, %v4257_v21  ;;  %v6135_v56 = vadd.f32 %v3615_v61, %v8677_v1  ;;  %v6141_v21 = vadd.f32 %v8761_v6, %v8936_v35 }
 0x4b7   :  { %v4260_v30 = vmul.f32 0.01, %v6134_v32  ;;  %v6140_v48 = vadd.f32 %v8758_v49, %v8946_v8 }
 0x4b8   :  { %v4261_v18 = vmul.f32 0.01, %v6135_v56  ;;  %v3619_v2 = vpop.f32.mrb[188].mxu0  ;;  %v8938_v27 = vpop.f32.mrb[234].mxu1  ;;  %4675 = vmatprep.mubr.f32.mxu0 %v4385_v42  ;;  %v4147_v6 = vmul.f32 0.01, %v6141_v21 }
 0x4b9   :  { %9539 = vst [vmem:[#allocation92_spill] sm:$0xff] %v8938_v27  ;;  %v6136_v43 = vadd.f32 %v3619_v2, %v8673_v46  ;;  %v3621_v17 = vpop.f32.mrb[189].mxu0  ;;  %v8941_v3 = vpop.f32.mrb[235].mxu1  ;;  %4676 = vmatmul.mubr.f32.gmra.mrb[248].mxu0 %v4384_v20  ;;  %v4388_v19 = vmax.f32 %v6134_v32, %v4260_v30 }
 0x4ba   :  { %v4389_v52 = vmax.f32 %v6135_v56, %v4261_v18  ;;  %v6137_v31 = vadd.f32 %v3621_v17, %v8677_v1  ;;  %v6143_v17 = vadd.f32 %v8774_v28, %v8936_v35  ;;  %v4275_v49 = vmax.f32 %v6141_v21, %v4147_v6 }
 0x4bb   :  { %v4264_v12 = vmul.f32 0.01, %v6136_v43  ;;  %v6147_v21 = vadd.f32 %v8800_v58, %v8936_v35 }
 0x4bc   :  { %v4265_v61 = vmul.f32 0.01, %v6137_v31  ;;  %v3625_v42 = vpop.f32.mrb[190].mxu0  ;;  %v8950_v27 = vpop.f32.mrb[236].mxu1  ;;  %4680 = vmatprep.mubr.f32.mxu0 %v4389_v52 }
 0x4bd   :  { %9540 = vst [vmem:[#allocation94_spill] sm:$0xff] %v8950_v27  ;;  %v6138_v2 = vadd.f32 %v3625_v42, %v8673_v46  ;;  %v3627_v20 = vpop.f32.mrb[191].mxu0  ;;  %v8953_v56 = vpop.f32.mrb[237].mxu1  ;;  %4681 = vmatmul.mubr.f32.gmra.mrb[250].mxu0 %v4388_v19  ;;  %v4392_v32 = vmax.f32 %v6136_v43, %v4264_v12  ;;  %v4151_v43 = vmul.f32 0.01, %v6143_v17  ;;  %v6145_v12 = vadd.f32 %v8787_v44, %v8936_v35 }
 0x4be   :  { %v4393_v18 = vmax.f32 %v6137_v31, %v4265_v61  ;;  %v6139_v45 = vadd.f32 %v3627_v20, %v8677_v1  ;;  %v4146_v31 = vmul.f32 0.01, %v6140_v48  ;;  %v6142_v1 = vadd.f32 %v8771_v55, %v8946_v8 }
 0x4bf   :  { %v4268_v30 = vmul.f32 0.01, %v6138_v2  ;;  %v4155_v55 = vmul.f32 0.01, %v6145_v12 }
 0x4c0   :  { %v4269_v27 = vmul.f32 0.01, %v6139_v45  ;;  %v8960_v52 = vpop.f32.mrb[238].mxu1  ;;  %4685 = vmatprep.mubr.f32.mxu0 %v4393_v18  ;;  %v4274_v20 = vmax.f32 %v6140_v48, %v4146_v31  ;;  %v4150_v18 = vmul.f32 0.01, %v6142_v1  ;;  %v6146_v48 = vadd.f32 %v8797_v33, %v8946_v8 }
 0x4c1   :  { %v8962_v46 = vpop.f32.mrb[239].mxu1  ;;  %4686 = vmatmul.mubr.f32.gmra.mrb[252].mxu0 %v4392_v32  ;;  %v4396_v61 = vmax.f32 %v6138_v2, %v4268_v30  ;;  %v4283_v6 = vmax.f32 %v6145_v12, %v4155_v55  ;;  %v6151_v33 = vadd.f32 %v8826_v13, %v8936_v35 }
 0x4c2   :  { %v4397_v19 = vmax.f32 %v6139_v45, %v4269_v27  ;;  %v6144_v27 = vadd.f32 %v8784_v15, %v8946_v8  ;;  %v4279_v45 = vmax.f32 %v6143_v17, %v4151_v43  ;;  %v4278_v32 = vmax.f32 %v6142_v1, %v4150_v18 }
 0x4c3   :  { %v6149_v15 = vadd.f32 %v8813_v10, %v8936_v35  ;;  %v6148_v1 = vadd.f32 %v8810_v14, %v8946_v8  ;;  %v4167_v55 = vmul.f32 0.01, %v6151_v33  ;;  %v6153_v14 = vadd.f32 %v8839_v0, %v8936_v35 }
 0x4c4   :  { %v8968_v42 = vpop.f32.mrb[240].mxu1  ;;  %4690 = vmatprep.mubr.f32.mxu0 %v4397_v19  ;;  %v4154_v30 = vmul.f32 0.01, %v6144_v27  ;;  %v4159_v19 = vmul.f32 0.01, %v6147_v21 }
 0x4c5   :  { %v8970_v28 = vpop.f32.mrb[241].mxu1  ;;  %4691 = vmatmul.mubr.f32.gmra.mrb[254].mxu0 %v4396_v61  ;;  %v4158_v61 = vmul.f32 0.01, %v6146_v48  ;;  %v4163_v43 = vmul.f32 0.01, %v6149_v15 }
 0x4c6   :  { %4760 = vmatprep.mubr.f32.mxu0 %v4275_v49  ;;  %v4282_v58 = vmax.f32 %v6144_v27, %v4154_v30  ;;  %v4287_v49 = vmax.f32 %v6147_v21, %v4159_v19  ;;  %v4162_v18 = vmul.f32 0.01, %v6148_v1  ;;  %v6150_v27 = vadd.f32 %v8823_v40, %v8946_v8 }
 0x4c7   :  { %v4286_v10 = vmax.f32 %v6146_v48, %v4158_v61  ;;  %v6152_v48 = vadd.f32 %v8836_v24, %v8946_v8  ;;  %v4171_v19 = vmul.f32 0.01, %v6153_v14  ;;  %v6155_v40 = vadd.f32 %v8852_v60, %v8936_v35 }
 0x4c8   :  { %v8976_v2 = vpop.f32.mrb[242].mxu1  ;;  %v4290_v13 = vmax.f32 %v6148_v1, %v4162_v18  ;;  %v4166_v30 = vmul.f32 0.01, %v6150_v27  ;;  %v6154_v1 = vadd.f32 %v8849_v29, %v8946_v8  ;;  %v6157_v24 = vadd.f32 %v8859_v63, %v8936_v35 }
 0x4c9   :  { %v8978_v44 = vpop.f32.mrb[243].mxu1  ;;  %4761 = vmatmul.mubr.f32.vlgmr.msra.gmra.mrb[192].mxu0 %v4274_v20  ;;  %v4170_v61 = vmul.f32 0.01, %v6152_v48  ;;  %v6159_v29 = vadd.f32 %v8865_v37, %v8936_v35 }
 0x4ca   :  { %4765 = vmatprep.mubr.f32.mxu0 %v4279_v45  ;;  %v4291_v45 = vmax.f32 %v6149_v15, %v4163_v43  ;;  %v4294_v0 = vmax.f32 %v6150_v27, %v4166_v30  ;;  %v4175_v43 = vmul.f32 0.01, %v6155_v40  ;;  %v4174_v18 = vmul.f32 0.01, %v6154_v1 }
 0x4cb   :  { %v4298_v60 = vmax.f32 %v6152_v48, %v4170_v61  ;;  %v6156_v27 = vadd.f32 %v8856_v59, %v8946_v8  ;;  %v6158_v48 = vadd.f32 %v8862_v62, %v8946_v8  ;;  %v6161_v59 = vadd.f32 %v8871_v50, %v8936_v35 }
 0x4cc   :  { %v8984_v17 = vpop.f32.mrb[244].mxu1  ;;  %v4302_v63 = vmax.f32 %v6154_v1, %v4174_v18  ;;  %v6163_v1 = vadd.f32 %v8877_v4, %v8936_v35  ;;  %v6165_v18 = vadd.f32 %v8883_v7, %v8936_v35 }
 0x4cd   :  { %v8986_v31 = vpop.f32.mrb[245].mxu1  ;;  %4766 = vmatmul.mubr.f32.gmra.mrb[194].mxu0 %v4278_v32  ;;  %v4178_v30 = vmul.f32 0.01, %v6156_v27  ;;  %v4182_v37 = vmul.f32 0.01, %v6158_v48 }
 0x4ce   :  { %4770 = vmatprep.mubr.f32.mxu0 %v4283_v6  ;;  %v4295_v6 = vmax.f32 %v6151_v33, %v4167_v55  ;;  %v4179_v55 = vmul.f32 0.01, %v6157_v24 }
 0x4cf   :  { %v4310_v62 = vmax.f32 %v6158_v48, %v4182_v37  ;;  %v6171_v37 = vadd.f32 %v8901_v16, %v8936_v35 }
 0x4d0   :  { %v8992_v12 = vpop.f32.mrb[246].mxu1 }
 0x4d1   :  { %v8994_v20 = vpop.f32.mrb[247].mxu1  ;;  %4771 = vmatmul.mubr.f32.gmra.mrb[196].mxu0 %v4282_v58 }
 0x4d2   :  { %4775 = vmatprep.mubr.f32.mxu0 %v4287_v49  ;;  %v4299_v49 = vmax.f32 %v6153_v14, %v4171_v19  ;;  %v4183_v19 = vmul.f32 0.01, %v6159_v29 }
 0x4d4   :  { %v9000_v21 = vpop.f32.mrb[248].mxu1  ;;  %v4311_v61 = vmax.f32 %v6159_v29, %v4183_v19  ;;  %v6167_v29 = vadd.f32 %v8889_v54, %v8936_v35 }
 0x4d5   :  { %v9002_v32 = vpop.f32.mrb[249].mxu1  ;;  %4776 = vmatmul.mubr.f32.gmra.mrb[198].mxu0 %v4286_v10 }
 0x4d6   :  { %4780 = vmatprep.mubr.f32.mxu0 %v4291_v45  ;;  %v4303_v45 = vmax.f32 %v6155_v40, %v4175_v43  ;;  %v4306_v40 = vmax.f32 %v6156_v27, %v4178_v30  ;;  %v6166_v30 = vadd.f32 %v8886_v34, %v8946_v8  ;;  %v4199_v48 = vmul.f32 0.01, %v6167_v29 }
 0x4d8   :  { %v9008_v15 = vpop.f32.mrb[250].mxu1  ;;  %v4198_v19 = vmul.f32 0.01, %v6166_v30  ;;  %v4327_v54 = vmax.f32 %v6167_v29, %v4199_v48  ;;  %v6179_v29 = vadd.f32 %v8925_v11, %v8936_v35 }
 0x4d9   :  { %v9010_v58 = vpop.f32.mrb[251].mxu1  ;;  %4781 = vmatmul.mubr.f32.gmra.mrb[200].mxu0 %v4290_v13 }
 0x4da   :  { %4785 = vmatprep.mubr.f32.mxu0 %v4295_v6  ;;  %v4307_v6 = vmax.f32 %v6157_v24, %v4179_v55  ;;  %v6162_v24 = vadd.f32 %v8874_v53, %v8946_v8  ;;  %v4195_v55 = vmul.f32 0.01, %v6165_v18  ;;  %v4326_v34 = vmax.f32 %v6166_v30, %v4198_v19 }
 0x4db   :  { %v4223_v30 = vmul.f32 0.01, %v6179_v29 }
 0x4dc   :  { %v9016_v33 = vpop.f32.mrb[252].mxu1  ;;  %v4190_v27 = vmul.f32 0.01, %v6162_v24  ;;  %v4323_v7 = vmax.f32 %v6165_v18, %v4195_v55  ;;  %v6174_v18 = vadd.f32 %v8910_v23, %v8946_v8 }
 0x4dd   :  { %v9018_v10 = vpop.f32.mrb[253].mxu1  ;;  %4786 = vmatmul.mubr.f32.gmra.mrb[202].mxu0 %v4294_v0  ;;  %v6160_v0 = vadd.f32 %v8868_v36, %v8946_v8  ;;  %v4351_v11 = vmax.f32 %v6179_v29, %v4223_v30  ;;  %v6192_v29 = vadd.f32 %v8984_v17, %v8946_v8 }
 0x4de   :  { %4790 = vmatprep.mubr.f32.mxu0 %v4299_v49  ;;  %v4187_v49 = vmul.f32 0.01, %v6161_v59  ;;  %v4318_v53 = vmax.f32 %v6162_v24, %v4190_v27  ;;  %v6177_v27 = vadd.f32 %v8919_v41, %v8936_v35 }
 0x4df   :  { %v4186_v43 = vmul.f32 0.01, %v6160_v0 }
 0x4e0   :  { %v9024_v14 = vpop.f32.mrb[254].mxu1  ;;  %v4315_v50 = vmax.f32 %v6161_v59, %v4187_v49  ;;  %v6168_v59 = vadd.f32 %v8892_v25, %v8946_v8  ;;  %v4207_v49 = vmul.f32 0.01, %v6171_v37  ;;  %v4219_v55 = vmul.f32 0.01, %v6177_v27 }
 0x4e1   :  { %v9026_v13 = vpop.f32.mrb[255].mxu1  ;;  %4791 = vmatmul.mubr.f32.gmra.mrb[204].mxu0 %v4298_v60  ;;  %v4191_v60 = vmul.f32 0.01, %v6163_v1  ;;  %v4314_v36 = vmax.f32 %v6160_v0, %v4186_v43  ;;  %v6172_v43 = vadd.f32 %v8904_v26, %v8946_v8 }
 0x4e2   :  { %4795 = vmatprep.mubr.f32.mxu0 %v4303_v45  ;;  %v6164_v45 = vadd.f32 %v8880_v39, %v8946_v8  ;;  %v4202_v0 = vmul.f32 0.01, %v6168_v59  ;;  %v4335_v16 = vmax.f32 %v6171_v37, %v4207_v49  ;;  %v4347_v41 = vmax.f32 %v6177_v27, %v4219_v55  ;;  %v9543_v49 = vld [vmem:[#allocation94_spill] sm:$0xff] }
 0x4e3   :  { %v4319_v4 = vmax.f32 %v6163_v1, %v4191_v60  ;;  %v6173_v1 = vadd.f32 %v8907_v5, %v8936_v35  ;;  %v4210_v60 = vmul.f32 0.01, %v6172_v43  ;;  %v6191_v27 = vadd.f32 %v8978_v44, %v8936_v35 }
 0x4e4   :  { %v4330_v25 = vmax.f32 %v6168_v59, %v4202_v0  ;;  %v6183_v59 = vadd.f32 %v8941_v3, %v8936_v35  ;;  %v6185_v0 = vadd.f32 %v8953_v56, %v8936_v35 }
 0x4e5   :  { %4796 = vmatmul.mubr.f32.gmra.mrb[206].mxu0 %v4302_v63  ;;  %v4194_v63 = vmul.f32 0.01, %v6164_v45  ;;  %v4211_v24 = vmul.f32 0.01, %v6173_v1  ;;  %v4338_v26 = vmax.f32 %v6172_v43, %v4210_v60 }
 0x4e6   :  { %4800 = vmatprep.mubr.f32.mxu0 %v4307_v6  ;;  %v6169_v6 = vadd.f32 %v8895_v22, %v8936_v35 }
 0x4e7   :  { %v4322_v39 = vmax.f32 %v6164_v45, %v4194_v63  ;;  %v4339_v5 = vmax.f32 %v6173_v1, %v4211_v24  ;;  %v4214_v45 = vmul.f32 0.01, %v6174_v18  ;;  %v6178_v63 = vadd.f32 %v8922_v57, %v8946_v8 }
 0x4e8   :  { %v6184_v1 = vadd.f32 %v9543_v49, %v8946_v8  ;;  %v6186_v24 = vadd.f32 %v8960_v52, %v8946_v8 }
 0x4e9   :  { %4801 = vmatmul.mubr.f32.gmra.mrb[208].mxu0 %v4306_v40  ;;  %v4203_v40 = vmul.f32 0.01, %v6169_v6  ;;  %v4342_v23 = vmax.f32 %v6174_v18, %v4214_v45  ;;  %v4222_v48 = vmul.f32 0.01, %v6178_v63  ;;  %v6190_v45 = vadd.f32 %v8976_v2, %v8946_v8 }
 0x4ea   :  { %4805 = vmatprep.mubr.f32.mxu0 %v4311_v61  ;;  %v6170_v61 = vadd.f32 %v8898_v51, %v8946_v8  ;;  %v4238_v18 = vmul.f32 0.01, %v6186_v24 }
 0x4eb   :  { %v4331_v22 = vmax.f32 %v6169_v6, %v4203_v40  ;;  %v9541_v6 = vld [vmem:[#allocation90_spill] sm:$0xff]  ;;  %v4350_v57 = vmax.f32 %v6178_v63, %v4222_v48  ;;  %v9542_v40 = vld [vmem:[#allocation92_spill] sm:$0xff]  ;;  %v4246_v55 = vmul.f32 0.01, %v6190_v45  ;;  %v4250_v63 = vmul.f32 0.01, %v6192_v29 }
 0x4ec   :  { %v6182_v37 = vadd.f32 %v9542_v40, %v8946_v8  ;;  %v4366_v52 = vmax.f32 %v6186_v24, %v4238_v18  ;;  %v6196_v48 = vadd.f32 %v9000_v21, %v8946_v8  ;;  %v6200_v40 = vadd.f32 %v9016_v33, %v8946_v8 }
 0x4ed   :  { %4806 = vmatmul.mubr.f32.gmra.mrb[210].mxu0 %v4310_v62  ;;  %v4206_v62 = vmul.f32 0.01, %v6170_v61  ;;  %v4374_v2 = vmax.f32 %v6190_v45, %v4246_v55  ;;  %v4378_v17 = vmax.f32 %v6192_v29, %v4250_v63 }
 0x4ee   :  { %4810 = vmatprep.mubr.f32.mxu0 %v4315_v50  ;;  %v6175_v50 = vadd.f32 %v8913_v47, %v8936_v35 }
 0x4ef   :  { %v4334_v51 = vmax.f32 %v6170_v61, %v4206_v62  ;;  %v6187_v62 = vadd.f32 %v8962_v46, %v8936_v35 }
 0x4f1   :  { %4811 = vmatmul.mubr.f32.gmra.mrb[212].mxu0 %v4314_v36  ;;  %v4215_v36 = vmul.f32 0.01, %v6175_v50 }
 0x4f2   :  { %4815 = vmatprep.mubr.f32.mxu0 %v4319_v4  ;;  %v6176_v4 = vadd.f32 %v8916_v9, %v8946_v8 }
 0x4f3   :  { %v4343_v47 = vmax.f32 %v6175_v50, %v4215_v36  ;;  %v4239_v50 = vmul.f32 0.01, %v6187_v62 }
 0x4f5   :  { %4816 = vmatmul.mubr.f32.gmra.mrb[214].mxu0 %v4318_v53  ;;  %v4218_v53 = vmul.f32 0.01, %v6176_v4  ;;  %v4367_v46 = vmax.f32 %v6187_v62, %v4239_v50 }
 0x4f6   :  { %4820 = vmatprep.mubr.f32.mxu0 %v4323_v7  ;;  %v6181_v7 = vadd.f32 %v8931_v38, %v8936_v35 }
 0x4f7   :  { %v4346_v9 = vmax.f32 %v6176_v4, %v4218_v53  ;;  %v4247_v4 = vmul.f32 0.01, %v6191_v27  ;;  %v6195_v53 = vadd.f32 %v8994_v20, %v8936_v35 }
 0x4f8   :  { %v4227_v19 = vmul.f32 0.01, %v6181_v7 }
 0x4f9   :  { %4821 = vmatmul.mubr.f32.gmra.mrb[216].mxu0 %v4322_v39  ;;  %v6180_v39 = vadd.f32 %v9541_v6, %v8946_v8  ;;  %v4375_v44 = vmax.f32 %v6191_v27, %v4247_v4  ;;  %v4255_v30 = vmul.f32 0.01, %v6195_v53 }
 0x4fa   :  { %4825 = vmatprep.mubr.f32.mxu0 %v4327_v54  ;;  %v4355_v38 = vmax.f32 %v6181_v7, %v4227_v19  ;;  %v6197_v7 = vadd.f32 %v9002_v32, %v8936_v35  ;;  %v6198_v19 = vadd.f32 %v9008_v15, %v8946_v8 }
 0x4fb   :  { %v4226_v54 = vmul.f32 0.01, %v6180_v39  ;;  %v4383_v20 = vmax.f32 %v6195_v53, %v4255_v30 }
 0x4fc   :  { %v4259_v6 = vmul.f32 0.01, %v6197_v7 }
 0x4fd   :  { %4826 = vmatmul.mubr.f32.gmra.mrb[218].mxu0 %v4326_v34  ;;  %v4231_v34 = vmul.f32 0.01, %v6183_v59  ;;  %v4354_v61 = vmax.f32 %v6180_v39, %v4226_v54  ;;  %v6199_v39 = vadd.f32 %v9010_v58, %v8936_v35  ;;  %v4262_v54 = vmul.f32 0.01, %v6198_v19 }
 0x4fe   :  { %4830 = vmatprep.mubr.f32.mxu0 %v4331_v22  ;;  %v4230_v22 = vmul.f32 0.01, %v6182_v37  ;;  %v4387_v32 = vmax.f32 %v6197_v7, %v4259_v6 }
 0x4ff   :  { %v4359_v3 = vmax.f32 %v6183_v59, %v4231_v34  ;;  %v4263_v59 = vmul.f32 0.01, %v6199_v39  ;;  %v4390_v15 = vmax.f32 %v6198_v19, %v4262_v54  ;;  %v4266_v34 = vmul.f32 0.01, %v6200_v40 }
 0x500   :  { %v4358_v43 = vmax.f32 %v6182_v37, %v4230_v22 }
 0x501   :  { %4831 = vmatmul.mubr.f32.gmra.mrb[220].mxu0 %v4330_v25  ;;  %v4235_v25 = vmul.f32 0.01, %v6185_v0  ;;  %v4391_v58 = vmax.f32 %v6199_v39, %v4263_v59  ;;  %v4394_v22 = vmax.f32 %v6200_v40, %v4266_v34 }
 0x502   :  { %4835 = vmatprep.mubr.f32.mxu0 %v4335_v16  ;;  %v4234_v16 = vmul.f32 0.01, %v6184_v1 }
 0x503   :  { %v4363_v56 = vmax.f32 %v6185_v0, %v4235_v25  ;;  %v6202_v0 = vadd.f32 %v9024_v14, %v8946_v8 }
 0x504   :  { %v4362_v60 = vmax.f32 %v6184_v1, %v4234_v16 }
 0x505   :  { %4836 = vmatmul.mubr.f32.gmra.mrb[222].mxu0 %v4334_v51  ;;  %v6189_v51 = vadd.f32 %v8970_v28, %v8936_v35  ;;  %v4270_v49 = vmul.f32 0.01, %v6202_v0 }
 0x506   :  { %4840 = vmatprep.mubr.f32.mxu0 %v4339_v5  ;;  %v6188_v5 = vadd.f32 %v8968_v42, %v8946_v8 }
 0x507   :  { %v4243_v36 = vmul.f32 0.01, %v6189_v51  ;;  %v4398_v33 = vmax.f32 %v6202_v0, %v4270_v49 }
 0x509   :  { %4841 = vmatmul.mubr.f32.gmra.mrb[224].mxu0 %v4338_v26  ;;  %v4242_v26 = vmul.f32 0.01, %v6188_v5  ;;  %v4371_v28 = vmax.f32 %v6189_v51, %v4243_v36 }
 0x50a   :  { %4845 = vmatprep.mubr.f32.mxu0 %v4343_v47  ;;  %v6193_v47 = vadd.f32 %v8986_v31, %v8936_v35 }
 0x50b   :  { %v4370_v42 = vmax.f32 %v6188_v5, %v4242_v26 }
 0x50d   :  { %4846 = vmatmul.mubr.f32.gmra.mrb[226].mxu0 %v4342_v23  ;;  %v4251_v23 = vmul.f32 0.01, %v6193_v47 }
 0x50e   :  { %4850 = vmatprep.mubr.f32.mxu0 %v4347_v41  ;;  %v6194_v41 = vadd.f32 %v8992_v12, %v8946_v8 }
 0x50f   :  { %v4379_v31 = vmax.f32 %v6193_v47, %v4251_v23 }
 0x511   :  { %4851 = vmatmul.mubr.f32.gmra.mrb[228].mxu0 %v4346_v9  ;;  %v4254_v9 = vmul.f32 0.01, %v6194_v41 }
 0x512   :  { %4855 = vmatprep.mubr.f32.mxu0 %v4351_v11  ;;  %v4258_v11 = vmul.f32 0.01, %v6196_v48 }
 0x513   :  { %v4382_v12 = vmax.f32 %v6194_v41, %v4254_v9 }
 0x514   :  { %v4386_v21 = vmax.f32 %v6196_v48, %v4258_v11 }
 0x515   :  { %4856 = vmatmul.mubr.f32.gmra.mrb[230].mxu0 %v4350_v57  ;;  %v6201_v57 = vadd.f32 %v9018_v10, %v8936_v35 }
 0x516   :  { %4860 = vmatprep.mubr.f32.mxu0 %v4355_v38  ;;  %v6203_v38 = vadd.f32 %v9026_v13, %v8936_v35  ;;  %v9121_v35 = vld [vmem:[%s9176_s9] ss:$0 sm:$0xff]  ;;  %s6734_s9 = smov [#allocation9]  }
 0x517   :  { %v4267_v37 = vmul.f32 0.01, %v6201_v57  ;;  %s5150_s24 = sshll.u32 %s6734_s9, 4  ;;  %s5151_s24 = int_to_ptr.vmem [resolvable:$true] %s5150_s24 }
 0x518   :  { %s6698_s0 = scalar_lea.vmem %s5151_s24, 4096  ;;  %p6703_p11 = scmp.lt.s32.totalorder %s5151_s24, %s5151_s24 }
 0x519   :  { %4861 = vmatmul.mubr.f32.gmra.mrb[232].mxu0 %v4354_v61  ;;  %v4395_v10 = vmax.f32 %v6201_v57, %v4267_v37  ;;  %v4271_v61 = vmul.f32 0.01, %v6203_v38  ;;  %p6699_p10 = scmp.ne.s32.totalorder %s5151_s24, %s6698_s0  ;;  %p6704_p12 = scmp.lt.s32.totalorder %s6698_s0, %s6698_s0 }
 0x51a   :  { %4865 = vmatprep.mubr.f32.mxu0 %v4359_v3 }
 0x51b   :  { %v4399_v1 = vmax.f32 %v6203_v38, %v4271_v61  ;;  %p6705_p13 = por %p6704_p12, %p6703_p11 }
 0x51d   :  { %4866 = vmatmul.mubr.f32.gmra.mrb[234].mxu0 %v4358_v43  ;;  %p6706_p0 = pnand %p6705_p13, %p6699_p10 }
 0x51e   :  { %4870 = vmatprep.mubr.f32.mxu0 %v4363_v56 }
 0x521   :  { %4871 = vmatmul.mubr.f32.gmra.mrb[236].mxu0 %v4362_v60 }
 0x522   :  { %4875 = vmatprep.mubr.f32.mxu0 %v4367_v46 }
 0x525   :  { %4876 = vmatmul.mubr.f32.gmra.mrb[238].mxu0 %v4366_v52 }
 0x526   :  { %4880 = vmatprep.mubr.f32.mxu0 %v4371_v28 }
 0x529   :  { %4881 = vmatmul.mubr.f32.gmra.mrb[240].mxu0 %v4370_v42 }
 0x52a   :  { %4885 = vmatprep.mubr.f32.mxu0 %v4375_v44 }
 0x52d   :  { %4886 = vmatmul.mubr.f32.gmra.mrb[242].mxu0 %v4374_v2 }
 0x52e   :  { %4890 = vmatprep.mubr.f32.mxu0 %v4379_v31 }
 0x531   :  { %4891 = vmatmul.mubr.f32.gmra.mrb[244].mxu0 %v4378_v17 }
 0x532   :  { %4895 = vmatprep.mubr.f32.mxu0 %v4383_v20 }
 0x535   :  { %4896 = vmatmul.mubr.f32.gmra.mrb[246].mxu0 %v4382_v12 }
 0x536   :  { %4900 = vmatprep.mubr.f32.mxu0 %v4387_v32 }
 0x539   :  { %4901 = vmatmul.mubr.f32.gmra.mrb[248].mxu0 %v4386_v21 }
 0x53a   :  { %4905 = vmatprep.mubr.f32.mxu0 %v4391_v58 }
 0x53d   :  { %4906 = vmatmul.mubr.f32.gmra.mrb[250].mxu0 %v4390_v15 }
 0x53e   :  { %4910 = vmatprep.mubr.f32.mxu0 %v4395_v10 }
 0x541   :  { %4911 = vmatmul.mubr.f32.gmra.mrb[252].mxu0 %v4394_v22 }
 0x542   :  { %4915 = vmatprep.mubr.f32.mxu0 %v4399_v1 }
 0x545   :  { %4916 = vmatmul.mubr.f32.gmra.mrb[254].mxu0 %v4398_v33 }
 0x59c   :  { %v4762_v13 = vpop.f32.mrb[192].mxu0 }
 0x59d   :  { %v6204_v3 = vadd.f32 %v9121_v35, %v4762_v13  ;;  %v4764_v8 = vpop.f32.mrb[193].mxu0 }
 0x59f   :  { %v5228_v14 = vmul.f32 -1.442695, %v6204_v3 }
 0x5a0   :  { %v4767_v25 = vpop.f32.mrb[194].mxu0 }
 0x5a1   :  { %6503 = vpow2.f32 %v5228_v14  ;;  %v6205_v62 = vadd.f32 %v9121_v35, %v4767_v25  ;;  %v4769_v43 = vpop.f32.mrb[195].mxu0 }
 0x5a3   :  { %v5229_v16 = vmul.f32 -1.442695, %v6205_v62 }
 0x5a4   :  { %v4772_v24 = vpop.f32.mrb[196].mxu0 }
 0x5a5   :  { %6505 = vpow2.f32 %v5229_v16  ;;  %v6206_v56 = vadd.f32 %v9121_v35, %v4772_v24  ;;  %v4774_v50 = vpop.f32.mrb[197].mxu0 }
 0x5a7   :  { %v5230_v51 = vmul.f32 -1.442695, %v6206_v56 }
 0x5a8   :  { %v4777_v60 = vpop.f32.mrb[198].mxu0 }
 0x5a9   :  { %6507 = vpow2.f32 %v5230_v51  ;;  %v6207_v18 = vadd.f32 %v9121_v35, %v4777_v60  ;;  %v4779_v5 = vpop.f32.mrb[199].mxu0 }
 0x5ab   :  { %v6504_v46 = vpop.eup %6503  ;;  %v5231_v36 = vmul.f32 -1.442695, %v6207_v18 }
 0x5ac   :  { %v5017_v27 = vadd.f32 1.0, %v6504_v46  ;;  %v4782_v52 = vpop.f32.mrb[200].mxu0 }
 0x5ad   :  { %6509 = vpow2.f32 %v5231_v36  ;;  %v6208_v26 = vadd.f32 %v9121_v35, %v4782_v52  ;;  %v4784_v45 = vpop.f32.mrb[201].mxu0 }
 0x5ae   :  { %6511 = vrcp.f32 %v5017_v27 }
 0x5af   :  { %v6506_v28 = vpop.eup %6505  ;;  %v5232_v4 = vmul.f32 -1.442695, %v6208_v26 }
 0x5b0   :  { %v5018_v47 = vadd.f32 1.0, %v6506_v28  ;;  %v4787_v42 = vpop.f32.mrb[202].mxu0 }
 0x5b1   :  { %6513 = vpow2.f32 %v5232_v4  ;;  %v6209_v55 = vadd.f32 %v9121_v35, %v4787_v42  ;;  %v4789_v29 = vpop.f32.mrb[203].mxu0 }
 0x5b2   :  { %6515 = vrcp.f32 %v5018_v47 }
 0x5b3   :  { %v6508_v44 = vpop.eup %6507  ;;  %v5233_v23 = vmul.f32 -1.442695, %v6209_v55 }
 0x5b4   :  { %v5019_v53 = vadd.f32 1.0, %v6508_v44  ;;  %v4792_v2 = vpop.f32.mrb[204].mxu0 }
 0x5b5   :  { %6517 = vpow2.f32 %v5233_v23  ;;  %v6210_v63 = vadd.f32 %v9121_v35, %v4792_v2  ;;  %v4794_v41 = vpop.f32.mrb[205].mxu0 }
 0x5b6   :  { %6519 = vrcp.f32 %v5019_v53 }
 0x5b7   :  { %v6510_v31 = vpop.eup %6509  ;;  %v5234_v30 = vmul.f32 -1.442695, %v6210_v63 }
 0x5b8   :  { %v6512_v7 = vpop.eup %6511  ;;  %v5020_v17 = vadd.f32 1.0, %v6510_v31  ;;  %v4797_v9 = vpop.f32.mrb[206].mxu0 }
 0x5b9   :  { %5113 = vst [vmem:[#allocation9] sm:$0xff] %v6512_v7  ;;  %6521 = vpow2.f32 %v5234_v30  ;;  %v6211_v48 = vadd.f32 %v9121_v35, %v4797_v9  ;;  %v4799_v20 = vpop.f32.mrb[207].mxu0 }
 0x5ba   :  { %6523 = vrcp.f32 %v5020_v17 }
 0x5bb   :  { %v6514_v6 = vpop.eup %6513  ;;  %v5235_v39 = vmul.f32 -1.442695, %v6211_v48 }
 0x5bc   :  { %v6516_v12 = vpop.eup %6515  ;;  %v5021_v11 = vadd.f32 1.0, %v6514_v6  ;;  %v4802_v19 = vpop.f32.mrb[208].mxu0 }
 0x5bd   :  { %5114 = vst [vmem:[#allocation9 + $0x8] sm:$0xff] %v6516_v12  ;;  %6525 = vpow2.f32 %v5235_v39  ;;  %v6212_v32 = vadd.f32 %v9121_v35, %v4802_v19  ;;  %v4804_v59 = vpop.f32.mrb[209].mxu0 }
 0x5be   :  { %6527 = vrcp.f32 %v5021_v11 }
 0x5bf   :  { %v6518_v57 = vpop.eup %6517  ;;  %v5236_v21 = vmul.f32 -1.442695, %v6212_v32 }
 0x5c0   :  { %v6520_v54 = vpop.eup %6519  ;;  %v5022_v40 = vadd.f32 1.0, %v6518_v57  ;;  %v4807_v58 = vpop.f32.mrb[210].mxu0 }
 0x5c1   :  { %5115 = vst [vmem:[#allocation9 + $0x10] sm:$0xff] %v6520_v54  ;;  %6529 = vpow2.f32 %v5236_v21  ;;  %v6213_v37 = vadd.f32 %v9121_v35, %v4807_v58  ;;  %v4809_v38 = vpop.f32.mrb[211].mxu0 }
 0x5c2   :  { %6531 = vrcp.f32 %v5022_v40 }
 0x5c3   :  { %v6522_v15 = vpop.eup %6521  ;;  %v5237_v34 = vmul.f32 -1.442695, %v6213_v37 }
 0x5c4   :  { %v6524_v0 = vpop.eup %6523  ;;  %v5023_v10 = vadd.f32 1.0, %v6522_v15  ;;  %v4812_v61 = vpop.f32.mrb[212].mxu0 }
 0x5c5   :  { %5116 = vst [vmem:[#allocation9 + $0x18] sm:$0xff] %v6524_v0  ;;  %6533 = vpow2.f32 %v5237_v34  ;;  %v6214_v22 = vadd.f32 %v9121_v35, %v4812_v61  ;;  %v4814_v49 = vpop.f32.mrb[213].mxu0 }
 0x5c6   :  { %6535 = vrcp.f32 %v5023_v10 }
 0x5c7   :  { %v6526_v1 = vpop.eup %6525  ;;  %v5238_v33 = vmul.f32 -1.442695, %v6214_v22 }
 0x5c8   :  { %v6528_v13 = vpop.eup %6527  ;;  %v5024_v3 = vadd.f32 1.0, %v6526_v1  ;;  %v4817_v8 = vpop.f32.mrb[214].mxu0 }
 0x5c9   :  { %5117 = vst [vmem:[#allocation9 + $0x20] sm:$0xff] %v6528_v13  ;;  %6537 = vpow2.f32 %v5238_v33  ;;  %v6215_v14 = vadd.f32 %v9121_v35, %v4817_v8  ;;  %v4819_v25 = vpop.f32.mrb[215].mxu0 }
 0x5ca   :  { %6539 = vrcp.f32 %v5024_v3 }
 0x5cb   :  { %v6530_v62 = vpop.eup %6529  ;;  %v5239_v43 = vmul.f32 -1.442695, %v6215_v14 }
 0x5cc   :  { %v6532_v16 = vpop.eup %6531  ;;  %v5025_v24 = vadd.f32 1.0, %v6530_v62  ;;  %v4822_v56 = vpop.f32.mrb[216].mxu0 }
 0x5cd   :  { %5118 = vst [vmem:[#allocation9 + $0x28] sm:$0xff] %v6532_v16  ;;  %6541 = vpow2.f32 %v5239_v43  ;;  %v6216_v50 = vadd.f32 %v9121_v35, %v4822_v56  ;;  %v4824_v51 = vpop.f32.mrb[217].mxu0 }
 0x5ce   :  { %6543 = vrcp.f32 %v5025_v24 }
 0x5cf   :  { %v6534_v60 = vpop.eup %6533  ;;  %v5240_v18 = vmul.f32 -1.442695, %v6216_v50 }
 0x5d0   :  { %v6536_v5 = vpop.eup %6535  ;;  %v5026_v46 = vadd.f32 1.0, %v6534_v60  ;;  %v4827_v36 = vpop.f32.mrb[218].mxu0 }
 0x5d1   :  { %5119 = vst [vmem:[#allocation9 + $0x30] sm:$0xff] %v6536_v5  ;;  %6545 = vpow2.f32 %v5240_v18  ;;  %v6217_v27 = vadd.f32 %v9121_v35, %v4827_v36  ;;  %v4829_v52 = vpop.f32.mrb[219].mxu0 }
 0x5d2   :  { %6547 = vrcp.f32 %v5026_v46 }
 0x5d3   :  { %v6538_v26 = vpop.eup %6537  ;;  %v5241_v45 = vmul.f32 -1.442695, %v6217_v27 }
 0x5d4   :  { %v6540_v28 = vpop.eup %6539  ;;  %v5027_v4 = vadd.f32 1.0, %v6538_v26  ;;  %v4832_v47 = vpop.f32.mrb[220].mxu0 }
 0x5d5   :  { %5120 = vst [vmem:[#allocation9 + $0x38] sm:$0xff] %v6540_v28  ;;  %6549 = vpow2.f32 %v5241_v45  ;;  %v6218_v42 = vadd.f32 %v9121_v35, %v4832_v47  ;;  %v4834_v55 = vpop.f32.mrb[221].mxu0 }
 0x5d6   :  { %6551 = vrcp.f32 %v5027_v4 }
 0x5d7   :  { %v6542_v29 = vpop.eup %6541  ;;  %v5242_v44 = vmul.f32 -1.442695, %v6218_v42 }
 0x5d8   :  { %v6544_v23 = vpop.eup %6543  ;;  %v5028_v53 = vadd.f32 1.0, %v6542_v29  ;;  %v4837_v2 = vpop.f32.mrb[222].mxu0 }
 0x5d9   :  { %5121 = vst [vmem:[#allocation9 + $0x40] sm:$0xff] %v6544_v23  ;;  %6553 = vpow2.f32 %v5242_v44  ;;  %v6219_v63 = vadd.f32 %v9121_v35, %v4837_v2  ;;  %v4839_v41 = vpop.f32.mrb[223].mxu0 }
 0x5da   :  { %6555 = vrcp.f32 %v5028_v53 }
 0x5db   :  { %v6546_v31 = vpop.eup %6545  ;;  %v5243_v30 = vmul.f32 -1.442695, %v6219_v63 }
 0x5dc   :  { %v6548_v7 = vpop.eup %6547  ;;  %v5029_v17 = vadd.f32 1.0, %v6546_v31  ;;  %v4842_v9 = vpop.f32.mrb[224].mxu0 }
 0x5dd   :  { %5122 = vst [vmem:[#allocation9 + $0x48] sm:$0xff] %v6548_v7  ;;  %6557 = vpow2.f32 %v5243_v30  ;;  %v6220_v48 = vadd.f32 %v9121_v35, %v4842_v9  ;;  %v4844_v20 = vpop.f32.mrb[225].mxu0 }
 0x5de   :  { %6559 = vrcp.f32 %v5029_v17 }
 0x5df   :  { %v6550_v6 = vpop.eup %6549  ;;  %v5244_v39 = vmul.f32 -1.442695, %v6220_v48 }
 0x5e0   :  { %v6552_v12 = vpop.eup %6551  ;;  %v5030_v11 = vadd.f32 1.0, %v6550_v6  ;;  %v4847_v19 = vpop.f32.mrb[226].mxu0 }
 0x5e1   :  { %5123 = vst [vmem:[#allocation9 + $0x50] sm:$0xff] %v6552_v12  ;;  %6561 = vpow2.f32 %v5244_v39  ;;  %v6221_v32 = vadd.f32 %v9121_v35, %v4847_v19  ;;  %v4849_v59 = vpop.f32.mrb[227].mxu0 }
 0x5e2   :  { %6563 = vrcp.f32 %v5030_v11 }
 0x5e3   :  { %v6554_v57 = vpop.eup %6553  ;;  %v5245_v21 = vmul.f32 -1.442695, %v6221_v32 }
 0x5e4   :  { %v6556_v54 = vpop.eup %6555  ;;  %v5031_v40 = vadd.f32 1.0, %v6554_v57  ;;  %v4852_v58 = vpop.f32.mrb[228].mxu0 }
 0x5e5   :  { %5124 = vst [vmem:[#allocation9 + $0x58] sm:$0xff] %v6556_v54  ;;  %6565 = vpow2.f32 %v5245_v21  ;;  %v6222_v37 = vadd.f32 %v9121_v35, %v4852_v58  ;;  %v4854_v38 = vpop.f32.mrb[229].mxu0 }
 0x5e6   :  { %6567 = vrcp.f32 %v5031_v40 }
 0x5e7   :  { %v6558_v15 = vpop.eup %6557  ;;  %v5246_v34 = vmul.f32 -1.442695, %v6222_v37 }
 0x5e8   :  { %v6560_v0 = vpop.eup %6559  ;;  %v5032_v10 = vadd.f32 1.0, %v6558_v15  ;;  %v4857_v61 = vpop.f32.mrb[230].mxu0 }
 0x5e9   :  { %5125 = vst [vmem:[#allocation9 + $0x60] sm:$0xff] %v6560_v0  ;;  %6569 = vpow2.f32 %v5246_v34  ;;  %v6223_v22 = vadd.f32 %v9121_v35, %v4857_v61  ;;  %v4859_v49 = vpop.f32.mrb[231].mxu0 }
 0x5ea   :  { %6571 = vrcp.f32 %v5032_v10 }
 0x5eb   :  { %v6562_v1 = vpop.eup %6561  ;;  %v5247_v33 = vmul.f32 -1.442695, %v6223_v22 }
 0x5ec   :  { %v6564_v13 = vpop.eup %6563  ;;  %v5033_v3 = vadd.f32 1.0, %v6562_v1  ;;  %v4862_v8 = vpop.f32.mrb[232].mxu0 }
 0x5ed   :  { %5126 = vst [vmem:[#allocation9 + $0x68] sm:$0xff] %v6564_v13  ;;  %6573 = vpow2.f32 %v5247_v33  ;;  %v6224_v14 = vadd.f32 %v9121_v35, %v4862_v8  ;;  %v4864_v25 = vpop.f32.mrb[233].mxu0 }
 0x5ee   :  { %6575 = vrcp.f32 %v5033_v3 }
 0x5ef   :  { %v6566_v62 = vpop.eup %6565  ;;  %v5248_v43 = vmul.f32 -1.442695, %v6224_v14 }
 0x5f0   :  { %v6568_v16 = vpop.eup %6567  ;;  %v5034_v24 = vadd.f32 1.0, %v6566_v62  ;;  %v4867_v56 = vpop.f32.mrb[234].mxu0 }
 0x5f1   :  { %5127 = vst [vmem:[#allocation9 + $0x70] sm:$0xff] %v6568_v16  ;;  %6577 = vpow2.f32 %v5248_v43  ;;  %v6225_v50 = vadd.f32 %v9121_v35, %v4867_v56  ;;  %v4869_v51 = vpop.f32.mrb[235].mxu0 }
 0x5f2   :  { %6579 = vrcp.f32 %v5034_v24 }
 0x5f3   :  { %v6570_v60 = vpop.eup %6569  ;;  %v5249_v18 = vmul.f32 -1.442695, %v6225_v50 }
 0x5f4   :  { %v6572_v5 = vpop.eup %6571  ;;  %v5035_v46 = vadd.f32 1.0, %v6570_v60  ;;  %v4872_v36 = vpop.f32.mrb[236].mxu0 }
 0x5f5   :  { %5128 = vst [vmem:[#allocation9 + $0x78] sm:$0xff] %v6572_v5  ;;  %6581 = vpow2.f32 %v5249_v18  ;;  %v6226_v27 = vadd.f32 %v9121_v35, %v4872_v36  ;;  %v4874_v52 = vpop.f32.mrb[237].mxu0 }
 0x5f6   :  { %6583 = vrcp.f32 %v5035_v46 }
 0x5f7   :  { %v6574_v26 = vpop.eup %6573  ;;  %v5250_v45 = vmul.f32 -1.442695, %v6226_v27 }
 0x5f8   :  { %v6576_v28 = vpop.eup %6575  ;;  %v5036_v4 = vadd.f32 1.0, %v6574_v26  ;;  %v4877_v47 = vpop.f32.mrb[238].mxu0 }
 0x5f9   :  { %5129 = vst [vmem:[#allocation9 + $0x80] sm:$0xff] %v6576_v28  ;;  %6585 = vpow2.f32 %v5250_v45  ;;  %v6227_v42 = vadd.f32 %v9121_v35, %v4877_v47  ;;  %v4879_v55 = vpop.f32.mrb[239].mxu0 }
 0x5fa   :  { %6587 = vrcp.f32 %v5036_v4 }
 0x5fb   :  { %v6578_v29 = vpop.eup %6577  ;;  %v5251_v44 = vmul.f32 -1.442695, %v6227_v42 }
 0x5fc   :  { %v6580_v23 = vpop.eup %6579  ;;  %v5037_v53 = vadd.f32 1.0, %v6578_v29  ;;  %v4882_v2 = vpop.f32.mrb[240].mxu0 }
 0x5fd   :  { %5130 = vst [vmem:[#allocation9 + $0x88] sm:$0xff] %v6580_v23  ;;  %6589 = vpow2.f32 %v5251_v44  ;;  %v6228_v63 = vadd.f32 %v9121_v35, %v4882_v2  ;;  %v4884_v41 = vpop.f32.mrb[241].mxu0 }
 0x5fe   :  { %6591 = vrcp.f32 %v5037_v53 }
 0x5ff   :  { %v6582_v31 = vpop.eup %6581  ;;  %v5252_v30 = vmul.f32 -1.442695, %v6228_v63 }
 0x600   :  { %v6584_v7 = vpop.eup %6583  ;;  %v5038_v17 = vadd.f32 1.0, %v6582_v31  ;;  %v4887_v9 = vpop.f32.mrb[242].mxu0 }
 0x601   :  { %5131 = vst [vmem:[#allocation9 + $0x90] sm:$0xff] %v6584_v7  ;;  %6593 = vpow2.f32 %v5252_v30  ;;  %v6229_v48 = vadd.f32 %v9121_v35, %v4887_v9  ;;  %v4889_v20 = vpop.f32.mrb[243].mxu0 }
 0x602   :  { %6595 = vrcp.f32 %v5038_v17 }
 0x603   :  { %v6586_v6 = vpop.eup %6585  ;;  %v5253_v39 = vmul.f32 -1.442695, %v6229_v48 }
 0x604   :  { %v6588_v12 = vpop.eup %6587  ;;  %v5039_v11 = vadd.f32 1.0, %v6586_v6  ;;  %v4892_v19 = vpop.f32.mrb[244].mxu0 }
 0x605   :  { %5132 = vst [vmem:[#allocation9 + $0x98] sm:$0xff] %v6588_v12  ;;  %6597 = vpow2.f32 %v5253_v39  ;;  %v6230_v32 = vadd.f32 %v9121_v35, %v4892_v19  ;;  %v4894_v59 = vpop.f32.mrb[245].mxu0 }
 0x606   :  { %6599 = vrcp.f32 %v5039_v11 }
 0x607   :  { %v6590_v57 = vpop.eup %6589  ;;  %v5254_v21 = vmul.f32 -1.442695, %v6230_v32 }
 0x608   :  { %v6592_v54 = vpop.eup %6591  ;;  %v5040_v40 = vadd.f32 1.0, %v6590_v57  ;;  %v4897_v58 = vpop.f32.mrb[246].mxu0 }
 0x609   :  { %5133 = vst [vmem:[#allocation9 + $0xa0] sm:$0xff] %v6592_v54  ;;  %6601 = vpow2.f32 %v5254_v21  ;;  %v6231_v37 = vadd.f32 %v9121_v35, %v4897_v58  ;;  %v4899_v38 = vpop.f32.mrb[247].mxu0 }
 0x60a   :  { %6603 = vrcp.f32 %v5040_v40 }
 0x60b   :  { %v6594_v15 = vpop.eup %6593  ;;  %v5255_v34 = vmul.f32 -1.442695, %v6231_v37 }
 0x60c   :  { %v6596_v0 = vpop.eup %6595  ;;  %v5041_v10 = vadd.f32 1.0, %v6594_v15  ;;  %v4902_v61 = vpop.f32.mrb[248].mxu0 }
 0x60d   :  { %5134 = vst [vmem:[#allocation9 + $0xa8] sm:$0xff] %v6596_v0  ;;  %6605 = vpow2.f32 %v5255_v34  ;;  %v6232_v22 = vadd.f32 %v9121_v35, %v4902_v61  ;;  %v4904_v49 = vpop.f32.mrb[249].mxu0 }
 0x60e   :  { %6607 = vrcp.f32 %v5041_v10 }
 0x60f   :  { %v6598_v1 = vpop.eup %6597  ;;  %v5256_v33 = vmul.f32 -1.442695, %v6232_v22 }
 0x610   :  { %v6600_v13 = vpop.eup %6599  ;;  %v5042_v3 = vadd.f32 1.0, %v6598_v1  ;;  %v4907_v8 = vpop.f32.mrb[250].mxu0 }
 0x611   :  { %5135 = vst [vmem:[#allocation9 + $0xb0] sm:$0xff] %v6600_v13  ;;  %6609 = vpow2.f32 %v5256_v33  ;;  %v6233_v14 = vadd.f32 %v9121_v35, %v4907_v8  ;;  %v4909_v25 = vpop.f32.mrb[251].mxu0 }
 0x612   :  { %6611 = vrcp.f32 %v5042_v3 }
 0x613   :  { %v6602_v62 = vpop.eup %6601  ;;  %v5257_v43 = vmul.f32 -1.442695, %v6233_v14 }
 0x614   :  { %v6604_v16 = vpop.eup %6603  ;;  %v5043_v24 = vadd.f32 1.0, %v6602_v62  ;;  %v4912_v56 = vpop.f32.mrb[252].mxu0 }
 0x615   :  { %5136 = vst [vmem:[#allocation9 + $0xb8] sm:$0xff] %v6604_v16  ;;  %6613 = vpow2.f32 %v5257_v43  ;;  %v6234_v50 = vadd.f32 %v9121_v35, %v4912_v56  ;;  %v4914_v51 = vpop.f32.mrb[253].mxu0 }
 0x616   :  { %6615 = vrcp.f32 %v5043_v24 }
 0x617   :  { %v6606_v60 = vpop.eup %6605  ;;  %v5258_v18 = vmul.f32 -1.442695, %v6234_v50 }
 0x618   :  { %v6608_v5 = vpop.eup %6607  ;;  %v5044_v46 = vadd.f32 1.0, %v6606_v60  ;;  %v4917_v36 = vpop.f32.mrb[254].mxu0 }
 0x619   :  { %5137 = vst [vmem:[#allocation9 + $0xc0] sm:$0xff] %v6608_v5  ;;  %6617 = vpow2.f32 %v5258_v18  ;;  %v6235_v27 = vadd.f32 %v9121_v35, %v4917_v36  ;;  %v4919_v52 = vpop.f32.mrb[255].mxu0 }
 0x61a   :  { %6619 = vrcp.f32 %v5044_v46 }
 0x61b   :  { %v6610_v26 = vpop.eup %6609  ;;  %v5259_v45 = vmul.f32 -1.442695, %v6235_v27 }
 0x61c   :  { %v6612_v28 = vpop.eup %6611  ;;  %v5045_v4 = vadd.f32 1.0, %v6610_v26 }
 0x61d   :  { %5138 = vst [vmem:[#allocation9 + $0xc8] sm:$0xff] %v6612_v28  ;;  %6621 = vpow2.f32 %v5259_v45 }
 0x61e   :  { %6623 = vrcp.f32 %v5045_v4 }
 0x61f   :  { %v6614_v47 = vpop.eup %6613 }
 0x620   :  { %v6616_v42 = vpop.eup %6615  ;;  %v5046_v55 = vadd.f32 1.0, %v6614_v47 }
 0x621   :  { %5139 = vst [vmem:[#allocation9 + $0xd0] sm:$0xff] %v6616_v42 }
 0x622   :  { %6625 = vrcp.f32 %v5046_v55 }
 0x623   :  { %v6618_v29 = vpop.eup %6617 }
 0x624   :  { %v6620_v44 = vpop.eup %6619  ;;  %v5047_v23 = vadd.f32 1.0, %v6618_v29 }
 0x625   :  { %5140 = vst [vmem:[#allocation9 + $0xd8] sm:$0xff] %v6620_v44 }
 0x626   :  { %6627 = vrcp.f32 %v5047_v23 }
 0x627   :  { %v6622_v35 = vpop.eup %6621 }
 0x628   :  { %v6624_v53 = vpop.eup %6623  ;;  %v5048_v2 = vadd.f32 1.0, %v6622_v35 }
 0x629   :  { %5141 = vst [vmem:[#allocation9 + $0xe0] sm:$0xff] %v6624_v53 }
 0x62a   :  { %6629 = vrcp.f32 %v5048_v2 }
 0x62c   :  { %v6626_v63 = vpop.eup %6625 }
 0x62d   :  { %5142 = vst [vmem:[#allocation9 + $0xe8] sm:$0xff] %v6626_v63 }
 0x630   :  { %v6628_v41 = vpop.eup %6627 }
 0x631   :  { %5143 = vst [vmem:[#allocation9 + $0xf0] sm:$0xff] %v6628_v41 }
 0x634   :  { %v6630_v31 = vpop.eup %6629 }
 0x635   :  { %5144 = vst [vmem:[#allocation9 + $0xf8] sm:$0xff] %v6630_v31 }
 0x636   :  { %6709 = shalt.err (!%p6706_p0)
}
 0x637   :  { %s6710_s28 = scalar_lea.hbm %s9177_s10, 4096 }
 0x638   :  { %p6711_p1 = scmp.ne.s32.totalorder %s9177_s10, %s6710_s28  ;;  %p6714_p2 = scmp.lt.u32.totalorder %s6710_s28, %s9177_s10 }
 0x63a   :  { %p6716_p3 = pnand %p6714_p2, %p6711_p1 }
 0x63c   :  { %6719 = shalt.err (!%p6716_p3)
}
 0x63d   :  { %s6735_s2 = smov 128   ;;  %s6736_s17 = smov 8  }
 0x63e   :  { %5156 = dma.vmem_to_hbm [thread:$0]  %s5151_s24, 4096, %s9177_s10, [#allocation5], %s6735_s2, %s6735_s2, %s6736_s17  }
 0x63f   :  { %6724 = dma.done.wait [#allocation5], 4096  }
 0x640   :  { %6725 = vsyncadd [#allocation5], 4294963200 }
 0x641   :  { %5160 = vsyncpa [#allocation4], 1 }
 0x642   :  { %5161 = vsyncpa [#allocation7], 1 }
 0x643   :  { %5162 = vsyncpa [#allocation5], 1 }

</bundles_post_ra>
